<compile_context>
chip_gen: v6e
topology: v6e:2x2x1
jax: 0.10.0
libtpu: 0.0.40
codegen_flags: <defaults>
</compile_context>

<pallas_src>
import jax
import jax.numpy as jnp
from jax import lax
from jax.experimental import pallas as pl
from jax.experimental.pallas import tpu as pltpu

# Small synthetic sizes consistent with the module (vs=50001, dim=300 scaled down).
V = 512      # vocab size (stand-in for 50001)
D = 128      # embedding dim (stand-in for 300; lane-aligned)
TB = 256     # tokens gathered per grid step (output tile (TB, D))


def _embed_onehot_kernel(ids_ref, table_ref, out_ref):
    # ids_ref  : VMEM (TB, 1) int32   -- this block's token ids
    # table_ref: VMEM (V, D)  float32 -- single-buffered, block index constant
    # out_ref  : VMEM (TB, D) float32 -- lane-dense output tile
    tb = out_ref.shape[0]
    v = table_ref.shape[0]

    ids = ids_ref[...]                                          # (TB, 1)
    vocab_iota = lax.broadcasted_iota(jnp.int32, (tb, v), 1)    # (TB, V)
    onehot = (ids == vocab_iota).astype(table_ref.dtype)        # (TB, V) 0/1

    # One-hot row-select on the MXU.  HIGHEST precision keeps the f32 matmul
    # multi-pass, so selecting a single row is bit-exact vs. a plain gather.
    out_ref[...] = jnp.dot(
        onehot,
        table_ref[...],
        preferred_element_type=jnp.float32,
        precision=lax.Precision.HIGHEST,
    ).astype(out_ref.dtype)


def _bpe_embed_flat(ids_flat, table):
    """Gather table[ids_flat] with a Pallas kernel. len(ids_flat) must be % TB == 0."""
    n = ids_flat.shape[0]
    v, d = table.shape
    assert n % TB == 0, (n, TB)
    ids2d = ids_flat.reshape(n, 1)

    return pl.pallas_call(
        _embed_onehot_kernel,
        out_shape=jax.ShapeDtypeStruct((n, d), table.dtype),
        grid=(n // TB,),
        in_specs=[
            # Per-block ids: pipelines with the grid (no whole-array SMEM prefetch).
            pl.BlockSpec((TB, 1), lambda i: (i, 0)),
            # Whole table resident in VMEM; constant block index, single buffer
            # (double-buffering an invariant input is wasted VMEM).
            pl.BlockSpec((v, d), lambda i: (0, 0), pipeline_mode=pl.Buffered(1)),
        ],
        out_specs=pl.BlockSpec((TB, d), lambda i: (i, 0)),
        compiler_params=pltpu.CompilerParams(
            # Blocks write disjoint output tiles -> let megacore (v7x) shard them.
            dimension_semantics=("parallel",),
            # Generous scoped-VMEM headroom (matters once the table grows).
            vmem_limit_bytes=32 * 1024 * 1024,
        ),
        cost_estimate=pl.CostEstimate(
            flops=2 * n * v * d,            # one-hot matmul
            transcendentals=0,
            bytes_accessed=n * 4 + v * d * 4 + n * d * 4,
        ),
    )(ids2d, table)


class LowerCasedBPEEmbedderPallas:
    """JAX/Pallas port of LowerCasedBPEEmbedder.

    The BPEmb pretrained vectors are replaced by a deterministic random table
    with the same construction shape-wise: (vs-1) pretrained rows + 1 uniform row.
    """

    def __init__(self, dim=D, vs=V, key=jax.random.PRNGKey(0)):
        k_vec, k_last = jax.random.split(key)
        vectors = jax.random.normal(k_vec, (vs - 1, dim), dtype=jnp.float32)
        last_row = jax.random.uniform(k_last, (1, dim), dtype=jnp.float32)
        self.weight = jnp.concatenate([vectors, last_row], axis=0)  # (V, D)

    def __call__(self, batch):
        ids = batch[0]                      # (B, S) int, matches forward(batch)[0]
        b, s = ids.shape
        vocab, dim = self.weight.shape
        flat = ids.reshape(-1).astype(jnp.int32)
        # Clamp to [0, V): keeps behaviour defined for any stray id.
        flat = jnp.clip(flat, 0, vocab - 1)
        n = flat.shape[0]
        pad = (-n) % TB
        if pad:
            # Padded tokens gather row 0; they are sliced off below (keep that invariant).
            flat = jnp.pad(flat, (0, pad))
        out = _bpe_embed_flat(flat, self.weight)
        return out[:n].reshape(b, s, dim)   # (B, S, D)


if __name__ == "__main__":
    key = jax.random.PRNGKey(0)
    k_ids, k_model = jax.random.split(key)

    B, S = 2, 200          # 400 tokens -> padded to 512 -> 2 grid steps of TB=256
    ids = jax.random.randint(k_ids, (B, S), 0, V, dtype=jnp.int32)

    embedder = LowerCasedBPEEmbedderPallas(dim=D, vs=V, key=k_model)

    # forward(batch) takes a tuple/list and uses batch[0]
    batch = (ids,)
    out = jax.block_until_ready(embedder(batch))

    # Reference check: plain JAX gather.
    ref = embedder.weight[ids]
    assert out.shape == (B, S, D), out.shape
    assert jnp.allclose(out, ref, rtol=1e-5, atol=1e-5), "mismatch vs reference gather"

    print("KERNEL_OK")
</pallas_src>

<mosaic_0001>
module attributes {stable_mosaic.version = 11 : i64} {
  func.func @_embed_onehot_kernel(%arg0: i32, %arg1: memref<256x1xi32, #tpu.memory_space<vmem>>, %arg2: memref<512x128xf32, #tpu.memory_space<vmem>>, %arg3: memref<256x128xf32, #tpu.memory_space<vmem>>) attributes {dimension_semantics = [#tpu.dimension_semantics<parallel>], iteration_bounds = array<i64: 2>, scalar_prefetch = 0 : i64, scratch_operands = 0 : i64, tpu.core_type = #tpu.core_type<tc>, window_params = [{transform_indices = @transform_0, window_bounds = array<i64: 256, 1>}, {pipeline_mode = #tpu.pipeline_mode<synchronous>, transform_indices = @transform_1, window_bounds = array<i64: 512, 128>}, {transform_indices = @transform_2, window_bounds = array<i64: 256, 128>}]} {
    %c0 = arith.constant 0 : index
    %c0_0 = arith.constant 0 : index
    %0 = vector.load %arg1[%c0, %c0_0] : memref<256x1xi32, #tpu.memory_space<vmem>>, vector<256x1xi32>
    %1 = tpu.iota {dimensions = array<i32: 1>} : vector<256x512xi32>
    %2 = vector.broadcast %0 : vector<256x1xi32> to vector<256x512xi32>
    %3 = arith.cmpi eq, %2, %1 : vector<256x512xi32>
    %4 = arith.extui %3 : vector<256x512xi1> to vector<256x512xi32>
    %5 = arith.sitofp %4 : vector<256x512xi32> to vector<256x512xf32>
    %c0_1 = arith.constant 0 : index
    %c0_2 = arith.constant 0 : index
    %6 = vector.load %arg2[%c0_1, %c0_2] : memref<512x128xf32, #tpu.memory_space<vmem>>, vector<512x128xf32>
    %cst = arith.constant dense<0.000000e+00> : vector<256x128xf32>
    %7 = tpu.matmul %5, %6, %cst {dimension_numbers = #tpu.dot_dimension_numbers<[1], [0], [0], [1], [0, 0, 1, 1], [], []>, precision = #tpu.contract_precision<fp32>} : vector<256x512xf32>, vector<512x128xf32>, vector<256x128xf32> -> vector<256x128xf32>
    %c0_3 = arith.constant 0 : index
    %c0_4 = arith.constant 0 : index
    %8 = vector.load %arg3[%c0_3, %c0_4] : memref<256x128xf32, #tpu.memory_space<vmem>>, vector<256x128xf32>
    tpu.vector_store %arg3[%c0_3, %c0_4], %7 {strides = array<i32>} : memref<256x128xf32, #tpu.memory_space<vmem>>, vector<256x128xf32>,
    return
  }
  func.func @transform_0(%arg0: i32) -> (i32, i32) {
    %c0_i32 = arith.constant 0 : i32
    %c0_i32_0 = arith.constant 0 : i32
    return %arg0, %c0_i32 : i32, i32
  }
  func.func @transform_1(%arg0: i32) -> (i32, i32) {
    %c0_i32 = arith.constant 0 : i32
    %c0_i32_0 = arith.constant 0 : i32
    %c0_i32_1 = arith.constant 0 : i32
    return %c0_i32, %c0_i32_0 : i32, i32
  }
  func.func @transform_2(%arg0: i32) -> (i32, i32) {
    %c0_i32 = arith.constant 0 : i32
    %c0_i32_0 = arith.constant 0 : i32
    return %arg0, %c0_i32 : i32, i32
  }
}

</mosaic_0001>

<bundles_post_ra>
// kernel: tpu_custom_call.1
= control target key start
LH: loop header
LB: loop body
LE: loop exit
PB: predicated region body
PF: predicated region fallthrough
CT: control target
= control target key end

     0   :  { %7 = vsyncpa [#allocation3], 0  ;;  %s12501_s0 = inlined_call_operand.vmem [shape: s32[512,1], index: 0, kind: input, shape index: {}]   ;;  %s12502_s1 = inlined_call_operand.vmem [shape: f32[512,128], index: 1, kind: input, shape index: {}]   ;;  %s12503_s2 = inlined_call_operand.hbm [shape: f32[512,128], index: 2, kind: output, shape index: {}]  }
   0x1   :  { %9 = vsyncpa [#allocation3 + $0x1], 0  ;;  %s6684_s9 = smov 0   ;;  %s6686_s10 = smov 0  }
   0x2   :  { %s6688_s11 = smov 0   ;;  %s6690_s12 = smov 0  }
   0x3 LB: > { %s6705_s13 = sadd.s32 4294967295, %s6661_s12   ;;  %s6030_s14 = sadd.s32 4294967294, %s6661_s12   ;;  %s6661_s12 = sphi %s6690_s12, %s14219_s12   ;;  %s6657_s11 = sphi %s6688_s11, %s14218_s11   ;;  %s6653_s10 = sphi %s6686_s10, %s14217_s10   ;;  %s6649_s9 = sphi %s6684_s9, %s14216_s9  }
   0x4   : > { %s6709_s15 = sadd.s32 1, %s6661_s12   ;;  %s69_s16 = sadd.s32 1, %s6657_s11 }
   0x5   : > { %s66_s17 = ssub.s32 %s6661_s12, %s6709_s15  ;;  %p79_p0 = scmp.ne.s32.totalorder %s6657_s11, %s6653_s10 }
   0x6   : > { %p67_p1 = scmp.eq.s32.totalorder %s66_s17, 0  ;;  %p80_p2 = scmp.eq.s32.totalorder %s6705_s13, 1 }
   0x7   : > { %p85_p3 = scmp.ne.s32.totalorder %s6653_s10, %s6649_s9  ;;  %p86_p4 = scmp.eq.s32.totalorder %s6030_s14, 1 }
   0x8   : > { %s6720_s18 = scalar_select %p67_p1, %s6657_s11, %s69_s16  }
   0x9   : > { %p6722_p5 = por %p80_p2, %p79_p0  ;;  %p6726_p6 = por %p86_p4, %p85_p3 }
   0xa   : > { %p6033_p7 = scmp.ge.s32.totalorder %s6661_s12, 1  ;;  %p116_p8 = scmp.lt.s32.totalorder %s6661_s12, 3 }
   0xc   : > { %p117_p9 = pnand %p6033_p7, %p116_p8 }
   0xe   : > { %120 = sbr.rel (%p117_p9) target bundleno = 1141 (0x475), region = 28 }
  0x13   : > { %s6035_s21 = sshll.u32 %s6705_s13, 5  ;;  %v677_v0 = vld [vmem:[%s12502_s1 + $0x78] sm:$0xff]  ;;  %v676_v1 = vld [vmem:[%s12502_s1 + $0x70] sm:$0xff]  ;;  %v675_v2 = vld [vmem:[%s12502_s1 + $0x68] sm:$0xff]  ;;  %v6663_v3 = vmov 0   ;;  %v12540_v9 = vmov 0.0  }
  0x14   : > { %6600 = vset.pattern.permute.xlu1 %v6663_v3  ;;  %6599 = vset.pattern.permute.xlu0 %v6663_v3  ;;  %p139_p10 = scmp.lt.s32.totalorder %s6035_s21, 63  ;;  %v6742_v4 = vand.u32 4294901760, %v677_v0  ;;  %v6744_v5 = vand.u32 4294901760, %v676_v1  ;;  %v6746_v6 = vand.u32 4294901760, %v675_v2  ;;  %v674_v7 = vld [vmem:[%s12502_s1 + $0x60] sm:$0xff]  ;;  %v673_v8 = vld [vmem:[%s12502_s1 + $0x58] sm:$0xff] }
  0x15   : > { %1303 = vmatprep.subr.mxu1 %v12540_v9  ;;  %v6755_v10 = vand.u32 4294901760, %v674_v7  ;;  %726 = vmatprep.subr.mxu0 %v12540_v9  ;;  %v6758_v11 = vand.u32 4294901760, %v673_v8  ;;  %v672_v12 = vld [vmem:[%s12502_s1 + $0x50] sm:$0xff]  ;;  %v671_v17 = vld [vmem:[%s12502_s1 + $0x48] sm:$0xff]  ;;  %v670_v29 = vld [vmem:[%s12502_s1 + $0x40] sm:$0xff]  ;;  %s135_s23 = sand.u32 1, %s6653_s10  }
  0x16   : > { %13103 = vst [vmem:[#allocation5_spill] sm:$0xff] %v6742_v4  ;;  %13104 = vst [vmem:[#allocation6_spill] sm:$0xff] %v6744_v5  ;;  %s14221_s21 = smov (!%p139_p10, %s6035_s21), 63  ;;  %v6764_v13 = vsub.f32 %v677_v0, %v6742_v4  ;;  %v6767_v14 = vsub.f32 %v676_v1, %v6744_v5  ;;  %v6770_v15 = vsub.f32 %v675_v2, %v6746_v6  ;;  %728 = vmatpush1.msra.mxu0 %v6742_v4  ;;  %v669_v38 = vld [vmem:[%s12502_s1 + $0x38] sm:$0xff]  ;;  %v668_v41 = vld [vmem:[%s12502_s1 + $0x30] sm:$0xff]  ;;  %s6034_s24 = sshll.u32 %s135_s23, 8 }
  0x17   : > { %13105 = vst [vmem:[#allocation7_spill] sm:$0xff] %v6746_v6  ;;  %13106 = vst [vmem:[#allocation8_spill] sm:$0xff] %v6755_v10  ;;  %v6774_v16 = vsub.f32 %v674_v7, %v6755_v10  ;;  %729 = vmatprep.subr.mxu0 %v12540_v9  ;;  %s6036_s8 = sshll.u32 %s14221_s21, 3  ;;  %v6784_v21 = vand.u32 4294901760, %v672_v12  ;;  %v6792_v22 = vsub.f32 %v673_v8, %v6758_v11  ;;  %v6805_v28 = vand.u32 4294901760, %v671_v17  ;;  %v667_v52 = vld [vmem:[%s12502_s1 + $0x28] sm:$0xff] }
  0x18   : > { %13107 = vst [vmem:[#allocation9_spill] sm:$0xff] %v6758_v11  ;;  %13108 = vst [vmem:[#allocation10_spill] sm:$0xff] %v6764_v13  ;;  %v12523_v18 = vand.u32 4294901760, %v6764_v13  ;;  %v12521_v19 = vand.u32 4294901760, %v6767_v14  ;;  %v12520_v20 = vand.u32 4294901760, %v6770_v15  ;;  %731 = vmatpush1.msra.mxu0 %v6744_v5  ;;  %s6789_s17 = scalar_lea.vmem %s12501_s0, %s6036_s8  ;;  %v6821_v37 = vand.u32 4294901760, %v670_v29 }
  0x19   : > { %13109 = vst [vmem:[#allocation11_spill] sm:$0xff] %v6767_v14  ;;  %13110 = vst [vmem:[#allocation12_spill] sm:$0xff] %v6770_v15  ;;  %732 = vmatprep.subr.mxu0 %v12540_v9  ;;  %v147_v23 = vld [vmem:[%s6789_s17 + $0x10] sm:$0xff]  ;;  %v145_v24 = vld [vmem:[%s6789_s17] sm:$0xff]  ;;  %v12518_v27 = vand.u32 4294901760, %v6774_v16  ;;  %v6816_v34 = vsub.f32 %v672_v12, %v6784_v21  ;;  %v12517_v36 = vand.u32 4294901760, %v6792_v22  ;;  %v6830_v40 = vsub.f32 %v671_v17, %v6805_v28 }
  0x1a   : > { %13111 = vst [vmem:[#allocation13_spill] sm:$0xff] %v6774_v16  ;;  %13112 = vst [vmem:[#allocation14_spill] sm:$0xff] %v6792_v22  ;;  %v1307_v25 = vsub.f32 %v6764_v13, %v12523_v18  ;;  %v1314_v26 = vsub.f32 %v6767_v14, %v12521_v19  ;;  %734 = vmatpush1.msra.mxu0 %v6746_v6  ;;  %189 = vperm.xlu1 %6600, %v147_v23   ;;  %v148_v30 = vld [vmem:[%s6789_s17 + $0x18] sm:$0xff]  ;;  %v146_v31 = vld [vmem:[%s6789_s17 + $0x8] sm:$0xff]  ;;  %v6841_v46 = vand.u32 4294901760, %v669_v38  ;;  %s12385_s25 = scalar_lea.vmem [#allocation2], %s6034_s24 }
  0x1b   : > { %13113 = vst [vmem:[#allocation15_spill] sm:$0xff] %v6805_v28  ;;  %183 = vperm.xlu0 %6599, %v145_v24   ;;  %v1321_v33 = vsub.f32 %v6770_v15, %v12520_v20  ;;  %13114 = vst [vmem:[#allocation16_spill] sm:$0xff] %v6816_v34  ;;  %735 = vmatprep.subr.mxu0 %v12540_v9  ;;  %v1328_v39 = vsub.f32 %v6774_v16, %v12518_v27  ;;  %v150_v42 = vld [vmem:[%s6789_s17 + $0x28] sm:$0xff]  ;;  %v149_v43 = vld [vmem:[%s6789_s17 + $0x20] sm:$0xff]  ;;  %v12515_v45 = vand.u32 4294901760, %v6816_v34  ;;  %s6554_s26 = sshll.u32 %s6705_s13, 12 }
  0x1c   : > { %v1308_v32 = vand.u32 4294901760, %v1307_v25  ;;  %v1315_v35 = vand.u32 4294901760, %v1314_v26  ;;  %737 = vmatpush1.msra.mxu0 %v6755_v10  ;;  %13115 = vst [vmem:[#allocation17_spill] sm:$0xff] %v6821_v37  ;;  %13116 = vst [vmem:[#allocation18_spill] sm:$0xff] %v6830_v40  ;;  %v1335_v47 = vsub.f32 %v6792_v22, %v12517_v36  ;;  %v6847_v48 = vsub.f32 %v670_v29, %v6821_v37  ;;  %v152_v53 = vld [vmem:[%s6789_s17 + $0x38] sm:$0xff]  ;;  %v151_v54 = vld [vmem:[%s6789_s17 + $0x30] sm:$0xff]  ;;  %s12454_s30 = scalar_lea.hbm %s12503_s2, %s6554_s26 }
  0x1d   : > { %738 = vmatprep.subr.mxu0 %v12540_v9  ;;  %v1322_v44 = vand.u32 4294901760, %v1321_v33  ;;  %13117 = vst [vmem:[#allocation19_spill] sm:$0xff] %v6841_v46  ;;  %v1329_v49 = vand.u32 4294901760, %v1328_v39  ;;  %v12514_v50 = vand.u32 4294901760, %v6830_v40  ;;  %v6853_v51 = vand.u32 4294901760, %v668_v41  ;;  %v666_v60 = vld [vmem:[%s12502_s1 + $0x20] sm:$0xff] }
  0x1e   : > { %1309 = vmatpush1.msra.mxu1 %v1308_v32  ;;  %192 = vperm.xlu1 %6600, %v148_v30   ;;  %13118 = vst [vmem:[#allocation20_spill] sm:$0xff] %v6847_v48  ;;  %v1342_v55 = vsub.f32 %v6816_v34, %v12515_v45  ;;  %v6864_v56 = vsub.f32 %v669_v38, %v6841_v46  ;;  %v1336_v57 = vand.u32 4294901760, %v1335_v47  ;;  %v12513_v58 = vand.u32 4294901760, %v6847_v48  ;;  %v665_v63 = vld [vmem:[%s12502_s1 + $0x18] sm:$0xff]  ;;  %v154_v0 = vld [vmem:[%s6789_s17 + $0x48] sm:$0xff]  ;;  %v153_v1 = vld [vmem:[%s6789_s17 + $0x40] sm:$0xff] }
  0x1f   : > { %186 = vperm.xlu0 %6599, %v146_v31   ;;  %1310 = vmatprep.subr.mxu1 %v12540_v9  ;;  %v6870_v59 = vand.u32 4294901760, %v667_v52  ;;  %v1349_v61 = vsub.f32 %v6830_v40, %v12514_v50  ;;  %v6879_v62 = vsub.f32 %v668_v41, %v6853_v51  ;;  %v6890_v7 = vand.u32 4294901760, %v666_v60  ;;  %v664_v25 = vld [vmem:[%s12502_s1 + $0x10] sm:$0xff]  ;;  %v156_v26 = vld [vmem:[%s6789_s17 + $0x58] sm:$0xff]  ;;  %v663_v38 = vld [vmem:[%s12502_s1 + $0x8] sm:$0xff]  ;;  %s5968_s27 = sshll.u32 %s12385_s25, 4  ;;  %s12456_s27 = int_to_ptr.vmem [resolvable:$true] %s5968_s27 }
  0x20   : > { %740 = vmatpush1.msra.mxu0 %v6758_v11  ;;  %1316 = vmatpush1.msra.mxu1 %v1315_v35  ;;  %13119 = vst [vmem:[#allocation21_spill] sm:$0xff] %v6864_v56  ;;  %v1343_v2 = vand.u32 4294901760, %v1342_v55  ;;  %v12511_v3 = vand.u32 4294901760, %v6864_v56  ;;  %v1356_v8 = vsub.f32 %v6847_v48, %v12513_v58  ;;  %v6902_v24 = vand.u32 4294901760, %v665_v63  ;;  %v155_v29 = vld [vmem:[%s6789_s17 + $0x50] sm:$0xff]  ;;  %v170_v36 = vld [vmem:[%s6789_s17 + $0xc8] sm:$0xff] }
  0x21   : > { %741 = vmatprep.subr.mxu0 %v12540_v9  ;;  %1317 = vmatprep.subr.mxu1 %v12540_v9  ;;  %13120 = vst [vmem:[#allocation22_spill] sm:$0xff] %v6879_v62  ;;  %13121 = vst [vmem:[#allocation23_spill] sm:$0xff] %v6890_v7  ;;  %v6896_v12 = vsub.f32 %v667_v52, %v6870_v59  ;;  %v1350_v17 = vand.u32 4294901760, %v1349_v61  ;;  %v12509_v23 = vand.u32 4294901760, %v6879_v62  ;;  %v6919_v35 = vand.u32 4294901760, %v664_v25  ;;  %v693_v61 = vld [vmem:[%s12502_s1 + $0xf8] sm:$0xff] }
  0x22   : > { %743 = vmatpush1.msra.mxu0 %v6784_v21  ;;  %198 = vperm.xlu1 %6600, %v150_v42   ;;  %13123 = vst [vmem:[#allocation25_spill] sm:$0xff] %v6902_v24  ;;  %v1363_v30 = vsub.f32 %v6864_v56, %v12511_v3  ;;  %v6913_v31 = vsub.f32 %v666_v60, %v6890_v7  ;;  %v1357_v32 = vand.u32 4294901760, %v1356_v8  ;;  %v662_v42 = vld [vmem:[%s12502_s1] sm:$0xff]  ;;  %v6939_v52 = vand.u32 4294901760, %v663_v38  ;;  %v167_v58 = vld [vmem:[%s6789_s17 + $0xb0] sm:$0xff]  ;;  %v172_v18 = vld [vmem:[%s6789_s17 + $0xd8] sm:$0xff] }
  0x23   : > { %195 = vperm.xlu0 %6599, %v149_v43   ;;  %1323 = vmatpush1.msra.mxu1 %v1322_v44  ;;  %13122 = vst [vmem:[#allocation24_spill] sm:$0xff] %v6896_v12  ;;  %v12508_v33 = vand.u32 4294901760, %v6896_v12  ;;  %v1370_v39 = vsub.f32 %v6879_v62, %v12509_v23  ;;  %v6928_v41 = vsub.f32 %v665_v63, %v6902_v24  ;;  %v158_v43 = vld [vmem:[%s6789_s17 + $0x68] sm:$0xff]  ;;  %v157_v44 = vld [vmem:[%s6789_s17 + $0x60] sm:$0xff]  ;;  %v6951_v60 = vand.u32 4294901760, %v662_v42  ;;  %v160_v63 = vld [vmem:[%s6789_s17 + $0x78] sm:$0xff] }
  0x24   : > { %744 = vmatprep.subr.mxu0 %v12540_v9  ;;  %1324 = vmatprep.subr.mxu1 %v12540_v9  ;;  %13124 = vst [vmem:[#allocation26_spill] sm:$0xff] %v6913_v31  ;;  %v1364_v47 = vand.u32 4294901760, %v1363_v30  ;;  %v169_v27 = vld [vmem:[%s6789_s17 + $0xc0] sm:$0xff]  ;;  %v684_v20 = vld [vmem:[%s12502_s1 + $0xb0] sm:$0xff]  ;;  %s12461_s13 = scalar_lea.sflag [#allocation3], %s135_s23  ;;  %s6601_s3 = scalar_lea.vmem %s12456_s27, 4096 }
  0x25   : > { %746 = vmatpush1.msra.mxu0 %v6805_v28  ;;  %1330 = vmatpush1.msra.mxu1 %v1329_v49  ;;  %13125 = vst [vmem:[#allocation27_spill] sm:$0xff] %v6928_v41  ;;  %v12507_v49 = vand.u32 4294901760, %v6913_v31  ;;  %v1371_v55 = vand.u32 4294901760, %v1370_v39  ;;  %13127 = vst [vmem:[#allocation29_spill] sm:$0xff] %v6951_v60  ;;  %v6977_v30 = vsub.f32 %v662_v42, %v6951_v60  ;;  %v161_v39 = vld [vmem:[%s6789_s17 + $0x80] sm:$0xff]  ;;  %p6602_p11 = scmp.ne.s32.totalorder %s12456_s27, %s6601_s3  ;;  %s6666_s4 = smov [#allocation2]  }
  0x26   : > { %747 = vmatprep.subr.mxu0 %v12540_v9  ;;  %204 = vperm.xlu1 %6600, %v152_v53   ;;  %v1377_v53 = vsub.f32 %v6896_v12, %v12508_v33  ;;  %v165_v33 = vld [vmem:[%s6789_s17 + $0xa0] sm:$0xff]  ;;  %s6605_s5 = sshll.u32 %s6666_s4, 4  ;;  %s6606_s5 = int_to_ptr.vmem [resolvable:$false] %s6605_s5 }
  0x27   : > { %201 = vperm.xlu0 %6599, %v151_v54   ;;  %1331 = vmatprep.subr.mxu1 %v12540_v9  ;;  %v6945_v54 = vsub.f32 %v664_v25, %v6919_v35  ;;  %v6968_v25 = vand.u32 4294901760, %v693_v61  ;;  %13130 = vst [vmem:[#allocation32_spill] sm:$0xff] %v6977_v30  ;;  %p6603_p12 = pnand %p6602_p11, %p6722_p5  ;;  %s6607_s6 = scalar_lea.vmem %s6606_s5, 8192 }
  0x28   : > { %749 = vmatpush1.msra.mxu0 %v6821_v37  ;;  %1337 = vmatpush1.msra.mxu1 %v1336_v57  ;;  %v12505_v57 = vand.u32 4294901760, %v6928_v41  ;;  %v1378_v8 = vand.u32 4294901760, %v1377_v53  ;;  %p6608_p0 = scmp.lt.s32.totalorder %s12456_s27, %s6606_s5  ;;  %p6609_p1 = scmp.lt.s32.totalorder %s6607_s6, %s6601_s3 }
  0x29   : > { %750 = vmatprep.subr.mxu0 %v12540_v9  ;;  %1338 = vmatprep.subr.mxu1 %v12540_v9  ;;  %13126 = vst [vmem:[#allocation28_spill] sm:$0xff] %v6945_v54  ;;  %13129 = vst [vmem:[#allocation31_spill] sm:$0xff] %v6968_v25  ;;  %v6994_v53 = vsub.f32 %v693_v61, %v6968_v25  ;;  %v163_v61 = vld [vmem:[%s6789_s17 + $0x90] sm:$0xff]  ;;  %p6604_p13 = pneg %p6603_p12 }
  0x2a   : > { %752 = vmatpush1.msra.mxu0 %v6841_v46  ;;  %210 = vperm.xlu1 %6600, %v154_v0   ;;  %v159_v0 = vld [vmem:[%s6789_s17 + $0x70] sm:$0xff]  ;;  %p6610_p2 = por %p6609_p1, %p6608_p0 }
  0x2b   : > { %207 = vperm.xlu0 %6599, %v153_v1   ;;  %1344 = vmatpush1.msra.mxu1 %v1343_v2  ;;  %v1384_v1 = vsub.f32 %v6913_v31, %v12507_v49  ;;  %v6962_v2 = vsub.f32 %v663_v38, %v6939_v52  ;;  %v162_v38 = vld [vmem:[%s6789_s17 + $0x88] sm:$0xff]  ;;  %13132 = vst [vmem:[#allocation34_spill] sm:$0xff] %v6994_v53 }
  0x2c   : > { %753 = vmatprep.subr.mxu0 %v12540_v9  ;;  %1345 = vmatprep.subr.mxu1 %v12540_v9  ;;  %v166_v49 = vld [vmem:[%s6789_s17 + $0xa8] sm:$0xff]  ;;  %p6611_p3 = pnand %p6610_p2, %p6604_p13 }
  0x2d   : > { %755 = vmatpush1.msra.mxu0 %v6853_v51  ;;  %1351 = vmatpush1.msra.mxu1 %v1350_v17  ;;  %13128 = vst [vmem:[#allocation30_spill] sm:$0xff] %v6962_v2  ;;  %v12504_v17 = vand.u32 4294901760, %v6945_v54 }
  0x2e   : > { %756 = vmatprep.subr.mxu0 %v12540_v9  ;;  %216 = vperm.xlu1 %6600, %v156_v26   ;;  %v692_v26 = vld [vmem:[%s12502_s1 + $0xf0] sm:$0xff] }
  0x2f   : > { %213 = vperm.xlu0 %6599, %v155_v29   ;;  %1352 = vmatprep.subr.mxu1 %v12540_v9  ;;  %v1391_v29 = vsub.f32 %v6928_v41, %v12505_v57  ;;  %v6988_v42 = vand.u32 4294901760, %v692_v26 }
  0x30   : > { %758 = vmatpush1.msra.mxu0 %v6870_v59  ;;  %1358 = vmatpush1.msra.mxu1 %v1357_v32  ;;  %v691_v32 = vld [vmem:[%s12502_s1 + $0xe8] sm:$0xff] }
  0x31   : > { %759 = vmatprep.subr.mxu0 %v12540_v9  ;;  %1359 = vmatprep.subr.mxu1 %v12540_v9  ;;  %13131 = vst [vmem:[#allocation33_spill] sm:$0xff] %v6988_v42 }
  0x32   : > { %761 = vmatpush1.msra.mxu0 %v6890_v7  ;;  %222 = vperm.xlu1 %6600, %v158_v43   ;;  %v1385_v43 = vand.u32 4294901760, %v1384_v1  ;;  %v690_v1 = vld [vmem:[%s12502_s1 + $0xe0] sm:$0xff] }
  0x33   : > { %219 = vperm.xlu0 %6599, %v157_v44   ;;  %1365 = vmatpush1.msra.mxu1 %v1364_v47  ;;  %v12506_v44 = vand.u32 4294901760, %v6962_v2  ;;  %v1398_v47 = vsub.f32 %v6945_v54, %v12504_v17 }
  0x34   : > { %762 = vmatprep.subr.mxu0 %v12540_v9  ;;  %1366 = vmatprep.subr.mxu1 %v12540_v9 }
  0x35   : > { %764 = vmatpush1.msra.mxu0 %v6902_v24  ;;  %1372 = vmatpush1.msra.mxu1 %v1371_v55  ;;  %v1392_v55 = vand.u32 4294901760, %v1391_v29  ;;  %v1405_v17 = vsub.f32 %v6962_v2, %v12506_v44  ;;  %v7011_v29 = vsub.f32 %v692_v26, %v6988_v42  ;;  %v1399_v57 = vand.u32 4294901760, %v1398_v47  ;;  %v688_v47 = vld [vmem:[%s12502_s1 + $0xd0] sm:$0xff] }
  0x36   : > { %765 = vmatprep.subr.mxu0 %v12540_v9  ;;  %228 = vperm.xlu1 %6600, %v160_v63   ;;  %v12510_v63 = vand.u32 4294901760, %v6977_v30 }
  0x37   : > { %225 = vperm.xlu0 %6599, %v159_v0   ;;  %1373 = vmatprep.subr.mxu1 %v12540_v9  ;;  %v7000_v0 = vand.u32 4294901760, %v691_v32  ;;  %13134 = vst [vmem:[#allocation36_spill] sm:$0xff] %v7011_v29  ;;  %v12516_v23 = vand.u32 4294901760, %v7011_v29 }
  0x38   : > { %767 = vmatpush1.msra.mxu0 %v6919_v35  ;;  %1379 = vmatpush1.msra.mxu1 %v1378_v8  ;;  %v164_v8 = vld [vmem:[%s6789_s17 + $0x98] sm:$0xff]  ;;  %v1412_v26 = vsub.f32 %v6977_v30, %v12510_v63 }
  0x39   : > { %768 = vmatprep.subr.mxu0 %v12540_v9  ;;  %1380 = vmatprep.subr.mxu1 %v12540_v9  ;;  %13133 = vst [vmem:[#allocation35_spill] sm:$0xff] %v7000_v0  ;;  %v7026_v44 = vsub.f32 %v691_v32, %v7000_v0  ;;  %v1426_v50 = vsub.f32 %v7011_v29, %v12516_v23 }
  0x3a   : > { %770 = vmatpush1.msra.mxu0 %v6939_v52  ;;  %234 = vperm.xlu1 %6600, %v162_v38   ;;  %v12512_v38 = vand.u32 4294901760, %v6994_v53  ;;  %v1413_v63 = vand.u32 4294901760, %v1412_v26 }
  0x3b   : > { %231 = vperm.xlu0 %6599, %v161_v39   ;;  %1386 = vmatpush1.msra.mxu1 %v1385_v43  ;;  %v7017_v39 = vand.u32 4294901760, %v690_v1  ;;  %v689_v43 = vld [vmem:[%s12502_s1 + $0xd8] sm:$0xff]  ;;  %13136 = vst [vmem:[#allocation38_spill] sm:$0xff] %v7026_v44  ;;  %v12519_v3 = vand.u32 4294901760, %v7026_v44 }
  0x3c   : > { %771 = vmatprep.subr.mxu0 %v12540_v9  ;;  %1387 = vmatprep.subr.mxu1 %v12540_v9  ;;  %v7037_v32 = vand.u32 4294901760, %v689_v43 }
  0x3d   : > { %773 = vmatpush1.msra.mxu0 %v6951_v60  ;;  %13135 = vst [vmem:[#allocation37_spill] sm:$0xff] %v7017_v39  ;;  %1393 = vmatpush1.msra.mxu1 %v1392_v55  ;;  %v1406_v55 = vand.u32 4294901760, %v1405_v17  ;;  %v687_v17 = vld [vmem:[%s12502_s1 + $0xc8] sm:$0xff] }
  0x3e   : > { %774 = vmatprep.subr.mxu0 %v12540_v9  ;;  %240 = vperm.xlu1 %6600, %v164_v8   ;;  %13137 = vst [vmem:[#allocation39_spill] sm:$0xff] %v7037_v32  ;;  %v1419_v8 = vsub.f32 %v6994_v53, %v12512_v38  ;;  %v168_v38 = vld [vmem:[%s6789_s17 + $0xb8] sm:$0xff]  ;;  %v7063_v26 = vsub.f32 %v689_v43, %v7037_v32 }
  0x3f   : > { %237 = vperm.xlu0 %6599, %v163_v61   ;;  %1394 = vmatprep.subr.mxu1 %v12540_v9  ;;  %v7043_v61 = vsub.f32 %v690_v1, %v7017_v39  ;;  %v686_v1 = vld [vmem:[%s12502_s1 + $0xc0] sm:$0xff] }
  0x40   : > { %776 = vmatpush2.msra.mxu0 %v6968_v25  ;;  %1400 = vmatpush1.msra.mxu1 %v1399_v57  ;;  %v7052_v57 = vand.u32 4294901760, %v688_v47  ;;  %13140 = vst [vmem:[#allocation42_spill] sm:$0xff] %v7063_v26  ;;  %v7078_v23 = vand.u32 4294901760, %v686_v1 }
  0x41   : > { %13138 = vst [vmem:[#allocation40_spill] sm:$0xff] %v7043_v61  ;;  %777 = vmatprep.subr.mxu0 %v12540_v9  ;;  %1401 = vmatprep.subr.mxu1 %v12540_v9  ;;  %v12522_v45 = vand.u32 4294901760, %v7043_v61 }
  0x42   : > { %779 = vmatpush2.msra.mxu0 %v6988_v42  ;;  %13139 = vst [vmem:[#allocation41_spill] sm:$0xff] %v7052_v57  ;;  %246 = vperm.xlu1 %6600, %v166_v49   ;;  %v7066_v49 = vand.u32 4294901760, %v687_v17  ;;  %v7075_v43 = vsub.f32 %v688_v47, %v7052_v57  ;;  %13143 = vst [vmem:[#allocation45_spill] sm:$0xff] %v7078_v23  ;;  %v7103_v19 = vsub.f32 %v686_v1, %v7078_v23 }
  0x43   : > { %243 = vperm.xlu0 %6599, %v165_v33   ;;  %1407 = vmatpush1.msra.mxu1 %v1406_v55  ;;  %v1420_v33 = vand.u32 4294901760, %v1419_v8  ;;  %v1433_v55 = vsub.f32 %v7026_v44, %v12519_v3  ;;  %v685_v8 = vld [vmem:[%s12502_s1 + $0xb8] sm:$0xff]  ;;  %v171_v3 = vld [vmem:[%s6789_s17 + $0xd0] sm:$0xff] }
  0x44   : > { %780 = vmatprep.subr.mxu0 %v12540_v9  ;;  %13141 = vst [vmem:[#allocation43_spill] sm:$0xff] %v7066_v49  ;;  %1408 = vmatprep.subr.mxu1 %v12540_v9  ;;  %13142 = vst [vmem:[#allocation44_spill] sm:$0xff] %v7075_v43  ;;  %v7088_v47 = vsub.f32 %v687_v17, %v7066_v49 }
  0x45   : > { %782 = vmatpush2.msra.mxu0 %v7000_v0  ;;  %1414 = vmatpush1.msra.mxu1 %v1413_v63  ;;  %v1427_v63 = vand.u32 4294901760, %v1426_v50  ;;  %v7098_v50 = vand.u32 4294901760, %v685_v8  ;;  %13146 = vst [vmem:[#allocation48_spill] sm:$0xff] %v7103_v19 }
  0x46   : > { %783 = vmatprep.subr.mxu0 %v12540_v9  ;;  %252 = vperm.xlu1 %6600, %v168_v38   ;;  %13144 = vst [vmem:[#allocation46_spill] sm:$0xff] %v7088_v47  ;;  %v1434_v38 = vand.u32 4294901760, %v1433_v55  ;;  %v13148_v55 = vand.u32 4294901760, %v7063_v26 }
  0x47   : > { %249 = vperm.xlu0 %6599, %v167_v58   ;;  %1415 = vmatprep.subr.mxu1 %v12540_v9  ;;  %v1440_v58 = vsub.f32 %v7043_v61, %v12522_v45  ;;  %13145 = vst [vmem:[#allocation47_spill] sm:$0xff] %v7098_v50  ;;  %v7109_v45 = vand.u32 4294901760, %v684_v20 }
  0x48   : > { %785 = vmatpush2.msra.mxu0 %v7017_v39  ;;  %1421 = vmatpush2.msra.mxu1 %v1420_v33  ;;  %v683_v33 = vld [vmem:[%s12502_s1 + $0xa8] sm:$0xff]  ;;  %v1447_v17 = vsub.f32 %v7063_v26, %v13148_v55  ;;  %v13151_v55 = vand.u32 4294901760, %v7075_v43  ;;  %v173_v39 = vld [vmem:[%s6789_s17 + $0xe0] sm:$0xff]  ;;  %v13153_v26 = vand.u32 4294901760, %v7088_v47 }
  0x49   : > { %786 = vmatprep.subr.mxu0 %v12540_v9  ;;  %1422 = vmatprep.subr.mxu1 %v12540_v9  ;;  %13147 = vst [vmem:[#allocation49_spill] sm:$0xff] %v7109_v45 }
  0x4a   : > { %788 = vmatpush2.msra.mxu0 %v7037_v32  ;;  %258 = vperm.xlu1 %6600, %v170_v36   ;;  %v682_v32 = vld [vmem:[%s12502_s1 + $0xa0] sm:$0xff]  ;;  %v7123_v36 = vsub.f32 %v685_v8, %v7098_v50  ;;  %v1454_v1 = vsub.f32 %v7075_v43, %v13151_v55  ;;  %v7137_v8 = vsub.f32 %v684_v20, %v7109_v45  ;;  %v1448_v55 = vand.u32 4294901760, %v1447_v17 }
  0x4b   : > { %255 = vperm.xlu0 %6599, %v169_v27   ;;  %1428 = vmatpush2.msra.mxu1 %v1427_v63  ;;  %v1441_v27 = vand.u32 4294901760, %v1440_v58  ;;  %v7126_v63 = vand.u32 4294901760, %v683_v33  ;;  %v681_v58 = vld [vmem:[%s12502_s1 + $0x98] sm:$0xff]  ;;  %v1461_v43 = vsub.f32 %v7088_v47, %v13153_v26 }
  0x4c   : > { %789 = vmatprep.subr.mxu0 %v12540_v9  ;;  %1429 = vmatprep.subr.mxu1 %v12540_v9  ;;  %13149 = vst [vmem:[#allocation50_spill] sm:$0xff] %v7123_v36  ;;  %13152 = vst [vmem:[#allocation52_spill] sm:$0xff] %v7137_v8  ;;  %v7156_v17 = vand.u32 4294901760, %v681_v58  ;;  %v1455_v26 = vand.u32 4294901760, %v1454_v1  ;;  %v176_v1 = vld [vmem:[%s6789_s17 + $0xf8] sm:$0xff] }
  0x4d   : > { %791 = vmatpush2.msra.mxu0 %v7052_v57  ;;  %13150 = vst [vmem:[#allocation51_spill] sm:$0xff] %v7126_v63  ;;  %1435 = vmatpush2.msra.mxu1 %v1434_v38  ;;  %v7139_v57 = vand.u32 4294901760, %v682_v32  ;;  %v174_v38 = vld [vmem:[%s6789_s17 + $0xe8] sm:$0xff]  ;;  %v1462_v0 = vand.u32 4294901760, %v1461_v43 }
  0x4e   : > { %792 = vmatprep.subr.mxu0 %v12540_v9  ;;  %264 = vperm.xlu1 %6600, %v172_v18   ;;  %v680_v18 = vld [vmem:[%s12502_s1 + $0x90] sm:$0xff] }
  0x4f   : > { %261 = vperm.xlu0 %6599, %v171_v3   ;;  %1436 = vmatprep.subr.mxu1 %v12540_v9  ;;  %v7153_v3 = vsub.f32 %v683_v33, %v7126_v63  ;;  %v7168_v20 = vsub.f32 %v682_v32, %v7139_v57  ;;  %v7170_v61 = vand.u32 4294901760, %v680_v18  ;;  %v7185_v33 = vsub.f32 %v681_v58, %v7156_v17 }
  0x50   : > { %794 = vmatpush2.msra.mxu0 %v7066_v49  ;;  %1442 = vmatpush2.msra.mxu1 %v1441_v27  ;;  %v13155_v49 = vand.u32 4294901760, %v7103_v19  ;;  %v679_v27 = vld [vmem:[%s12502_s1 + $0x88] sm:$0xff] }
  0x51   : > { %13154 = vst [vmem:[#allocation53_spill] sm:$0xff] %v7153_v3  ;;  %795 = vmatprep.subr.mxu0 %v12540_v9  ;;  %1443 = vmatprep.subr.mxu1 %v12540_v9  ;;  %13156 = vst [vmem:[#allocation54_spill] sm:$0xff] %v7170_v61  ;;  %v175_v9 = vld [vmem:[%s6789_s17 + $0xf0] sm:$0xff]  ;;  %v7187_v43 = vand.u32 4294901760, %v679_v27  ;;  %v7195_v32 = vsub.f32 %v680_v18, %v7170_v61  ;;  %v13164_v58 = vand.u32 4294901760, %v7153_v3 }
  0x52   : > { %v1468_v47 = vsub.f32 %v7103_v19, %v13155_v49  ;;  %797 = vmatpush2.msra.mxu0 %v7078_v23  ;;  %270 = vperm.xlu1 %6600, %v174_v38   ;;  %v13157_v49 = vmov 0.0   ;;  %v678_v23 = vld [vmem:[%s12502_s1 + $0x80] sm:$0xff]  ;;  %13159 = vst [vmem:[#allocation55_spill] sm:$0xff] %v7185_v33  ;;  %v13161_v19 = vand.u32 4294901760, %v7137_v8 }
  0x53   : > { %267 = vperm.xlu0 %6599, %v173_v39   ;;  %1449 = vmatpush2.msra.mxu1 %v1448_v55  ;;  %v13158_v39 = vand.u32 4294901760, %v7123_v36  ;;  %13160 = vst [vmem:[#allocation56_spill] sm:$0xff] %v7187_v43  ;;  %13162 = vst [vmem:[#allocation57_spill] sm:$0xff] %v7195_v32 }
  0x54   : > { %798 = vmatprep.subr.mxu0 %v13157_v49  ;;  %1450 = vmatprep.subr.mxu1 %v13157_v49  ;;  %v1469_v55 = vand.u32 4294901760, %v1468_v47  ;;  %v1482_v44 = vsub.f32 %v7137_v8, %v13161_v19  ;;  %v7207_v19 = vsub.f32 %v679_v27, %v7187_v43 }
  0x55   : > { %v1475_v38 = vsub.f32 %v7123_v36, %v13158_v39  ;;  %800 = vmatpush2.msra.mxu0 %v7098_v50  ;;  %1456 = vmatpush2.msra.mxu1 %v1455_v26  ;;  %v12556_v39 = vand.u32 4294901760, %v7168_v20  ;;  %v7197_v50 = vand.u32 4294901760, %v678_v23  ;;  %v12552_v26 = vand.u32 4294901760, %v7185_v33 }
  0x56   : > { %801 = vmatprep.subr.mxu0 %v13157_v49  ;;  %276 = vperm.xlu1 %6600, %v176_v1   ;;  %13165 = vst [vmem:[#allocation59_spill] sm:$0xff] %v7207_v19  ;;  %v1483_v18 = vand.u32 4294901760, %v1482_v44  ;;  %v12555_v1 = vand.u32 4294901760, %v7195_v32 }
  0x57   : > { %273 = vperm.xlu0 %6599, %v175_v9   ;;  %13163 = vst [vmem:[#allocation58_spill] sm:$0xff] %v7197_v50  ;;  %1457 = vmatprep.subr.mxu1 %v13157_v49  ;;  %v1476_v47 = vand.u32 4294901760, %v1475_v38  ;;  %v1489_v9 = vsub.f32 %v7153_v3, %v13164_v58  ;;  %v7217_v38 = vsub.f32 %v678_v23, %v7197_v50 }
  0x58   : > { %803 = vmatpush2.msra.mxu0 %v7109_v45  ;;  %1463 = vmatpush2.msra.mxu1 %v1462_v0  ;;  %v1496_v0 = vsub.f32 %v7168_v20, %v12556_v39  ;;  %v1503_v44 = vsub.f32 %v7185_v33, %v12552_v26  ;;  %v1510_v58 = vsub.f32 %v7195_v32, %v12555_v1 }
  0x59   : > { %804 = vmatprep.subr.mxu0 %v13157_v49  ;;  %1464 = vmatprep.subr.mxu1 %v13157_v49  ;;  %13166 = vst [vmem:[#allocation60_spill] sm:$0xff] %v7217_v38  ;;  %v1490_v27 = vand.u32 4294901760, %v1489_v9 }
  0x5a   : > { %806 = vmatpush2.msra.mxu0 %v7126_v63  ;;  %1470 = vmatpush2.msra.mxu1 %v1469_v55  ;;  %v12554_v55 = vand.u32 4294901760, %v7207_v19  ;;  %v1497_v23 = vand.u32 4294901760, %v1496_v0  ;;  %v1504_v9 = vand.u32 4294901760, %v1503_v44 }
  0x5b   : > { %807 = vmatprep.subr.mxu0 %v13157_v49  ;;  %1471 = vmatprep.subr.mxu1 %v13157_v49 }
  0x5c   : > { %809 = vmatpush2.msra.mxu0 %v7139_v57  ;;  %1477 = vmatpush2.msra.mxu1 %v1476_v47  ;;  %v12553_v47 = vand.u32 4294901760, %v7217_v38  ;;  %v1517_v26 = vsub.f32 %v7207_v19, %v12554_v55 }
  0x5d   : > { %810 = vmatprep.subr.mxu0 %v13157_v49  ;;  %1478 = vmatprep.subr.mxu1 %v13157_v49 }
  0x5e   : > { %812 = vmatpush2.msra.mxu0 %v7156_v17  ;;  %1484 = vmatpush2.msra.mxu1 %v1483_v18  ;;  %v1511_v18 = vand.u32 4294901760, %v1510_v58  ;;  %v1524_v0 = vsub.f32 %v7217_v38, %v12553_v47 }
  0x5f   : > { %813 = vmatprep.subr.mxu0 %v13157_v49  ;;  %1485 = vmatprep.subr.mxu1 %v13157_v49 }
  0x60   : > { %815 = vmatpush2.msra.mxu0 %v7170_v61  ;;  %1491 = vmatpush2.msra.mxu1 %v1490_v27  ;;  %v1518_v27 = vand.u32 4294901760, %v1517_v26  ;;  %v1525_v44 = vand.u32 4294901760, %v1524_v0 }
  0x61   : > { %816 = vmatprep.subr.mxu0 %v13157_v49  ;;  %1492 = vmatprep.subr.mxu1 %v13157_v49 }
  0x62   : > { %818 = vmatpush2.msra.mxu0 %v7187_v43  ;;  %1498 = vmatpush2.msra.mxu1 %v1497_v23  ;;  %v177_v23 = vlaneseq }
  0x63   : > { %819 = vmatprep.subr.mxu0 %v13157_v49  ;;  %1499 = vmatprep.subr.mxu1 %v13157_v49 }
  0x64   : > { %821 = vmatpush2.msra.mxu0 %v7197_v50  ;;  %1505 = vmatpush2.msra.mxu1 %v1504_v9  ;;  %v7252_v58 = vand.u32 127, %v177_v23 }
  0x65   : > { %1752 = vmatprep.subr.mxu0 %v13157_v49  ;;  %1506 = vmatprep.subr.mxu1 %v13157_v49 }
  0x66   : > { %1512 = vmatpush2.msra.mxu1 %v1511_v18  ;;  %13167 = vst [vmem:[#allocation61_spill] sm:$0xff] %v7252_v58  ;;  %v7255_v9 = vadd.s32 128, %v7252_v58  ;;  %v12572_v18 = vmov 1.0  }
  0x67   : > { %1513 = vmatprep.subr.mxu1 %v13157_v49 }
  0x68   : > { %1519 = vmatpush2.msra.mxu1 %v1518_v27  ;;  %13168 = vst [vmem:[#allocation62_spill] sm:$0xff] %v7255_v9 }
  0x69   : > { %1520 = vmatprep.subr.mxu1 %v13157_v49 }
  0x6a   : > { %1526 = vmatpush2.msra.mxu1 %v1525_v44 }
  0x6b   : > { %2169 = vmatprep.subr.mxu1 %v13157_v49 }
  0x95   : > { %v7257_v26 = vpop.permute.xlu1 %189 }
  0x96   : > { %13169 = vst [vmem:[#allocation63_spill] sm:$0xff] %v7257_v26  ;;  %v7259_v47 = vpop.permute.xlu0 %183  ;;  %vm287_vm2 = vcmp.eq.s32.totalorder %v7257_v26, %v7255_v9  ;;  %vm286_vm3 = vcmp.eq.s32.totalorder %v7257_v26, %v7252_v58 }
  0x97   : > { %13170 = vst [vmem:[#allocation64_spill] sm:$0xff] %v7259_v47  ;;  %vm279_vm0 = vcmp.eq.s32.totalorder %v7259_v47, %v7255_v9  ;;  %vm278_vm1 = vcmp.eq.s32.totalorder %v7259_v47, %v7252_v58  ;;  %v6046_v1 = vsel %vm287_vm2, 1.0, %v13157_v49 }
  0x98   : > { %6165 = vmatprep.mubr.msk.f32.mxu1 %vm279_vm0, %v12572_v18  ;;  %v6037_v0 = vsel %vm278_vm1, 1.0, %v13157_v49  ;;  %v6038_v27 = vsel %vm279_vm0, 1.0, %v13157_v49  ;;  %v7330_v43 = vsub.f32 %v6046_v1, %v6046_v1 }
  0x99   : > { %v7279_v44 = vsub.f32 %v6037_v0, %v6037_v0  ;;  %6166 = vmatmul.mubr.msk.f32.vlgmr.msra.gmra.mxu1 %vm278_vm1, %v12572_v18  ;;  %v7285_v23 = vsub.f32 %v6038_v27, %v6038_v27  ;;  %v7296_v0 = vpop.permute.xlu1 %192  ;;  %v6045_v27 = vsel %vm286_vm3, 1.0, %v13157_v49 }
  0x9a   : > { %v7287_v55 = vpop.permute.xlu0 %186  ;;  %2171 = vmatpush1.msra.mxu1 %v6742_v4  ;;  %13173 = vst [vmem:[#allocation67_spill] sm:$0xff] %v7296_v0  ;;  %vm291_vm6 = vcmp.eq.s32.totalorder %v7296_v0, %v7255_v9  ;;  %vm290_vm7 = vcmp.eq.s32.totalorder %v7296_v0, %v7252_v58 }
  0x9b   : > { %13171 = vst [vmem:[#allocation65_spill] sm:$0xff] %v7279_v44  ;;  %13172 = vst [vmem:[#allocation66_spill] sm:$0xff] %v7287_v55  ;;  %vm283_vm4 = vcmp.eq.s32.totalorder %v7287_v55, %v7255_v9  ;;  %vm282_vm5 = vcmp.eq.s32.totalorder %v7287_v55, %v7252_v58  ;;  %2172 = vmatprep.subr.mxu1 %v13157_v49  ;;  %v12576_v4 = vand.u32 4294901760, %v7279_v44  ;;  %v13176_v19 = vand.u32 4294901760, %v7285_v23 }
  0x9c   : > { %v6042_v39 = vsel %vm283_vm4, 1.0, %v13157_v49  ;;  %6167 = vmatprep.mubr.msk.f32.mxu1 %vm283_vm4, %v12572_v18  ;;  %v6041_v47 = vsel %vm282_vm5, 1.0, %v13157_v49  ;;  %2174 = vmatpush1.msra.mxu1 %v6744_v5  ;;  %v6050_v1 = vsel %vm291_vm6, 1.0, %v13157_v49 }
  0x9d   : > { %v7322_v38 = vsub.f32 %v6042_v39, %v6042_v39  ;;  %v7324_v50 = vsub.f32 %v6041_v47, %v6041_v47  ;;  %6168 = vmatmul.mubr.msk.f32.gmra.mxu1 %vm282_vm5, %v12572_v18  ;;  %v825_v61 = vsub.f32 %v7285_v23, %v13176_v19  ;;  %v7341_v39 = vsub.f32 %v6045_v27, %v6045_v27 }
  0x9e   : > { %v7335_v32 = vpop.permute.xlu0 %195  ;;  %6169 = vmatprep.mubr.msk.f32.mxu1 %vm287_vm2, %v12572_v18  ;;  %v831_v47 = vsub.f32 %v7279_v44, %v12576_v4  ;;  %2175 = vmatprep.subr.mxu1 %v13157_v49  ;;  %v7356_v55 = vsub.f32 %v6050_v1, %v6050_v1  ;;  %v6049_v4 = vsel %vm290_vm7, 1.0, %v13157_v49  ;;  %v13180_v44 = vmov 1.0  }
  0x9f   : > { %13174 = vst [vmem:[#allocation68_spill] sm:$0xff] %v7322_v38  ;;  %13175 = vst [vmem:[#allocation69_spill] sm:$0xff] %v7324_v50  ;;  %v826_v19 = vand.u32 4294901760, %v825_v61  ;;  %v12582_v18 = vand.u32 4294901760, %v7322_v38  ;;  %2177 = vmatpush1.msra.mxu1 %v6746_v6  ;;  %v7364_v61 = vpop.permute.xlu1 %198  ;;  %v7373_v1 = vsub.f32 %v6049_v4, %v6049_v4  ;;  %vm295_vm8 = vcmp.eq.s32.totalorder %v7335_v32, %v7255_v9 }
  0xa0   : > { %13177 = vst [vmem:[#allocation70_spill] sm:$0xff] %v7335_v32  ;;  %13178 = vst [vmem:[#allocation71_spill] sm:$0xff] %v7341_v39  ;;  %v832_v27 = vand.u32 4294901760, %v831_v47  ;;  %v6054_v4 = vsel %vm295_vm8, 1.0, %v13157_v49  ;;  %vm12615_vm9 = vcmp.eq.s32.totalorder %v7335_v32, %v7252_v58  ;;  %v13184_v6 = vand.u32 4294901760, %v7330_v43  ;;  %2178 = vmatprep.subr.mxu1 %v13157_v49 }
  0xa1   : > { %13179 = vst [vmem:[#allocation72_spill] sm:$0xff] %v7364_v61  ;;  %827 = vmatprep.mubr.f32.mxu0 %v826_v19  ;;  %6170 = vmatmul.mubr.msk.f32.gmra.mxu1 %vm286_vm3, %v13180_v44  ;;  %v840_v47 = vsub.f32 %v7322_v38, %v12582_v18  ;;  %13181 = vst [vmem:[#allocation73_spill] sm:$0xff] %v7373_v1  ;;  %v13182_v19 = vand.u32 4294901760, %v7324_v50  ;;  %v7393_v5 = vsub.f32 %v6054_v4, %v6054_v4 }
  0xa2   : > { %833 = vmatmul.mubr.f32.vlgmr.msra.gmra.mxu0 %v832_v27  ;;  %6171 = vmatprep.mubr.msk.f32.mxu1 %vm291_vm6, %v13180_v44  ;;  %v855_v38 = vsub.f32 %v7330_v43, %v13184_v6  ;;  %vm12603_vm10 = vcmp.eq.s32.totalorder %v7364_v61, %v7255_v9  ;;  %vm12604_vm11 = vcmp.eq.s32.totalorder %v7364_v61, %v7252_v58  ;;  %v12594_v0 = vand.u32 4294901760, %v7373_v1 }
  0xa3   : > { %v846_v26 = vsub.f32 %v7324_v50, %v13182_v19  ;;  %1755 = vmatpush1.msra.mxu0 %v6764_v13  ;;  %v841_v27 = vand.u32 4294901760, %v840_v47  ;;  %13183 = vst [vmem:[#allocation74_spill] sm:$0xff] %v7393_v5  ;;  %v6053_v19 = vsel %vm12615_vm9, 1.0, %v13157_v49  ;;  %v7403_v50 = vpop.permute.xlu0 %201  ;;  %v13187_v47 = vand.u32 4294901760, %v7341_v39  ;;  %2180 = vmatpush1.msra.mxu1 %v6755_v10 }
  0xa4   : > { %13185 = vst [vmem:[#allocation75_spill] sm:$0xff] %v7403_v50  ;;  %1756 = vmatprep.subr.mxu0 %v13157_v49  ;;  %v7406_v13 = vsub.f32 %v6053_v19, %v6053_v19  ;;  %v856_v6 = vand.u32 4294901760, %v855_v38  ;;  %v6057_v38 = vsel %vm12604_vm11, 1.0, %v13157_v49  ;;  %v7436_v19 = vpop.permute.xlu1 %204  ;;  %vm12614_vm12 = vcmp.eq.s32.totalorder %v7403_v50, %v7255_v9  ;;  %2181 = vmatprep.subr.mxu1 %v13157_v49 }
  0xa5   : > { %v847_v18 = vand.u32 4294901760, %v846_v26  ;;  %v861_v4 = vsub.f32 %v7341_v39, %v13187_v47  ;;  %842 = vmatprep.mubr.f32.mxu0 %v841_v27  ;;  %6172 = vmatmul.mubr.msk.f32.gmra.mxu1 %vm290_vm7, %v13180_v44  ;;  %v6058_v26 = vsel %vm12603_vm10, 1.0, %v13157_v49  ;;  %13189 = vst [vmem:[#allocation78_spill] sm:$0xff] %v7436_v19  ;;  %v7442_v39 = vsub.f32 %v6057_v38, %v6057_v38 }
  0xa6   : > { %13186 = vst [vmem:[#allocation76_spill] sm:$0xff] %v7406_v13  ;;  %6173 = vmatprep.mubr.msk.f32.mxu1 %vm295_vm8, %v13180_v44  ;;  %v7429_v47 = vsub.f32 %v6058_v26, %v6058_v26  ;;  %1759 = vmatpush1.msra.mxu0 %v6767_v14  ;;  %v876_v26 = vsub.f32 %v7373_v1, %v12594_v0  ;;  %v13192_v32 = vand.u32 4294901760, %v7406_v13 }
  0xa7   : > { %848 = vmatmul.mubr.f32.gmra.mxu0 %v847_v18  ;;  %v862_v27 = vand.u32 4294901760, %v861_v4  ;;  %v13190_v18 = vand.u32 4294901760, %v7356_v55  ;;  %v12598_v4 = vand.u32 4294901760, %v7393_v5  ;;  %1760 = vmatprep.subr.mxu0 %v13157_v49  ;;  %vm12621_vm13 = vcmp.eq.s32.totalorder %v7403_v50, %v7252_v58  ;;  %v7473_v14 = vpop.permute.xlu0 %207 }
  0xa8   : > { %13188 = vst [vmem:[#allocation77_spill] sm:$0xff] %v7429_v47  ;;  %857 = vmatprep.mubr.f32.mxu0 %v856_v6  ;;  %v6062_v6 = vsel %vm12614_vm12, 1.0, %v13157_v49  ;;  %1763 = vmatpush1.msra.mxu0 %v6770_v15  ;;  %v6061_v38 = vsel %vm12621_vm13, 1.0, %v13157_v49  ;;  %13191 = vst [vmem:[#allocation79_spill] sm:$0xff] %v7473_v14  ;;  %vm12616_vm14 = vcmp.eq.s32.totalorder %v7436_v19, %v7255_v9 }
  0xa9   : > { %v870_v10 = vsub.f32 %v7356_v55, %v13190_v18  ;;  %6174 = vmatmul.mubr.msk.f32.gmra.mxu1 %vm12615_vm9, %v13180_v44  ;;  %v7464_v0 = vsub.f32 %v6062_v6, %v6062_v6  ;;  %v885_v1 = vsub.f32 %v7393_v5, %v12598_v4  ;;  %1764 = vmatprep.subr.mxu0 %v13157_v49  ;;  %v6066_v4 = vsel %vm12616_vm14, 1.0, %v13157_v49 }
  0xaa   : > { %6175 = vmatprep.mubr.msk.f32.mxu1 %vm12603_vm10, %v13180_v44  ;;  %v7482_v6 = vsub.f32 %v6061_v38, %v6061_v38  ;;  %vm12622_vm15 = vcmp.eq.s32.totalorder %v7436_v19, %v7252_v58  ;;  %1767 = vmatpush1.msra.mxu0 %v6774_v16  ;;  %vm12628_vm10 = vcmp.eq.s32.totalorder %v7473_v14, %v7255_v9 }
  0xab   : > { %v871_v18 = vand.u32 4294901760, %v870_v10  ;;  %863 = vmatmul.mubr.f32.gmra.mxu0 %v862_v27  ;;  %v877_v10 = vand.u32 4294901760, %v876_v26  ;;  %v886_v26 = vand.u32 4294901760, %v885_v1  ;;  %2183 = vmatpush1.msra.mxu1 %v6758_v11  ;;  %v6065_v38 = vsel %vm12622_vm15, 1.0, %v13157_v49  ;;  %v7501_v27 = vpop.permute.xlu1 %210  ;;  %v7533_v16 = vpop.permute.xlu0 %213 }
  0xac   : > { %13193 = vst [vmem:[#allocation80_spill] sm:$0xff] %v7501_v27  ;;  %1768 = vmatprep.subr.mxu0 %v13157_v49  ;;  %v7508_v1 = vsub.f32 %v6066_v4, %v6066_v4  ;;  %v6070_v4 = vsel %vm12628_vm10, 1.0, %v13157_v49  ;;  %v12623_v61 = vand.u32 4294901760, %v7482_v6  ;;  %13196 = vst [vmem:[#allocation81_spill] sm:$0xff] %v7533_v16  ;;  %v13197_v5 = vand.u32 4294901760, %v7464_v0  ;;  %2184 = vmatprep.subr.mxu1 %v13157_v49 }
  0xad   : > { %872 = vmatprep.mubr.f32.mxu0 %v871_v18  ;;  %v891_v18 = vsub.f32 %v7406_v13, %v13192_v32  ;;  %6176 = vmatmul.mubr.msk.f32.gmra.mxu1 %vm12604_vm11, %v13180_v44  ;;  %v13194_v32 = vand.u32 4294901760, %v7429_v47  ;;  %vm12631_vm11 = vcmp.eq.s32.totalorder %v7473_v14, %v7252_v58  ;;  %vm12634_vm9 = vcmp.eq.s32.totalorder %v7501_v27, %v7252_v58 }
  0xae   : > { %6177 = vmatprep.mubr.msk.f32.mxu1 %vm12614_vm12, %v13180_v44  ;;  %1771 = vmatpush1.msra.mxu0 %v6792_v22  ;;  %vm12641_vm12 = vcmp.eq.s32.totalorder %v7501_v27, %v7255_v9  ;;  %v13199_v22 = vand.u32 4294901760, %v7508_v1 }
  0xaf   : > { %v900_v11 = vsub.f32 %v7429_v47, %v13194_v32  ;;  %878 = vmatmul.mubr.f32.gmra.mxu0 %v877_v10  ;;  %v7527_v32 = vsub.f32 %v6065_v38, %v6065_v38  ;;  %v13195_v10 = vand.u32 4294901760, %v7442_v39  ;;  %v892_v47 = vand.u32 4294901760, %v891_v18  ;;  %1772 = vmatprep.subr.mxu0 %v13157_v49  ;;  %v7610_v19 = vpop.permute.xlu0 %219 }
  0xb0   : > { %887 = vmatprep.mubr.f32.mxu0 %v886_v26  ;;  %v915_v26 = vsub.f32 %v7464_v0, %v13197_v5  ;;  %v7546_v38 = vsub.f32 %v6070_v4, %v6070_v4  ;;  %1775 = vmatpush1.msra.mxu0 %v6816_v34  ;;  %v6074_v18 = vsel %vm12641_vm12, 1.0, %v13157_v49  ;;  %v7564_v4 = vpop.permute.xlu1 %216  ;;  %13201 = vst [vmem:[#allocation84_spill] sm:$0xff] %v7610_v19 }
  0xb1   : > { %v906_v15 = vsub.f32 %v7442_v39, %v13195_v10  ;;  %v901_v13 = vand.u32 4294901760, %v900_v11  ;;  %6178 = vmatmul.mubr.msk.f32.gmra.mxu1 %vm12621_vm13, %v13180_v44  ;;  %v6069_v11 = vsel %vm12631_vm11, 1.0, %v13157_v49  ;;  %13198 = vst [vmem:[#allocation82_spill] sm:$0xff] %v7564_v4  ;;  %v12627_v5 = vand.u32 4294901760, %v7527_v32  ;;  %1776 = vmatprep.subr.mxu0 %v13157_v49 }
  0xb2   : > { %6179 = vmatprep.mubr.msk.f32.mxu1 %vm12616_vm14, %v13180_v44  ;;  %2186 = vmatpush1.msra.mxu1 %v6784_v21  ;;  %vm12637_vm14 = vcmp.eq.s32.totalorder %v7533_v16, %v7255_v9  ;;  %v916_v50 = vand.u32 4294901760, %v915_v26  ;;  %v7573_v34 = vsub.f32 %v6069_v11, %v6069_v11  ;;  %v7588_v26 = vsub.f32 %v6074_v18, %v6074_v18 }
  0xb3   : > { %893 = vmatmul.mubr.f32.gmra.mxu0 %v892_v47  ;;  %v907_v10 = vand.u32 4294901760, %v906_v15  ;;  %v921_v47 = vsub.f32 %v7482_v6, %v12623_v61  ;;  %2187 = vmatprep.subr.mxu1 %v13157_v49  ;;  %v6073_v15 = vsel %vm12634_vm9, 1.0, %v13157_v49  ;;  %vm12642_vm13 = vcmp.eq.s32.totalorder %v7533_v16, %v7252_v58 }
  0xb4   : > { %902 = vmatprep.mubr.f32.mxu0 %v901_v13  ;;  %v930_v13 = vsub.f32 %v7508_v1, %v13199_v22  ;;  %1779 = vmatpush1.msra.mxu0 %v6830_v40  ;;  %v6078_v22 = vsel %vm12637_vm14, 1.0, %v13157_v49  ;;  %v7605_v61 = vsub.f32 %v6073_v15, %v6073_v15  ;;  %v936_v11 = vsub.f32 %v7527_v32, %v12627_v5  ;;  %v7646_v5 = vpop.permute.xlu1 %222 }
  0xb5   : > { %6180 = vmatmul.mubr.msk.f32.gmra.mxu1 %vm12622_vm15, %v13180_v44  ;;  %vm12651_vm15 = vcmp.eq.s32.totalorder %v7564_v4, %v7255_v9  ;;  %v922_v18 = vand.u32 4294901760, %v921_v47  ;;  %1780 = vmatprep.subr.mxu0 %v13157_v49  ;;  %v7613_v40 = vsub.f32 %v6078_v22, %v6078_v22  ;;  %13204 = vst [vmem:[#allocation86_spill] sm:$0xff] %v7646_v5 }
  0xb6   : > { %6181 = vmatprep.mubr.msk.f32.mxu1 %vm12628_vm10, %v13180_v44  ;;  %2189 = vmatpush1.msra.mxu1 %v6805_v28  ;;  %13200 = vst [vmem:[#allocation83_spill] sm:$0xff] %v7605_v61  ;;  %v6082_v22 = vsel %vm12651_vm15, 1.0, %v13157_v49  ;;  %vm12652_vm10 = vcmp.eq.s32.totalorder %v7564_v4, %v7252_v58  ;;  %v937_v47 = vand.u32 4294901760, %v936_v11  ;;  %v12640_v14 = vand.u32 4294901760, %v7605_v61 }
  0xb7   : > { %908 = vmatmul.mubr.f32.gmra.mxu0 %v907_v10  ;;  %v931_v10 = vand.u32 4294901760, %v930_v13  ;;  %13202 = vst [vmem:[#allocation85_spill] sm:$0xff] %v7613_v40  ;;  %2190 = vmatprep.subr.mxu1 %v13157_v49  ;;  %v13203_v13 = vand.u32 4294901760, %v7546_v38  ;;  %v7652_v28 = vsub.f32 %v6082_v22, %v6082_v22  ;;  %v6081_v11 = vsel %vm12652_vm10, 1.0, %v13157_v49 }
  0xb8   : > { %917 = vmatprep.mubr.f32.mxu0 %v916_v50  ;;  %v6077_v50 = vsel %vm12642_vm13, 1.0, %v13157_v49  ;;  %1783 = vmatpush1.msra.mxu0 %v6847_v48  ;;  %v13206_v22 = vand.u32 4294901760, %v7588_v26 }
  0xb9   : > { %6182 = vmatmul.mubr.msk.f32.gmra.mxu1 %vm12631_vm11, %v13180_v44  ;;  %v945_v15 = vsub.f32 %v7546_v38, %v13203_v13  ;;  %v7641_v13 = vsub.f32 %v6077_v50, %v6077_v50  ;;  %vm12656_vm11 = vcmp.eq.s32.totalorder %v7610_v19, %v7255_v9  ;;  %1784 = vmatprep.subr.mxu0 %v13157_v49 }
  0xba   : > { %6183 = vmatprep.mubr.msk.f32.mxu1 %vm12641_vm12, %v13180_v44  ;;  %2192 = vmatpush1.msra.mxu1 %v6821_v37  ;;  %v13208_v37 = vand.u32 4294901760, %v7613_v40  ;;  %vm12662_vm12 = vcmp.eq.s32.totalorder %v7646_v5, %v7252_v58 }
  0xbb   : > { %923 = vmatmul.mubr.f32.gmra.mxu0 %v922_v18  ;;  %v13205_v18 = vand.u32 4294901760, %v7573_v34  ;;  %2193 = vmatprep.subr.mxu1 %v13157_v49  ;;  %v946_v50 = vand.u32 4294901760, %v945_v15  ;;  %v7678_v15 = vpop.permute.xlu0 %225 }
  0xbc   : > { %932 = vmatprep.mubr.f32.mxu0 %v931_v10  ;;  %1787 = vmatpush1.msra.mxu0 %v6864_v56  ;;  %v6086_v10 = vsel %vm12656_vm11, 1.0, %v13157_v49  ;;  %13207 = vst [vmem:[#allocation87_spill] sm:$0xff] %v7678_v15 }
  0xbd   : > { %v951_v48 = vsub.f32 %v7573_v34, %v13205_v18  ;;  %6184 = vmatmul.mubr.msk.f32.gmra.mxu1 %vm12634_vm9, %v13180_v44  ;;  %v960_v18 = vsub.f32 %v7588_v26, %v13206_v22  ;;  %vm12659_vm9 = vcmp.eq.s32.totalorder %v7610_v19, %v7252_v58  ;;  %v7681_v22 = vsub.f32 %v6081_v11, %v6081_v11 }
  0xbe   : > { %6185 = vmatprep.mubr.msk.f32.mxu1 %vm12637_vm14, %v13180_v44  ;;  %2195 = vmatpush1.msra.mxu1 %v6841_v46  ;;  %vm12669_vm14 = vcmp.eq.s32.totalorder %v7646_v5, %v7255_v9  ;;  %v7699_v27 = vsub.f32 %v6086_v10, %v6086_v10  ;;  %v7718_v10 = vpop.permute.xlu1 %228 }
  0xbf   : > { %938 = vmatmul.mubr.f32.gmra.mxu0 %v937_v47  ;;  %v966_v47 = vsub.f32 %v7605_v61, %v12640_v14  ;;  %v952_v56 = vand.u32 4294901760, %v951_v48  ;;  %1788 = vmatprep.subr.mxu0 %v13157_v49  ;;  %v961_v14 = vand.u32 4294901760, %v960_v18  ;;  %v6085_v48 = vsel %vm12659_vm9, 1.0, %v13157_v49  ;;  %13209 = vst [vmem:[#allocation88_spill] sm:$0xff] %v7718_v10 }
  0xc0   : > { %947 = vmatprep.mubr.f32.mxu0 %v946_v50  ;;  %v975_v50 = vsub.f32 %v7613_v40, %v13208_v37  ;;  %2196 = vmatprep.subr.mxu1 %v13157_v49  ;;  %v6090_v37 = vsel %vm12669_vm14, 1.0, %v13157_v49  ;;  %v12655_v16 = vand.u32 4294901760, %v7681_v22  ;;  %v7725_v46 = vsub.f32 %v6085_v48, %v6085_v48 }
  0xc1   : > { %6186 = vmatmul.mubr.msk.f32.gmra.mxu1 %vm12642_vm13, %v13180_v44  ;;  %1791 = vmatpush1.msra.mxu0 %v6879_v62  ;;  %vm12665_vm13 = vcmp.eq.s32.totalorder %v7678_v15, %v7255_v9  ;;  %v967_v18 = vand.u32 4294901760, %v966_v47  ;;  %v13211_v40 = vand.u32 4294901760, %v7652_v28  ;;  %v7740_v47 = vsub.f32 %v6090_v37, %v6090_v37 }
  0xc2   : > { %6187 = vmatprep.mubr.msk.f32.mxu1 %vm12651_vm15, %v13180_v44  ;;  %2198 = vmatpush1.msra.mxu1 %v6853_v51  ;;  %v976_v62 = vand.u32 4294901760, %v975_v50  ;;  %vm12670_vm15 = vcmp.eq.s32.totalorder %v7678_v15, %v7252_v58  ;;  %v7762_v50 = vpop.permute.xlu0 %231 }
  0xc3   : > { %953 = vmatmul.mubr.f32.gmra.mxu0 %v952_v56  ;;  %v13210_v56 = vand.u32 4294901760, %v7641_v13  ;;  %1792 = vmatprep.subr.mxu0 %v13157_v49  ;;  %v990_v61 = vsub.f32 %v7652_v28, %v13211_v40  ;;  %v6094_v40 = vsel %vm12665_vm13, 1.0, %v13157_v49  ;;  %13213 = vst [vmem:[#allocation90_spill] sm:$0xff] %v7762_v50 }
  0xc4   : > { %962 = vmatprep.mubr.f32.mxu0 %v961_v14  ;;  %2199 = vmatprep.subr.mxu1 %v13157_v49  ;;  %v6089_v14 = vsel %vm12662_vm12, 1.0, %v13157_v49  ;;  %v7765_v4 = vsub.f32 %v6094_v40, %v6094_v40 }
  0xc5   : > { %v981_v11 = vsub.f32 %v7641_v13, %v13210_v56  ;;  %6188 = vmatmul.mubr.msk.f32.gmra.mxu1 %vm12652_vm10, %v13180_v44  ;;  %1795 = vmatpush1.msra.mxu0 %v6896_v12  ;;  %vm12679_vm10 = vcmp.eq.s32.totalorder %v7718_v10, %v7255_v9  ;;  %v7757_v37 = vsub.f32 %v6089_v14, %v6089_v14 }
  0xc6   : > { %6189 = vmatprep.mubr.msk.f32.mxu1 %vm12656_vm11, %v13180_v44  ;;  %2201 = vmatpush1.msra.mxu1 %v6870_v59  ;;  %v996_v56 = vsub.f32 %v7681_v22, %v12655_v16  ;;  %13214 = vst [vmem:[#allocation91_spill] sm:$0xff] %v7765_v4  ;;  %v6098_v40 = vsel %vm12679_vm10, 1.0, %v13157_v49  ;;  %vm12680_vm11 = vcmp.eq.s32.totalorder %v7718_v10, %v7252_v58  ;;  %v7798_v16 = vpop.permute.xlu1 %234 }
  0xc7   : > { %968 = vmatmul.mubr.f32.gmra.mxu0 %v967_v18  ;;  %v982_v48 = vand.u32 4294901760, %v981_v11  ;;  %13212 = vst [vmem:[#allocation89_spill] sm:$0xff] %v7757_v37  ;;  %v991_v18 = vand.u32 4294901760, %v990_v61  ;;  %1796 = vmatprep.subr.mxu0 %v13157_v49  ;;  %v13215_v61 = vand.u32 4294901760, %v7699_v27  ;;  %v12668_v19 = vand.u32 4294901760, %v7757_v37  ;;  %13216 = vst [vmem:[#allocation92_spill] sm:$0xff] %v7798_v16 }
  0xc8   : > { %977 = vmatprep.mubr.f32.mxu0 %v976_v62  ;;  %2202 = vmatprep.subr.mxu1 %v13157_v49  ;;  %v6093_v62 = vsel %vm12670_vm15, 1.0, %v13157_v49  ;;  %v997_v11 = vand.u32 4294901760, %v996_v56  ;;  %v7804_v12 = vsub.f32 %v6098_v40, %v6098_v40  ;;  %v6097_v56 = vsel %vm12680_vm11, 1.0, %v13157_v49 }
  0xc9   : > { %6190 = vmatmul.mubr.msk.f32.gmra.mxu1 %vm12659_vm9, %v13180_v44  ;;  %1799 = vmatpush1.msra.mxu0 %v6913_v31  ;;  %v1005_v14 = vsub.f32 %v7699_v27, %v13215_v61  ;;  %v7793_v61 = vsub.f32 %v6093_v62, %v6093_v62  ;;  %vm12684_vm9 = vcmp.eq.s32.totalorder %v7762_v50, %v7255_v9  ;;  %v13218_v40 = vand.u32 4294901760, %v7740_v47 }
  0xca   : > { %6191 = vmatprep.mubr.msk.f32.mxu1 %vm12669_vm14, %v13180_v44  ;;  %2204 = vmatpush1.msra.mxu1 %v6890_v7  ;;  %v13220_v7 = vand.u32 4294901760, %v7765_v4  ;;  %vm12690_vm14 = vcmp.eq.s32.totalorder %v7798_v16, %v7252_v58 }
  0xcb   : > { %983 = vmatmul.mubr.f32.gmra.mxu0 %v982_v48  ;;  %1800 = vmatprep.subr.mxu0 %v13157_v49  ;;  %v13217_v48 = vand.u32 4294901760, %v7725_v46  ;;  %v1006_v62 = vand.u32 4294901760, %v1005_v14  ;;  %v7830_v14 = vpop.permute.xlu0 %237 }
  0xcc   : > { %992 = vmatprep.mubr.f32.mxu0 %v991_v18  ;;  %2205 = vmatprep.subr.mxu1 %v13157_v49  ;;  %v6102_v18 = vsel %vm12684_vm9, 1.0, %v13157_v49  ;;  %13219 = vst [vmem:[#allocation93_spill] sm:$0xff] %v7830_v14 }
  0xcd   : > { %v1011_v31 = vsub.f32 %v7725_v46, %v13217_v48  ;;  %6192 = vmatmul.mubr.msk.f32.gmra.mxu1 %vm12662_vm12, %v13180_v44  ;;  %1803 = vmatpush1.msra.mxu0 %v6928_v41  ;;  %v1020_v48 = vsub.f32 %v7740_v47, %v13218_v40  ;;  %vm12688_vm12 = vcmp.eq.s32.totalorder %v7762_v50, %v7252_v58 }
  0xce   : > { %6193 = vmatprep.mubr.msk.f32.mxu1 %vm12665_vm13, %v13180_v44  ;;  %2207 = vmatpush1.msra.mxu1 %v6902_v24  ;;  %v7833_v40 = vsub.f32 %v6097_v56, %v6097_v56  ;;  %vm12691_vm13 = vcmp.eq.s32.totalorder %v7798_v16, %v7255_v9  ;;  %v7851_v5 = vsub.f32 %v6102_v18, %v6102_v18  ;;  %v7870_v18 = vpop.permute.xlu1 %240 }
  0xcf   : > { %998 = vmatmul.mubr.f32.gmra.mxu0 %v997_v11  ;;  %v1026_v11 = vsub.f32 %v7757_v37, %v12668_v19  ;;  %v1012_v41 = vand.u32 4294901760, %v1011_v31  ;;  %1804 = vmatprep.subr.mxu0 %v13157_v49  ;;  %v1021_v19 = vand.u32 4294901760, %v1020_v48  ;;  %v6101_v31 = vsel %vm12688_vm12, 1.0, %v13157_v49  ;;  %13221 = vst [vmem:[#allocation94_spill] sm:$0xff] %v7870_v18 }
  0xd0   : > { %1007 = vmatprep.mubr.f32.mxu0 %v1006_v62  ;;  %v1035_v62 = vsub.f32 %v7765_v4, %v13220_v7  ;;  %2208 = vmatprep.subr.mxu1 %v13157_v49  ;;  %v6106_v7 = vsel %vm12691_vm13, 1.0, %v13157_v49  ;;  %v12683_v15 = vand.u32 4294901760, %v7833_v40  ;;  %v7877_v24 = vsub.f32 %v6101_v31, %v6101_v31 }
  0xd1   : > { %6194 = vmatmul.mubr.msk.f32.gmra.mxu1 %vm12670_vm15, %v13180_v44  ;;  %1807 = vmatpush1.msra.mxu0 %v6945_v54  ;;  %vm12700_vm15 = vcmp.eq.s32.totalorder %v7830_v14, %v7255_v9  ;;  %v1027_v48 = vand.u32 4294901760, %v1026_v11  ;;  %v13223_v4 = vand.u32 4294901760, %v7804_v12  ;;  %v7892_v11 = vsub.f32 %v6106_v7, %v6106_v7 }
  0xd2   : > { %6195 = vmatprep.mubr.msk.f32.mxu1 %vm12679_vm10, %v13180_v44  ;;  %2210 = vmatpush1.msra.mxu1 %v6919_v35  ;;  %v1036_v54 = vand.u32 4294901760, %v1035_v62  ;;  %vm12699_vm10 = vcmp.eq.s32.totalorder %v7830_v14, %v7252_v58  ;;  %v7914_v62 = vpop.permute.xlu0 %243 }
  0xd3   : > { %1013 = vmatmul.mubr.f32.gmra.mxu0 %v1012_v41  ;;  %v13222_v41 = vand.u32 4294901760, %v7793_v61  ;;  %1808 = vmatprep.subr.mxu0 %v13157_v49  ;;  %v1050_v37 = vsub.f32 %v7804_v12, %v13223_v4  ;;  %13224 = vst [vmem:[#allocation95_spill] sm:$0xff] %v7892_v11  ;;  %v6110_v4 = vsel %vm12700_vm15, 1.0, %v13157_v49  ;;  %13225 = vst [vmem:[#allocation96_spill] sm:$0xff] %v7914_v62 }
  0xd4   : > { %1022 = vmatprep.mubr.f32.mxu0 %v1021_v19  ;;  %2211 = vmatprep.subr.mxu1 %v13157_v49  ;;  %v6105_v19 = vsel %vm12690_vm14, 1.0, %v13157_v49  ;;  %v7917_v10 = vsub.f32 %v6110_v4, %v6110_v4 }
  0xd5   : > { %v1041_v56 = vsub.f32 %v7793_v61, %v13222_v41  ;;  %6196 = vmatmul.mubr.msk.f32.gmra.mxu1 %vm12680_vm11, %v13180_v44  ;;  %1811 = vmatpush1.msra.mxu0 %v6962_v2  ;;  %vm12706_vm11 = vcmp.eq.s32.totalorder %v7870_v18, %v7255_v9  ;;  %v7909_v7 = vsub.f32 %v6105_v19, %v6105_v19 }
  0xd6   : > { %6197 = vmatprep.mubr.msk.f32.mxu1 %vm12684_vm9, %v13180_v44  ;;  %2213 = vmatpush1.msra.mxu1 %v6939_v52  ;;  %v1056_v41 = vsub.f32 %v7833_v40, %v12683_v15  ;;  %v6114_v4 = vsel %vm12706_vm11, 1.0, %v13157_v49  ;;  %vm12710_vm9 = vcmp.eq.s32.totalorder %v7870_v18, %v7252_v58  ;;  %v13241_v18 = vld [vmem:[#allocation35_spill] sm:$0xff] }
  0xd7   : > { %1028 = vmatmul.mubr.f32.gmra.mxu0 %v1027_v48  ;;  %v1042_v31 = vand.u32 4294901760, %v1041_v56  ;;  %v1051_v48 = vand.u32 4294901760, %v1050_v37  ;;  %1812 = vmatprep.subr.mxu0 %v13157_v49  ;;  %v13226_v37 = vand.u32 4294901760, %v7851_v5  ;;  %v7944_v56 = vpop.permute.xlu1 %246  ;;  %v7956_v2 = vsub.f32 %v6114_v4, %v6114_v4 }
  0xd8   : > { %1037 = vmatprep.mubr.f32.mxu0 %v1036_v54  ;;  %2214 = vmatprep.subr.mxu1 %v13157_v49  ;;  %v6109_v54 = vsel %vm12699_vm10, 1.0, %v13157_v49  ;;  %13227 = vst [vmem:[#allocation97_spill] sm:$0xff] %v7944_v56  ;;  %v13230_v4 = vand.u32 4294901760, %v7892_v11 }
  0xd9   : > { %6198 = vmatmul.mubr.msk.f32.gmra.mxu1 %vm12688_vm12, %v13180_v44  ;;  %1815 = vmatpush1.msra.mxu0 %v6977_v30  ;;  %v1065_v19 = vsub.f32 %v7851_v5, %v13226_v37  ;;  %v1057_v37 = vand.u32 4294901760, %v1056_v41  ;;  %v7947_v50 = vsub.f32 %v6109_v54, %v6109_v54  ;;  %v12698_v30 = vand.u32 4294901760, %v7909_v7  ;;  %13229 = vst [vmem:[#allocation98_spill] sm:$0xff] %v7956_v2 }
  0xda   : > { %6199 = vmatprep.mubr.msk.f32.mxu1 %vm12691_vm13, %v13180_v44  ;;  %2216 = vmatpush1.msra.mxu1 %v6951_v60  ;;  %vm12713_vm12 = vcmp.eq.s32.totalorder %v7914_v62, %v7255_v9  ;;  %v6113_v41 = vsel %vm12710_vm9, 1.0, %v13157_v49  ;;  %vm12724_vm13 = vcmp.eq.s32.totalorder %v7944_v56, %v7255_v9  ;;  %v13233_v60 = vand.u32 4294901760, %v7917_v10 }
  0xdb   : > { %1043 = vmatmul.mubr.f32.gmra.mxu0 %v1042_v31  ;;  %1816 = vmatprep.subr.mxu0 %v13157_v49  ;;  %v13228_v31 = vand.u32 4294901760, %v7877_v24  ;;  %v1066_v54 = vand.u32 4294901760, %v1065_v19  ;;  %v7984_v19 = vpop.permute.xlu0 %249  ;;  %v12705_v16 = vand.u32 4294901760, %v7947_v50 }
  0xdc   : > { %1052 = vmatprep.mubr.f32.mxu0 %v1051_v48  ;;  %2217 = vmatprep.subr.mxu1 %v13157_v49  ;;  %v6118_v48 = vsel %vm12713_vm12, 1.0, %v13157_v49  ;;  %13231 = vst [vmem:[#allocation99_spill] sm:$0xff] %v7984_v19 }
  0xdd   : > { %v1071_v15 = vsub.f32 %v7877_v24, %v13228_v31  ;;  %6200 = vmatmul.mubr.msk.f32.gmra.mxu1 %vm12690_vm14, %v13180_v44  ;;  %1819 = vmatpush2.msra.mxu0 %v6994_v53  ;;  %v1080_v31 = vsub.f32 %v7892_v11, %v13230_v4  ;;  %vm12714_vm14 = vcmp.eq.s32.totalorder %v7914_v62, %v7252_v58 }
  0xde   : > { %6201 = vmatprep.mubr.msk.f32.mxu1 %vm12700_vm15, %v13180_v44  ;;  %2219 = vmatpush2.msra.mxu1 %v6968_v25  ;;  %v1086_v4 = vsub.f32 %v7909_v7, %v12698_v30  ;;  %v1095_v11 = vsub.f32 %v7917_v10, %v13233_v60  ;;  %v8003_v30 = vsub.f32 %v6118_v48, %v6118_v48  ;;  %v6122_v60 = vsel %vm12724_vm13, 1.0, %v13157_v49 }
  0xdf   : > { %1058 = vmatmul.mubr.f32.gmra.mxu0 %v1057_v37  ;;  %v7987_v37 = vsub.f32 %v6113_v41, %v6113_v41  ;;  %v1072_v53 = vand.u32 4294901760, %v1071_v15  ;;  %1820 = vmatprep.subr.mxu0 %v13157_v49  ;;  %v1081_v41 = vand.u32 4294901760, %v1080_v31  ;;  %v6117_v15 = vsel %vm12714_vm14, 1.0, %v13157_v49 }
  0xe0   : > { %1067 = vmatprep.mubr.f32.mxu0 %v1066_v54  ;;  %2220 = vmatprep.subr.mxu1 %v13157_v49  ;;  %13234 = vst [vmem:[#allocation101_spill] sm:$0xff] %v8003_v30  ;;  %vm12737_vm15 = vcmp.eq.s32.totalorder %v7984_v19, %v7255_v9  ;;  %v1087_v48 = vand.u32 4294901760, %v1086_v4  ;;  %v1101_v31 = vsub.f32 %v7947_v50, %v12705_v16  ;;  %v8027_v54 = vpop.permute.xlu1 %252  ;;  %v1096_v14 = vand.u32 4294901760, %v1095_v11  ;;  %v13239_v16 = vld [vmem:[#allocation38_spill] sm:$0xff] }
  0xe1   : > { %13232 = vst [vmem:[#allocation100_spill] sm:$0xff] %v7987_v37  ;;  %6202 = vmatmul.mubr.msk.f32.gmra.mxu1 %vm12699_vm10, %v13180_v44  ;;  %1823 = vmatpush2.msra.mxu0 %v7011_v29  ;;  %vm12723_vm10 = vcmp.eq.s32.totalorder %v7944_v56, %v7252_v58  ;;  %13235 = vst [vmem:[#allocation102_spill] sm:$0xff] %v8027_v54  ;;  %v8029_v29 = vsub.f32 %v6117_v15, %v6117_v15  ;;  %v6126_v15 = vsel %vm12737_vm15, 1.0, %v13157_v49 }
  0xe2   : > { %6203 = vmatprep.mubr.msk.f32.mxu1 %vm12706_vm11, %v13180_v44  ;;  %2222 = vmatpush2.msra.mxu1 %v6988_v42  ;;  %v8032_v25 = vsub.f32 %v6122_v60, %v6122_v60  ;;  %v6121_v11 = vsel %vm12723_vm10, 1.0, %v13157_v49  ;;  %vm12729_vm11 = vcmp.eq.s32.totalorder %v7984_v19, %v7252_v58 }
  0xe3   : > { %1073 = vmatmul.mubr.f32.gmra.mxu0 %v1072_v53  ;;  %13236 = vst [vmem:[#allocation103_spill] sm:$0xff] %v8029_v29  ;;  %1824 = vmatprep.subr.mxu0 %v13157_v49  ;;  %v1102_v53 = vand.u32 4294901760, %v1101_v31  ;;  %v8066_v60 = vsub.f32 %v6121_v11, %v6121_v11  ;;  %v13245_v11 = vld [vmem:[#allocation40_spill] sm:$0xff]  ;;  %v13250_v62 = vand.u32 4294901760, %v8029_v29 }
  0xe4   : > { %1082 = vmatprep.mubr.f32.mxu0 %v1081_v41  ;;  %13237 = vst [vmem:[#allocation104_spill] sm:$0xff] %v8032_v25  ;;  %v13238_v41 = vand.u32 4294901760, %v7956_v2  ;;  %2223 = vmatprep.subr.mxu1 %v13157_v49 }
  0xe5   : > { %6204 = vmatmul.mubr.msk.f32.gmra.mxu1 %vm12710_vm9, %v13180_v44  ;;  %1827 = vmatpush2.msra.mxu0 %v13239_v16  ;;  %v13242_v16 = vand.u32 4294901760, %v7987_v37  ;;  %vm12732_vm9 = vcmp.eq.s32.totalorder %v8027_v54, %v7255_v9  ;;  %13243 = vst [vmem:[#allocation106_spill] sm:$0xff] %v8066_v60  ;;  %v13256_v56 = vand.u32 4294901760, %v8066_v60 }
  0xe6   : > { %v1110_v4 = vsub.f32 %v7956_v2, %v13238_v41  ;;  %6205 = vmatprep.mubr.msk.f32.mxu1 %vm12713_vm12, %v13180_v44  ;;  %v8058_v41 = vpop.permute.xlu0 %255  ;;  %2225 = vmatpush2.msra.mxu1 %v13241_v18  ;;  %vm12740_vm12 = vcmp.eq.s32.totalorder %v8027_v54, %v7252_v58  ;;  %v13267_v54 = vld [vmem:[#allocation43_spill] sm:$0xff] }
  0xe7   : > { %1088 = vmatmul.mubr.f32.gmra.mxu0 %v1087_v48  ;;  %13240 = vst [vmem:[#allocation105_spill] sm:$0xff] %v8058_v41  ;;  %v1116_v42 = vsub.f32 %v7987_v37, %v13242_v16  ;;  %1828 = vmatprep.subr.mxu0 %v13157_v49  ;;  %v8069_v48 = vsub.f32 %v6126_v15, %v6126_v15  ;;  %v13246_v15 = vand.u32 4294901760, %v8003_v30  ;;  %v13247_v37 = vld [vmem:[#allocation37_spill] sm:$0xff] }
  0xe8   : > { %1097 = vmatprep.mubr.f32.mxu0 %v1096_v14  ;;  %2226 = vmatprep.subr.mxu1 %v13157_v49  ;;  %v6125_v14 = vsel %vm12729_vm11, 1.0, %v13157_v49  ;;  %v1111_v16 = vand.u32 4294901760, %v1110_v4  ;;  %v6130_v4 = vsel %vm12732_vm9, 1.0, %v13157_v49 }
  0xe9   : > { %13244 = vst [vmem:[#allocation107_spill] sm:$0xff] %v8069_v48  ;;  %6206 = vmatmul.mubr.msk.f32.gmra.mxu1 %vm12714_vm14, %v13180_v44  ;;  %1831 = vmatpush2.msra.mxu0 %v13245_v11  ;;  %v1125_v18 = vsub.f32 %v8003_v30, %v13246_v15  ;;  %vm12745_vm14 = vcmp.eq.s32.totalorder %v8058_v41, %v7255_v9  ;;  %v1117_v15 = vand.u32 4294901760, %v1116_v42 }
  0xea   : > { %6207 = vmatprep.mubr.msk.f32.mxu1 %vm12724_vm13, %v13180_v44  ;;  %2228 = vmatpush2.msra.mxu1 %v13247_v37  ;;  %v8099_v31 = vsub.f32 %v6125_v14, %v6125_v14  ;;  %v1131_v11 = vsub.f32 %v8029_v29, %v13250_v62  ;;  %v8118_v30 = vsub.f32 %v6130_v4, %v6130_v4  ;;  %v13252_v62 = vld [vmem:[#allocation42_spill] sm:$0xff]  ;;  %v13253_v29 = vand.u32 4294901760, %v8032_v25  ;;  %v8140_v14 = vpop.permute.xlu0 %261 }
  0xeb   : > { %1103 = vmatmul.mubr.f32.gmra.mxu0 %v1102_v53  ;;  %v8101_v53 = vpop.permute.xlu1 %258  ;;  %1832 = vmatprep.subr.mxu0 %v13157_v49  ;;  %v1126_v37 = vand.u32 4294901760, %v1125_v18  ;;  %v6134_v42 = vsel %vm12745_vm14, 1.0, %v13157_v49  ;;  %v13254_v18 = vld [vmem:[#allocation39_spill] sm:$0xff]  ;;  %13255 = vst [vmem:[#allocation111_spill] sm:$0xff] %v8140_v14 }
  0xec   : > { %1112 = vmatprep.mubr.f32.mxu0 %v1111_v16  ;;  %13248 = vst [vmem:[#allocation108_spill] sm:$0xff] %v8099_v31  ;;  %13249 = vst [vmem:[#allocation109_spill] sm:$0xff] %v8101_v53  ;;  %2229 = vmatprep.subr.mxu1 %v13157_v49  ;;  %v6129_v16 = vsel %vm12740_vm12, 1.0, %v13157_v49  ;;  %v1140_v2 = vsub.f32 %v8032_v25, %v13253_v29  ;;  %vm12752_vm13 = vcmp.eq.s32.totalorder %v8101_v53, %v7255_v9  ;;  %v13259_v29 = vld [vmem:[#allocation44_spill] sm:$0xff] }
  0xed   : > { %6208 = vmatmul.mubr.msk.f32.gmra.mxu1 %vm12723_vm10, %v13180_v44  ;;  %13251 = vst [vmem:[#allocation110_spill] sm:$0xff] %v8118_v30  ;;  %1835 = vmatpush2.msra.mxu0 %v13252_v62  ;;  %vm12746_vm10 = vcmp.eq.s32.totalorder %v8058_v41, %v7252_v58  ;;  %v8135_v4 = vsub.f32 %v6129_v16, %v6129_v16  ;;  %v13261_v19 = vand.u32 4294901760, %v8099_v31 }
  0xee   : > { %6209 = vmatprep.mubr.msk.f32.mxu1 %vm12737_vm15, %v13180_v44  ;;  %2231 = vmatpush2.msra.mxu1 %v13254_v18  ;;  %v1146_v62 = vsub.f32 %v8066_v60, %v13256_v56  ;;  %v8146_v25 = vsub.f32 %v6134_v42, %v6134_v42  ;;  %v6133_v56 = vsel %vm12746_vm10, 1.0, %v13157_v49  ;;  %v13264_v42 = vld [vmem:[#allocation46_spill] sm:$0xff]  ;;  %vm12758_vm15 = vcmp.eq.s32.totalorder %v8140_v14, %v7252_v58 }
  0xef   : > { %1118 = vmatmul.mubr.f32.gmra.mxu0 %v1117_v15  ;;  %v1132_v15 = vand.u32 4294901760, %v1131_v11  ;;  %1836 = vmatprep.subr.mxu0 %v13157_v49  ;;  %v1141_v11 = vand.u32 4294901760, %v1140_v2  ;;  %v6138_v2 = vsel %vm12752_vm13, 1.0, %v13157_v49  ;;  %v8181_v60 = vsub.f32 %v6133_v56, %v6133_v56 }
  0xf0   : > { %1127 = vmatprep.mubr.f32.mxu0 %v1126_v37  ;;  %13257 = vst [vmem:[#allocation112_spill] sm:$0xff] %v8146_v25  ;;  %v13258_v37 = vand.u32 4294901760, %v8069_v48  ;;  %2232 = vmatprep.subr.mxu1 %v13157_v49  ;;  %v1147_v18 = vand.u32 4294901760, %v1146_v62  ;;  %v13265_v62 = vand.u32 4294901760, %v8118_v30 }
  0xf1   : > { %6210 = vmatmul.mubr.msk.f32.gmra.mxu1 %vm12729_vm11, %v13180_v44  ;;  %1839 = vmatpush2.msra.mxu0 %v13259_v29  ;;  %vm12751_vm11 = vcmp.eq.s32.totalorder %v8101_v53, %v7252_v58  ;;  %v8179_v29 = vpop.permute.xlu1 %264 }
  0xf2   : > { %v1155_v16 = vsub.f32 %v8069_v48, %v13258_v37  ;;  %6211 = vmatprep.mubr.msk.f32.mxu1 %vm12732_vm9, %v13180_v44  ;;  %v13260_v37 = vld [vmem:[#allocation41_spill] sm:$0xff]  ;;  %vm12759_vm9 = vcmp.eq.s32.totalorder %v8140_v14, %v7255_v9  ;;  %13262 = vst [vmem:[#allocation113_spill] sm:$0xff] %v8179_v29  ;;  %1840 = vmatprep.subr.mxu0 %v13157_v49  ;;  %v6137_v56 = vsel %vm12751_vm11, 1.0, %v13157_v49 }
  0xf3   : > { %1133 = vmatmul.mubr.f32.gmra.mxu0 %v1132_v15  ;;  %2234 = vmatpush2.msra.mxu1 %v13260_v37  ;;  %v1161_v15 = vsub.f32 %v8099_v31, %v13261_v19  ;;  %v8190_v19 = vsub.f32 %v6138_v2, %v6138_v2  ;;  %v6142_v2 = vsel %vm12759_vm9, 1.0, %v13157_v49  ;;  %v8218_v37 = vsub.f32 %v6137_v56, %v6137_v56 }
  0xf4   : > { %1142 = vmatprep.mubr.f32.mxu0 %v1141_v11  ;;  %v1156_v48 = vand.u32 4294901760, %v1155_v16  ;;  %2235 = vmatprep.subr.mxu1 %v13157_v49  ;;  %v1170_v16 = vsub.f32 %v8118_v30, %v13265_v62  ;;  %v8210_v62 = vpop.permute.xlu0 %267  ;;  %v13269_v30 = vand.u32 4294901760, %v8146_v25  ;;  %v8234_v56 = vsub.f32 %v6142_v2, %v6142_v2 }
  0xf5   : > { %6212 = vmatmul.mubr.msk.f32.gmra.mxu1 %vm12740_vm12, %v13180_v44  ;;  %13263 = vst [vmem:[#allocation114_spill] sm:$0xff] %v8190_v19  ;;  %1843 = vmatpush2.msra.mxu0 %v13264_v42  ;;  %13266 = vst [vmem:[#allocation115_spill] sm:$0xff] %v8210_v62  ;;  %v1162_v11 = vand.u32 4294901760, %v1161_v15  ;;  %v13268_v42 = vand.u32 4294901760, %v8135_v4  ;;  %vm12765_vm12 = vcmp.eq.s32.totalorder %v8179_v29, %v7255_v9 }
  0xf6   : > { %6213 = vmatprep.mubr.msk.f32.mxu1 %vm12745_vm14, %v13180_v44  ;;  %2237 = vmatpush2.msra.mxu1 %v13267_v54  ;;  %v1185_v31 = vsub.f32 %v8146_v25, %v13269_v30  ;;  %v1171_v15 = vand.u32 4294901760, %v1170_v16  ;;  %v13270_v54 = vld [vmem:[#allocation48_spill] sm:$0xff]  ;;  %vm12764_vm14 = vcmp.eq.s32.totalorder %v8179_v29, %v7252_v58  ;;  %v6146_v16 = vsel %vm12765_vm12, 1.0, %v13157_v49  ;;  %v13271_v30 = vld [vmem:[#allocation45_spill] sm:$0xff] }
  0xf7   : > { %1148 = vmatmul.mubr.f32.gmra.mxu0 %v1147_v18  ;;  %v1176_v18 = vsub.f32 %v8135_v4, %v13268_v42  ;;  %1844 = vmatprep.subr.mxu0 %v13157_v49 }
  0xf8   : > { %1157 = vmatprep.mubr.f32.mxu0 %v1156_v48  ;;  %2238 = vmatprep.subr.mxu1 %v13157_v49  ;;  %v6141_v48 = vsel %vm12758_vm15, 1.0, %v13157_v49  ;;  %v1186_v41 = vand.u32 4294901760, %v1185_v31  ;;  %v8269_v31 = vsub.f32 %v6146_v16, %v6146_v16  ;;  %v13275_v16 = vld [vmem:[#allocation47_spill] sm:$0xff]  ;;  %v8291_v53 = vpop.permute.xlu0 %273 }
  0xf9   : > { %6214 = vmatmul.mubr.msk.f32.gmra.mxu1 %vm12746_vm10, %v13180_v44  ;;  %1847 = vmatpush2.msra.mxu0 %v13270_v54  ;;  %vm391_vm10 = vcmp.eq.s32.totalorder %v8210_v62, %v7255_v9  ;;  %v1177_v2 = vand.u32 4294901760, %v1176_v18  ;;  %v8251_v42 = vsub.f32 %v6141_v48, %v6141_v48  ;;  %v13273_v54 = vand.u32 4294901760, %v8181_v60  ;;  %13276 = vst [vmem:[#allocation117_spill] sm:$0xff] %v8291_v53 }
  0xfa   : > { %6215 = vmatprep.mubr.msk.f32.mxu1 %vm12752_vm13, %v13180_v44  ;;  %2240 = vmatpush2.msra.mxu1 %v13271_v30  ;;  %v6145_v18 = vsel %vm12764_vm14, 1.0, %v13157_v49  ;;  %v6150_v30 = vsel %vm391_vm10, 1.0, %v13157_v49 }
  0xfb   : > { %1163 = vmatmul.mubr.f32.gmra.mxu0 %v1162_v11  ;;  %v8253_v11 = vpop.permute.xlu1 %270  ;;  %1848 = vmatprep.subr.mxu0 %v13157_v49  ;;  %v1191_v25 = vsub.f32 %v8181_v60, %v13273_v54  ;;  %v13274_v54 = vand.u32 4294901760, %v8190_v19  ;;  %v13280_v14 = vand.u32 4294901760, %v8251_v42 }
  0xfc   : > { %1172 = vmatprep.mubr.f32.mxu0 %v1171_v15  ;;  %13272 = vst [vmem:[#allocation116_spill] sm:$0xff] %v8253_v11  ;;  %2241 = vmatprep.subr.mxu1 %v13157_v49  ;;  %vm395_vm13 = vcmp.eq.s32.totalorder %v8253_v11, %v7255_v9 }
  0xfd   : > { %6216 = vmatmul.mubr.msk.f32.gmra.mxu1 %vm12751_vm11, %v13180_v44  ;;  %1851 = vmatpush2.msra.mxu0 %v7123_v36  ;;  %v1200_v48 = vsub.f32 %v8190_v19, %v13274_v54  ;;  %vm12770_vm11 = vcmp.eq.s32.totalorder %v8210_v62, %v7252_v58  ;;  %v8287_v54 = vsub.f32 %v6145_v18, %v6145_v18  ;;  %v1192_v15 = vand.u32 4294901760, %v1191_v25 }
  0xfe   : > { %6217 = vmatprep.mubr.msk.f32.mxu1 %vm12759_vm9, %v13180_v44  ;;  %2243 = vmatpush2.msra.mxu1 %v13275_v16  ;;  %v8297_v19 = vsub.f32 %v6150_v30, %v6150_v30  ;;  %v13278_v25 = vand.u32 4294901760, %v8234_v56  ;;  %v6149_v30 = vsel %vm12770_vm11, 1.0, %v13157_v49  ;;  %vm399_vm9 = vcmp.eq.s32.totalorder %v8291_v53, %v7255_v9 }
  0xff   : > { %1178 = vmatmul.mubr.f32.gmra.mxu0 %v1177_v2  ;;  %1852 = vmatprep.subr.mxu0 %v13157_v49  ;;  %v13277_v2 = vand.u32 4294901760, %v8218_v37  ;;  %v1201_v18 = vand.u32 4294901760, %v1200_v48  ;;  %v6154_v48 = vsel %vm395_vm13, 1.0, %v13157_v49 }
 0x100   : > { %1187 = vmatprep.mubr.f32.mxu0 %v1186_v41  ;;  %2244 = vmatprep.subr.mxu1 %v13157_v49  ;;  %v1215_v16 = vsub.f32 %v8234_v56, %v13278_v25  ;;  %v8330_v41 = vsub.f32 %v6149_v30, %v6149_v30  ;;  %v13283_v29 = vand.u32 4294901760, %v8297_v19 }
 0x101   : > { %v1206_v36 = vsub.f32 %v8218_v37, %v13277_v2  ;;  %6218 = vmatmul.mubr.msk.f32.gmra.mxu1 %vm12758_vm15, %v13180_v44  ;;  %1855 = vmatpush2.msra.mxu0 %v7137_v8  ;;  %vm394_vm15 = vcmp.eq.s32.totalorder %v8253_v11, %v7252_v58  ;;  %v1221_v8 = vsub.f32 %v8251_v42, %v13280_v14  ;;  %v13285_v11 = vld [vmem:[#allocation57_spill] sm:$0xff] }
 0x102   : > { %6219 = vmatprep.mubr.msk.f32.mxu1 %vm12765_vm12, %v13180_v44  ;;  %2246 = vmatpush2.msra.mxu1 %v7109_v45  ;;  %v1216_v25 = vand.u32 4294901760, %v1215_v16  ;;  %v8342_v45 = vsub.f32 %v6154_v48, %v6154_v48  ;;  %v6153_v14 = vsel %vm394_vm15, 1.0, %v13157_v49  ;;  %v6158_v16 = vsel %vm399_vm9, 1.0, %v13157_v49 }
 0x103   : > { %1193 = vmatmul.mubr.f32.gmra.mxu0 %v1192_v15  ;;  %v8328_v15 = vpop.permute.xlu1 %276  ;;  %v1207_v2 = vand.u32 4294901760, %v1206_v36  ;;  %1856 = vmatprep.subr.mxu0 %v13157_v49  ;;  %v13281_v36 = vand.u32 4294901760, %v8269_v31  ;;  %v13282_v48 = vand.u32 4294901760, %v8287_v54 }
 0x104   : > { %1202 = vmatprep.mubr.f32.mxu0 %v1201_v18  ;;  %13279 = vst [vmem:[#allocation118_spill] sm:$0xff] %v8328_v15  ;;  %2247 = vmatprep.subr.mxu1 %v13157_v49  ;;  %vm403_vm12 = vcmp.eq.s32.totalorder %v8328_v15, %v7255_v9  ;;  %v8368_v18 = vsub.f32 %v6153_v14, %v6153_v14  ;;  %v13290_v9 = vld [vmem:[#allocation56_spill] sm:$0xff] }
 0x105   : > { %6220 = vmatmul.mubr.msk.f32.gmra.mxu1 %vm12764_vm14, %v13180_v44  ;;  %1859 = vmatpush2.msra.mxu0 %v7153_v3  ;;  %v1230_v30 = vsub.f32 %v8269_v31, %v13281_v36  ;;  %vm398_vm14 = vcmp.eq.s32.totalorder %v8291_v53, %v7252_v58  ;;  %v1222_v36 = vand.u32 4294901760, %v1221_v8  ;;  %v1245_v3 = vsub.f32 %v8297_v19, %v13283_v29 }
 0x106   : > { %6221 = vmatprep.mubr.msk.f32.mxu1 %vm391_vm10, %v13180_v44  ;;  %2249 = vmatpush2.msra.mxu1 %v7126_v63  ;;  %v8380_v63 = vsub.f32 %v6158_v16, %v6158_v16  ;;  %v6157_v8 = vsel %vm398_vm14, 1.0, %v13157_v49  ;;  %v12777_v62 = vand.u32 4294901760, %v8368_v18 }
 0x107   : > { %1208 = vmatmul.mubr.f32.gmra.mxu0 %v1207_v2  ;;  %v1236_v2 = vsub.f32 %v8287_v54, %v13282_v48  ;;  %1860 = vmatprep.subr.mxu0 %v13157_v49  ;;  %v1231_v48 = vand.u32 4294901760, %v1230_v30  ;;  %v6162_v30 = vsel %vm403_vm12, 1.0, %v13157_v49  ;;  %v1246_v16 = vand.u32 4294901760, %v1245_v3 }
 0x108   : > { %1217 = vmatprep.mubr.f32.mxu0 %v1216_v25  ;;  %2250 = vmatprep.subr.mxu1 %v13157_v49  ;;  %v12773_v25 = vand.u32 4294901760, %v8330_v41  ;;  %v8399_v29 = vsub.f32 %v6157_v8, %v6157_v8  ;;  %v13284_v3 = vand.u32 4294901760, %v8342_v45 }
 0x109   : > { %6222 = vmatmul.mubr.msk.f32.gmra.mxu1 %vm12770_vm11, %v13180_v44  ;;  %1863 = vmatpush2.msra.mxu0 %v7168_v20  ;;  %vm402_vm11 = vcmp.eq.s32.totalorder %v8328_v15, %v7252_v58  ;;  %v1237_v14 = vand.u32 4294901760, %v1236_v2  ;;  %v8411_v2 = vsub.f32 %v6162_v30, %v6162_v30  ;;  %v13292_v15 = vld [vmem:[#allocation58_spill] sm:$0xff] }
 0x10a   : > { %6223 = vmatprep.mubr.msk.f32.mxu1 %vm395_vm13, %v13180_v44  ;;  %2252 = vmatpush2.msra.mxu1 %v7139_v57  ;;  %v6161_v8 = vsel %vm402_vm11, 1.0, %v13157_v49 }
 0x10b   : > { %1223 = vmatmul.mubr.f32.gmra.mxu0 %v1222_v36  ;;  %1864 = vmatprep.subr.mxu0 %v13157_v49  ;;  %v1251_v36 = vsub.f32 %v8330_v41, %v12773_v25  ;;  %v1266_v25 = vsub.f32 %v8368_v18, %v12777_v62  ;;  %v13287_v62 = vld [vmem:[#allocation54_spill] sm:$0xff]  ;;  %v13289_v53 = vand.u32 4294901760, %v8411_v2 }
 0x10c   : > { %1232 = vmatprep.mubr.f32.mxu0 %v1231_v48  ;;  %2253 = vmatprep.subr.mxu1 %v13157_v49  ;;  %v1260_v48 = vsub.f32 %v8342_v45, %v13284_v3  ;;  %v8428_v3 = vsub.f32 %v6161_v8, %v6161_v8 }
 0x10d   : > { %6224 = vmatmul.mubr.msk.f32.gmra.mxu1 %vm394_vm15, %v13180_v44  ;;  %1867 = vmatpush2.msra.mxu0 %v7185_v33  ;;  %v1252_v30 = vand.u32 4294901760, %v1251_v36  ;;  %v13286_v36 = vand.u32 4294901760, %v8380_v63 }
 0x10e   : > { %6225 = vmatprep.mubr.msk.f32.mxu1 %vm399_vm9, %v13180_v44  ;;  %2255 = vmatpush2.msra.mxu1 %v7156_v17  ;;  %v12788_v33 = vand.u32 4294901760, %v8428_v3 }
 0x10f   : > { %1238 = vmatmul.mubr.f32.gmra.mxu0 %v1237_v14  ;;  %2256 = vmatprep.subr.mxu1 %v13157_v49  ;;  %v12782_v14 = vand.u32 4294901760, %v8399_v29  ;;  %v1275_v8 = vsub.f32 %v8380_v63, %v13286_v36 }
 0x110   : > { %1247 = vmatprep.mubr.f32.mxu0 %v1246_v16  ;;  %1868 = vmatprep.subr.mxu0 %v13157_v49  ;;  %v1261_v16 = vand.u32 4294901760, %v1260_v48  ;;  %v1267_v48 = vand.u32 4294901760, %v1266_v25  ;;  %v1290_v25 = vsub.f32 %v8411_v2, %v13289_v53  ;;  %v13293_v53 = vld [vmem:[#allocation60_spill] sm:$0xff] }
 0x111   : > { %6226 = vmatmul.mubr.msk.f32.gmra.mxu1 %vm398_vm14, %v13180_v44  ;;  %1871 = vmatpush2.msra.mxu0 %v13285_v11  ;;  %v1281_v36 = vsub.f32 %v8399_v29, %v12782_v14  ;;  %v13291_v11 = vand.u32 4294901760, %v7285_v23 }
 0x112   : > { %6227 = vmatprep.mubr.msk.f32.mxu1 %vm403_vm12, %v13180_v44  ;;  %2258 = vmatpush2.msra.mxu1 %v13287_v62 }
 0x113   : > { %1253 = vmatmul.mubr.f32.gmra.mxu0 %v1252_v30  ;;  %2259 = vmatprep.subr.mxu1 %v13157_v49  ;;  %v1276_v30 = vand.u32 4294901760, %v1275_v8  ;;  %v1282_v14 = vand.u32 4294901760, %v1281_v36  ;;  %v1296_v8 = vsub.f32 %v8428_v3, %v12788_v33  ;;  %v13299_v33 = vld [vmem:[#allocation69_spill] sm:$0xff] }
 0x114   : > { %1262 = vmatprep.mubr.f32.mxu0 %v1261_v16  ;;  %1872 = vmatprep.subr.mxu0 %v13157_v49  ;;  %v13288_v16 = vld [vmem:[#allocation59_spill] sm:$0xff] }
 0x115   : > { %6228 = vmatmul.mubr.msk.f32.gmra.mxu1 %vm402_vm11, %v13180_v44  ;;  %1875 = vmatpush2.msra.mxu0 %v13288_v16  ;;  %v1291_v16 = vand.u32 4294901760, %v1290_v25  ;;  %v1297_v36 = vand.u32 4294901760, %v1296_v8  ;;  %v13298_v44 = vld [vmem:[#allocation5_spill] sm:$0xff]  ;;  %v13301_v25 = vand.u32 4294901760, %v7330_v43  ;;  %v13306_v8 = vld [vmem:[#allocation10_spill] sm:$0xff] }
 0x116   : > { %2261 = vmatpush2.msra.mxu1 %v13290_v9  ;;  %2268 = vmatprep.mubr.f32.mxu1 %v13291_v11  ;;  %v13296_v11 = vld [vmem:[#allocation68_spill] sm:$0xff] }
 0x117   : > { %1268 = vmatmul.mubr.f32.gmra.mxu0 %v1267_v48  ;;  %2262 = vmatprep.subr.mxu1 %v13157_v49  ;;  %v13294_v48 = vld [vmem:[#allocation65_spill] sm:$0xff] }
 0x118   : > { %1277 = vmatprep.mubr.f32.mxu0 %v1276_v30  ;;  %1876 = vmatprep.subr.mxu0 %v13157_v49  ;;  %v13295_v58 = vand.u32 4294901760, %v13294_v48  ;;  %v13297_v30 = vand.u32 4294901760, %v13296_v11 }
 0x119   : > { %2264 = vmatpush2.msra.mxu1 %v13292_v15  ;;  %1879 = vmatpush2.msra.mxu0 %v13293_v53  ;;  %v13300_v15 = vand.u32 4294901760, %v13299_v33 }
 0x11a   : > { %2272 = vmatmul.mubr.f32.vlgmr.msra.gmra.mxu1 %v13295_v58  ;;  %2618 = vmatprep.subr.mxu0 %v13157_v49  ;;  %v13302_v58 = vld [vmem:[#allocation6_spill] sm:$0xff] }
 0x11b   : > { %1283 = vmatmul.mubr.f32.gmra.mxu0 %v1282_v14  ;;  %2279 = vmatprep.mubr.f32.mxu1 %v13297_v30  ;;  %v13303_v14 = vld [vmem:[#allocation71_spill] sm:$0xff] }
 0x11c   : > { %1292 = vmatprep.mubr.f32.mxu0 %v1291_v16  ;;  %3003 = vmatprep.subr.mxu1 %v13157_v49  ;;  %v13304_v16 = vand.u32 4294901760, %v13303_v14 }
 0x11d   : > { %3005 = vmatpush1.msra.mxu1 %v13298_v44  ;;  %v13305_v44 = vand.u32 4294901760, %v7356_v55 }
 0x11e   : > { %2283 = vmatmul.mubr.f32.gmra.mxu1 %v13300_v15  ;;  %3006 = vmatprep.subr.mxu1 %v13157_v49  ;;  %v13307_v15 = vand.u32 4294901760, %v13306_v8  ;;  %v13317_v8 = vld [vmem:[#allocation76_spill] sm:$0xff] }
 0x11f   : > { %1298 = vmatmul.mubr.f32.gmra.mxu0 %v1297_v36  ;;  %2290 = vmatprep.mubr.f32.mxu1 %v13301_v25  ;;  %v13310_v36 = vld [vmem:[#allocation73_spill] sm:$0xff] }
 0x120   : > { %1882 = vmatprep.mubr.f32.mxu0 %v7285_v23  ;;  %3008 = vmatpush1.msra.mxu1 %v13302_v58  ;;  %v13308_v23 = vld [vmem:[#allocation11_spill] sm:$0xff]  ;;  %v13311_v25 = vand.u32 4294901760, %v13310_v36 }
 0x121   : > { %v13309_v30 = vand.u32 4294901760, %v13308_v23  ;;  %3009 = vmatprep.subr.mxu1 %v13157_v49 }
 0x122   : > { %2294 = vmatmul.mubr.f32.gmra.mxu1 %v13304_v16  ;;  %v13315_v16 = vld [vmem:[#allocation12_spill] sm:$0xff] }
 0x123   : > { %1885 = vmatmul.mubr.f32.vlgmr.msra.gmra.mxu0 %v13294_v48  ;;  %2301 = vmatprep.mubr.f32.mxu1 %v13305_v44  ;;  %v13312_v48 = vld [vmem:[#allocation74_spill] sm:$0xff]  ;;  %v13316_v44 = vand.u32 4294901760, %v13315_v16 }
 0x124   : > { %2622 = vmatpush1.msra.mxu0 %v13307_v15  ;;  %1891 = vmatprep.mubr.f32.mxu0 %v13296_v11  ;;  %v13313_v58 = vand.u32 4294901760, %v13312_v48  ;;  %v13314_v11 = vld [vmem:[#allocation7_spill] sm:$0xff]  ;;  %v13318_v15 = vand.u32 4294901760, %v13317_v8 }
 0x125   : > { %2623 = vmatprep.subr.mxu0 %v13157_v49  ;;  %3011 = vmatpush1.msra.mxu1 %v13314_v11  ;;  %v13327_v11 = vld [vmem:[#allocation14_spill] sm:$0xff] }
 0x126   : > { %2627 = vmatpush1.msra.mxu0 %v13309_v30  ;;  %2305 = vmatmul.mubr.f32.gmra.mxu1 %v13311_v25  ;;  %v13322_v30 = vld [vmem:[#allocation13_spill] sm:$0xff]  ;;  %v13328_v16 = vand.u32 4294901760, %v13327_v11 }
 0x127   : > { %1894 = vmatmul.mubr.f32.gmra.mxu0 %v13299_v33  ;;  %2312 = vmatprep.mubr.f32.mxu1 %v13313_v58  ;;  %v13319_v33 = vld [vmem:[#allocation77_spill] sm:$0xff]  ;;  %v13323_v25 = vand.u32 4294901760, %v13322_v30  ;;  %v13324_v58 = vand.u32 4294901760, %v7442_v39  ;;  %v13338_v30 = vand.u32 4294901760, %v7573_v34 }
 0x128   : > { %1900 = vmatprep.mubr.f32.mxu0 %v7330_v43  ;;  %2628 = vmatprep.subr.mxu0 %v13157_v49  ;;  %v13320_v23 = vand.u32 4294901760, %v13319_v33  ;;  %v13321_v43 = vld [vmem:[#allocation8_spill] sm:$0xff] }
 0x129   : > { %2632 = vmatpush1.msra.mxu0 %v13316_v44  ;;  %3012 = vmatprep.subr.mxu1 %v13157_v49  ;;  %v13329_v44 = vand.u32 4294901760, %v7482_v6 }
 0x12a   : > { %2316 = vmatmul.mubr.f32.gmra.mxu1 %v13318_v15  ;;  %2633 = vmatprep.subr.mxu0 %v13157_v49 }
 0x12b   : > { %1903 = vmatmul.mubr.f32.gmra.mxu0 %v13303_v14  ;;  %2323 = vmatprep.mubr.f32.mxu1 %v13320_v23  ;;  %v13325_v14 = vand.u32 4294901760, %v7464_v0  ;;  %v13333_v23 = vand.u32 4294901760, %v7527_v32 }
 0x12c   : > { %1909 = vmatprep.mubr.f32.mxu0 %v7356_v55  ;;  %3014 = vmatpush1.msra.mxu1 %v13321_v43  ;;  %v13326_v55 = vld [vmem:[#allocation9_spill] sm:$0xff] }
 0x12d   : > { %2637 = vmatpush1.msra.mxu0 %v13323_v25  ;;  %3015 = vmatprep.subr.mxu1 %v13157_v49  ;;  %v13341_v25 = vld [vmem:[#allocation20_spill] sm:$0xff] }
 0x12e   : > { %2327 = vmatmul.mubr.f32.gmra.mxu1 %v13324_v58  ;;  %2638 = vmatprep.subr.mxu0 %v13157_v49  ;;  %v13342_v58 = vand.u32 4294901760, %v13341_v25 }
 0x12f   : > { %1912 = vmatmul.mubr.f32.gmra.mxu0 %v13310_v36  ;;  %2334 = vmatprep.mubr.f32.mxu1 %v13325_v14  ;;  %v13330_v36 = vand.u32 4294901760, %v7508_v1  ;;  %v13343_v14 = vld [vmem:[#allocation83_spill] sm:$0xff] }
 0x130   : > { %1918 = vmatprep.mubr.f32.mxu0 %v13312_v48  ;;  %3017 = vmatpush1.msra.mxu1 %v13326_v55  ;;  %v13331_v48 = vld [vmem:[#allocation16_spill] sm:$0xff]  ;;  %v13344_v55 = vand.u32 4294901760, %v13343_v14 }
 0x131   : > { %2642 = vmatpush1.msra.mxu0 %v13328_v16  ;;  %3018 = vmatprep.subr.mxu1 %v13157_v49  ;;  %v13332_v15 = vand.u32 4294901760, %v13331_v48  ;;  %v13348_v16 = vld [vmem:[#allocation21_spill] sm:$0xff] }
 0x132   : > { %2338 = vmatmul.mubr.f32.gmra.mxu1 %v13329_v44  ;;  %2643 = vmatprep.subr.mxu0 %v13157_v49  ;;  %v13349_v44 = vand.u32 4294901760, %v13348_v16 }
 0x133   : > { %1921 = vmatmul.mubr.f32.gmra.mxu0 %v13317_v8  ;;  %2345 = vmatprep.mubr.f32.mxu1 %v13330_v36  ;;  %v13334_v8 = vand.u32 4294901760, %v7546_v38  ;;  %v13350_v36 = vand.u32 4294901760, %v7641_v13 }
 0x134   : > { %1927 = vmatprep.mubr.f32.mxu0 %v13319_v33  ;;  %3020 = vmatpush1.msra.mxu1 %v6784_v21  ;;  %v13335_v33 = vld [vmem:[#allocation15_spill] sm:$0xff]  ;;  %v13336_v21 = vld [vmem:[#allocation18_spill] sm:$0xff] }
 0x135   : > { %2647 = vmatpush1.msra.mxu0 %v13332_v15  ;;  %3021 = vmatprep.subr.mxu1 %v13157_v49  ;;  %v13337_v43 = vand.u32 4294901760, %v13336_v21  ;;  %v13354_v15 = vand.u32 4294901760, %v7681_v22 }
 0x136   : > { %2349 = vmatmul.mubr.f32.gmra.mxu1 %v13333_v23  ;;  %2648 = vmatprep.subr.mxu0 %v13157_v49  ;;  %v13358_v23 = vand.u32 4294901760, %v7725_v46 }
 0x137   : > { %1930 = vmatmul.mubr.f32.gmra.mxu0 %v7442_v39  ;;  %2356 = vmatprep.mubr.f32.mxu1 %v13334_v8  ;;  %v13339_v39 = vand.u32 4294901760, %v7588_v26  ;;  %v13359_v8 = vand.u32 4294901760, %v7740_v47 }
 0x138   : > { %1936 = vmatprep.mubr.f32.mxu0 %v7464_v0  ;;  %3023 = vmatpush1.msra.mxu1 %v13335_v33  ;;  %v13340_v0 = vld [vmem:[#allocation17_spill] sm:$0xff]  ;;  %v13360_v33 = vld [vmem:[#allocation23_spill] sm:$0xff] }
 0x139   : > { %2652 = vmatpush1.msra.mxu0 %v13337_v43  ;;  %3024 = vmatprep.subr.mxu1 %v13157_v49  ;;  %v13363_v43 = vld [vmem:[#allocation89_spill] sm:$0xff] }
 0x13a   : > { %2360 = vmatmul.mubr.f32.gmra.mxu1 %v13338_v30  ;;  %2653 = vmatprep.subr.mxu0 %v13157_v49  ;;  %v13364_v30 = vand.u32 4294901760, %v13363_v43 }
 0x13b   : > { %1939 = vmatmul.mubr.f32.gmra.mxu0 %v7482_v6  ;;  %2367 = vmatprep.mubr.f32.mxu1 %v13339_v39  ;;  %v13345_v6 = vld [vmem:[#allocation85_spill] sm:$0xff] }
 0x13c   : > { %1945 = vmatprep.mubr.f32.mxu0 %v7508_v1  ;;  %3026 = vmatpush1.msra.mxu1 %v13340_v0  ;;  %v13346_v11 = vand.u32 4294901760, %v13345_v6  ;;  %v13347_v1 = vld [vmem:[#allocation19_spill] sm:$0xff] }
 0x13d   : > { %2657 = vmatpush1.msra.mxu0 %v13342_v58  ;;  %3027 = vmatprep.subr.mxu1 %v13157_v49  ;;  %v13368_v0 = vld [vmem:[#allocation27_spill] sm:$0xff]  ;;  %v13370_v58 = vand.u32 4294901760, %v7793_v61 }
 0x13e   : > { %2371 = vmatmul.mubr.f32.gmra.mxu1 %v13344_v55  ;;  %2658 = vmatprep.subr.mxu0 %v13157_v49  ;;  %v13369_v25 = vand.u32 4294901760, %v13368_v0  ;;  %v13374_v55 = vand.u32 4294901760, %v7833_v40 }
 0x13f   : > { %1948 = vmatmul.mubr.f32.gmra.mxu0 %v7527_v32  ;;  %2378 = vmatprep.mubr.f32.mxu1 %v13346_v11  ;;  %v13351_v32 = vand.u32 4294901760, %v7652_v28  ;;  %v13378_v11 = vand.u32 4294901760, %v7877_v24 }
 0x140   : > { %1954 = vmatprep.mubr.f32.mxu0 %v7546_v38  ;;  %3029 = vmatpush1.msra.mxu1 %v13347_v1  ;;  %v13352_v38 = vld [vmem:[#allocation22_spill] sm:$0xff]  ;;  %v13379_v1 = vld [vmem:[#allocation95_spill] sm:$0xff] }
 0x141   : > { %2662 = vmatpush1.msra.mxu0 %v13349_v44  ;;  %3030 = vmatprep.subr.mxu1 %v13157_v49  ;;  %v13353_v48 = vand.u32 4294901760, %v13352_v38  ;;  %v13380_v16 = vand.u32 4294901760, %v13379_v1 }
 0x142   : > { %2382 = vmatmul.mubr.f32.gmra.mxu1 %v13350_v36  ;;  %2663 = vmatprep.subr.mxu0 %v13157_v49 }
 0x143   : > { %1957 = vmatmul.mubr.f32.gmra.mxu0 %v7573_v34  ;;  %2389 = vmatprep.mubr.f32.mxu1 %v13351_v32  ;;  %v13355_v34 = vand.u32 4294901760, %v7699_v27  ;;  %v13382_v32 = vld [vmem:[#allocation32_spill] sm:$0xff] }
 0x144   : > { %1963 = vmatprep.mubr.f32.mxu0 %v7588_v26  ;;  %3032 = vmatpush1.msra.mxu1 %v6853_v51  ;;  %v13356_v51 = vld [vmem:[#allocation24_spill] sm:$0xff]  ;;  %v13383_v38 = vand.u32 4294901760, %v13382_v32 }
 0x145   : > { %2667 = vmatpush1.msra.mxu0 %v13353_v48  ;;  %3033 = vmatprep.subr.mxu1 %v13157_v49  ;;  %v13357_v26 = vand.u32 4294901760, %v13356_v51  ;;  %v13384_v48 = vand.u32 4294901760, %v7909_v7  ;;  %v13387_v51 = vld [vmem:[#allocation34_spill] sm:$0xff] }
 0x146   : > { %2393 = vmatmul.mubr.f32.gmra.mxu1 %v13354_v15  ;;  %2668 = vmatprep.subr.mxu0 %v13157_v49 }
 0x147   : > { %1966 = vmatmul.mubr.f32.gmra.mxu0 %v13343_v14  ;;  %2400 = vmatprep.mubr.f32.mxu1 %v13355_v34 }
 0x148   : > { %1972 = vmatprep.mubr.f32.mxu0 %v13345_v6  ;;  %3035 = vmatpush1.msra.mxu1 %v6870_v59  ;;  %v13361_v59 = vld [vmem:[#allocation26_spill] sm:$0xff] }
 0x149   : > { %2672 = vmatpush1.msra.mxu0 %v13357_v26  ;;  %3036 = vmatprep.subr.mxu1 %v13157_v49  ;;  %v13362_v21 = vand.u32 4294901760, %v13361_v59  ;;  %v13388_v26 = vand.u32 4294901760, %v13387_v51 }
 0x14a   : > { %2404 = vmatmul.mubr.f32.gmra.mxu1 %v13358_v23  ;;  %2673 = vmatprep.subr.mxu0 %v13157_v49  ;;  %v13389_v23 = vand.u32 4294901760, %v7947_v50 }
 0x14b   : > { %1975 = vmatmul.mubr.f32.gmra.mxu0 %v7641_v13  ;;  %2411 = vmatprep.mubr.f32.mxu1 %v13359_v8  ;;  %v13365_v13 = vld [vmem:[#allocation91_spill] sm:$0xff] }
 0x14c   : > { %1981 = vmatprep.mubr.f32.mxu0 %v7652_v28  ;;  %3038 = vmatpush1.msra.mxu1 %v13360_v33  ;;  %v13366_v39 = vand.u32 4294901760, %v13365_v13  ;;  %v13367_v28 = vld [vmem:[#allocation25_spill] sm:$0xff]  ;;  %v13390_v33 = vld [vmem:[#allocation98_spill] sm:$0xff] }
 0x14d   : > { %2677 = vmatpush1.msra.mxu0 %v13362_v21  ;;  %3039 = vmatprep.subr.mxu1 %v13157_v49 }
 0x14e   : > { %2415 = vmatmul.mubr.f32.gmra.mxu1 %v13364_v30  ;;  %2678 = vmatprep.subr.mxu0 %v13157_v49 }
 0x14f   : > { %1984 = vmatmul.mubr.f32.gmra.mxu0 %v7681_v22  ;;  %2422 = vmatprep.mubr.f32.mxu1 %v13366_v39  ;;  %v13371_v22 = vand.u32 4294901760, %v7804_v12 }
 0x150   : > { %1990 = vmatprep.mubr.f32.mxu0 %v7699_v27  ;;  %3041 = vmatpush1.msra.mxu1 %v13367_v28  ;;  %v13372_v27 = vld [vmem:[#allocation28_spill] sm:$0xff] }
 0x151   : > { %2682 = vmatpush1.msra.mxu0 %v13369_v25  ;;  %3042 = vmatprep.subr.mxu1 %v13157_v49  ;;  %v13373_v14 = vand.u32 4294901760, %v13372_v27 }
 0x152   : > { %2426 = vmatmul.mubr.f32.gmra.mxu1 %v13370_v58  ;;  %2683 = vmatprep.subr.mxu0 %v13157_v49  ;;  %v13397_v58 = vld [vmem:[#allocation101_spill] sm:$0xff] }
 0x153   : > { %1993 = vmatmul.mubr.f32.gmra.mxu0 %v7725_v46  ;;  %2433 = vmatprep.mubr.f32.mxu1 %v13371_v22  ;;  %v13375_v46 = vand.u32 4294901760, %v7851_v5  ;;  %v13398_v22 = vand.u32 4294901760, %v13397_v58 }
 0x154   : > { %1999 = vmatprep.mubr.f32.mxu0 %v7740_v47  ;;  %3044 = vmatpush1.msra.mxu1 %v6919_v35  ;;  %v13376_v47 = vld [vmem:[#allocation30_spill] sm:$0xff] }
 0x155   : > { %2687 = vmatpush1.msra.mxu0 %v13373_v14  ;;  %3045 = vmatprep.subr.mxu1 %v13157_v49  ;;  %v13377_v6 = vand.u32 4294901760, %v13376_v47 }
 0x156   : > { %2437 = vmatmul.mubr.f32.gmra.mxu1 %v13374_v55  ;;  %2688 = vmatprep.subr.mxu0 %v13157_v49  ;;  %v13399_v55 = vld [vmem:[#allocation35_spill] sm:$0xff] }
 0x157   : > { %2002 = vmatmul.mubr.f32.gmra.mxu0 %v13363_v43  ;;  %2444 = vmatprep.mubr.f32.mxu1 %v13375_v46  ;;  %v13392_v43 = vld [vmem:[#allocation33_spill] sm:$0xff] }
 0x158   : > { %2008 = vmatprep.mubr.f32.mxu0 %v13365_v13  ;;  %3047 = vmatpush1.msra.mxu1 %v6939_v52  ;;  %v13381_v52 = vld [vmem:[#allocation29_spill] sm:$0xff]  ;;  %v13393_v13 = vld [vmem:[#allocation36_spill] sm:$0xff] }
 0x159   : > { %v1531_v35 = vpop.f32.mrf.mxu1  ;;  %2692 = vmatpush1.msra.mxu0 %v13377_v6  ;;  %3048 = vmatprep.subr.mxu1 %v13157_v49  ;;  %v13394_v39 = vand.u32 4294901760, %v13393_v13 }
 0x15a   : > { %2448 = vmatmul.mubr.f32.gmra.mxu1 %v13378_v11  ;;  %2693 = vmatprep.subr.mxu0 %v13157_v49 }
 0x15b   : > { %2011 = vmatmul.mubr.f32.gmra.mxu0 %v7793_v61  ;;  %2455 = vmatprep.mubr.f32.mxu1 %v13380_v16  ;;  %v1533_v44 = vpop.f32.mrf.mxu1  ;;  %v13385_v61 = vand.u32 4294901760, %v7917_v10 }
 0x15c   : > { %2017 = vmatprep.mubr.f32.mxu0 %v7804_v12  ;;  %3050 = vmatpush1.msra.mxu1 %v13381_v52  ;;  %v13386_v12 = vld [vmem:[#allocation31_spill] sm:$0xff] }
 0x15d   : > { %v1538_v36 = vpop.f32.mrf.mxu1  ;;  %2697 = vmatpush1.msra.mxu0 %v13383_v38  ;;  %3051 = vmatprep.subr.mxu1 %v13157_v49  ;;  %v13407_v38 = vld [vmem:[#allocation40_spill] sm:$0xff] }
 0x15e   : > { %2459 = vmatmul.mubr.f32.gmra.mxu1 %v13384_v48  ;;  %2698 = vmatprep.subr.mxu0 %v13157_v49  ;;  %v13408_v48 = vand.u32 4294901760, %v13407_v38 }
 0x15f   : > { %2020 = vmatmul.mubr.f32.gmra.mxu0 %v7833_v40  ;;  %2466 = vmatprep.mubr.f32.mxu1 %v13385_v61  ;;  %v1540_v15 = vpop.f32.mrf.mxu1 }
 0x160   : > { %2026 = vmatprep.mubr.f32.mxu0 %v7851_v5  ;;  %3053 = vmatpush2.msra.mxu1 %v13386_v12  ;;  %v13391_v5 = vand.u32 4294901760, %v13390_v33 }
 0x161   : > { %v1545_v34 = vpop.f32.mrf.mxu1  ;;  %2702 = vmatpush2.msra.mxu0 %v13388_v26  ;;  %3054 = vmatprep.subr.mxu1 %v13157_v49 }
 0x162   : > { %2470 = vmatmul.mubr.f32.gmra.mxu1 %v13389_v23  ;;  %v834_v40 = vpop.f32.mrf.mxu0  ;;  %2703 = vmatprep.subr.mxu0 %v13157_v49 }
 0x163   : > { %2029 = vmatmul.mubr.f32.gmra.mxu0 %v7877_v24  ;;  %v8667_v8 = vadd.f32 %v1531_v35, %v834_v40  ;;  %2477 = vmatprep.mubr.f32.mxu1 %v13391_v5  ;;  %v1547_v59 = vpop.f32.mrf.mxu1  ;;  %v13395_v24 = vld [vmem:[#allocation100_spill] sm:$0xff]  ;;  %v13400_v35 = vld [vmem:[#allocation38_spill] sm:$0xff]  ;;  %v13413_v40 = vld [vmem:[#allocation39_spill] sm:$0xff] }
 0x164   : > { %2035 = vmatprep.mubr.f32.mxu0 %v13379_v1  ;;  %v836_v21 = vpop.f32.mrf.mxu0  ;;  %3056 = vmatpush2.msra.mxu1 %v13392_v43  ;;  %v13396_v28 = vand.u32 4294901760, %v13395_v24  ;;  %v13401_v47 = vand.u32 4294901760, %v13400_v35  ;;  %v13414_v5 = vld [vmem:[#allocation42_spill] sm:$0xff] }
 0x165   : > { %v1552_v30 = vpop.f32.mrf.mxu1  ;;  %2707 = vmatpush2.msra.mxu0 %v13394_v39  ;;  %3057 = vmatprep.subr.mxu1 %v13157_v49  ;;  %v13415_v59 = vand.u32 4294901760, %v13414_v5  ;;  %v13416_v21 = vld [vmem:[#allocation108_spill] sm:$0xff]  ;;  %v13418_v39 = vld [vmem:[#allocation110_spill] sm:$0xff] }
 0x166   : > { %2481 = vmatmul.mubr.f32.gmra.mxu1 %v13396_v28  ;;  %2708 = vmatprep.subr.mxu0 %v13157_v49  ;;  %v13417_v43 = vand.u32 4294901760, %v13416_v21 }
 0x167   : > { %v849_v0 = vpop.f32.mrf.mxu0  ;;  %2038 = vmatmul.mubr.f32.gmra.mxu0 %v7909_v7  ;;  %2488 = vmatprep.mubr.f32.mxu1 %v13398_v22  ;;  %v1554_v27 = vpop.f32.mrf.mxu1  ;;  %v13402_v7 = vld [vmem:[#allocation103_spill] sm:$0xff] }
 0x168   : > { %v8680_v25 = vadd.f32 %v1538_v36, %v849_v0  ;;  %2044 = vmatprep.mubr.f32.mxu0 %v7917_v10  ;;  %3059 = vmatpush2.msra.mxu1 %v13399_v55  ;;  %v13403_v6 = vand.u32 4294901760, %v13402_v7  ;;  %v13404_v10 = vld [vmem:[#allocation104_spill] sm:$0xff]  ;;  %v13406_v36 = vld [vmem:[#allocation37_spill] sm:$0xff]  ;;  %v13423_v55 = vand.u32 4294901760, %v8135_v4 }
 0x169   : > { %v851_v14 = vpop.f32.mrf.mxu0  ;;  %v1559_v46 = vpop.f32.mrf.mxu1  ;;  %2712 = vmatpush2.msra.mxu0 %v13401_v47  ;;  %3060 = vmatprep.subr.mxu1 %v13157_v49  ;;  %v13405_v16 = vand.u32 4294901760, %v13404_v10  ;;  %v13421_v27 = vld [vmem:[#allocation44_spill] sm:$0xff] }
 0x16a   : > { %2492 = vmatmul.mubr.f32.gmra.mxu1 %v13403_v6  ;;  %2713 = vmatprep.subr.mxu0 %v13157_v49  ;;  %v13422_v14 = vand.u32 4294901760, %v13421_v27  ;;  %v13424_v47 = vld [vmem:[#allocation112_spill] sm:$0xff] }
 0x16b   : > { %v864_v11 = vpop.f32.mrf.mxu0  ;;  %2047 = vmatmul.mubr.f32.gmra.mxu0 %v7947_v50  ;;  %2499 = vmatprep.mubr.f32.mxu1 %v13405_v16  ;;  %v1561_v44 = vpop.f32.mrf.mxu1  ;;  %v13409_v50 = vld [vmem:[#allocation106_spill] sm:$0xff] }
 0x16c   : > { %v8693_v1 = vadd.f32 %v1545_v34, %v864_v11  ;;  %2053 = vmatprep.mubr.f32.mxu0 %v13390_v33  ;;  %3062 = vmatpush2.msra.mxu1 %v13406_v36  ;;  %v13410_v61 = vand.u32 4294901760, %v13409_v50  ;;  %v13411_v34 = vld [vmem:[#allocation107_spill] sm:$0xff]  ;;  %v13427_v44 = vld [vmem:[#allocation46_spill] sm:$0xff]  ;;  %v13429_v36 = vand.u32 4294901760, %v8181_v60 }
 0x16d   : > { %v866_v52 = vpop.f32.mrf.mxu0  ;;  %v1566_v32 = vpop.f32.mrf.mxu1  ;;  %2717 = vmatpush2.msra.mxu0 %v13408_v48  ;;  %3063 = vmatprep.subr.mxu1 %v13157_v49  ;;  %v13412_v51 = vand.u32 4294901760, %v13411_v34  ;;  %v13430_v48 = vld [vmem:[#allocation114_spill] sm:$0xff] }
 0x16e   : > { %2503 = vmatmul.mubr.f32.gmra.mxu1 %v13410_v61  ;;  %2718 = vmatprep.subr.mxu0 %v13157_v49  ;;  %v13428_v52 = vand.u32 4294901760, %v13427_v44 }
 0x16f   : > { %v879_v15 = vpop.f32.mrf.mxu0  ;;  %2056 = vmatmul.mubr.f32.gmra.mxu0 %v13395_v24  ;;  %2510 = vmatprep.mubr.f32.mxu1 %v13412_v51  ;;  %v1568_v26 = vpop.f32.mrf.mxu1  ;;  %v13419_v24 = vand.u32 4294901760, %v13418_v39 }
 0x170   : > { %v8706_v12 = vadd.f32 %v1552_v30, %v879_v15  ;;  %2062 = vmatprep.mubr.f32.mxu0 %v13397_v58  ;;  %3065 = vmatpush2.msra.mxu1 %v13413_v40  ;;  %v13420_v58 = vld [vmem:[#allocation41_spill] sm:$0xff]  ;;  %v13433_v26 = vld [vmem:[#allocation48_spill] sm:$0xff]  ;;  %v13435_v40 = vand.u32 4294901760, %v8218_v37 }
 0x171   : > { %v881_v23 = vpop.f32.mrf.mxu0  ;;  %v1573_v33 = vpop.f32.mrf.mxu1  ;;  %2722 = vmatpush2.msra.mxu0 %v13415_v59  ;;  %3066 = vmatprep.subr.mxu1 %v13157_v49  ;;  %v13436_v59 = vand.u32 4294901760, %v8234_v56 }
 0x172   : > { %2514 = vmatmul.mubr.f32.gmra.mxu1 %v13417_v43  ;;  %2723 = vmatprep.subr.mxu0 %v13157_v49  ;;  %v13434_v23 = vand.u32 4294901760, %v13433_v26 }
 0x173   : > { %v894_v30 = vpop.f32.mrf.mxu0  ;;  %2065 = vmatmul.mubr.f32.gmra.mxu0 %v13402_v7  ;;  %2521 = vmatprep.mubr.f32.mxu1 %v13419_v24  ;;  %v1575_v28 = vpop.f32.mrf.mxu1  ;;  %v13425_v7 = vand.u32 4294901760, %v13424_v47  ;;  %v13438_v24 = vld [vmem:[#allocation50_spill] sm:$0xff] }
 0x174   : > { %v8719_v13 = vadd.f32 %v1559_v46, %v894_v30  ;;  %2071 = vmatprep.mubr.f32.mxu0 %v13404_v10  ;;  %3068 = vmatpush2.msra.mxu1 %v13420_v58  ;;  %v13426_v10 = vld [vmem:[#allocation43_spill] sm:$0xff]  ;;  %v13439_v28 = vand.u32 4294901760, %v13438_v24 }
 0x175   : > { %v896_v0 = vpop.f32.mrf.mxu0  ;;  %v1580_v22 = vpop.f32.mrf.mxu1  ;;  %2727 = vmatpush2.msra.mxu0 %v13422_v14  ;;  %3069 = vmatprep.subr.mxu1 %v13157_v49  ;;  %v13437_v30 = vld [vmem:[#allocation47_spill] sm:$0xff] }
 0x176   : > { %2525 = vmatmul.mubr.f32.gmra.mxu1 %v13423_v55  ;;  %2728 = vmatprep.subr.mxu0 %v13157_v49  ;;  %v13442_v55 = vld [vmem:[#allocation49_spill] sm:$0xff] }
 0x177   : > { %v909_v46 = vpop.f32.mrf.mxu0  ;;  %2074 = vmatmul.mubr.f32.gmra.mxu0 %v13409_v50  ;;  %2532 = vmatprep.mubr.f32.mxu1 %v13425_v7  ;;  %v1582_v6 = vpop.f32.mrf.mxu1  ;;  %v13431_v50 = vand.u32 4294901760, %v13430_v48 }
 0x178   : > { %v8732_v35 = vadd.f32 %v1566_v32, %v909_v46  ;;  %2080 = vmatprep.mubr.f32.mxu0 %v13411_v34  ;;  %3071 = vmatpush2.msra.mxu1 %v13426_v10  ;;  %v13432_v34 = vld [vmem:[#allocation45_spill] sm:$0xff]  ;;  %v13446_v10 = vand.u32 4294901760, %v8297_v19 }
 0x179   : > { %v911_v11 = vpop.f32.mrf.mxu0  ;;  %v1587_v16 = vpop.f32.mrf.mxu1  ;;  %2732 = vmatpush2.msra.mxu0 %v13428_v52  ;;  %3072 = vmatprep.subr.mxu1 %v13157_v49  ;;  %v13447_v52 = vld [vmem:[#allocation51_spill] sm:$0xff] }
 0x17a   : > { %2536 = vmatmul.mubr.f32.gmra.mxu1 %v13429_v36  ;;  %2733 = vmatprep.subr.mxu0 %v13157_v49 }
 0x17b   : > { %v924_v32 = vpop.f32.mrf.mxu0  ;;  %2083 = vmatmul.mubr.f32.gmra.mxu0 %v13416_v21  ;;  %2543 = vmatprep.mubr.f32.mxu1 %v13431_v50  ;;  %v1589_v61 = vpop.f32.mrf.mxu1  ;;  %v13450_v50 = vand.u32 4294901760, %v8330_v41 }
 0x17c   : > { %v8745_v38 = vadd.f32 %v1573_v33, %v924_v32  ;;  %2089 = vmatprep.mubr.f32.mxu0 %v13418_v39  ;;  %3074 = vmatpush2.msra.mxu1 %v13432_v34  ;;  %v13448_v32 = vld [vmem:[#allocation53_spill] sm:$0xff] }
 0x17d   : > { %v926_v15 = vpop.f32.mrf.mxu0  ;;  %v1594_v51 = vpop.f32.mrf.mxu1  ;;  %2737 = vmatpush2.msra.mxu0 %v13434_v23  ;;  %3075 = vmatprep.subr.mxu1 %v13157_v49 }
 0x17e   : > { %2547 = vmatmul.mubr.f32.gmra.mxu1 %v13435_v40  ;;  %2738 = vmatprep.subr.mxu0 %v13157_v49  ;;  %v13451_v15 = vand.u32 4294901760, %v8342_v45  ;;  %v13453_v40 = vand.u32 4294901760, %v7168_v20 }
 0x17f   : > { %v939_v33 = vpop.f32.mrf.mxu0  ;;  %2092 = vmatmul.mubr.f32.gmra.mxu0 %v8135_v4  ;;  %2554 = vmatprep.mubr.f32.mxu1 %v13436_v59  ;;  %v1596_v21 = vpop.f32.mrf.mxu1  ;;  %v13440_v4 = vand.u32 4294901760, %v8251_v42 }
 0x180   : > { %v8758_v5 = vadd.f32 %v1580_v22, %v939_v33  ;;  %2098 = vmatprep.mubr.f32.mxu0 %v13424_v47  ;;  %3077 = vmatpush2.msra.mxu1 %v13437_v30  ;;  %v13441_v22 = vand.u32 4294901760, %v8269_v31  ;;  %v13443_v47 = vld [vmem:[#allocation52_spill] sm:$0xff]  ;;  %v13457_v30 = vld [vmem:[#allocation55_spill] sm:$0xff] }
 0x181   : > { %v941_v43 = vpop.f32.mrf.mxu0  ;;  %v1601_v39 = vpop.f32.mrf.mxu1  ;;  %2742 = vmatpush2.msra.mxu0 %v13439_v28  ;;  %3078 = vmatprep.subr.mxu1 %v13157_v49  ;;  %v13444_v7 = vand.u32 4294901760, %v13443_v47  ;;  %v13460_v28 = vand.u32 4294901760, %v8399_v29 }
 0x182   : > { %2558 = vmatmul.mubr.f32.gmra.mxu1 %v13440_v4  ;;  %2743 = vmatprep.subr.mxu0 %v13157_v49 }
 0x183   : > { %v954_v0 = vpop.f32.mrf.mxu0  ;;  %2101 = vmatmul.mubr.f32.gmra.mxu0 %v8181_v60  ;;  %2565 = vmatprep.mubr.f32.mxu1 %v13441_v22  ;;  %v1603_v27 = vpop.f32.mrf.mxu1  ;;  %v13445_v60 = vand.u32 4294901760, %v8287_v54 }
 0x184   : > { %v8771_v58 = vadd.f32 %v1587_v16, %v954_v0  ;;  %2107 = vmatprep.mubr.f32.mxu0 %v13430_v48  ;;  %3080 = vmatpush2.msra.mxu1 %v13442_v55  ;;  %v13449_v48 = vand.u32 4294901760, %v13448_v32  ;;  %v13461_v0 = vand.u32 4294901760, %v8411_v2  ;;  %v13462_v55 = vld [vmem:[#allocation57_spill] sm:$0xff]  ;;  %v13468_v32 = vld [vmem:[#allocation58_spill] sm:$0xff] }
 0x185   : > { %v956_v14 = vpop.f32.mrf.mxu0  ;;  %v1608_v46 = vpop.f32.mrf.mxu1  ;;  %2747 = vmatpush2.msra.mxu0 %v13444_v7  ;;  %3081 = vmatprep.subr.mxu1 %v13157_v49 }
 0x186   : > { %2569 = vmatmul.mubr.f32.gmra.mxu1 %v13445_v60  ;;  %2748 = vmatprep.subr.mxu0 %v13157_v49 }
 0x187   : > { %v969_v6 = vpop.f32.mrf.mxu0  ;;  %2110 = vmatmul.mubr.f32.gmra.mxu0 %v8218_v37  ;;  %2576 = vmatprep.mubr.f32.mxu1 %v13446_v10  ;;  %v1610_v16 = vpop.f32.mrf.mxu1  ;;  %v709_v37 = vld [vmem:[%s12502_s1 + $0x178] sm:$0xff]  ;;  %v13465_v10 = vmov 1.0  }
 0x188   : > { %v8784_v11 = vadd.f32 %v1594_v51, %v969_v6  ;;  %2116 = vmatprep.mubr.f32.mxu0 %v8234_v56  ;;  %3083 = vmatpush2.msra.mxu1 %v13447_v52  ;;  %v8807_v26 = vand.u32 4294901760, %v709_v37  ;;  %v13466_v16 = vld [vmem:[#allocation64_spill] sm:$0xff] }
 0x189   : > { %v971_v44 = vpop.f32.mrf.mxu0  ;;  %v1615_v36 = vpop.f32.mrf.mxu1  ;;  %2752 = vmatpush2.msra.mxu0 %v13449_v48  ;;  %3084 = vmatprep.subr.mxu1 %v13157_v49 }
 0x18a   : > { %2580 = vmatmul.mubr.f32.gmra.mxu1 %v13450_v50  ;;  %2753 = vmatprep.subr.mxu0 %v13157_v49  ;;  %13452 = vst [vmem:[#allocation54_spill] sm:$0xff] %v8807_v26  ;;  %v8826_v43 = vsub.f32 %v709_v37, %v8807_v26  ;;  %v13467_v44 = vld [vmem:[#allocation62_spill] sm:$0xff] }
 0x18b   : > { %v984_v61 = vpop.f32.mrf.mxu0  ;;  %2119 = vmatmul.mubr.f32.gmra.mxu0 %v8251_v42  ;;  %2587 = vmatprep.mubr.f32.mxu1 %v13451_v15  ;;  %v1617_v34 = vpop.f32.mrf.mxu1  ;;  %v13454_v42 = vand.u32 4294901760, %v8368_v18  ;;  %v705_v15 = vld [vmem:[%s12502_s1 + $0x158] sm:$0xff] }
 0x18c   : > { %v8800_v56 = vadd.f32 %v1601_v39, %v984_v61  ;;  %2125 = vmatprep.mubr.f32.mxu0 %v8269_v31  ;;  %3086 = vmatpush2.msra.mxu1 %v7139_v57  ;;  %v708_v31 = vld [vmem:[%s12502_s1 + $0x170] sm:$0xff]  ;;  %v13455_v57 = vand.u32 4294901760, %v8380_v63  ;;  %13456 = vst [vmem:[#allocation56_spill] sm:$0xff] %v8826_v43  ;;  %v13458_v39 = vand.u32 4294901760, %v13457_v30  ;;  %v12795_v14 = vand.u32 4294901760, %v8826_v43 }
 0x18d   : > { %v986_v51 = vpop.f32.mrf.mxu0  ;;  %v1622_v23 = vpop.f32.mrf.mxu1  ;;  %2757 = vmatpush2.msra.mxu0 %v13453_v40  ;;  %3087 = vmatprep.subr.mxu1 %v13157_v49  ;;  %v8831_v24 = vand.u32 4294901760, %v708_v31  ;;  %v13473_v40 = vld [vmem:[#allocation66_spill] sm:$0xff]  ;;  %v704_v30 = vld [vmem:[%s12502_s1 + $0x150] sm:$0xff] }
 0x18e   : > { %2591 = vmatmul.mubr.f32.gmra.mxu1 %v13454_v42  ;;  %2758 = vmatprep.subr.mxu0 %v13157_v49  ;;  %v13471_v51 = vld [vmem:[#allocation59_spill] sm:$0xff] }
 0x18f   : > { %v999_v33 = vpop.f32.mrf.mxu0  ;;  %2128 = vmatmul.mubr.f32.gmra.mxu0 %v8287_v54  ;;  %2598 = vmatprep.mubr.f32.mxu1 %v13455_v57  ;;  %v1624_v21 = vpop.f32.mrf.mxu1  ;;  %13459 = vst [vmem:[#allocation60_spill] sm:$0xff] %v8831_v24  ;;  %v8851_v47 = vsub.f32 %v708_v31, %v8831_v24  ;;  %v13474_v57 = vand.u32 4294901760, %v13293_v53 }
 0x190   : > { %v8818_v59 = vadd.f32 %v1608_v46, %v999_v33  ;;  %2134 = vmatprep.mubr.f32.mxu0 %v8297_v19  ;;  %3089 = vmatpush2.msra.mxu1 %v7156_v17  ;;  %v707_v17 = vld [vmem:[%s12502_s1 + $0x168] sm:$0xff]  ;;  %v13463_v46 = vand.u32 4294901760, %v13462_v55 }
 0x191   : > { %v1001_v20 = vpop.f32.mrf.mxu0  ;;  %v1629_v54 = vpop.f32.mrf.mxu1  ;;  %2762 = vmatpush2.msra.mxu0 %v13458_v39  ;;  %3090 = vmatprep.subr.mxu1 %v13157_v49  ;;  %v8853_v7 = vand.u32 4294901760, %v707_v17 }
 0x192   : > { %2602 = vmatmul.mubr.f32.gmra.mxu1 %v13460_v28  ;;  %2763 = vmatprep.subr.mxu0 %v13157_v49  ;;  %v13477_v28 = vld [vmem:[#allocation63_spill] sm:$0xff] }
 0x193   : > { %v1014_v19 = vpop.f32.mrf.mxu0  ;;  %2137 = vmatmul.mubr.f32.gmra.mxu0 %v8330_v41  ;;  %2609 = vmatprep.mubr.f32.mxu1 %v13461_v0  ;;  %v1631_v22 = vpop.f32.mrf.mxu1  ;;  %v8877_v37 = vsub.f32 %v707_v17, %v8853_v7  ;;  %v8930_v0 = vand.u32 4294901760, %v704_v30 }
 0x194   : > { %v8839_v4 = vadd.f32 %v1615_v36, %v1014_v19  ;;  %2143 = vmatprep.mubr.f32.mxu0 %v8342_v45  ;;  %3092 = vmatpush2.msra.mxu1 %v13287_v62  ;;  %v13464_v45 = vand.u32 4294901760, %v8428_v3  ;;  %v706_v62 = vld [vmem:[%s12502_s1 + $0x160] sm:$0xff] }
 0x195   : > { %v1016_v27 = vpop.f32.mrf.mxu0  ;;  %v1636_v41 = vpop.f32.mrf.mxu1  ;;  %3093 = vmatprep.subr.mxu1 %v13157_v49  ;;  %2767 = vmatpush2.msra.mxu0 %v13463_v46  ;;  %v8879_v50 = vand.u32 4294901760, %v706_v62  ;;  %v12792_v20 = vand.u32 4294901760, %v8877_v37  ;;  %13478 = vst [vmem:[#allocation69_spill] sm:$0xff] %v8930_v0 }
 0x196   : > { %2613 = vmatmul.mubr.f32.gmra.mxu1 %v13464_v45  ;;  %2768 = vmatprep.subr.mxu0 %v13157_v49  ;;  %v703_v45 = vld [vmem:[%s12502_s1 + $0x148] sm:$0xff] }
 0x197   : > { %v1029_v60 = vpop.f32.mrf.mxu0  ;;  %2146 = vmatmul.mubr.f32.gmra.mxu0 %v8368_v18  ;;  %3095 = vmatpush2.msra.mxu1 %v13290_v9  ;;  %v1638_v52 = vpop.f32.mrf.mxu1  ;;  %v3905_v18 = vsub.f32 %v8826_v43, %v12795_v14  ;;  %v12794_v9 = vand.u32 4294901760, %v8851_v47  ;;  %13469 = vst [vmem:[#allocation65_spill] sm:$0xff] %v8879_v50  ;;  %v3919_v27 = vsub.f32 %v8877_v37, %v12792_v20 }
 0x198   : > { %v8861_v6 = vadd.f32 %v1622_v23, %v1029_v60  ;;  %6293 = vmatprep.mubr.msk.f32.mxu1 %vm279_vm0, %v13465_v10  ;;  %2152 = vmatprep.mubr.f32.mxu0 %v8380_v63  ;;  %v13470_v63 = vld [vmem:[#allocation61_spill] sm:$0xff]  ;;  %v13472_v23 = vand.u32 4294901760, %v13471_v51  ;;  %v8971_v51 = vand.u32 4294901760, %v703_v45 }
 0x199   : > { %3096 = vmatprep.subr.mxu1 %v13157_v49  ;;  %v1031_v36 = vpop.f32.mrf.mxu0  ;;  %v1643_v48 = vpop.f32.mrf.mxu1  ;;  %v3912_v21 = vsub.f32 %v8851_v47, %v12794_v9 }
 0x19a   : > { %3098 = vmatpush2.msra.mxu1 %v13468_v32  ;;  %2772 = vmatpush2.msra.mxu0 %v13472_v23  ;;  %13482 = vst [vmem:[#allocation10_spill] sm:$0xff] %v8971_v51 }
 0x19b   : > { %6294 = vmatmul.mubr.msk.f32.vlgmr.msra.gmra.mxu1 %vm278_vm1, %v13465_v10  ;;  %v1044_v61 = vpop.f32.mrf.mxu0  ;;  %2155 = vmatmul.mubr.f32.gmra.mxu0 %v8399_v29  ;;  %v1645_v42 = vpop.f32.mrf.mxu1  ;;  %v3906_v29 = vand.u32 4294901760, %v3905_v18  ;;  %v3913_v22 = vand.u32 4294901760, %v3912_v21  ;;  %v8964_v18 = vsub.f32 %v704_v30, %v8930_v0 }
 0x19c   : > { %v8889_v34 = vadd.f32 %v1629_v54, %v1044_v61  ;;  %6295 = vmatprep.mubr.msk.f32.mxu1 %vm283_vm4, %v13465_v10  ;;  %2161 = vmatprep.mubr.f32.mxu0 %v8411_v2  ;;  %v8907_v54 = vsub.f32 %v706_v62, %v8879_v50  ;;  %v8909_v2 = vand.u32 4294901760, %v705_v15  ;;  %v13480_v62 = vld [vmem:[#allocation67_spill] sm:$0xff]  ;;  %v702_v42 = vld [vmem:[%s12502_s1 + $0x140] sm:$0xff] }
 0x19d   : > { %v1046_v33 = vpop.f32.mrf.mxu0  ;;  %2773 = vmatprep.subr.mxu0 %v13157_v49  ;;  %v1650_v31 = vpop.f32.mrf.mxu1  ;;  %3901 = vmatprep.subr.mxu1 %v13157_v49  ;;  %13481 = vst [vmem:[#allocation71_spill] sm:$0xff] %v8964_v18  ;;  %v12789_v30 = vand.u32 4294901760, %v8964_v18 }
 0x19e   : > { %2777 = vmatpush2.msra.mxu0 %v13474_v57  ;;  %13475 = vst [vmem:[#allocation68_spill] sm:$0xff] %v8907_v54  ;;  %13476 = vst [vmem:[#allocation5_spill] sm:$0xff] %v8909_v2  ;;  %3907 = vmatpush1.msra.mxu1 %v3906_v29  ;;  %v8938_v55 = vsub.f32 %v705_v15, %v8909_v2  ;;  %v13483_v29 = vld [vmem:[#allocation70_spill] sm:$0xff] }
 0x19f   : > { %6296 = vmatmul.mubr.msk.f32.gmra.mxu1 %vm282_vm5, %v13465_v10  ;;  %v1059_v53 = vpop.f32.mrf.mxu0  ;;  %2164 = vmatmul.mubr.f32.gmra.mxu0 %v8428_v3  ;;  %v1652_v19 = vpop.f32.mrf.mxu1 }
 0x1a0   : > { %v8919_v39 = vadd.f32 %v1636_v41, %v1059_v53  ;;  %6297 = vmatprep.mubr.msk.f32.mxu1 %vm287_vm2, %v13465_v10  ;;  %6229 = vmatprep.mubr.msk.f32.mxu0 %vm279_vm0, %v13465_v10  ;;  %v12791_v41 = vand.u32 4294901760, %v8907_v54  ;;  %13479 = vst [vmem:[#allocation6_spill] sm:$0xff] %v8938_v55  ;;  %v12790_v15 = vand.u32 4294901760, %v8938_v55  ;;  %vm13486_vm0 = vcmp.eq.s32.totalorder %v13483_v29, %v13470_v63 }
 0x1a1   : > { %v1061_v17 = vpop.f32.mrf.mxu0  ;;  %3324 = vmatprep.subr.mxu0 %v13157_v49  ;;  %v1657_v3 = vpop.f32.mrf.mxu1  ;;  %3908 = vmatprep.subr.mxu1 %v13157_v49 }
 0x1a2   : > { %3914 = vmatpush1.msra.mxu1 %v3913_v22  ;;  %v3926_v61 = vsub.f32 %v8907_v54, %v12791_v41  ;;  %v3933_v19 = vsub.f32 %v8938_v55, %v12790_v15  ;;  %v9002_v17 = vsub.f32 %v703_v45, %v8971_v51  ;;  %v9004_v22 = vand.u32 4294901760, %v702_v42  ;;  %v13487_v45 = vld [vmem:[#allocation72_spill] sm:$0xff] }
 0x1a3   : > { %6298 = vmatmul.mubr.msk.f32.gmra.mxu1 %vm286_vm3, %v13465_v10  ;;  %v1074_v46 = vpop.f32.mrf.mxu0  ;;  %6230 = vmatmul.mubr.msk.f32.vlgmr.msra.gmra.mxu0 %vm278_vm1, %v13465_v10  ;;  %v1659_v52 = vpop.f32.mrf.mxu1  ;;  %vm13488_vm1 = vcmp.eq.s32.totalorder %v13487_v45, %v13467_v44 }
 0x1a4   : > { %v8951_v60 = vadd.f32 %v1643_v48, %v1074_v46  ;;  %6299 = vmatprep.mubr.msk.f32.mxu1 %vm291_vm6, %v13465_v10  ;;  %3326 = vmatpush1.msra.mxu0 %v8807_v26  ;;  %v3920_v48 = vand.u32 4294901760, %v3919_v27  ;;  %v3927_v53 = vand.u32 4294901760, %v3926_v61  ;;  %13484 = vst [vmem:[#allocation11_spill] sm:$0xff] %v9002_v17  ;;  %13485 = vst [vmem:[#allocation73_spill] sm:$0xff] %v9004_v22  ;;  %v701_v46 = vld [vmem:[%s12502_s1 + $0x138] sm:$0xff] }
 0x1a5   : > { %6231 = vmatprep.mubr.msk.f32.mxu0 %vm283_vm4, %v13465_v10  ;;  %v1076_v36 = vpop.f32.mrf.mxu0  ;;  %3327 = vmatprep.subr.mxu0 %v13157_v49  ;;  %v1664_v32 = vpop.f32.mrf.mxu1 }
 0x1a6   : > { %3329 = vmatpush1.msra.mxu0 %v8831_v24  ;;  %3915 = vmatprep.subr.mxu1 %v13157_v49 }
 0x1a7   : > { %6300 = vmatmul.mubr.msk.f32.gmra.mxu1 %vm290_vm7, %v13465_v10  ;;  %v1089_v23 = vpop.f32.mrf.mxu0  ;;  %6232 = vmatmul.mubr.msk.f32.gmra.mxu0 %vm282_vm5, %v13465_v10  ;;  %v1666_v57 = vpop.f32.mrf.mxu1  ;;  %vm13498_vm5 = vmmov %vm13486_vm0 }
 0x1a8   : > { %v8984_v33 = vadd.f32 %v1650_v31, %v1089_v23  ;;  %6301 = vmatprep.mubr.msk.f32.mxu1 %vm295_vm8, %v13465_v10  ;;  %6233 = vmatprep.mubr.msk.f32.mxu0 %vm287_vm2, %v13465_v10  ;;  %v3934_v23 = vand.u32 4294901760, %v3933_v19  ;;  %v12793_v57 = vand.u32 4294901760, %v9002_v17  ;;  %vm13491_vm2 = vcmp.eq.s32.totalorder %v13487_v45, %v13470_v63 }
 0x1a9   : > { %v1091_v21 = vpop.f32.mrf.mxu0  ;;  %3330 = vmatprep.subr.mxu0 %v13157_v49  ;;  %v1671_v31 = vpop.f32.mrf.mxu1  ;;  %3921 = vmatpush1.msra.mxu1 %v3920_v48 }
 0x1aa   : > { %3332 = vmatpush1.msra.mxu0 %v8853_v7  ;;  %3922 = vmatprep.subr.mxu1 %v13157_v49  ;;  %v9035_v21 = vsub.f32 %v702_v42, %v9004_v22  ;;  %v13493_v42 = vld [vmem:[#allocation75_spill] sm:$0xff] }
 0x1ab   : > { %6302 = vmatmul.mubr.msk.f32.gmra.mxu1 %vm13486_vm0, %v13465_v10  ;;  %v1104_v27 = vpop.f32.mrf.mxu0  ;;  %6234 = vmatmul.mubr.msk.f32.gmra.mxu0 %vm286_vm3, %v13465_v10  ;;  %v1673_v36 = vpop.f32.mrf.mxu1  ;;  %vm13494_vm3 = vcmp.eq.s32.totalorder %v13493_v42, %v13467_v44  ;;  %vm13497_vm4 = vcmp.eq.s32.totalorder %v13493_v42, %v13470_v63  ;;  %vm13506_vm0 = vmmov %vm13491_vm2 }
 0x1ac   : > { %v9017_v52 = vadd.f32 %v1657_v3, %v1104_v27  ;;  %6303 = vmatprep.mubr.msk.f32.mxu1 %vm13488_vm1, %v13465_v10  ;;  %6235 = vmatprep.mubr.msk.f32.mxu0 %vm291_vm6, %v13465_v10  ;;  %v3940_v3 = vsub.f32 %v8964_v18, %v12789_v30  ;;  %13489 = vst [vmem:[#allocation74_spill] sm:$0xff] %v9035_v21  ;;  %v9037_v27 = vand.u32 4294901760, %v701_v46 }
 0x1ad   : > { %v1106_v48 = vpop.f32.mrf.mxu0  ;;  %3333 = vmatprep.subr.mxu0 %v13157_v49  ;;  %v1678_v61 = vpop.f32.mrf.mxu1  ;;  %3928 = vmatpush1.msra.mxu1 %v3927_v53  ;;  %v700_v53 = vld [vmem:[%s12502_s1 + $0x130] sm:$0xff] }
 0x1ae   : > { %3335 = vmatpush1.msra.mxu0 %v8879_v50  ;;  %13490 = vst [vmem:[#allocation7_spill] sm:$0xff] %v9037_v27  ;;  %3929 = vmatprep.subr.mxu1 %v13157_v49  ;;  %v3941_v15 = vand.u32 4294901760, %v3940_v3  ;;  %v9070_v20 = vand.u32 4294901760, %v700_v53 }
 0x1af   : > { %6304 = vmatmul.mubr.msk.f32.gmra.mxu1 %vm13491_vm2, %v13465_v10  ;;  %v1119_v36 = vpop.f32.mrf.mxu0  ;;  %6236 = vmatmul.mubr.msk.f32.gmra.mxu0 %vm290_vm7, %v13465_v10  ;;  %v1680_v48 = vpop.f32.mrf.mxu1  ;;  %vm13502_vm7 = vmmov %vm13488_vm1 }
 0x1b0   : > { %v9050_v19 = vadd.f32 %v1664_v32, %v1119_v36  ;;  %6305 = vmatprep.mubr.msk.f32.mxu1 %vm13494_vm3, %v13465_v10  ;;  %6237 = vmatprep.mubr.msk.f32.mxu0 %vm295_vm8, %v13465_v10  ;;  %v3947_v32 = vsub.f32 %v9002_v17, %v12793_v57  ;;  %v12800_v36 = vand.u32 4294901760, %v9035_v21  ;;  %v9068_v48 = vsub.f32 %v701_v46, %v9037_v27  ;;  %v13500_v46 = vld [vmem:[#allocation78_spill] sm:$0xff]  ;;  %vm13510_vm2 = vmmov %vm13494_vm3 }
 0x1b1   : > { %v1121_v30 = vpop.f32.mrf.mxu0  ;;  %3336 = vmatprep.subr.mxu0 %v13157_v49  ;;  %v1685_v41 = vpop.f32.mrf.mxu1  ;;  %3935 = vmatpush1.msra.mxu1 %v3934_v23  ;;  %13496 = vst [vmem:[#allocation77_spill] sm:$0xff] %v9070_v20  ;;  %vm13501_vm6 = vcmp.eq.s32.totalorder %v13500_v46, %v13467_v44  ;;  %v9103_v18 = vsub.f32 %v700_v53, %v9070_v20  ;;  %v13508_v53 = vld [vmem:[#allocation79_spill] sm:$0xff] }
 0x1b2   : > { %13492 = vst [vmem:[#allocation12_spill] sm:$0xff] %v9050_v19  ;;  %3338 = vmatpush1.msra.mxu0 %v8909_v2  ;;  %13495 = vst [vmem:[#allocation76_spill] sm:$0xff] %v9068_v48  ;;  %v699_v30 = vld [vmem:[%s12502_s1 + $0x128] sm:$0xff]  ;;  %3936 = vmatprep.subr.mxu1 %v13157_v49  ;;  %vm13505_vm8 = vcmp.eq.s32.totalorder %v13500_v46, %v13470_v63  ;;  %vm13509_vm1 = vcmp.eq.s32.totalorder %v13508_v53, %v13467_v44 }
 0x1b3   : > { %6306 = vmatmul.mubr.msk.f32.gmra.mxu1 %vm13497_vm4, %v13465_v10  ;;  %v1134_v3 = vpop.f32.mrf.mxu0  ;;  %6238 = vmatmul.mubr.msk.f32.gmra.mxu0 %vm13498_vm5, %v13465_v10  ;;  %v1687_v57 = vpop.f32.mrf.mxu1  ;;  %v9095_v14 = vand.u32 4294901760, %v699_v30  ;;  %13504 = vst [vmem:[#allocation9_spill] sm:$0xff] %v9103_v18  ;;  %vm13514_vm3 = vcmp.eq.s32.totalorder %v13508_v53, %v13470_v63 }
 0x1b4   : > { %v9083_v23 = vadd.f32 %v1671_v31, %v1134_v3  ;;  %6307 = vmatprep.mubr.msk.f32.mxu1 %vm13501_vm6, %v13465_v10  ;;  %6239 = vmatprep.mubr.msk.f32.mxu0 %vm13502_vm7, %v13465_v10  ;;  %v3948_v3 = vand.u32 4294901760, %v3947_v32  ;;  %v3954_v57 = vsub.f32 %v9035_v21, %v12800_v36 }
 0x1b5   : > { %v1136_v9 = vpop.f32.mrf.mxu0  ;;  %3339 = vmatprep.subr.mxu0 %v13157_v49  ;;  %13503 = vst [vmem:[#allocation13_spill] sm:$0xff] %v9095_v14  ;;  %v1692_v31 = vpop.f32.mrf.mxu1  ;;  %3942 = vmatpush1.msra.mxu1 %v3941_v15  ;;  %v698_v15 = vld [vmem:[%s12502_s1 + $0x120] sm:$0xff]  ;;  %v9129_v21 = vsub.f32 %v699_v30, %v9095_v14  ;;  %v697_v30 = vld [vmem:[%s12502_s1 + $0x118] sm:$0xff] }
 0x1b6   : > { %13499 = vst [vmem:[#allocation8_spill] sm:$0xff] %v9083_v23  ;;  %3341 = vmatpush1.msra.mxu0 %v8930_v0  ;;  %3943 = vmatprep.subr.mxu1 %v13157_v49  ;;  %v9136_v23 = vand.u32 4294901760, %v698_v15  ;;  %v9169_v55 = vand.u32 4294901760, %v697_v30 }
 0x1b7   : > { %6308 = vmatmul.mubr.msk.f32.gmra.mxu1 %vm13505_vm8, %v13465_v10  ;;  %v1149_v9 = vpop.f32.mrf.mxu0  ;;  %6240 = vmatmul.mubr.msk.f32.gmra.mxu0 %vm13506_vm0, %v13465_v10  ;;  %v1694_v36 = vpop.f32.mrf.mxu1  ;;  %13511 = vst [vmem:[#allocation16_spill] sm:$0xff] %v9129_v21 }
 0x1b8   : > { %v9116_v32 = vadd.f32 %v1678_v61, %v1149_v9  ;;  %6309 = vmatprep.mubr.msk.f32.mxu1 %vm13509_vm1, %v13465_v10  ;;  %6241 = vmatprep.mubr.msk.f32.mxu0 %vm13510_vm2, %v13465_v10  ;;  %v3955_v9 = vand.u32 4294901760, %v3954_v57  ;;  %v13512_v36 = vand.u32 4294901760, %v9068_v48  ;;  %13513 = vst [vmem:[#allocation15_spill] sm:$0xff] %v9136_v23  ;;  %v13516_v57 = vld [vmem:[#allocation80_spill] sm:$0xff]  ;;  %13520 = vst [vmem:[#allocation20_spill] sm:$0xff] %v9169_v55 }
 0x1b9   : > { %v1151_v17 = vpop.f32.mrf.mxu0  ;;  %3342 = vmatprep.subr.mxu0 %v13157_v49  ;;  %v1699_v61 = vpop.f32.mrf.mxu1  ;;  %3949 = vmatpush1.msra.mxu1 %v3948_v3  ;;  %vm13517_vm5 = vcmp.eq.s32.totalorder %v13516_v57, %v13467_v44  ;;  %vm13521_vm7 = vcmp.eq.s32.totalorder %v13516_v57, %v13470_v63 }
 0x1ba   : > { %13507 = vst [vmem:[#allocation14_spill] sm:$0xff] %v9116_v32  ;;  %3344 = vmatpush1.msra.mxu0 %v8971_v51  ;;  %v3961_v32 = vsub.f32 %v9068_v48, %v13512_v36  ;;  %3950 = vmatprep.subr.mxu1 %v13157_v49  ;;  %v9167_v51 = vsub.f32 %v698_v15, %v9136_v23  ;;  %v13523_v15 = vld [vmem:[#allocation81_spill] sm:$0xff] }
 0x1bb   : > { %6310 = vmatmul.mubr.msk.f32.gmra.mxu1 %vm13514_vm3, %v13465_v10  ;;  %v1164_v17 = vpop.f32.mrf.mxu0  ;;  %6242 = vmatmul.mubr.msk.f32.gmra.mxu0 %vm13497_vm4, %v13465_v10  ;;  %v1701_v36 = vpop.f32.mrf.mxu1  ;;  %vm13524_vm0 = vcmp.eq.s32.totalorder %v13523_v15, %v13467_v44  ;;  %vm13528_vm2 = vcmp.eq.s32.totalorder %v13523_v15, %v13470_v63 }
 0x1bc   : > { %v9149_v3 = vadd.f32 %v1685_v41, %v1164_v17  ;;  %6311 = vmatprep.mubr.msk.f32.mxu1 %vm13517_vm5, %v13465_v10  ;;  %6243 = vmatprep.mubr.msk.f32.mxu0 %vm13501_vm6, %v13465_v10  ;;  %v3962_v17 = vand.u32 4294901760, %v3961_v32  ;;  %13519 = vst [vmem:[#allocation17_spill] sm:$0xff] %v9167_v51  ;;  %v696_v32 = vld [vmem:[%s12502_s1 + $0x110] sm:$0xff] }
 0x1bd   : > { %v1166_v0 = vpop.f32.mrf.mxu0  ;;  %3345 = vmatprep.subr.mxu0 %v13157_v49  ;;  %v1706_v41 = vpop.f32.mrf.mxu1  ;;  %3956 = vmatpush1.msra.mxu1 %v3955_v9  ;;  %v9202_v2 = vand.u32 4294901760, %v696_v32 }
 0x1be   : > { %13515 = vst [vmem:[#allocation18_spill] sm:$0xff] %v9149_v3  ;;  %3347 = vmatpush1.msra.mxu0 %v9004_v22  ;;  %v13518_v3 = vand.u32 4294901760, %v9103_v18  ;;  %3957 = vmatprep.subr.mxu1 %v13157_v49  ;;  %v9200_v22 = vsub.f32 %v697_v30, %v9169_v55  ;;  %v13530_v30 = vld [vmem:[#allocation82_spill] sm:$0xff] }
 0x1bf   : > { %6312 = vmatmul.mubr.msk.f32.gmra.mxu1 %vm13521_vm7, %v13465_v10  ;;  %v1179_v0 = vpop.f32.mrf.mxu0  ;;  %6244 = vmatmul.mubr.msk.f32.gmra.mxu0 %vm13505_vm8, %v13465_v10  ;;  %13527 = vst [vmem:[#allocation19_spill] sm:$0xff] %v9202_v2  ;;  %vm13531_vm4 = vcmp.eq.s32.totalorder %v13530_v30, %v13467_v44  ;;  %vm13535_vm6 = vcmp.eq.s32.totalorder %v13530_v30, %v13470_v63 }
 0x1c0   : > { %v3968_v36 = vsub.f32 %v9103_v18, %v13518_v3  ;;  %v9182_v9 = vadd.f32 %v1692_v31, %v1179_v0  ;;  %6313 = vmatprep.mubr.msk.f32.mxu1 %vm13524_vm0, %v13465_v10  ;;  %v1708_v3 = vpop.f32.mrf.mxu1  ;;  %6245 = vmatprep.mubr.msk.f32.mxu0 %vm13509_vm1, %v13465_v10  ;;  %v13525_v18 = vand.u32 4294901760, %v9129_v21  ;;  %13526 = vst [vmem:[#allocation85_spill] sm:$0xff] %v9200_v22 }
 0x1c1   : > { %v1181_v48 = vpop.f32.mrf.mxu0  ;;  %3348 = vmatprep.subr.mxu0 %v13157_v49  ;;  %3963 = vmatpush1.msra.mxu1 %v3962_v17 }
 0x1c2   : > { %13522 = vst [vmem:[#allocation83_spill] sm:$0xff] %v9182_v9  ;;  %v3975_v31 = vsub.f32 %v9129_v21, %v13525_v18  ;;  %v1713_v0 = vpop.f32.mrf.mxu1  ;;  %3350 = vmatpush1.msra.mxu0 %v9037_v27  ;;  %v3969_v9 = vand.u32 4294901760, %v3968_v36  ;;  %v695_v18 = vld [vmem:[%s12502_s1 + $0x108] sm:$0xff]  ;;  %3964 = vmatprep.subr.mxu1 %v13157_v49 }
 0x1c3   : > { %6314 = vmatmul.mubr.msk.f32.gmra.mxu1 %vm13528_vm2, %v13465_v10  ;;  %v1194_v48 = vpop.f32.mrf.mxu0  ;;  %6246 = vmatmul.mubr.msk.f32.gmra.mxu0 %vm13514_vm3, %v13465_v10  ;;  %v9235_v19 = vand.u32 4294901760, %v695_v18 }
 0x1c4   : > { %v9215_v17 = vadd.f32 %v1699_v61, %v1194_v48  ;;  %6315 = vmatprep.mubr.msk.f32.mxu1 %vm13531_vm4, %v13465_v10  ;;  %v1715_v36 = vpop.f32.mrf.mxu1  ;;  %6247 = vmatprep.mubr.msk.f32.mxu0 %vm13517_vm5, %v13465_v10  ;;  %v3976_v21 = vand.u32 4294901760, %v3975_v31  ;;  %v13532_v61 = vand.u32 4294901760, %v9167_v51 }
 0x1c5   : > { %v1196_v3 = vpop.f32.mrf.mxu0  ;;  %3351 = vmatprep.subr.mxu0 %v13157_v49  ;;  %3970 = vmatpush1.msra.mxu1 %v3969_v9  ;;  %13534 = vst [vmem:[#allocation24_spill] sm:$0xff] %v9235_v19  ;;  %v9268_v57 = vsub.f32 %v695_v18, %v9235_v19  ;;  %v13544_v18 = vld [vmem:[#allocation86_spill] sm:$0xff] }
 0x1c6   : > { %13529 = vst [vmem:[#allocation21_spill] sm:$0xff] %v9215_v17  ;;  %v1720_v27 = vpop.f32.mrf.mxu1  ;;  %3353 = vmatpush1.msra.mxu0 %v9070_v20  ;;  %v3982_v48 = vsub.f32 %v9167_v51, %v13532_v61  ;;  %v9233_v17 = vsub.f32 %v696_v32, %v9202_v2  ;;  %v694_v3 = vld [vmem:[%s12502_s1 + $0x100] sm:$0xff]  ;;  %v13537_v32 = vld [vmem:[#allocation84_spill] sm:$0xff]  ;;  %3971 = vmatprep.subr.mxu1 %v13157_v49 }
 0x1c7   : > { %6316 = vmatmul.mubr.msk.f32.gmra.mxu1 %vm13535_vm6, %v13465_v10  ;;  %v1209_v9 = vpop.f32.mrf.mxu0  ;;  %6248 = vmatmul.mubr.msk.f32.gmra.mxu0 %vm13521_vm7, %v13465_v10  ;;  %vm13538_vm8 = vcmp.eq.s32.totalorder %v13537_v32, %v13467_v44  ;;  %v9260_v51 = vand.u32 4294901760, %v694_v3  ;;  %13541 = vst [vmem:[#allocation89_spill] sm:$0xff] %v9268_v57  ;;  %vm13542_vm1 = vcmp.eq.s32.totalorder %v13537_v32, %v13470_v63 }
 0x1c8   : > { %13533 = vst [vmem:[#allocation22_spill] sm:$0xff] %v9233_v17  ;;  %v9248_v31 = vadd.f32 %v1706_v41, %v1209_v9  ;;  %6317 = vmatprep.mubr.msk.f32.mxu1 %vm13538_vm8, %v13465_v10  ;;  %v1722_v61 = vpop.f32.mrf.mxu1  ;;  %6249 = vmatprep.mubr.msk.f32.mxu0 %vm13524_vm0, %v13465_v10  ;;  %v3983_v9 = vand.u32 4294901760, %v3982_v48  ;;  %vm13545_vm3 = vcmp.eq.s32.totalorder %v13544_v18, %v13467_v44 }
 0x1c9   : > { %v1211_v36 = vpop.f32.mrf.mxu0  ;;  %3354 = vmatprep.subr.mxu0 %v13157_v49  ;;  %13539 = vst [vmem:[#allocation26_spill] sm:$0xff] %v9260_v51  ;;  %3977 = vmatpush1.msra.mxu1 %v3976_v21  ;;  %v725_v21 = vld [vmem:[%s12502_s1 + $0x1f8] sm:$0xff]  ;;  %vm13549_vm5 = vcmp.eq.s32.totalorder %v13544_v18, %v13470_v63 }
 0x1ca   : > { %13536 = vst [vmem:[#allocation23_spill] sm:$0xff] %v9248_v31  ;;  %v1727_v41 = vpop.f32.mrf.mxu1  ;;  %3356 = vmatpush1.msra.mxu0 %v9095_v14  ;;  %v13540_v31 = vand.u32 4294901760, %v9200_v22  ;;  %3978 = vmatprep.subr.mxu1 %v13157_v49  ;;  %v9301_v15 = vand.u32 4294901760, %v725_v21 }
 0x1cb   : > { %6318 = vmatmul.mubr.msk.f32.gmra.mxu1 %vm13542_vm1, %v13465_v10  ;;  %v1224_v36 = vpop.f32.mrf.mxu0  ;;  %6250 = vmatmul.mubr.msk.f32.gmra.mxu0 %vm13528_vm2, %v13465_v10 }
 0x1cc   : > { %v3989_v61 = vsub.f32 %v9200_v22, %v13540_v31  ;;  %v9281_v48 = vadd.f32 %v1713_v0, %v1224_v36  ;;  %6319 = vmatprep.mubr.msk.f32.mxu1 %vm13545_vm3, %v13465_v10  ;;  %v1729_v31 = vpop.f32.mrf.mxu1  ;;  %6251 = vmatprep.mubr.msk.f32.mxu0 %vm13531_vm4, %v13465_v10  ;;  %v9294_v22 = vsub.f32 %v694_v3, %v9260_v51  ;;  %v724_v3 = vld [vmem:[%s12502_s1 + $0x1f0] sm:$0xff] }
 0x1cd   : > { %v1226_v20 = vpop.f32.mrf.mxu0  ;;  %3357 = vmatprep.subr.mxu0 %v13157_v49  ;;  %3984 = vmatpush1.msra.mxu1 %v3983_v9  ;;  %v13547_v31 = vand.u32 4294901760, %v9233_v17  ;;  %13548 = vst [vmem:[#allocation27_spill] sm:$0xff] %v9301_v15  ;;  %v9334_v30 = vand.u32 4294901760, %v724_v3 }
 0x1ce   : > { %13543 = vst [vmem:[#allocation91_spill] sm:$0xff] %v9281_v48  ;;  %13546 = vst [vmem:[#allocation25_spill] sm:$0xff] %v9294_v22  ;;  %v1734_v0 = vpop.f32.mrf.mxu1  ;;  %3359 = vmatpush1.msra.mxu0 %v9136_v23  ;;  %v3990_v36 = vand.u32 4294901760, %v3989_v61  ;;  %v13551_v61 = vld [vmem:[#allocation87_spill] sm:$0xff]  ;;  %3985 = vmatprep.subr.mxu1 %v13157_v49  ;;  %v9332_v23 = vsub.f32 %v725_v21, %v9301_v15  ;;  %v13558_v21 = vld [vmem:[#allocation88_spill] sm:$0xff] }
 0x1cf   : > { %v3996_v48 = vsub.f32 %v9233_v17, %v13547_v31  ;;  %6320 = vmatmul.mubr.msk.f32.gmra.mxu1 %vm13549_vm5, %v13465_v10  ;;  %v1239_v20 = vpop.f32.mrf.mxu0  ;;  %6252 = vmatmul.mubr.msk.f32.gmra.mxu0 %vm13535_vm6, %v13465_v10  ;;  %vm13552_vm7 = vcmp.eq.s32.totalorder %v13551_v61, %v13467_v44  ;;  %13555 = vst [vmem:[#allocation95_spill] sm:$0xff] %v9334_v30 }
 0x1d0   : > { %v9314_v9 = vadd.f32 %v1720_v27, %v1239_v20  ;;  %6321 = vmatprep.mubr.msk.f32.mxu1 %vm13552_vm7, %v13465_v10  ;;  %v1736_v31 = vpop.f32.mrf.mxu1  ;;  %6253 = vmatprep.mubr.msk.f32.mxu0 %vm13538_vm8, %v13465_v10  ;;  %13554 = vst [vmem:[#allocation30_spill] sm:$0xff] %v9332_v23  ;;  %vm13556_vm0 = vcmp.eq.s32.totalorder %v13551_v61, %v13470_v63 }
 0x1d1   : > { %v1241_v14 = vpop.f32.mrf.mxu0  ;;  %3360 = vmatprep.subr.mxu0 %v13157_v49  ;;  %3991 = vmatpush1.msra.mxu1 %v3990_v36  ;;  %v3997_v20 = vand.u32 4294901760, %v3996_v48  ;;  %v723_v48 = vld [vmem:[%s12502_s1 + $0x1e8] sm:$0xff]  ;;  %vm13559_vm2 = vcmp.eq.s32.totalorder %v13558_v21, %v13467_v44  ;;  %vm13563_vm4 = vcmp.eq.s32.totalorder %v13558_v21, %v13470_v63 }
 0x1d2   : > { %13550 = vst [vmem:[#allocation28_spill] sm:$0xff] %v9314_v9  ;;  %v1741_v27 = vpop.f32.mrf.mxu1  ;;  %3362 = vmatpush1.msra.mxu0 %v9169_v55  ;;  %v13553_v9 = vand.u32 4294901760, %v9268_v57  ;;  %3992 = vmatprep.subr.mxu1 %v13157_v49  ;;  %v9365_v55 = vsub.f32 %v724_v3, %v9334_v30  ;;  %v9367_v32 = vand.u32 4294901760, %v723_v48  ;;  %v13565_v3 = vld [vmem:[#allocation90_spill] sm:$0xff] }
 0x1d3   : > { %6322 = vmatmul.mubr.msk.f32.gmra.mxu1 %vm13556_vm0, %v13465_v10  ;;  %v1254_v14 = vpop.f32.mrf.mxu0  ;;  %6254 = vmatmul.mubr.msk.f32.gmra.mxu0 %vm13542_vm1, %v13465_v10  ;;  %vm13566_vm6 = vcmp.eq.s32.totalorder %v13565_v3, %v13467_v44  ;;  %vm13570_vm8 = vcmp.eq.s32.totalorder %v13565_v3, %v13470_v63 }
 0x1d4   : > { %v4003_v31 = vsub.f32 %v9268_v57, %v13553_v9  ;;  %v9347_v36 = vadd.f32 %v1727_v41, %v1254_v14  ;;  %6323 = vmatprep.mubr.msk.f32.mxu1 %vm13559_vm2, %v13465_v10  ;;  %v1743_v9 = vpop.f32.mrf.mxu1  ;;  %6255 = vmatprep.mubr.msk.f32.mxu0 %vm13545_vm3, %v13465_v10  ;;  %v13560_v57 = vand.u32 4294901760, %v9294_v22  ;;  %13561 = vst [vmem:[#allocation32_spill] sm:$0xff] %v9365_v55  ;;  %13562 = vst [vmem:[#allocation31_spill] sm:$0xff] %v9367_v32 }
 0x1d5   : > { %v1256_v17 = vpop.f32.mrf.mxu0  ;;  %3363 = vmatprep.subr.mxu0 %v13157_v49  ;;  %3998 = vmatpush1.msra.mxu1 %v3997_v20 }
 0x1d6   : > { %13557 = vst [vmem:[#allocation29_spill] sm:$0xff] %v9347_v36  ;;  %v4010_v41 = vsub.f32 %v9294_v22, %v13560_v57  ;;  %v1748_v14 = vpop.f32.mrf.mxu1  ;;  %3365 = vmatpush1.msra.mxu0 %v9202_v2  ;;  %v4004_v36 = vand.u32 4294901760, %v4003_v31  ;;  %v722_v57 = vld [vmem:[%s12502_s1 + $0x1e0] sm:$0xff]  ;;  %3999 = vmatprep.subr.mxu1 %v13157_v49 }
 0x1d7   : > { %6324 = vmatmul.mubr.msk.f32.gmra.mxu1 %vm13563_vm4, %v13465_v10  ;;  %v1269_v17 = vpop.f32.mrf.mxu0  ;;  %6256 = vmatmul.mubr.msk.f32.gmra.mxu0 %vm13549_vm5, %v13465_v10  ;;  %v9400_v2 = vand.u32 4294901760, %v722_v57 }
 0x1d8   : > { %v9380_v20 = vadd.f32 %v1734_v0, %v1269_v17  ;;  %6325 = vmatprep.mubr.msk.f32.mxu1 %vm13566_vm6, %v13465_v10  ;;  %v1750_v31 = vpop.f32.mrf.mxu1  ;;  %6257 = vmatprep.mubr.msk.f32.mxu0 %vm13552_vm7, %v13465_v10  ;;  %v4011_v22 = vand.u32 4294901760, %v4010_v41  ;;  %v13567_v0 = vand.u32 4294901760, %v9332_v23  ;;  %v13572_v41 = vld [vmem:[#allocation92_spill] sm:$0xff] }
 0x1d9   : > { %v1271_v9 = vpop.f32.mrf.mxu0  ;;  %3366 = vmatprep.subr.mxu0 %v13157_v49  ;;  %4005 = vmatpush1.msra.mxu1 %v4004_v36  ;;  %13569 = vst [vmem:[#allocation33_spill] sm:$0xff] %v9400_v2  ;;  %vm13573_vm1 = vcmp.eq.s32.totalorder %v13572_v41, %v13467_v44  ;;  %v9433_v61 = vsub.f32 %v722_v57, %v9400_v2  ;;  %v13579_v57 = vld [vmem:[#allocation93_spill] sm:$0xff] }
 0x1da   : > { %13564 = vst [vmem:[#allocation34_spill] sm:$0xff] %v9380_v20  ;;  %3368 = vmatpush1.msra.mxu0 %v9235_v19  ;;  %v4017_v17 = vsub.f32 %v9332_v23, %v13567_v0  ;;  %v9398_v20 = vsub.f32 %v723_v48, %v9367_v32  ;;  %v721_v9 = vld [vmem:[%s12502_s1 + $0x1d8] sm:$0xff]  ;;  %v2273_v18 = vpop.f32.mrf.mxu1  ;;  %4006 = vmatprep.subr.mxu1 %v13157_v49 }
 0x1db   : > { %6326 = vmatmul.mubr.msk.f32.gmra.mxu1 %vm13570_vm8, %v13465_v10  ;;  %v1284_v36 = vpop.f32.mrf.mxu0  ;;  %6258 = vmatmul.mubr.msk.f32.gmra.mxu0 %vm13556_vm0, %v13465_v10  ;;  %v9425_v23 = vand.u32 4294901760, %v721_v9  ;;  %13576 = vst [vmem:[#allocation101_spill] sm:$0xff] %v9433_v61  ;;  %vm13577_vm3 = vcmp.eq.s32.totalorder %v13572_v41, %v13470_v63  ;;  %vm13580_vm5 = vcmp.eq.s32.totalorder %v13579_v57, %v13467_v44  ;;  %v13588_v3 = vand.u32 4294901760, %v9433_v61 }
 0x1dc   : > { %13568 = vst [vmem:[#allocation98_spill] sm:$0xff] %v9398_v20  ;;  %v9413_v48 = vadd.f32 %v1741_v27, %v1284_v36  ;;  %6327 = vmatprep.mubr.msk.f32.mxu1 %vm13573_vm1, %v13465_v10  ;;  %6259 = vmatprep.mubr.msk.f32.mxu0 %vm13559_vm2, %v13465_v10  ;;  %v2275_v0 = vpop.f32.mrf.mxu1  ;;  %v4018_v27 = vand.u32 4294901760, %v4017_v17  ;;  %v13575_v36 = vand.u32 4294901760, %v9365_v55  ;;  %vm13584_vm7 = vcmp.eq.s32.totalorder %v13579_v57, %v13470_v63 }
 0x1dd   : > { %v1286_v31 = vpop.f32.mrf.mxu0  ;;  %3369 = vmatprep.subr.mxu0 %v13157_v49  ;;  %13574 = vst [vmem:[#allocation100_spill] sm:$0xff] %v9425_v23  ;;  %4012 = vmatpush1.msra.mxu1 %v4011_v22  ;;  %v4038_v21 = vsub.f32 %v9433_v61, %v13588_v3 }
 0x1de   : > { %13571 = vst [vmem:[#allocation36_spill] sm:$0xff] %v9413_v48  ;;  %3371 = vmatpush1.msra.mxu0 %v9260_v51  ;;  %v4024_v48 = vsub.f32 %v9365_v55, %v13575_v36  ;;  %v720_v31 = vld [vmem:[%s12502_s1 + $0x1d0] sm:$0xff]  ;;  %v2284_v0 = vpop.f32.mrf.mxu1  ;;  %4013 = vmatprep.subr.mxu1 %v13157_v49  ;;  %v9459_v55 = vsub.f32 %v721_v9, %v9425_v23 }
 0x1df   : > { %6328 = vmatmul.mubr.msk.f32.gmra.mxu1 %vm13577_vm3, %v13465_v10  ;;  %v1299_v22 = vpop.f32.mrf.mxu0  ;;  %6260 = vmatmul.mubr.msk.f32.gmra.mxu0 %vm13563_vm4, %v13465_v10  ;;  %v4039_v61 = vand.u32 4294901760, %v4038_v21  ;;  %v717_v21 = vld [vmem:[%s12502_s1 + $0x1b8] sm:$0xff] }
 0x1e0   : > { %v9446_v17 = vadd.f32 %v1748_v14, %v1299_v22  ;;  %6329 = vmatprep.mubr.msk.f32.mxu1 %vm13580_vm5, %v13465_v10  ;;  %6261 = vmatprep.mubr.msk.f32.mxu0 %vm13566_vm6, %v13465_v10  ;;  %v2286_v36 = vpop.f32.mrf.mxu1  ;;  %13581 = vst [vmem:[#allocation38_spill] sm:$0xff] %v9459_v55  ;;  %v9461_v14 = vand.u32 4294901760, %v720_v31  ;;  %v4025_v22 = vand.u32 4294901760, %v4024_v48  ;;  %v719_v48 = vld [vmem:[%s12502_s1 + $0x1c8] sm:$0xff] }
 0x1e1   : > { %v1301_v19 = vpop.f32.mrf.mxu0  ;;  %3372 = vmatprep.subr.mxu0 %v13157_v49  ;;  %4019 = vmatpush2.msra.mxu1 %v4018_v27  ;;  %v9498_v54 = vand.u32 4294901760, %v719_v48 }
 0x1e2   : > { %13578 = vst [vmem:[#allocation35_spill] sm:$0xff] %v9446_v17  ;;  %13582 = vst [vmem:[#allocation103_spill] sm:$0xff] %v9461_v14  ;;  %3374 = vmatpush2.msra.mxu0 %v9301_v15  ;;  %v13583_v17 = vand.u32 4294901760, %v9398_v20  ;;  %v2295_v19 = vpop.f32.mrf.mxu1  ;;  %4020 = vmatprep.subr.mxu1 %v13157_v49  ;;  %v12867_v15 = vand.u32 4294901760, %v9459_v55 }
 0x1e3   : > { %6330 = vmatmul.mubr.msk.f32.gmra.mxu1 %vm13584_vm7, %v13465_v10  ;;  %v1886_v9 = vpop.f32.mrf.mxu0  ;;  %6262 = vmatmul.mubr.msk.f32.gmra.mxu0 %vm13570_vm8, %v13465_v10  ;;  %13589 = vst [vmem:[#allocation37_spill] sm:$0xff] %v9498_v54 }
 0x1e4   : > { %v4031_v51 = vsub.f32 %v9398_v20, %v13583_v17  ;;  %v1887_v27 = vadd.f32 %v1886_v9, %v8667_v8  ;;  %v13585_v17 = vld [vmem:[#allocation94_spill] sm:$0xff]  ;;  %6263 = vmatprep.mubr.msk.f32.mxu0 %vm13573_vm1, %v13465_v10  ;;  %v2297_v36 = vpop.f32.mrf.mxu1  ;;  %3375 = vmatprep.subr.mxu0 %v13157_v49  ;;  %v9492_v8 = vsub.f32 %v720_v31, %v9461_v14 }
 0x1e5   : > { %vm13586_vm0 = vcmp.eq.s32.totalorder %v13585_v17, %v13467_v44  ;;  %v1888_v20 = vpop.f32.mrf.mxu0  ;;  %3377 = vmatpush2.msra.mxu0 %v9334_v30  ;;  %4026 = vmatpush2.msra.mxu1 %v4025_v22  ;;  %vm13591_vm2 = vcmp.eq.s32.totalorder %v13585_v17, %v13470_v63  ;;  %v9530_v30 = vsub.f32 %v719_v48, %v9498_v54 }
 0x1e6   : > { %6331 = vmatprep.mubr.msk.f32.mxu1 %vm13586_vm0, %v13465_v10  ;;  %13587 = vst [vmem:[#allocation104_spill] sm:$0xff] %v9492_v8  ;;  %v4032_v9 = vand.u32 4294901760, %v4031_v51  ;;  %v9500_v20 = vadd.f32 %v2273_v18, %v1887_v27  ;;  %v2306_v36 = vpop.f32.mrf.mxu1  ;;  %v718_v51 = vld [vmem:[%s12502_s1 + $0x1c0] sm:$0xff]  ;;  %v13592_v18 = vld [vmem:[#allocation96_spill] sm:$0xff]  ;;  %3378 = vmatprep.subr.mxu0 %v13157_v49 }
 0x1e7   : > { %6332 = vmatmul.mubr.msk.f32.gmra.mxu1 %vm13591_vm2, %v13465_v10  ;;  %v1895_v31 = vpop.f32.mrf.mxu0  ;;  %6264 = vmatmul.mubr.msk.f32.gmra.mxu0 %vm13577_vm3, %v13465_v10  ;;  %vm13593_vm4 = vcmp.eq.s32.totalorder %v13592_v18, %v13467_v44  ;;  %13594 = vst [vmem:[#allocation106_spill] sm:$0xff] %v9530_v30  ;;  %vm13597_vm6 = vcmp.eq.s32.totalorder %v13592_v18, %v13470_v63 }
 0x1e8   : > { %13590 = vst [vmem:[#allocation40_spill] sm:$0xff] %v9500_v20  ;;  %v1896_v3 = vadd.f32 %v1895_v31, %v8680_v25  ;;  %6333 = vmatprep.mubr.msk.f32.mxu1 %vm13593_vm4, %v13465_v10  ;;  %6265 = vmatprep.mubr.msk.f32.mxu0 %vm13580_vm5, %v13465_v10  ;;  %v2308_v22 = vpop.f32.mrf.mxu1  ;;  %v4045_v25 = vsub.f32 %v9459_v55, %v12867_v15  ;;  %v9532_v20 = vand.u32 4294901760, %v718_v51  ;;  %v13600_v55 = vand.u32 4294901760, %v9492_v8 }
 0x1e9   : > { %v1897_v27 = vpop.f32.mrf.mxu0  ;;  %4027 = vmatprep.subr.mxu1 %v13157_v49  ;;  %3380 = vmatpush2.msra.mxu0 %v9367_v32 }
 0x1ea   : > { %4033 = vmatpush2.msra.mxu1 %v4032_v9  ;;  %13595 = vst [vmem:[#allocation107_spill] sm:$0xff] %v9532_v20  ;;  %v9534_v22 = vadd.f32 %v2284_v0, %v1896_v3  ;;  %v2317_v27 = vpop.f32.mrf.mxu1  ;;  %v13598_v0 = vld [vmem:[#allocation97_spill] sm:$0xff]  ;;  %3381 = vmatprep.subr.mxu0 %v13157_v49  ;;  %v4046_v31 = vand.u32 4294901760, %v4045_v25  ;;  %v9564_v32 = vsub.f32 %v718_v51, %v9532_v20  ;;  %v13605_v51 = vld [vmem:[#allocation99_spill] sm:$0xff] }
 0x1eb   : > { %6334 = vmatmul.mubr.msk.f32.gmra.mxu1 %vm13597_vm6, %v13465_v10  ;;  %v1904_v15 = vpop.f32.mrf.mxu0  ;;  %6266 = vmatmul.mubr.msk.f32.gmra.mxu0 %vm13584_vm7, %v13465_v10  ;;  %vm13599_vm8 = vcmp.eq.s32.totalorder %v13598_v0, %v13467_v44  ;;  %vm13604_vm1 = vcmp.eq.s32.totalorder %v13598_v0, %v13470_v63  ;;  %vm13606_vm3 = vcmp.eq.s32.totalorder %v13605_v51, %v13467_v44 }
 0x1ec   : > { %13596 = vst [vmem:[#allocation39_spill] sm:$0xff] %v9534_v22  ;;  %v1905_v48 = vadd.f32 %v1904_v15, %v8693_v1  ;;  %6335 = vmatprep.mubr.msk.f32.mxu1 %vm13599_vm8, %v13465_v10  ;;  %6267 = vmatprep.mubr.msk.f32.mxu0 %vm13586_vm0, %v13465_v10  ;;  %v2319_v9 = vpop.f32.mrf.mxu1  ;;  %v4052_v1 = vsub.f32 %v9492_v8, %v13600_v55  ;;  %13601 = vst [vmem:[#allocation42_spill] sm:$0xff] %v9564_v32  ;;  %v9566_v22 = vand.u32 4294901760, %v717_v21 }
 0x1ed   : > { %v1906_v3 = vpop.f32.mrf.mxu0  ;;  %4034 = vmatprep.subr.mxu1 %v13157_v49  ;;  %3383 = vmatpush2.msra.mxu0 %v9400_v2  ;;  %v716_v9 = vld [vmem:[%s12502_s1 + $0x1b0] sm:$0xff]  ;;  %vm13611_vm5 = vcmp.eq.s32.totalorder %v13605_v51, %v13470_v63 }
 0x1ee   : > { %4040 = vmatpush2.msra.mxu1 %v4039_v61  ;;  %13602 = vst [vmem:[#allocation108_spill] sm:$0xff] %v9566_v22  ;;  %v9571_v3 = vadd.f32 %v2295_v19, %v1905_v48  ;;  %v2328_v25 = vpop.f32.mrf.mxu1  ;;  %3384 = vmatprep.subr.mxu0 %v13157_v49  ;;  %v4053_v15 = vand.u32 4294901760, %v4052_v1  ;;  %v9592_v8 = vand.u32 4294901760, %v716_v9 }
 0x1ef   : > { %6336 = vmatmul.mubr.msk.f32.gmra.mxu1 %vm13604_vm1, %v13465_v10  ;;  %v1913_v55 = vpop.f32.mrf.mxu0  ;;  %6268 = vmatmul.mubr.msk.f32.gmra.mxu0 %vm13591_vm2, %v13465_v10 }
 0x1f0   : > { %13603 = vst [vmem:[#allocation110_spill] sm:$0xff] %v9571_v3  ;;  %v1914_v61 = vadd.f32 %v1913_v55, %v8706_v12  ;;  %6337 = vmatprep.mubr.msk.f32.mxu1 %vm13606_vm3, %v13465_v10  ;;  %6269 = vmatprep.mubr.msk.f32.mxu0 %vm13593_vm4, %v13465_v10  ;;  %v2330_v19 = vpop.f32.mrf.mxu1  ;;  %13607 = vst [vmem:[#allocation41_spill] sm:$0xff] %v9592_v8  ;;  %v13608_v12 = vand.u32 4294901760, %v9530_v30  ;;  %v9600_v3 = vsub.f32 %v717_v21, %v9566_v22 }
 0x1f1   : > { %v1915_v48 = vpop.f32.mrf.mxu0  ;;  %4041 = vmatprep.subr.mxu1 %v13157_v49  ;;  %3386 = vmatpush2.msra.mxu0 %v9425_v23  ;;  %v715_v19 = vld [vmem:[%s12502_s1 + $0x1a8] sm:$0xff]  ;;  %v9627_v2 = vsub.f32 %v716_v9, %v9592_v8 }
 0x1f2   : > { %4047 = vmatpush2.msra.mxu1 %v4046_v31  ;;  %v4059_v55 = vsub.f32 %v9530_v30, %v13608_v12  ;;  %13609 = vst [vmem:[#allocation44_spill] sm:$0xff] %v9600_v3  ;;  %v9605_v48 = vadd.f32 %v2306_v36, %v1914_v61  ;;  %v2339_v1 = vpop.f32.mrf.mxu1  ;;  %v13612_v12 = vld [vmem:[#allocation102_spill] sm:$0xff]  ;;  %3387 = vmatprep.subr.mxu0 %v13157_v49  ;;  %v13616_v30 = vand.u32 4294901760, %v9564_v32 }
 0x1f3   : > { %6338 = vmatmul.mubr.msk.f32.gmra.mxu1 %vm13611_vm5, %v13465_v10  ;;  %v1922_v31 = vpop.f32.mrf.mxu0  ;;  %6270 = vmatmul.mubr.msk.f32.gmra.mxu0 %vm13597_vm6, %v13465_v10  ;;  %vm13613_vm7 = vcmp.eq.s32.totalorder %v13612_v12, %v13467_v44  ;;  %13614 = vst [vmem:[#allocation43_spill] sm:$0xff] %v9627_v2  ;;  %vm13618_vm0 = vcmp.eq.s32.totalorder %v13612_v12, %v13470_v63 }
 0x1f4   : > { %13610 = vst [vmem:[#allocation112_spill] sm:$0xff] %v9605_v48  ;;  %v1923_v21 = vadd.f32 %v1922_v31, %v8719_v13  ;;  %6339 = vmatprep.mubr.msk.f32.mxu1 %vm13613_vm7, %v13465_v10  ;;  %6271 = vmatprep.mubr.msk.f32.mxu0 %vm13599_vm8, %v13465_v10  ;;  %v2341_v36 = vpop.f32.mrf.mxu1  ;;  %v9629_v13 = vand.u32 4294901760, %v715_v19  ;;  %v4060_v31 = vand.u32 4294901760, %v4059_v55  ;;  %v4066_v23 = vsub.f32 %v9564_v32, %v13616_v30  ;;  %v714_v30 = vld [vmem:[%s12502_s1 + $0x1a0] sm:$0xff] }
 0x1f5   : > { %v1924_v61 = vpop.f32.mrf.mxu0  ;;  %4048 = vmatprep.subr.mxu1 %v13157_v49  ;;  %3389 = vmatpush2.msra.mxu0 %v9461_v14  ;;  %v12888_v36 = vand.u32 4294901760, %v9627_v2  ;;  %v13622_v32 = vand.u32 4294901760, %v9600_v3 }
 0x1f6   : > { %13615 = vst [vmem:[#allocation46_spill] sm:$0xff] %v9629_v13  ;;  %4054 = vmatpush2.msra.mxu1 %v4053_v15  ;;  %v9636_v61 = vadd.f32 %v2317_v27, %v1923_v21  ;;  %v2350_v48 = vpop.f32.mrf.mxu1  ;;  %v13619_v27 = vld [vmem:[#allocation105_spill] sm:$0xff]  ;;  %3390 = vmatprep.subr.mxu0 %v13157_v49 }
 0x1f7   : > { %6340 = vmatmul.mubr.msk.f32.gmra.mxu1 %vm13618_vm0, %v13465_v10  ;;  %v1931_v9 = vpop.f32.mrf.mxu0  ;;  %6272 = vmatmul.mubr.msk.f32.gmra.mxu0 %vm13604_vm1, %v13465_v10  ;;  %vm13620_vm2 = vcmp.eq.s32.totalorder %v13619_v27, %v13467_v44  ;;  %v4073_v14 = vsub.f32 %v9600_v3, %v13622_v32  ;;  %vm13625_vm4 = vcmp.eq.s32.totalorder %v13619_v27, %v13470_v63 }
 0x1f8   : > { %13617 = vst [vmem:[#allocation114_spill] sm:$0xff] %v9636_v61  ;;  %v1932_v15 = vadd.f32 %v1931_v9, %v8732_v35  ;;  %6341 = vmatprep.mubr.msk.f32.mxu1 %vm13620_vm2, %v13465_v10  ;;  %6273 = vmatprep.mubr.msk.f32.mxu0 %vm13606_vm3, %v13465_v10  ;;  %v2352_v55 = vpop.f32.mrf.mxu1  ;;  %v9662_v35 = vsub.f32 %v715_v19, %v9629_v13  ;;  %v4067_v9 = vand.u32 4294901760, %v4066_v23  ;;  %v9668_v61 = vand.u32 4294901760, %v714_v30  ;;  %v713_v23 = vld [vmem:[%s12502_s1 + $0x198] sm:$0xff] }
 0x1f9   : > { %v1933_v21 = vpop.f32.mrf.mxu0  ;;  %4055 = vmatprep.subr.mxu1 %v13157_v49  ;;  %3392 = vmatpush2.msra.mxu0 %v9498_v54  ;;  %v4074_v3 = vand.u32 4294901760, %v4073_v14  ;;  %v712_v14 = vld [vmem:[%s12502_s1 + $0x190] sm:$0xff] }
 0x1fa   : > { %13621 = vst [vmem:[#allocation45_spill] sm:$0xff] %v9662_v35  ;;  %4061 = vmatpush2.msra.mxu1 %v4060_v31  ;;  %13623 = vst [vmem:[#allocation48_spill] sm:$0xff] %v9668_v61  ;;  %v9670_v55 = vadd.f32 %v2328_v25, %v1932_v15  ;;  %v2361_v21 = vpop.f32.mrf.mxu1  ;;  %v13626_v25 = vld [vmem:[#allocation109_spill] sm:$0xff]  ;;  %3393 = vmatprep.subr.mxu0 %v13157_v49  ;;  %v9700_v54 = vsub.f32 %v714_v30, %v9668_v61 }
 0x1fb   : > { %6342 = vmatmul.mubr.msk.f32.gmra.mxu1 %vm13625_vm4, %v13465_v10  ;;  %v1940_v19 = vpop.f32.mrf.mxu0  ;;  %6274 = vmatmul.mubr.msk.f32.gmra.mxu0 %vm13611_vm5, %v13465_v10  ;;  %vm13627_vm6 = vcmp.eq.s32.totalorder %v13626_v25, %v13467_v44  ;;  %vm13631_vm8 = vcmp.eq.s32.totalorder %v13626_v25, %v13470_v63 }
 0x1fc   : > { %13624 = vst [vmem:[#allocation47_spill] sm:$0xff] %v9670_v55  ;;  %v1941_v32 = vadd.f32 %v1940_v19, %v8745_v38  ;;  %6343 = vmatprep.mubr.msk.f32.mxu1 %vm13627_vm6, %v13465_v10  ;;  %6275 = vmatprep.mubr.msk.f32.mxu0 %vm13613_vm7, %v13465_v10  ;;  %v2363_v31 = vpop.f32.mrf.mxu1  ;;  %v4080_v38 = vsub.f32 %v9627_v2, %v12888_v36  ;;  %13628 = vst [vmem:[#allocation50_spill] sm:$0xff] %v9700_v54  ;;  %v9702_v55 = vand.u32 4294901760, %v713_v23 }
 0x1fd   : > { %v1942_v15 = vpop.f32.mrf.mxu0  ;;  %4062 = vmatprep.subr.mxu1 %v13157_v49  ;;  %3395 = vmatpush2.msra.mxu0 %v9532_v20  ;;  %v13634_v2 = vand.u32 4294901760, %v9662_v35 }
 0x1fe   : > { %4068 = vmatpush2.msra.mxu1 %v4067_v9  ;;  %13629 = vst [vmem:[#allocation49_spill] sm:$0xff] %v9702_v55  ;;  %v9704_v31 = vadd.f32 %v2339_v1, %v1941_v32  ;;  %v2372_v15 = vpop.f32.mrf.mxu1  ;;  %v13632_v1 = vld [vmem:[#allocation111_spill] sm:$0xff]  ;;  %3396 = vmatprep.subr.mxu0 %v13157_v49  ;;  %v4081_v19 = vand.u32 4294901760, %v4080_v38 }
 0x1ff   : > { %6344 = vmatmul.mubr.msk.f32.gmra.mxu1 %vm13631_vm8, %v13465_v10  ;;  %v1949_v36 = vpop.f32.mrf.mxu0  ;;  %6276 = vmatmul.mubr.msk.f32.gmra.mxu0 %vm13618_vm0, %v13465_v10  ;;  %vm13633_vm1 = vcmp.eq.s32.totalorder %v13632_v1, %v13467_v44  ;;  %vm13638_vm3 = vcmp.eq.s32.totalorder %v13632_v1, %v13470_v63 }
 0x200   : > { %13630 = vst [vmem:[#allocation52_spill] sm:$0xff] %v9704_v31  ;;  %v1950_v30 = vadd.f32 %v1949_v36, %v8758_v5  ;;  %6345 = vmatprep.mubr.msk.f32.mxu1 %vm13633_vm1, %v13465_v10  ;;  %6277 = vmatprep.mubr.msk.f32.mxu0 %vm13620_vm2, %v13465_v10  ;;  %v2374_v9 = vpop.f32.mrf.mxu1  ;;  %v4087_v5 = vsub.f32 %v9662_v35, %v13634_v2  ;;  %v711_v36 = vld [vmem:[%s12502_s1 + $0x188] sm:$0xff]  ;;  %vm13649_vm0 = vmmov %vm13633_vm1 }
 0x201   : > { %v1951_v32 = vpop.f32.mrf.mxu0  ;;  %4069 = vmatprep.subr.mxu1 %v13157_v49  ;;  %3398 = vmatpush2.msra.mxu0 %v9566_v22  ;;  %v9737_v9 = vsub.f32 %v713_v23, %v9702_v55  ;;  %v13639_v23 = vld [vmem:[#allocation113_spill] sm:$0xff]  ;;  %vm13654_vm2 = vmmov %vm13638_vm3 }
 0x202   : > { %4075 = vmatpush2.msra.mxu1 %v4074_v3  ;;  %v9739_v32 = vand.u32 4294901760, %v712_v14  ;;  %v9741_v31 = vadd.f32 %v2350_v48, %v1950_v30  ;;  %v2383_v38 = vpop.f32.mrf.mxu1  ;;  %vm13640_vm5 = vcmp.eq.s32.totalorder %v13639_v23, %v13467_v44  ;;  %v9760_v48 = vand.u32 4294901760, %v711_v36  ;;  %v710_v30 = vld [vmem:[%s12502_s1 + $0x180] sm:$0xff]  ;;  %3399 = vmatprep.subr.mxu0 %v13157_v49 }
 0x203   : > { %13635 = vst [vmem:[#allocation51_spill] sm:$0xff] %v9737_v9  ;;  %6346 = vmatmul.mubr.msk.f32.gmra.mxu1 %vm13638_vm3, %v13465_v10  ;;  %v1958_v2 = vpop.f32.mrf.mxu0  ;;  %6278 = vmatmul.mubr.msk.f32.gmra.mxu0 %vm13625_vm4, %v13465_v10  ;;  %vm13645_vm7 = vcmp.eq.s32.totalorder %v13639_v23, %v13470_v63  ;;  %vm13657_vm4 = vmmov %vm13640_vm5 }
 0x204   : > { %13636 = vst [vmem:[#allocation53_spill] sm:$0xff] %v9739_v32  ;;  %13637 = vst [vmem:[#allocation55_spill] sm:$0xff] %v9741_v31  ;;  %v1959_v3 = vadd.f32 %v1958_v2, %v8771_v58  ;;  %6347 = vmatprep.mubr.msk.f32.mxu1 %vm13640_vm5, %v13465_v10  ;;  %6279 = vmatprep.mubr.msk.f32.mxu0 %vm13627_vm6, %v13465_v10  ;;  %v2385_v20 = vpop.f32.mrf.mxu1  ;;  %v4088_v58 = vand.u32 4294901760, %v4087_v5  ;;  %v13642_v2 = vand.u32 4294901760, %v9700_v54  ;;  %v9788_v5 = vadd.s32 256, %v13470_v63 }
 0x205   : > { %13641 = vst [vmem:[#allocation57_spill] sm:$0xff] %v9760_v48  ;;  %v1960_v35 = vpop.f32.mrf.mxu0  ;;  %4076 = vmatprep.subr.mxu1 %v13157_v49  ;;  %3401 = vmatpush2.msra.mxu0 %v9592_v8  ;;  %v9773_v27 = vsub.f32 %v712_v14, %v9739_v32  ;;  %v13648_v14 = vld [vmem:[#allocation115_spill] sm:$0xff]  ;;  %vm13658_vm6 = vmmov %vm13645_vm7 }
 0x206   : > { %4082 = vmatpush2.msra.mxu1 %v4081_v19  ;;  %v4094_v22 = vsub.f32 %v9700_v54, %v13642_v2  ;;  %v9775_v12 = vadd.f32 %v2361_v21, %v1959_v3  ;;  %v2394_v20 = vpop.f32.mrf.mxu1  ;;  %v9785_v19 = vand.u32 4294901760, %v710_v30  ;;  %13647 = vst [vmem:[#allocation59_spill] sm:$0xff] %v9788_v5  ;;  %v9800_v3 = vsub.f32 %v711_v36, %v9760_v48 }
 0x207   : > { %13643 = vst [vmem:[#allocation62_spill] sm:$0xff] %v9773_v27  ;;  %6348 = vmatmul.mubr.msk.f32.gmra.mxu1 %vm13645_vm7, %v13465_v10  ;;  %v1967_v35 = vpop.f32.mrf.mxu0  ;;  %6280 = vmatmul.mubr.msk.f32.gmra.mxu0 %vm13631_vm8, %v13465_v10  ;;  %v13652_v54 = vand.u32 4294901760, %v9737_v9  ;;  %v12905_v36 = vand.u32 4294901760, %v9773_v27  ;;  %vm13653_vm1 = vcmp.eq.s32.totalorder %v13648_v14, %v13470_v63  ;;  %vm280_vm3 = vcmp.eq.s32.totalorder %v13466_v16, %v9788_v5 }
 0x208   : > { %13644 = vst [vmem:[#allocation58_spill] sm:$0xff] %v9775_v12  ;;  %13646 = vst [vmem:[#allocation61_spill] sm:$0xff] %v9785_v19  ;;  %v1968_v21 = vadd.f32 %v1967_v35, %v8784_v11  ;;  %6349 = vmatprep.mubr.msk.f32.mxu1 %vm391_vm10, %v13465_v10  ;;  %6281 = vmatprep.mubr.msk.f32.mxu0 %vm13649_vm0, %v13465_v10  ;;  %v2396_v2 = vpop.f32.mrf.mxu1  ;;  %v9805_v11 = vadd.s32 384, %v13470_v63  ;;  %v4095_v35 = vand.u32 4294901760, %v4094_v22 }
 0x209   : > { %13650 = vst [vmem:[#allocation119_spill] sm:$0xff] %v9800_v3  ;;  %v1969_v31 = vpop.f32.mrf.mxu0  ;;  %3402 = vmatprep.subr.mxu0 %v13157_v49  ;;  %4083 = vmatprep.subr.mxu1 %v13157_v49  ;;  %v4101_v8 = vsub.f32 %v9737_v9, %v13652_v54  ;;  %v9823_v22 = vsub.f32 %v710_v30, %v9785_v19  ;;  %vm13661_vm7 = vmmov %vm13653_vm1 }
 0x20a   : > { %13651 = vst [vmem:[#allocation120_spill] sm:$0xff] %v9805_v11  ;;  %3404 = vmatpush2.msra.mxu0 %v9629_v13  ;;  %4089 = vmatpush2.msra.mxu1 %v4088_v58  ;;  %v9812_v12 = vadd.f32 %v2372_v15, %v1968_v21  ;;  %v2405_v31 = vpop.f32.mrf.mxu1  ;;  %v13656_v15 = vld [vmem:[#allocation116_spill] sm:$0xff]  ;;  %v12910_v58 = vand.u32 4294901760, %v9800_v3  ;;  %vm281_vm5 = vcmp.eq.s32.totalorder %v13466_v16, %v9805_v11 }
 0x20b   : > { %6350 = vmatmul.mubr.msk.f32.gmra.mxu1 %vm13653_vm1, %v13465_v10  ;;  %v1976_v2 = vpop.f32.mrf.mxu0  ;;  %6282 = vmatmul.mubr.msk.f32.gmra.mxu0 %vm13654_vm2, %v13465_v10  ;;  %13655 = vst [vmem:[#allocation121_spill] sm:$0xff] %v9823_v22  ;;  %vm284_vm8 = vcmp.eq.s32.totalorder %v13473_v40, %v9788_v5  ;;  %vm289_vm0 = vcmp.eq.s32.totalorder %v13477_v28, %v9805_v11 }
 0x20c   : > { %v1977_v54 = vadd.f32 %v1976_v2, %v8800_v56  ;;  %6351 = vmatprep.mubr.msk.f32.mxu1 %vm395_vm13, %v13465_v10  ;;  %6283 = vmatprep.mubr.msk.f32.mxu0 %vm13657_vm4, %v13465_v10  ;;  %v2407_v21 = vpop.f32.mrf.mxu1  ;;  %v4102_v56 = vand.u32 4294901760, %v4101_v8  ;;  %v4108_v2 = vsub.f32 %v9773_v27, %v12905_v36  ;;  %v4115_v36 = vsub.f32 %v9800_v3, %v12910_v58 }
 0x20d   : > { %v1978_v30 = vpop.f32.mrf.mxu0  ;;  %3405 = vmatprep.subr.mxu0 %v13157_v49  ;;  %4090 = vmatprep.subr.mxu1 %v13157_v49  ;;  %v6039_v21 = vsel %vm280_vm3, 1.0, %v13157_v49  ;;  %v6040_v8 = vsel %vm281_vm5, 1.0, %v13157_v49  ;;  %vm293_vm1 = vcmp.eq.s32.totalorder %v13480_v62, %v9805_v11  ;;  %vm12942_vm2 = vcmp.eq.s32.totalorder %v13493_v42, %v9805_v11 }
 0x20e   : > { %3407 = vmatpush2.msra.mxu0 %v9668_v61  ;;  %4096 = vmatpush2.msra.mxu1 %v4095_v35  ;;  %v9845_v9 = vadd.f32 %v2383_v38, %v1977_v54  ;;  %v9851_v30 = vpop.f32.mrf.mxu1  ;;  %v13659_v54 = vld [vmem:[#allocation117_spill] sm:$0xff]  ;;  %v9880_v27 = vsub.f32 %v6039_v21, %v6039_v21  ;;  %v4109_v61 = vand.u32 4294901760, %v4108_v2  ;;  %v13662_v2 = vand.u32 4294901760, %v9823_v22 }
 0x20f   : > { %6352 = vmatmul.mubr.msk.f32.gmra.mxu1 %vm394_vm15, %v13465_v10  ;;  %v1985_v35 = vpop.f32.mrf.mxu0  ;;  %6284 = vmatmul.mubr.msk.f32.gmra.mxu0 %vm13658_vm6, %v13465_v10  ;;  %vm12946_vm4 = vcmp.eq.s32.totalorder %v13493_v42, %v9788_v5  ;;  %vm12951_vm6 = vcmp.eq.s32.totalorder %v13500_v46, %v9805_v11 }
 0x210   : > { %v1986_v38 = vadd.f32 %v1985_v35, %v8818_v59  ;;  %6353 = vmatprep.mubr.msk.f32.mxu1 %vm399_vm9, %v13465_v10  ;;  %6285 = vmatprep.mubr.msk.f32.mxu0 %vm391_vm10, %v13465_v10  ;;  %v2418_v59 = vpop.f32.mrf.mxu1  ;;  %13660 = vst [vmem:[#allocation122_spill] sm:$0xff] %v9880_v27  ;;  %vm285_vm10 = vcmp.eq.s32.totalorder %v13473_v40, %v9805_v11 }
 0x211   : > { %v1987_v35 = vpop.f32.mrf.mxu0  ;;  %3408 = vmatprep.subr.mxu0 %v13157_v49  ;;  %4097 = vmatprep.subr.mxu1 %v13157_v49 }
 0x212   : > { %3410 = vmatpush2.msra.mxu0 %v9702_v55  ;;  %4103 = vmatpush2.msra.mxu1 %v4102_v56  ;;  %v9885_v58 = vadd.f32 %v2394_v20, %v1986_v38  ;;  %v9887_v3 = vpop.f32.mrf.mxu1  ;;  %v9897_v56 = vsub.f32 %v6040_v8, %v6040_v8  ;;  %v4122_v20 = vsub.f32 %v9823_v22, %v13662_v2  ;;  %v13663_v38 = vld [vmem:[#allocation118_spill] sm:$0xff]  ;;  %v4116_v8 = vand.u32 4294901760, %v4115_v36 }
 0x213   : > { %6354 = vmatmul.mubr.msk.f32.gmra.mxu1 %vm398_vm14, %v13465_v10  ;;  %v1994_v59 = vpop.f32.mrf.mxu0  ;;  %6286 = vmatmul.mubr.msk.f32.gmra.mxu0 %vm13661_vm7, %v13465_v10  ;;  %v6043_v36 = vsel %vm284_vm8, 1.0, %v13157_v49  ;;  %v6052_v55 = vsel %vm293_vm1, 1.0, %v13157_v49  ;;  %vm12959_vm7 = vcmp.eq.s32.totalorder %v13500_v46, %v9788_v5 }
 0x214   : > { %v1995_v21 = vadd.f32 %v1994_v59, %v8839_v4  ;;  %6355 = vmatprep.mubr.msk.f32.mxu1 %vm403_vm12, %v13465_v10  ;;  %6287 = vmatprep.mubr.msk.f32.mxu0 %vm395_vm13, %v13465_v10  ;;  %v2429_v35 = vpop.f32.mrf.mxu1  ;;  %v6044_v4 = vsel %vm285_vm10, 1.0, %v13157_v49  ;;  %v4123_v22 = vand.u32 4294901760, %v4122_v20  ;;  %vm288_vm13 = vcmp.eq.s32.totalorder %v13477_v28, %v9788_v5 }
 0x215   : > { %4104 = vmatprep.subr.mxu1 %v13157_v49  ;;  %v1996_v2 = vpop.f32.mrf.mxu0  ;;  %3411 = vmatprep.subr.mxu0 %v13157_v49  ;;  %v6048_v20 = vsel %vm289_vm0, 1.0, %v13157_v49  ;;  %v10016_v16 = vsub.f32 %v6052_v55, %v6052_v55 }
 0x216   : > { %4110 = vmatpush2.msra.mxu1 %v4109_v61  ;;  %3413 = vmatpush2.msra.mxu0 %v9739_v32  ;;  %v9926_v59 = vadd.f32 %v2405_v31, %v1995_v21  ;;  %v9929_v2 = vpop.f32.mrf.mxu1  ;;  %v12919_v32 = vand.u32 4294901760, %v9897_v56  ;;  %v9944_v21 = vsub.f32 %v6044_v4, %v6044_v4  ;;  %v9960_v4 = vsub.f32 %v6043_v36, %v6043_v36 }
 0x217   : > { %6356 = vmatmul.mubr.msk.f32.gmra.mxu1 %vm402_vm11, %v13465_v10  ;;  %4111 = vmatprep.subr.mxu1 %v13157_v49  ;;  %v2003_v61 = vpop.f32.mrf.mxu0 }
 0x218   : > { %13664 = vst [vmem:[#allocation123_spill] sm:$0xff] %v9926_v59  ;;  %v2004_v31 = vadd.f32 %v2003_v61, %v8861_v6  ;;  %6288 = vmatmul.mubr.msk.f32.gmra.mxu0 %vm394_vm15, %v13465_v10  ;;  %4117 = vmatpush2.msra.mxu1 %v4116_v8  ;;  %v2440_v6 = vpop.f32.mrf.mxu1  ;;  %v6047_v61 = vsel %vm288_vm13, 1.0, %v13157_v49  ;;  %vm292_vm15 = vcmp.eq.s32.totalorder %v13480_v62, %v9788_v5 }
 0x219   : > { %6357 = vmatprep.mubr.msk.f32.mxu1 %vm281_vm5, %v13465_v10  ;;  %6289 = vmatprep.mubr.msk.f32.mxu0 %vm399_vm9, %v13465_v10  ;;  %v2005_v8 = vpop.f32.mrf.mxu0  ;;  %v3423_v59 = vsub.f32 %v9897_v56, %v12919_v32  ;;  %vm12933_vm9 = vcmp.eq.s32.totalorder %v13483_v29, %v9805_v11  ;;  %v6051_v32 = vsel %vm292_vm15, 1.0, %v13157_v49 }
 0x21a   : > { %4118 = vmatprep.subr.mxu1 %v13157_v49  ;;  %3414 = vmatprep.subr.mxu0 %v13157_v49  ;;  %v9971_v6 = vadd.f32 %v9851_v30, %v2004_v31  ;;  %v9973_v35 = vpop.f32.mrf.mxu1  ;;  %v9976_v8 = vsub.f32 %v6048_v20, %v6048_v20  ;;  %v13666_v30 = vand.u32 4294901760, %v9880_v27  ;;  %v6056_v55 = vsel %vm12933_vm9, 1.0, %v13157_v49 }
 0x21b   : > { %4124 = vmatpush2.msra.mxu1 %v4123_v22  ;;  %v2012_v36 = vpop.f32.mrf.mxu0  ;;  %3416 = vmatpush2.msra.mxu0 %v9760_v48 }
 0x21c   : > { %13665 = vst [vmem:[#allocation124_spill] sm:$0xff] %v9976_v8  ;;  %v3429_v22 = vsub.f32 %v9880_v27, %v13666_v30  ;;  %6358 = vmatmul.mubr.msk.f32.vlgmr.msra.gmra.mxu1 %vm280_vm3, %v13465_v10  ;;  %v2013_v31 = vadd.f32 %v2012_v36, %v8889_v34  ;;  %6290 = vmatmul.mubr.msk.f32.gmra.mxu0 %vm398_vm14, %v13465_v10  ;;  %v2451_v30 = vpop.f32.mrf.mxu1 }
 0x21d   : > { %6359 = vmatprep.mubr.msk.f32.mxu1 %vm285_vm10, %v13465_v10  ;;  %6291 = vmatprep.mubr.msk.f32.mxu0 %vm403_vm12, %v13465_v10  ;;  %v2014_v34 = vpop.f32.mrf.mxu0  ;;  %v10008_v36 = vsub.f32 %v6047_v61, %v6047_v61  ;;  %vm12952_vm14 = vcmp.eq.s32.totalorder %v13483_v29, %v9788_v5  ;;  %vm12941_vm12 = vcmp.eq.s32.totalorder %v13487_v45, %v9788_v5 }
 0x21e   : > { %3417 = vmatprep.subr.mxu0 %v13157_v49  ;;  %4767 = vmatprep.subr.mxu1 %v13157_v49  ;;  %v10022_v44 = vadd.f32 %v9887_v3, %v2013_v31  ;;  %v10024_v61 = vpop.f32.mrf.mxu1  ;;  %v3424_v34 = vand.u32 4294901760, %v3423_v59  ;;  %v3430_v27 = vand.u32 4294901760, %v3429_v22  ;;  %v13668_v59 = vand.u32 4294901760, %v9944_v21 }
 0x21f   : > { %13667 = vst [vmem:[#allocation125_spill] sm:$0xff] %v10008_v36  ;;  %v2021_v30 = vpop.f32.mrf.mxu0  ;;  %3419 = vmatpush2.msra.mxu0 %v9785_v19  ;;  %4769 = vmatpush1.msra.mxu1 %v8807_v26  ;;  %v10045_v26 = vsub.f32 %v6051_v32, %v6051_v32  ;;  %v6055_v63 = vsel %vm12952_vm14, 1.0, %v13157_v49  ;;  %v13670_v32 = vand.u32 4294901760, %v9976_v8 }
 0x220   : > { %6360 = vmatmul.mubr.msk.f32.gmra.mxu1 %vm284_vm8, %v13465_v10  ;;  %v2022_v3 = vadd.f32 %v2021_v30, %v8919_v39  ;;  %6292 = vmatmul.mubr.msk.f32.gmra.mxu0 %vm402_vm11, %v13465_v10  ;;  %v3438_v31 = vsub.f32 %v9944_v21, %v13668_v59  ;;  %v2462_v22 = vpop.f32.mrf.mxu1  ;;  %v13669_v39 = vand.u32 4294901760, %v9960_v4  ;;  %vm12936_vm11 = vcmp.eq.s32.totalorder %v13487_v45, %v9805_v11 }
 0x221   : > { %6361 = vmatprep.mubr.msk.f32.mxu1 %vm289_vm0, %v13465_v10  ;;  %3425 = vmatprep.mubr.f32.mxu0 %v3424_v34  ;;  %v2023_v20 = vpop.f32.mrf.mxu0  ;;  %v10062_v59 = vsub.f32 %v6056_v55, %v6056_v55  ;;  %v3453_v40 = vsub.f32 %v9976_v8, %v13670_v32 }
 0x222   : > { %v3444_v30 = vsub.f32 %v9960_v4, %v13669_v39  ;;  %4350 = vmatprep.subr.mxu0 %v13157_v49  ;;  %4770 = vmatprep.subr.mxu1 %v13157_v49  ;;  %v10069_v34 = vadd.f32 %v9929_v2, %v2022_v3  ;;  %v10071_v22 = vpop.f32.mrf.mxu1  ;;  %v3439_v20 = vand.u32 4294901760, %v3438_v31  ;;  %v10082_v2 = vsub.f32 %v6055_v63, %v6055_v63 }
 0x223   : > { %v2030_v39 = vpop.f32.mrf.mxu0  ;;  %4772 = vmatpush1.msra.mxu1 %v8831_v24  ;;  %v6060_v3 = vsel %vm12936_vm11, 1.0, %v13157_v49  ;;  %v6059_v31 = vsel %vm12941_vm12, 1.0, %v13157_v49  ;;  %v3454_v63 = vand.u32 4294901760, %v3453_v40  ;;  %v6064_v40 = vsel %vm12942_vm2, 1.0, %v13157_v49 }
 0x224   : > { %6362 = vmatmul.mubr.msk.f32.gmra.mxu1 %vm288_vm13, %v13465_v10  ;;  %v2031_v55 = vadd.f32 %v2030_v39, %v8951_v60  ;;  %3431 = vmatmul.mubr.f32.vlgmr.msra.gmra.mxu0 %v3430_v27  ;;  %13671 = vst [vmem:[#allocation126_spill] sm:$0xff] %v10082_v2  ;;  %v2473_v32 = vpop.f32.mrf.mxu1  ;;  %v13672_v60 = vand.u32 4294901760, %v10008_v36  ;;  %v3445_v39 = vand.u32 4294901760, %v3444_v30  ;;  %v10114_v8 = vsub.f32 %v6060_v3, %v6060_v3 }
 0x225   : > { %6363 = vmatprep.mubr.msk.f32.mxu1 %vm293_vm1, %v13465_v10  ;;  %4353 = vmatpush1.msra.mxu0 %v8826_v43  ;;  %v2032_v28 = vpop.f32.mrf.mxu0  ;;  %v10124_v30 = vsub.f32 %v6059_v31, %v6059_v31  ;;  %v13679_v29 = vand.u32 4294901760, %v10082_v2 }
 0x226   : > { %v3459_v27 = vsub.f32 %v10008_v36, %v13672_v60  ;;  %3440 = vmatprep.mubr.f32.mxu0 %v3439_v20  ;;  %4354 = vmatprep.subr.mxu0 %v13157_v49  ;;  %v13673_v28 = vand.u32 4294901760, %v10016_v16  ;;  %v12932_v60 = vand.u32 4294901760, %v10062_v59  ;;  %v10109_v24 = vadd.f32 %v9973_v35, %v2031_v55  ;;  %v10111_v43 = vpop.f32.mrf.mxu1  ;;  %13674 = vst [vmem:[#allocation127_spill] sm:$0xff] %v10114_v8 }
 0x227   : > { %v2039_v36 = vpop.f32.mrf.mxu0  ;;  %4357 = vmatpush1.msra.mxu0 %v8851_v47  ;;  %4773 = vmatprep.subr.mxu1 %v13157_v49  ;;  %13675 = vst [vmem:[#allocation128_spill] sm:$0xff] %v10124_v30 }
 0x228   : > { %v3468_v32 = vsub.f32 %v10016_v16, %v13673_v28  ;;  %6364 = vmatmul.mubr.msk.f32.gmra.mxu1 %vm292_vm15, %v13465_v10  ;;  %v2040_v35 = vadd.f32 %v2039_v36, %v8984_v33  ;;  %3446 = vmatmul.mubr.f32.gmra.mxu0 %v3445_v39  ;;  %v2484_v20 = vpop.f32.mrf.mxu1  ;;  %v3460_v33 = vand.u32 4294901760, %v3459_v27  ;;  %v13676_v36 = vand.u32 4294901760, %v10045_v26 }
 0x229   : > { %6365 = vmatprep.mubr.msk.f32.mxu1 %vm12933_vm9, %v13465_v10  ;;  %3455 = vmatprep.mubr.f32.mxu0 %v3454_v63  ;;  %v2041_v55 = vpop.f32.mrf.mxu0  ;;  %v3483_v28 = vsub.f32 %v10062_v59, %v12932_v60  ;;  %v6063_v27 = vsel %vm12946_vm4, 1.0, %v13157_v49  ;;  %vm12958_vm9 = vcmp.eq.s32.totalorder %v13508_v53, %v9805_v11 }
 0x22a   : > { %v3474_v3 = vsub.f32 %v10045_v26, %v13676_v36  ;;  %4358 = vmatprep.subr.mxu0 %v13157_v49  ;;  %v3469_v39 = vand.u32 4294901760, %v3468_v32  ;;  %4775 = vmatpush1.msra.mxu1 %v8853_v7  ;;  %v10150_v63 = vadd.f32 %v10024_v61, %v2040_v35  ;;  %v10152_v20 = vpop.f32.mrf.mxu1  ;;  %v10155_v32 = vsub.f32 %v6064_v40, %v6064_v40 }
 0x22b   : > { %v2048_v55 = vpop.f32.mrf.mxu0  ;;  %4361 = vmatpush1.msra.mxu0 %v8877_v37  ;;  %4776 = vmatprep.subr.mxu1 %v13157_v49  ;;  %v6068_v36 = vsel %vm12951_vm6, 1.0, %v13157_v49  ;;  %v10177_v62 = vsub.f32 %v6063_v27, %v6063_v27 }
 0x22c   : > { %13677 = vst [vmem:[#allocation129_spill] sm:$0xff] %v10155_v32  ;;  %6366 = vmatmul.mubr.msk.f32.gmra.mxu1 %vm12952_vm14, %v13465_v10  ;;  %v2049_v61 = vadd.f32 %v2048_v55, %v9017_v52  ;;  %3461 = vmatmul.mubr.f32.gmra.mxu0 %v3460_v33  ;;  %v2495_v40 = vpop.f32.mrf.mxu1  ;;  %v3475_v31 = vand.u32 4294901760, %v3474_v3  ;;  %v3489_v52 = vsub.f32 %v10082_v2, %v13679_v29  ;;  %v3484_v33 = vand.u32 4294901760, %v3483_v28 }
 0x22d   : > { %6367 = vmatprep.mubr.msk.f32.mxu1 %vm12936_vm11, %v13465_v10  ;;  %3470 = vmatprep.mubr.f32.mxu0 %v3469_v39  ;;  %v2050_v60 = vpop.f32.mrf.mxu0  ;;  %13678 = vst [vmem:[#allocation130_spill] sm:$0xff] %v10177_v62  ;;  %v10184_v55 = vsub.f32 %v6068_v36, %v6068_v36  ;;  %v6067_v39 = vsel %vm12959_vm7, 1.0, %v13157_v49  ;;  %v13682_v40 = vld [vmem:[#allocation68_spill] sm:$0xff]  ;;  %v13683_v29 = vand.u32 4294901760, %v10114_v8  ;;  %v6072_v36 = vsel %vm12958_vm9, 1.0, %v13157_v49 }
 0x22e   : > { %4362 = vmatprep.subr.mxu0 %v13157_v49  ;;  %4778 = vmatpush1.msra.mxu1 %v8879_v50  ;;  %v10191_v60 = vadd.f32 %v10071_v22, %v2049_v61  ;;  %v10193_v3 = vpop.f32.mrf.mxu1  ;;  %vm12996_vm11 = vcmp.eq.s32.totalorder %v13508_v53, %v9788_v5  ;;  %v13684_v22 = vld [vmem:[#allocation12_spill] sm:$0xff]  ;;  %v13695_v42 = vand.u32 4294901760, %v10177_v62 }
 0x22f   : > { %13680 = vst [vmem:[#allocation131_spill] sm:$0xff] %v10184_v55  ;;  %v2057_v27 = vpop.f32.mrf.mxu0  ;;  %4365 = vmatpush1.msra.mxu0 %v13682_v40  ;;  %v3498_v28 = vsub.f32 %v10114_v8, %v13683_v29  ;;  %4779 = vmatprep.subr.mxu1 %v13157_v49  ;;  %v13685_v29 = vand.u32 4294901760, %v10124_v30  ;;  %v3490_v8 = vand.u32 4294901760, %v3489_v52 }
 0x230   : > { %13681 = vst [vmem:[#allocation132_spill] sm:$0xff] %v10191_v60  ;;  %6368 = vmatmul.mubr.msk.f32.gmra.mxu1 %vm12941_vm12, %v13465_v10  ;;  %v2058_v61 = vadd.f32 %v2057_v27, %v13684_v22  ;;  %3476 = vmatmul.mubr.f32.gmra.mxu0 %v3475_v31  ;;  %v2506_v35 = vpop.f32.mrf.mxu1  ;;  %v10219_v60 = vsub.f32 %v6067_v39, %v6067_v39  ;;  %v13687_v27 = vld [vmem:[#allocation80_spill] sm:$0xff]  ;;  %v13688_v31 = vld [vmem:[#allocation5_spill] sm:$0xff] }
 0x231   : > { %v3504_v50 = vsub.f32 %v10124_v30, %v13685_v29  ;;  %6369 = vmatprep.mubr.msk.f32.mxu1 %vm12942_vm2, %v13465_v10  ;;  %3485 = vmatprep.mubr.f32.mxu0 %v3484_v33  ;;  %v2059_v40 = vpop.f32.mrf.mxu0  ;;  %vm12967_vm12 = vcmp.eq.s32.totalorder %v13687_v27, %v9805_v11  ;;  %v10226_v22 = vsub.f32 %v6072_v36, %v6072_v36  ;;  %v6071_v35 = vsel %vm12996_vm11, 1.0, %v13157_v49  ;;  %v13691_v29 = vld [vmem:[#allocation6_spill] sm:$0xff] }
 0x232   : > { %13686 = vst [vmem:[#allocation12_spill] sm:$0xff] %v10219_v60  ;;  %4366 = vmatprep.subr.mxu0 %v13157_v49  ;;  %4781 = vmatpush1.msra.mxu1 %v13688_v31  ;;  %v10234_v33 = vadd.f32 %v10111_v43, %v2058_v61  ;;  %v10236_v39 = vpop.f32.mrf.mxu1  ;;  %v3499_v45 = vand.u32 4294901760, %v3498_v28  ;;  %v13692_v31 = vand.u32 4294901760, %v10155_v32  ;;  %vm12971_vm2 = vcmp.eq.s32.totalorder %v13687_v27, %v9788_v5  ;;  %v13693_v43 = vld [vmem:[#allocation8_spill] sm:$0xff]  ;;  %v13722_v27 = vld [vmem:[#allocation86_spill] sm:$0xff] }
 0x233   : > { %13689 = vst [vmem:[#allocation133_spill] sm:$0xff] %v10226_v22  ;;  %v2066_v40 = vpop.f32.mrf.mxu0  ;;  %4369 = vmatpush1.msra.mxu0 %v13691_v29  ;;  %4782 = vmatprep.subr.mxu1 %v13157_v49  ;;  %v3505_v52 = vand.u32 4294901760, %v3504_v50  ;;  %v6076_v28 = vsel %vm12967_vm12, 1.0, %v13157_v49  ;;  %v13707_v2 = vand.u32 4294901760, %v10226_v22 }
 0x234   : > { %13690 = vst [vmem:[#allocation134_spill] sm:$0xff] %v10234_v33  ;;  %v3513_v36 = vsub.f32 %v10155_v32, %v13692_v31  ;;  %6370 = vmatmul.mubr.msk.f32.gmra.mxu1 %vm12946_vm4, %v13465_v10  ;;  %v2067_v61 = vadd.f32 %v2066_v40, %v13693_v43  ;;  %3491 = vmatmul.mubr.f32.gmra.mxu0 %v3490_v8  ;;  %v2517_v31 = vpop.f32.mrf.mxu1  ;;  %v13696_v40 = vld [vmem:[#allocation81_spill] sm:$0xff]  ;;  %v13698_v33 = vand.u32 4294901760, %v10184_v55 }
 0x235   : > { %6371 = vmatprep.mubr.msk.f32.mxu1 %vm12951_vm6, %v13465_v10  ;;  %3500 = vmatprep.mubr.f32.mxu0 %v3499_v45  ;;  %v2068_v29 = vpop.f32.mrf.mxu0  ;;  %v10258_v32 = vsub.f32 %v6071_v35, %v6071_v35  ;;  %v3519_v8 = vsub.f32 %v10177_v62, %v13695_v42  ;;  %vm12974_vm4 = vcmp.eq.s32.totalorder %v13696_v40, %v9805_v11  ;;  %v13697_v43 = vld [vmem:[#allocation69_spill] sm:$0xff]  ;;  %v6075_v35 = vsel %vm12971_vm2, 1.0, %v13157_v49  ;;  %v13700_v62 = vld [vmem:[#allocation71_spill] sm:$0xff] }
 0x236   : > { %4370 = vmatprep.subr.mxu0 %v13157_v49  ;;  %4784 = vmatpush1.msra.mxu1 %v13697_v43  ;;  %v3528_v45 = vsub.f32 %v10184_v55, %v13698_v33  ;;  %v10277_v29 = vadd.f32 %v10152_v20, %v2067_v61  ;;  %v10279_v31 = vpop.f32.mrf.mxu1  ;;  %v3514_v43 = vand.u32 4294901760, %v3513_v36  ;;  %v10282_v30 = vsub.f32 %v6076_v28, %v6076_v28  ;;  %v13702_v33 = vld [vmem:[#allocation14_spill] sm:$0xff] }
 0x237   : > { %13694 = vst [vmem:[#allocation8_spill] sm:$0xff] %v10258_v32  ;;  %v2075_v50 = vpop.f32.mrf.mxu0  ;;  %4373 = vmatpush1.msra.mxu0 %v13700_v62  ;;  %4785 = vmatprep.subr.mxu1 %v13157_v49  ;;  %v6080_v20 = vsel %vm12974_vm4, 1.0, %v13157_v49  ;;  %vm12976_vm6 = vcmp.eq.s32.totalorder %v13696_v40, %v9788_v5  ;;  %v13703_v36 = vld [vmem:[#allocation82_spill] sm:$0xff]  ;;  %v13712_v62 = vld [vmem:[#allocation84_spill] sm:$0xff] }
 0x238   : > { %13699 = vst [vmem:[#allocation135_spill] sm:$0xff] %v10277_v29  ;;  %13701 = vst [vmem:[#allocation136_spill] sm:$0xff] %v10282_v30  ;;  %6372 = vmatmul.mubr.msk.f32.gmra.mxu1 %vm12959_vm7, %v13465_v10  ;;  %v2076_v42 = vadd.f32 %v2075_v50, %v13702_v33  ;;  %3506 = vmatmul.mubr.f32.gmra.mxu0 %v3505_v52  ;;  %vm12981_vm14 = vcmp.eq.s32.totalorder %v13703_v36, %v9805_v11  ;;  %v2528_v61 = vpop.f32.mrf.mxu1  ;;  %v3520_v52 = vand.u32 4294901760, %v3519_v8  ;;  %v13706_v29 = vld [vmem:[#allocation10_spill] sm:$0xff] }
 0x239   : > { %6373 = vmatprep.mubr.msk.f32.mxu1 %vm12958_vm9, %v13465_v10  ;;  %3515 = vmatprep.mubr.f32.mxu0 %v3514_v43  ;;  %v2077_v28 = vpop.f32.mrf.mxu0  ;;  %v10302_v50 = vsub.f32 %v6075_v35, %v6075_v35  ;;  %v13705_v33 = vand.u32 4294901760, %v10219_v60  ;;  %v3529_v55 = vand.u32 4294901760, %v3528_v45  ;;  %v3543_v61 = vsub.f32 %v10226_v22, %v13707_v2 }
 0x23a   : > { %4374 = vmatprep.subr.mxu0 %v13157_v49  ;;  %4787 = vmatpush1.msra.mxu1 %v13706_v29  ;;  %vm12982_vm9 = vcmp.eq.s32.totalorder %v13703_v36, %v9788_v5  ;;  %v10316_v8 = vadd.f32 %v10193_v3, %v2076_v42  ;;  %v10318_v43 = vpop.f32.mrf.mxu1  ;;  %v13709_v28 = vld [vmem:[#allocation11_spill] sm:$0xff]  ;;  %v6079_v2 = vsel %vm12976_vm6, 1.0, %v13157_v49  ;;  %v6084_v3 = vsel %vm12981_vm14, 1.0, %v13157_v49  ;;  %v13711_v42 = vld [vmem:[#allocation18_spill] sm:$0xff] }
 0x23b   : > { %13704 = vst [vmem:[#allocation14_spill] sm:$0xff] %v10302_v50  ;;  %v3534_v46 = vsub.f32 %v10219_v60, %v13705_v33  ;;  %v2084_v35 = vpop.f32.mrf.mxu0  ;;  %4377 = vmatpush1.msra.mxu0 %v13709_v28  ;;  %v10321_v33 = vsub.f32 %v6080_v20, %v6080_v20  ;;  %4788 = vmatprep.subr.mxu1 %v13157_v49  ;;  %v13713_v22 = vand.u32 4294901760, %v10258_v32  ;;  %v13718_v60 = vand.u32 4294901760, %v10282_v30 }
 0x23c   : > { %13708 = vst [vmem:[#allocation137_spill] sm:$0xff] %v10316_v8  ;;  %6374 = vmatmul.mubr.msk.f32.gmra.mxu1 %vm12996_vm11, %v13465_v10  ;;  %v2085_v20 = vadd.f32 %v2084_v35, %v13711_v42  ;;  %3521 = vmatmul.mubr.f32.gmra.mxu0 %v3520_v52  ;;  %vm12988_vm7 = vcmp.eq.s32.totalorder %v13712_v62, %v9805_v11  ;;  %v2539_v29 = vpop.f32.mrf.mxu1  ;;  %v6083_v52 = vsel %vm12982_vm9, 1.0, %v13157_v49  ;;  %v3544_v42 = vand.u32 4294901760, %v3543_v61  ;;  %v13714_v8 = vld [vmem:[#allocation73_spill] sm:$0xff] }
 0x23d   : > { %13710 = vst [vmem:[#allocation138_spill] sm:$0xff] %v10321_v33  ;;  %6375 = vmatprep.mubr.msk.f32.mxu1 %vm12967_vm12, %v13465_v10  ;;  %3530 = vmatprep.mubr.f32.mxu0 %v3529_v55  ;;  %v2086_v28 = vpop.f32.mrf.mxu0  ;;  %v3535_v45 = vand.u32 4294901760, %v3534_v46  ;;  %v3549_v53 = vsub.f32 %v10258_v32, %v13713_v22  ;;  %v10354_v29 = vsub.f32 %v6079_v2, %v6079_v2  ;;  %v13717_v32 = vld [vmem:[#allocation74_spill] sm:$0xff]  ;;  %v6088_v61 = vsel %vm12988_vm7, 1.0, %v13157_v49 }
 0x23e   : > { %4378 = vmatprep.subr.mxu0 %v13157_v49  ;;  %4790 = vmatpush1.msra.mxu1 %v13714_v8  ;;  %v10356_v55 = vsub.f32 %v6084_v3, %v6084_v3  ;;  %v10359_v46 = vadd.f32 %v10236_v39, %v2085_v20  ;;  %v10361_v22 = vpop.f32.mrf.mxu1  ;;  %v3558_v35 = vsub.f32 %v10282_v30, %v13718_v60  ;;  %v13719_v39 = vld [vmem:[#allocation83_spill] sm:$0xff] }
 0x23f   : > { %13715 = vst [vmem:[#allocation18_spill] sm:$0xff] %v10354_v29  ;;  %v2093_v28 = vpop.f32.mrf.mxu0  ;;  %4381 = vmatpush1.msra.mxu0 %v13717_v32  ;;  %4791 = vmatprep.subr.mxu1 %v13157_v49  ;;  %vm12990_vm12 = vcmp.eq.s32.totalorder %v13712_v62, %v9788_v5  ;;  %v10380_v60 = vsub.f32 %v6083_v52, %v6083_v52  ;;  %v3550_v8 = vand.u32 4294901760, %v3549_v53  ;;  %v13721_v32 = vand.u32 4294901760, %v10302_v50 }
 0x240   : > { %13716 = vst [vmem:[#allocation139_spill] sm:$0xff] %v10356_v55  ;;  %6376 = vmatmul.mubr.msk.f32.gmra.mxu1 %vm12971_vm2, %v13465_v10  ;;  %v2094_v3 = vadd.f32 %v2093_v28, %v13719_v39  ;;  %3536 = vmatmul.mubr.f32.gmra.mxu0 %v3535_v45  ;;  %v2550_v20 = vpop.f32.mrf.mxu1  ;;  %vm12991_vm2 = vcmp.eq.s32.totalorder %v13722_v27, %v9805_v11  ;;  %v13723_v45 = vld [vmem:[#allocation7_spill] sm:$0xff]  ;;  %v13726_v39 = vld [vmem:[#allocation76_spill] sm:$0xff] }
 0x241   : > { %13720 = vst [vmem:[#allocation83_spill] sm:$0xff] %v10380_v60  ;;  %6377 = vmatprep.mubr.msk.f32.mxu1 %vm12974_vm4, %v13465_v10  ;;  %3545 = vmatprep.mubr.f32.mxu0 %v3544_v42  ;;  %v2095_v2 = vpop.f32.mrf.mxu0  ;;  %v3564_v30 = vsub.f32 %v10302_v50, %v13721_v32  ;;  %v10393_v52 = vsub.f32 %v6088_v61, %v6088_v61  ;;  %v6087_v42 = vsel %vm12990_vm12, 1.0, %v13157_v49  ;;  %v3559_v20 = vand.u32 4294901760, %v3558_v35 }
 0x242   : > { %4382 = vmatprep.subr.mxu0 %v13157_v49  ;;  %4793 = vmatpush1.msra.mxu1 %v13723_v45  ;;  %v10401_v28 = vadd.f32 %v10279_v31, %v2094_v3  ;;  %v10403_v32 = vpop.f32.mrf.mxu1  ;;  %v13727_v45 = vand.u32 4294901760, %v10321_v33  ;;  %vm13003_vm4 = vcmp.eq.s32.totalorder %v13722_v27, %v9788_v5  ;;  %v13728_v31 = vld [vmem:[#allocation21_spill] sm:$0xff]  ;;  %v6092_v35 = vsel %vm12991_vm2, 1.0, %v13157_v49 }
 0x243   : > { %13724 = vst [vmem:[#allocation140_spill] sm:$0xff] %v10393_v52  ;;  %v2102_v2 = vpop.f32.mrf.mxu0  ;;  %4385 = vmatpush1.msra.mxu0 %v13726_v39  ;;  %4794 = vmatprep.subr.mxu1 %v13157_v49  ;;  %v3565_v40 = vand.u32 4294901760, %v3564_v30  ;;  %v10427_v39 = vsub.f32 %v6087_v42, %v6087_v42  ;;  %v13738_v30 = vand.u32 4294901760, %v10380_v60  ;;  %vm13021_vm11 = vcmp.eq.s32.totalorder %v13572_v41, %v9805_v11 }
 0x244   : > { %13725 = vst [vmem:[#allocation141_spill] sm:$0xff] %v10401_v28  ;;  %v3573_v61 = vsub.f32 %v10321_v33, %v13727_v45  ;;  %6378 = vmatmul.mubr.msk.f32.gmra.mxu1 %vm12976_vm6, %v13465_v10  ;;  %v2103_v3 = vadd.f32 %v2102_v2, %v13728_v31  ;;  %3551 = vmatmul.mubr.f32.gmra.mxu0 %v3550_v8  ;;  %v2561_v50 = vpop.f32.mrf.mxu1  ;;  %v13730_v8 = vld [vmem:[#allocation87_spill] sm:$0xff]  ;;  %v13731_v2 = vld [vmem:[#allocation77_spill] sm:$0xff]  ;;  %v13732_v31 = vand.u32 4294901760, %v10354_v29 }
 0x245   : > { %6379 = vmatprep.mubr.msk.f32.mxu1 %vm12981_vm14, %v13465_v10  ;;  %3560 = vmatprep.mubr.f32.mxu0 %v3559_v20  ;;  %v2104_v53 = vpop.f32.mrf.mxu0  ;;  %13729 = vst [vmem:[#allocation21_spill] sm:$0xff] %v10427_v39  ;;  %vm12998_vm6 = vcmp.eq.s32.totalorder %v13730_v8, %v9805_v11  ;;  %v6091_v50 = vsel %vm13003_vm4, 1.0, %v13157_v49  ;;  %v13734_v33 = vld [vmem:[#allocation9_spill] sm:$0xff]  ;;  %v10447_v28 = vsub.f32 %v6092_v35, %v6092_v35  ;;  %v13746_v62 = vand.u32 4294901760, %v10427_v39 }
 0x246   : > { %4386 = vmatprep.subr.mxu0 %v13157_v49  ;;  %4796 = vmatpush1.msra.mxu1 %v13731_v2  ;;  %v3579_v45 = vsub.f32 %v10354_v29, %v13732_v31  ;;  %v10442_v42 = vadd.f32 %v10318_v43, %v2103_v3  ;;  %v10444_v53 = vpop.f32.mrf.mxu1  ;;  %v3574_v2 = vand.u32 4294901760, %v3573_v61  ;;  %v13736_v31 = vand.u32 4294901760, %v10356_v55  ;;  %v13737_v43 = vld [vmem:[#allocation23_spill] sm:$0xff] }
 0x247   : > { %v2111_v20 = vpop.f32.mrf.mxu0  ;;  %4389 = vmatpush1.msra.mxu0 %v13734_v33  ;;  %13735 = vst [vmem:[#allocation143_spill] sm:$0xff] %v10447_v28  ;;  %4797 = vmatprep.subr.mxu1 %v13157_v49  ;;  %v3594_v61 = vsub.f32 %v10380_v60, %v13738_v30  ;;  %v6096_v35 = vsel %vm12998_vm6, 1.0, %v13157_v49  ;;  %vm13013_vm14 = vcmp.eq.s32.totalorder %v13730_v8, %v9788_v5  ;;  %v13741_v60 = vld [vmem:[#allocation13_spill] sm:$0xff]  ;;  %v13742_v33 = vand.u32 4294901760, %v10393_v52 }
 0x248   : > { %13733 = vst [vmem:[#allocation142_spill] sm:$0xff] %v10442_v42  ;;  %v3588_v29 = vsub.f32 %v10356_v55, %v13736_v31  ;;  %6380 = vmatmul.mubr.msk.f32.gmra.mxu1 %vm12982_vm9, %v13465_v10  ;;  %v2112_v3 = vadd.f32 %v2111_v20, %v13737_v43  ;;  %3566 = vmatmul.mubr.f32.gmra.mxu0 %v3565_v40  ;;  %v2572_v31 = vpop.f32.mrf.mxu1  ;;  %v13740_v43 = vld [vmem:[#allocation88_spill] sm:$0xff]  ;;  %v3580_v36 = vand.u32 4294901760, %v3579_v45 }
 0x249   : > { %6381 = vmatprep.mubr.msk.f32.mxu1 %vm12988_vm7, %v13465_v10  ;;  %3575 = vmatprep.mubr.f32.mxu0 %v3574_v2  ;;  %v2113_v40 = vpop.f32.mrf.mxu0  ;;  %v10471_v20 = vsub.f32 %v6091_v50, %v6091_v50  ;;  %vm13005_vm9 = vcmp.eq.s32.totalorder %v13740_v43, %v9805_v11  ;;  %v3603_v55 = vsub.f32 %v10393_v52, %v13742_v33  ;;  %v6095_v33 = vsel %vm13013_vm14, 1.0, %v13157_v49 }
 0x24a   : > { %4390 = vmatprep.subr.mxu0 %v13157_v49  ;;  %4799 = vmatpush1.msra.mxu1 %v13741_v60  ;;  %vm13008_vm7 = vcmp.eq.s32.totalorder %v13740_v43, %v9788_v5  ;;  %v10484_v2 = vadd.f32 %v10361_v22, %v2112_v3  ;;  %v10486_v50 = vpop.f32.mrf.mxu1  ;;  %v13744_v40 = vld [vmem:[#allocation16_spill] sm:$0xff]  ;;  %v3589_v30 = vand.u32 4294901760, %v3588_v29  ;;  %v10489_v42 = vsub.f32 %v6096_v35, %v6096_v35  ;;  %v13745_v22 = vld [vmem:[#allocation91_spill] sm:$0xff]  ;;  %v13773_v43 = vld [vmem:[#allocation89_spill] sm:$0xff] }
 0x24b   : > { %13739 = vst [vmem:[#allocation23_spill] sm:$0xff] %v10471_v20  ;;  %v2120_v31 = vpop.f32.mrf.mxu0  ;;  %4393 = vmatpush1.msra.mxu0 %v13744_v40  ;;  %4800 = vmatprep.subr.mxu1 %v13157_v49  ;;  %v3595_v29 = vand.u32 4294901760, %v3594_v61  ;;  %v6100_v35 = vsel %vm13005_vm9, 1.0, %v13157_v49  ;;  %v3609_v40 = vsub.f32 %v10427_v39, %v13746_v62  ;;  %v13750_v61 = vld [vmem:[#allocation17_spill] sm:$0xff] }
 0x24c   : > { %13743 = vst [vmem:[#allocation144_spill] sm:$0xff] %v10484_v2  ;;  %6382 = vmatmul.mubr.msk.f32.gmra.mxu1 %vm12990_vm12, %v13465_v10  ;;  %v2121_v3 = vadd.f32 %v2120_v31, %v13745_v22  ;;  %3581 = vmatmul.mubr.f32.gmra.mxu0 %v3580_v36  ;;  %v2583_v45 = vpop.f32.mrf.mxu1  ;;  %v6099_v36 = vsel %vm13008_vm7, 1.0, %v13157_v49  ;;  %v13747_v31 = vld [vmem:[#allocation90_spill] sm:$0xff]  ;;  %v3604_v22 = vand.u32 4294901760, %v3603_v55  ;;  %v10532_v52 = vsub.f32 %v6100_v35, %v6100_v35 }
 0x24d   : > { %6383 = vmatprep.mubr.msk.f32.mxu1 %vm12991_vm2, %v13465_v10  ;;  %3590 = vmatprep.mubr.f32.mxu0 %v3589_v30  ;;  %v2122_v60 = vpop.f32.mrf.mxu0  ;;  %vm13009_vm12 = vcmp.eq.s32.totalorder %v13747_v31, %v9805_v11  ;;  %v13748_v45 = vld [vmem:[#allocation15_spill] sm:$0xff]  ;;  %vm13022_vm2 = vcmp.eq.s32.totalorder %v13747_v31, %v9788_v5  ;;  %v13752_v2 = vand.u32 4294901760, %v10447_v28  ;;  %v10546_v35 = vsub.f32 %v6099_v36, %v6099_v36  ;;  %v13756_v36 = vld [vmem:[#allocation20_spill] sm:$0xff] }
 0x24e   : > { %4394 = vmatprep.subr.mxu0 %v13157_v49  ;;  %4802 = vmatpush1.msra.mxu1 %v13748_v45  ;;  %v10522_v60 = vsub.f32 %v6095_v33, %v6095_v33  ;;  %v10527_v62 = vadd.f32 %v10403_v32, %v2121_v3  ;;  %v10529_v30 = vpop.f32.mrf.mxu1  ;;  %13751 = vst [vmem:[#allocation145_spill] sm:$0xff] %v10532_v52  ;;  %v13753_v32 = vld [vmem:[#allocation28_spill] sm:$0xff]  ;;  %v3610_v27 = vand.u32 4294901760, %v3609_v40  ;;  %v6108_v40 = vsel %vm13021_vm11, 1.0, %v13157_v49 }
 0x24f   : > { %v2129_v39 = vpop.f32.mrf.mxu0  ;;  %4397 = vmatpush1.msra.mxu0 %v13750_v61  ;;  %v3618_v55 = vsub.f32 %v10447_v28, %v13752_v2  ;;  %4803 = vmatprep.subr.mxu1 %v13157_v49  ;;  %13754 = vst [vmem:[#allocation28_spill] sm:$0xff] %v10546_v35  ;;  %v6104_v2 = vsel %vm13009_vm12, 1.0, %v13157_v49  ;;  %v13755_v61 = vand.u32 4294901760, %v10471_v20  ;;  %v10599_v8 = vsub.f32 %v6108_v40, %v6108_v40 }
 0x250   : > { %13749 = vst [vmem:[#allocation91_spill] sm:$0xff] %v10527_v62  ;;  %6384 = vmatmul.mubr.msk.f32.gmra.mxu1 %vm13003_vm4, %v13465_v10  ;;  %v2130_v3 = vadd.f32 %v2129_v39, %v13753_v32  ;;  %3596 = vmatmul.mubr.f32.gmra.mxu0 %v3595_v29  ;;  %v2594_v33 = vpop.f32.mrf.mxu1  ;;  %v6103_v29 = vsel %vm13022_vm2, 1.0, %v13157_v49  ;;  %v13759_v32 = vand.u32 4294901760, %v10489_v42  ;;  %vm13024_vm4 = vcmp.eq.s32.totalorder %v13579_v57, %v9805_v11 }
 0x251   : > { %6385 = vmatprep.mubr.msk.f32.mxu1 %vm12998_vm6, %v13465_v10  ;;  %3605 = vmatprep.mubr.f32.mxu0 %v3604_v22  ;;  %v2131_v45 = vpop.f32.mrf.mxu0  ;;  %v3624_v39 = vsub.f32 %v10471_v20, %v13755_v61  ;;  %vm13025_vm6 = vcmp.eq.s32.totalorder %v13572_v41, %v9788_v5  ;;  %v13757_v33 = vld [vmem:[#allocation85_spill] sm:$0xff]  ;;  %v3619_v20 = vand.u32 4294901760, %v3618_v55  ;;  %v10597_v62 = vsub.f32 %v6103_v29, %v6103_v29 }
 0x252   : > { %4398 = vmatprep.subr.mxu0 %v13157_v49  ;;  %4805 = vmatpush1.msra.mxu1 %v13756_v36  ;;  %v10573_v61 = vadd.f32 %v10444_v53, %v2130_v3  ;;  %v10575_v22 = vpop.f32.mrf.mxu1  ;;  %v10578_v36 = vsub.f32 %v6104_v2, %v6104_v2  ;;  %v3633_v28 = vsub.f32 %v10489_v42, %v13759_v32  ;;  %v13760_v53 = vld [vmem:[#allocation29_spill] sm:$0xff]  ;;  %v13764_v55 = vand.u32 4294901760, %v10522_v60 }
 0x253   : > { %v2138_v45 = vpop.f32.mrf.mxu0  ;;  %4401 = vmatpush1.msra.mxu0 %v13757_v33  ;;  %4806 = vmatprep.subr.mxu1 %v13157_v49  ;;  %13761 = vst [vmem:[#allocation29_spill] sm:$0xff] %v10597_v62  ;;  %13762 = vst [vmem:[#allocation147_spill] sm:$0xff] %v10599_v8 }
 0x254   : > { %13758 = vst [vmem:[#allocation146_spill] sm:$0xff] %v10578_v36  ;;  %6386 = vmatmul.mubr.msk.f32.gmra.mxu1 %vm13013_vm14, %v13465_v10  ;;  %v2139_v3 = vadd.f32 %v2138_v45, %v13760_v53  ;;  %3611 = vmatmul.mubr.f32.gmra.mxu0 %v3610_v27  ;;  %v2605_v2 = vpop.f32.mrf.mxu1  ;;  %v6107_v27 = vsel %vm13025_vm6, 1.0, %v13157_v49  ;;  %v3625_v45 = vand.u32 4294901760, %v3624_v39  ;;  %v13763_v53 = vld [vmem:[#allocation19_spill] sm:$0xff]  ;;  %v3634_v33 = vand.u32 4294901760, %v3633_v28 }
 0x255   : > { %6387 = vmatprep.mubr.msk.f32.mxu1 %vm13005_vm9, %v13465_v10  ;;  %3620 = vmatprep.mubr.f32.mxu0 %v3619_v20  ;;  %v2140_v32 = vpop.f32.mrf.mxu0  ;;  %v3639_v2 = vsub.f32 %v10522_v60, %v13764_v55  ;;  %vm13044_vm9 = vcmp.eq.s32.totalorder %v13579_v57, %v9788_v5  ;;  %v13767_v39 = vand.u32 4294901760, %v10532_v52  ;;  %v6112_v55 = vsel %vm13024_vm4, 1.0, %v13157_v49 }
 0x256   : > { %4402 = vmatprep.subr.mxu0 %v13157_v49  ;;  %4808 = vmatpush1.msra.mxu1 %v13763_v53  ;;  %v10613_v20 = vadd.f32 %v10486_v50, %v2139_v3  ;;  %v10615_v29 = vpop.f32.mrf.mxu1  ;;  %v13766_v32 = vld [vmem:[#allocation22_spill] sm:$0xff]  ;;  %vm13036_vm14 = vcmp.eq.s32.totalorder %v13592_v18, %v9805_v11 }
 0x257   : > { %v2147_v40 = vpop.f32.mrf.mxu0  ;;  %4405 = vmatpush1.msra.mxu0 %v13766_v32  ;;  %v3648_v53 = vsub.f32 %v10532_v52, %v13767_v39  ;;  %4809 = vmatprep.subr.mxu1 %v13157_v49  ;;  %v13768_v3 = vld [vmem:[#allocation34_spill] sm:$0xff]  ;;  %v10632_v32 = vsub.f32 %v6107_v27, %v6107_v27  ;;  %v13769_v39 = vand.u32 4294901760, %v10546_v35 }
 0x258   : > { %13765 = vst [vmem:[#allocation148_spill] sm:$0xff] %v10613_v20  ;;  %6388 = vmatmul.mubr.msk.f32.gmra.mxu1 %vm13008_vm7, %v13465_v10  ;;  %v2148_v28 = vadd.f32 %v2147_v40, %v13768_v3  ;;  %3626 = vmatmul.mubr.f32.gmra.mxu0 %v3625_v45  ;;  %v2616_v50 = vpop.f32.mrf.mxu1  ;;  %v6111_v40 = vsel %vm13044_vm9, 1.0, %v13157_v49  ;;  %vm13029_vm7 = vcmp.eq.s32.totalorder %v13585_v17, %v9805_v11  ;;  %v3640_v3 = vand.u32 4294901760, %v3639_v2 }
 0x259   : > { %v3654_v52 = vsub.f32 %v10546_v35, %v13769_v39  ;;  %6389 = vmatprep.mubr.msk.f32.mxu1 %vm13009_vm12, %v13465_v10  ;;  %3635 = vmatprep.mubr.f32.mxu0 %v3634_v33  ;;  %v2149_v20 = vpop.f32.mrf.mxu0  ;;  %v13770_v39 = vld [vmem:[#allocation24_spill] sm:$0xff]  ;;  %v10651_v50 = vsub.f32 %v6112_v55, %v6112_v55  ;;  %vm13033_vm12 = vcmp.eq.s32.totalorder %v13585_v17, %v9788_v5  ;;  %v3649_v35 = vand.u32 4294901760, %v3648_v53 }
 0x25a   : > { %4406 = vmatprep.subr.mxu0 %v13157_v49  ;;  %4811 = vmatpush1.msra.mxu1 %v13770_v39  ;;  %v10656_v33 = vadd.f32 %v10529_v30, %v2148_v28  ;;  %v13774_v45 = vand.u32 4294901760, %v10578_v36  ;;  %v13775_v55 = vld [vmem:[#allocation36_spill] sm:$0xff]  ;;  %v10670_v28 = vsub.f32 %v6111_v40, %v6111_v40  ;;  %v6116_v53 = vsel %vm13029_vm7, 1.0, %v13157_v49 }
 0x25b   : > { %13771 = vst [vmem:[#allocation34_spill] sm:$0xff] %v10651_v50  ;;  %v10658_v20 = vpop.f32.mrf.mxu1  ;;  %v2156_v27 = vpop.f32.mrf.mxu0  ;;  %4409 = vmatpush1.msra.mxu0 %v13773_v43  ;;  %4812 = vmatprep.subr.mxu1 %v13157_v49  ;;  %v6115_v39 = vsel %vm13033_vm12, 1.0, %v13157_v49  ;;  %v13784_v41 = vand.u32 4294901760, %v10632_v32 }
 0x25c   : > { %13772 = vst [vmem:[#allocation149_spill] sm:$0xff] %v10656_v33  ;;  %v3663_v2 = vsub.f32 %v10578_v36, %v13774_v45  ;;  %6390 = vmatmul.mubr.msk.f32.gmra.mxu1 %vm13022_vm2, %v13465_v10  ;;  %v2157_v30 = vadd.f32 %v2156_v27, %v13775_v55  ;;  %3641 = vmatmul.mubr.f32.gmra.mxu0 %v3640_v3  ;;  %13776 = vst [vmem:[#allocation36_spill] sm:$0xff] %v10670_v28  ;;  %v13777_v27 = vand.u32 4294901760, %v10597_v62 }
 0x25d   : > { %6391 = vmatprep.mubr.msk.f32.mxu1 %vm13021_vm11, %v13465_v10  ;;  %v3105_v45 = vpop.f32.mrf.mxu1  ;;  %3650 = vmatprep.mubr.f32.mxu0 %v3649_v35  ;;  %v2158_v31 = vpop.f32.mrf.mxu0  ;;  %v13778_v3 = vand.u32 4294901760, %v10599_v8  ;;  %v13779_v35 = vld [vmem:[#allocation26_spill] sm:$0xff]  ;;  %v10702_v33 = vsub.f32 %v6116_v53, %v6116_v53  ;;  %vm13038_vm11 = vcmp.eq.s32.totalorder %v13592_v18, %v9788_v5  ;;  %vm13043_vm2 = vcmp.eq.s32.totalorder %v13598_v0, %v9805_v11 }
 0x25e   : > { %v3669_v40 = vsub.f32 %v10597_v62, %v13777_v27  ;;  %4410 = vmatprep.subr.mxu0 %v13157_v49  ;;  %v3655_v45 = vand.u32 4294901760, %v3654_v52  ;;  %4814 = vmatpush1.msra.mxu1 %v13779_v35  ;;  %v10697_v27 = vadd.f32 %v10575_v22, %v2157_v30  ;;  %v3664_v36 = vand.u32 4294901760, %v3663_v2  ;;  %v13782_v22 = vld [vmem:[#allocation35_spill] sm:$0xff] }
 0x25f   : > { %v3678_v55 = vsub.f32 %v10599_v8, %v13778_v3  ;;  %v10699_v62 = vpop.f32.mrf.mxu1  ;;  %v2165_v3 = vpop.f32.mrf.mxu0  ;;  %v13780_v8 = vld [vmem:[#allocation25_spill] sm:$0xff]  ;;  %13781 = vst [vmem:[#allocation150_spill] sm:$0xff] %v10702_v33  ;;  %4815 = vmatprep.subr.mxu1 %v13157_v49  ;;  %v6120_v52 = vsel %vm13036_vm14, 1.0, %v13157_v49  ;;  %v10716_v2 = vsub.f32 %v6115_v39, %v6115_v39 }
 0x260   : > { %4413 = vmatpush1.msra.mxu0 %v13780_v8  ;;  %6392 = vmatmul.mubr.msk.f32.gmra.mxu1 %vm13025_vm6, %v13465_v10  ;;  %v2166_v30 = vadd.f32 %v2165_v3, %v13782_v22  ;;  %v3670_v43 = vand.u32 4294901760, %v3669_v40  ;;  %v3684_v3 = vsub.f32 %v10632_v32, %v13784_v41  ;;  %v10730_v22 = vsub.f32 %v6120_v52, %v6120_v52 }
 0x261   : > { %3656 = vmatmul.mubr.f32.gmra.mxu0 %v3655_v45  ;;  %13783 = vst [vmem:[#allocation35_spill] sm:$0xff] %v10716_v2  ;;  %6393 = vmatprep.mubr.msk.f32.mxu1 %vm13024_vm4, %v13465_v10  ;;  %v3112_v53 = vpop.f32.mrf.mxu1  ;;  %v2167_v31 = vpop.f32.mrf.mxu0  ;;  %v3679_v35 = vand.u32 4294901760, %v3678_v55  ;;  %v13785_v45 = vld [vmem:[#allocation27_spill] sm:$0xff]  ;;  %v13787_v8 = vand.u32 4294901760, %v10651_v50  ;;  %vm13051_vm4 = vcmp.eq.s32.totalorder %v13598_v0, %v9788_v5  ;;  %vm13050_vm6 = vcmp.eq.s32.totalorder %v13605_v51, %v9805_v11 }
 0x262   : > { %3665 = vmatprep.mubr.f32.mxu0 %v3664_v36  ;;  %4414 = vmatprep.subr.mxu0 %v13157_v49  ;;  %13786 = vst [vmem:[#allocation151_spill] sm:$0xff] %v10730_v22  ;;  %v6119_v36 = vsel %vm13038_vm11, 1.0, %v13157_v49  ;;  %v10740_v40 = vadd.f32 %v10615_v29, %v2166_v30  ;;  %v13789_v31 = vld [vmem:[#allocation30_spill] sm:$0xff]  ;;  %v13790_v29 = vld [vmem:[#allocation40_spill] sm:$0xff] }
 0x263   : > { %4817 = vmatpush2.msra.mxu1 %v13785_v45  ;;  %v3693_v53 = vsub.f32 %v10651_v50, %v13787_v8  ;;  %v10742_v41 = vpop.f32.mrf.mxu1  ;;  %v2782_v55 = vpop.f32.mrf.mxu0  ;;  %4417 = vmatpush2.msra.mxu0 %v13789_v31  ;;  %v6124_v8 = vsel %vm13043_vm2, 1.0, %v13157_v49  ;;  %v3685_v31 = vand.u32 4294901760, %v3684_v3  ;;  %v10765_v50 = vsub.f32 %v6119_v36, %v6119_v36 }
 0x264   : > { %13788 = vst [vmem:[#allocation152_spill] sm:$0xff] %v10740_v40  ;;  %4818 = vmatprep.subr.mxu1 %v13157_v49  ;;  %6394 = vmatmul.mubr.msk.f32.gmra.mxu1 %vm13044_vm9, %v13465_v10  ;;  %v2783_v30 = vadd.f32 %v2782_v55, %v13790_v29  ;;  %v13792_v40 = vand.u32 4294901760, %v10670_v28  ;;  %v10772_v55 = vsub.f32 %v6124_v8, %v6124_v8  ;;  %v13797_v29 = vand.u32 4294901760, %v10702_v33 }
 0x265   : > { %3671 = vmatmul.mubr.f32.gmra.mxu0 %v3670_v43  ;;  %6395 = vmatprep.mubr.msk.f32.mxu1 %vm13029_vm7, %v13465_v10  ;;  %v3119_v52 = vpop.f32.mrf.mxu1  ;;  %v2784_v45 = vpop.f32.mrf.mxu0  ;;  %13791 = vst [vmem:[#allocation40_spill] sm:$0xff] %v10765_v50  ;;  %v13793_v43 = vld [vmem:[#allocation95_spill] sm:$0xff]  ;;  %v3694_v8 = vand.u32 4294901760, %v3693_v53  ;;  %vm13075_vm7 = vcmp.eq.s32.totalorder %v13605_v51, %v9788_v5  ;;  %v13799_v53 = vand.u32 4294901760, %v10716_v2  ;;  %vm13067_vm9 = vcmp.eq.s32.totalorder %v13626_v25, %v9805_v11 }
 0x266   : > { %3680 = vmatprep.mubr.f32.mxu0 %v3679_v35  ;;  %v3699_v57 = vsub.f32 %v10670_v28, %v13792_v40  ;;  %4418 = vmatprep.subr.mxu0 %v13157_v49  ;;  %13794 = vst [vmem:[#allocation153_spill] sm:$0xff] %v10772_v55  ;;  %v6123_v52 = vsel %vm13051_vm4, 1.0, %v13157_v49  ;;  %v6128_v35 = vsel %vm13050_vm6, 1.0, %v13157_v49  ;;  %v10783_v3 = vadd.f32 %v10658_v20, %v2783_v30  ;;  %v13796_v40 = vld [vmem:[#allocation32_spill] sm:$0xff]  ;;  %v13798_v20 = vld [vmem:[#allocation39_spill] sm:$0xff] }
 0x267   : > { %4820 = vmatpush2.msra.mxu1 %v13793_v43  ;;  %v10785_v45 = vpop.f32.mrf.mxu1  ;;  %v2789_v36 = vpop.f32.mrf.mxu0  ;;  %4421 = vmatpush2.msra.mxu0 %v13796_v40  ;;  %v3708_v39 = vsub.f32 %v10702_v33, %v13797_v29  ;;  %v3714_v40 = vsub.f32 %v10716_v2, %v13799_v53  ;;  %v10809_v17 = vsub.f32 %v6128_v35, %v6128_v35  ;;  %v13804_v53 = vld [vmem:[#allocation98_spill] sm:$0xff] }
 0x268   : > { %13795 = vst [vmem:[#allocation154_spill] sm:$0xff] %v10783_v3  ;;  %4821 = vmatprep.subr.mxu1 %v13157_v49  ;;  %6396 = vmatmul.mubr.msk.f32.gmra.mxu1 %vm13033_vm12, %v13465_v10  ;;  %v2790_v30 = vadd.f32 %v2789_v36, %v13798_v20  ;;  %v3700_v33 = vand.u32 4294901760, %v3699_v57  ;;  %v10807_v3 = vsub.f32 %v6123_v52, %v6123_v52  ;;  %v13801_v36 = vld [vmem:[#allocation102_spill] sm:$0xff]  ;;  %v6127_v20 = vsel %vm13075_vm7, 1.0, %v13157_v49 }
 0x269   : > { %3686 = vmatmul.mubr.f32.gmra.mxu0 %v3685_v31  ;;  %6397 = vmatprep.mubr.msk.f32.mxu1 %vm13036_vm14, %v13465_v10  ;;  %v3126_v29 = vpop.f32.mrf.mxu1  ;;  %v2791_v43 = vpop.f32.mrf.mxu0  ;;  %13800 = vst [vmem:[#allocation39_spill] sm:$0xff] %v10809_v17  ;;  %vm13055_vm12 = vcmp.eq.s32.totalorder %v13801_v36, %v9805_v11  ;;  %v13802_v31 = vld [vmem:[#allocation31_spill] sm:$0xff]  ;;  %vm13058_vm14 = vcmp.eq.s32.totalorder %v13801_v36, %v9788_v5  ;;  %v3715_v57 = vand.u32 4294901760, %v3714_v40 }
 0x26a   : > { %3695 = vmatprep.mubr.f32.mxu0 %v3694_v8  ;;  %4422 = vmatprep.subr.mxu0 %v13157_v49  ;;  %v10822_v43 = vadd.f32 %v10699_v62, %v2790_v30  ;;  %v3709_v29 = vand.u32 4294901760, %v3708_v39  ;;  %v13806_v62 = vld [vmem:[#allocation110_spill] sm:$0xff]  ;;  %v6132_v39 = vsel %vm13055_vm12, 1.0, %v13157_v49 }
 0x26b   : > { %4823 = vmatpush2.msra.mxu1 %v13802_v31  ;;  %v10824_v52 = vpop.f32.mrf.mxu1  ;;  %v2796_v35 = vpop.f32.mrf.mxu0  ;;  %4425 = vmatpush2.msra.mxu0 %v13804_v53  ;;  %v13805_v31 = vand.u32 4294901760, %v10730_v22  ;;  %v10846_v53 = vsub.f32 %v6127_v20, %v6127_v20  ;;  %v10870_v28 = vsub.f32 %v6132_v39, %v6132_v39 }
 0x26c   : > { %13803 = vst [vmem:[#allocation155_spill] sm:$0xff] %v10822_v43  ;;  %4824 = vmatprep.subr.mxu1 %v13157_v49  ;;  %6398 = vmatmul.mubr.msk.f32.gmra.mxu1 %vm13038_vm11, %v13465_v10  ;;  %v2797_v30 = vadd.f32 %v2796_v35, %v13806_v62  ;;  %v13808_v35 = vld [vmem:[#allocation33_spill] sm:$0xff]  ;;  %v13809_v62 = vand.u32 4294901760, %v10765_v50 }
 0x26d   : > { %v3723_v2 = vsub.f32 %v10730_v22, %v13805_v31  ;;  %3701 = vmatmul.mubr.f32.gmra.mxu0 %v3700_v33  ;;  %6399 = vmatprep.mubr.msk.f32.mxu1 %vm13043_vm2, %v13465_v10  ;;  %v3133_v31 = vpop.f32.mrf.mxu1  ;;  %v2798_v8 = vpop.f32.mrf.mxu0  ;;  %v13807_v33 = vld [vmem:[#allocation105_spill] sm:$0xff]  ;;  %13813 = vst [vmem:[#allocation156_spill] sm:$0xff] %v10870_v28 }
 0x26e   : > { %3710 = vmatprep.mubr.f32.mxu0 %v3709_v29  ;;  %vm13060_vm11 = vcmp.eq.s32.totalorder %v13807_v33, %v9805_v11  ;;  %4426 = vmatprep.subr.mxu0 %v13157_v49  ;;  %v3729_v22 = vsub.f32 %v10765_v50, %v13809_v62  ;;  %v13810_v29 = vand.u32 4294901760, %v10772_v55  ;;  %v6131_v8 = vsel %vm13058_vm14, 1.0, %v13157_v49  ;;  %v13817_v50 = vld [vmem:[#allocation100_spill] sm:$0xff] }
 0x26f   : > { %4826 = vmatpush2.msra.mxu1 %v13808_v35  ;;  %v10865_v31 = vadd.f32 %v10742_v41, %v2797_v30  ;;  %v10867_v40 = vpop.f32.mrf.mxu1  ;;  %v2803_v18 = vpop.f32.mrf.mxu0  ;;  %v13812_v35 = vld [vmem:[#allocation101_spill] sm:$0xff]  ;;  %v3724_v43 = vand.u32 4294901760, %v3723_v2  ;;  %vm13062_vm2 = vcmp.eq.s32.totalorder %v13807_v33, %v9788_v5  ;;  %v13814_v41 = vld [vmem:[#allocation112_spill] sm:$0xff]  ;;  %v6136_v2 = vsel %vm13060_vm11, 1.0, %v13157_v49  ;;  %v13838_v33 = vld [vmem:[#allocation42_spill] sm:$0xff] }
 0x270   : > { %v3738_v20 = vsub.f32 %v10772_v55, %v13810_v29  ;;  %4429 = vmatpush2.msra.mxu0 %v13812_v35  ;;  %4827 = vmatprep.subr.mxu1 %v13157_v49  ;;  %v2804_v30 = vadd.f32 %v2803_v18, %v13814_v41  ;;  %v10890_v29 = vsub.f32 %v6131_v8, %v6131_v8  ;;  %v13815_v18 = vand.u32 4294901760, %v10807_v3 }
 0x271   : > { %13811 = vst [vmem:[#allocation110_spill] sm:$0xff] %v10865_v31  ;;  %6400 = vmatmul.mubr.msk.f32.gmra.mxu1 %vm13051_vm4, %v13465_v10  ;;  %3716 = vmatmul.mubr.f32.gmra.mxu0 %v3715_v57  ;;  %v3140_v39 = vpop.f32.mrf.mxu1  ;;  %v2805_v62 = vpop.f32.mrf.mxu0  ;;  %v13816_v41 = vand.u32 4294901760, %v10809_v17  ;;  %v3730_v55 = vand.u32 4294901760, %v3729_v22  ;;  %v6140_v22 = vsel %vm13067_vm9, 1.0, %v13157_v49  ;;  %vm13074_vm4 = vcmp.eq.s32.totalorder %v13632_v1, %v9805_v11 }
 0x272   : > { %6401 = vmatprep.mubr.msk.f32.mxu1 %vm13050_vm6, %v13465_v10  ;;  %3725 = vmatprep.mubr.f32.mxu0 %v3724_v43  ;;  %v3744_v57 = vsub.f32 %v10807_v3, %v13815_v18  ;;  %v3739_v31 = vand.u32 4294901760, %v3738_v20  ;;  %v6135_v43 = vsel %vm13062_vm2, 1.0, %v13157_v49  ;;  %v10906_v8 = vadd.f32 %v10785_v45, %v2804_v30  ;;  %v13818_v18 = vld [vmem:[#allocation38_spill] sm:$0xff] }
 0x273   : > { %v3753_v0 = vsub.f32 %v10809_v17, %v13816_v41  ;;  %4430 = vmatprep.subr.mxu0 %v13157_v49  ;;  %4829 = vmatpush2.msra.mxu1 %v13817_v50  ;;  %v10908_v39 = vpop.f32.mrf.mxu1  ;;  %v2810_v62 = vpop.f32.mrf.mxu0  ;;  %v10911_v41 = vsub.f32 %v6136_v2, %v6136_v2  ;;  %vm13068_vm6 = vcmp.eq.s32.totalorder %v13626_v25, %v9788_v5  ;;  %v13820_v45 = vld [vmem:[#allocation114_spill] sm:$0xff] }
 0x274   : > { %4433 = vmatpush2.msra.mxu0 %v13818_v18  ;;  %4830 = vmatprep.subr.mxu1 %v13157_v49  ;;  %v2811_v30 = vadd.f32 %v2810_v62, %v13820_v45  ;;  %v3745_v35 = vand.u32 4294901760, %v3744_v57  ;;  %v13821_v18 = vand.u32 4294901760, %v10846_v53  ;;  %v10938_v45 = vsub.f32 %v6135_v43, %v6135_v43 }
 0x275   : > { %13819 = vst [vmem:[#allocation112_spill] sm:$0xff] %v10911_v41  ;;  %6402 = vmatmul.mubr.msk.f32.gmra.mxu1 %vm13075_vm7, %v13465_v10  ;;  %3731 = vmatmul.mubr.f32.gmra.mxu0 %v3730_v55  ;;  %v3147_v2 = vpop.f32.mrf.mxu1  ;;  %v2812_v20 = vpop.f32.mrf.mxu0  ;;  %v3754_v50 = vand.u32 4294901760, %v3753_v0  ;;  %v13822_v55 = vld [vmem:[#allocation103_spill] sm:$0xff]  ;;  %v10940_v17 = vsub.f32 %v6140_v22, %v6140_v22  ;;  %v6144_v22 = vsel %vm13074_vm4, 1.0, %v13157_v49  ;;  %v13834_v36 = vand.u32 4294901760, %v10911_v41 }
 0x276   : > { %6403 = vmatprep.mubr.msk.f32.mxu1 %vm13055_vm12, %v13465_v10  ;;  %3740 = vmatprep.mubr.f32.mxu0 %v3739_v31  ;;  %v3759_v51 = vsub.f32 %v10846_v53, %v13821_v18  ;;  %13823 = vst [vmem:[#allocation114_spill] sm:$0xff] %v10938_v45  ;;  %v6139_v31 = vsel %vm13068_vm6, 1.0, %v13157_v49  ;;  %v10947_v0 = vadd.f32 %v10824_v52, %v2811_v30  ;;  %v13826_v20 = vld [vmem:[#allocation104_spill] sm:$0xff]  ;;  %v13827_v2 = vand.u32 4294901760, %v10870_v28  ;;  %v13828_v52 = vld [vmem:[#allocation47_spill] sm:$0xff] }
 0x277   : > { %4434 = vmatprep.subr.mxu0 %v13157_v49  ;;  %4832 = vmatpush2.msra.mxu1 %v13822_v55  ;;  %13824 = vst [vmem:[#allocation157_spill] sm:$0xff] %v10940_v17  ;;  %v10949_v57 = vpop.f32.mrf.mxu1  ;;  %v2817_v18 = vpop.f32.mrf.mxu0  ;;  %vm13080_vm12 = vcmp.eq.s32.totalorder %v13632_v1, %v9788_v5  ;;  %vm400_vm7 = vcmp.eq.s32.totalorder %v13659_v54, %v9788_v5 }
 0x278   : > { %13825 = vst [vmem:[#allocation158_spill] sm:$0xff] %v10947_v0  ;;  %4437 = vmatpush2.msra.mxu0 %v13826_v20  ;;  %v3768_v43 = vsub.f32 %v10870_v28, %v13827_v2  ;;  %4833 = vmatprep.subr.mxu1 %v13157_v49  ;;  %v2818_v30 = vadd.f32 %v2817_v18, %v13828_v52  ;;  %v3760_v62 = vand.u32 4294901760, %v3759_v51  ;;  %v13830_v28 = vand.u32 4294901760, %v10890_v29  ;;  %v13833_v52 = vld [vmem:[#allocation106_spill] sm:$0xff] }
 0x279   : > { %6404 = vmatmul.mubr.msk.f32.gmra.mxu1 %vm13058_vm14, %v13465_v10  ;;  %3746 = vmatmul.mubr.f32.gmra.mxu0 %v3745_v35  ;;  %v3154_v2 = vpop.f32.mrf.mxu1  ;;  %v2819_v55 = vpop.f32.mrf.mxu0  ;;  %v10972_v20 = vsub.f32 %v6139_v31, %v6139_v31  ;;  %vm13079_vm14 = vcmp.eq.s32.totalorder %v13639_v23, %v9805_v11  ;;  %v13831_v35 = vld [vmem:[#allocation37_spill] sm:$0xff]  ;;  %v10981_v18 = vsub.f32 %v6144_v22, %v6144_v22  ;;  %v6143_v51 = vsel %vm13080_vm12, 1.0, %v13157_v49 }
 0x27a   : > { %6405 = vmatprep.mubr.msk.f32.mxu1 %vm13060_vm11, %v13465_v10  ;;  %3755 = vmatprep.mubr.f32.mxu0 %v3754_v50  ;;  %v3774_v0 = vsub.f32 %v10890_v29, %v13830_v28  ;;  %v10989_v55 = vadd.f32 %v10867_v40, %v2818_v30  ;;  %v3769_v2 = vand.u32 4294901760, %v3768_v43  ;;  %v3783_v22 = vsub.f32 %v10911_v41, %v13834_v36  ;;  %v13835_v40 = vld [vmem:[#allocation52_spill] sm:$0xff] }
 0x27b   : > { %13829 = vst [vmem:[#allocation47_spill] sm:$0xff] %v10972_v20  ;;  %4438 = vmatprep.subr.mxu0 %v13157_v49  ;;  %4835 = vmatpush2.msra.mxu1 %v13831_v35  ;;  %13832 = vst [vmem:[#allocation159_spill] sm:$0xff] %v10981_v18  ;;  %v10991_v28 = vpop.f32.mrf.mxu1  ;;  %v2824_v31 = vpop.f32.mrf.mxu0  ;;  %vm388_vm11 = vcmp.eq.s32.totalorder %v13639_v23, %v9788_v5  ;;  %v6148_v36 = vsel %vm13079_vm14, 1.0, %v13157_v49 }
 0x27c   : > { %4441 = vmatpush2.msra.mxu0 %v13833_v52  ;;  %4836 = vmatprep.subr.mxu1 %v13157_v49  ;;  %v2825_v30 = vadd.f32 %v2824_v31, %v13835_v40  ;;  %v3775_v50 = vand.u32 4294901760, %v3774_v0  ;;  %v11014_v52 = vsub.f32 %v6143_v51, %v6143_v51  ;;  %v13837_v31 = vand.u32 4294901760, %v10938_v45 }
 0x27d   : > { %6406 = vmatmul.mubr.msk.f32.gmra.mxu1 %vm13062_vm2, %v13465_v10  ;;  %3761 = vmatmul.mubr.f32.gmra.mxu0 %v3760_v62  ;;  %v3161_v43 = vpop.f32.mrf.mxu1  ;;  %v2826_v35 = vpop.f32.mrf.mxu0  ;;  %vm13082_vm2 = vcmp.eq.s32.totalorder %v13648_v14, %v9805_v11  ;;  %v13836_v62 = vld [vmem:[#allocation107_spill] sm:$0xff]  ;;  %v6147_v0 = vsel %vm388_vm11, 1.0, %v13157_v49  ;;  %v11035_v41 = vsub.f32 %v6148_v36, %v6148_v36 }
 0x27e   : > { %6407 = vmatprep.mubr.msk.f32.mxu1 %vm13067_vm9, %v13465_v10  ;;  %3770 = vmatprep.mubr.f32.mxu0 %v3769_v2  ;;  %v3789_v40 = vsub.f32 %v10938_v45, %v13837_v31  ;;  %v11030_v51 = vadd.f32 %v10908_v39, %v2825_v30  ;;  %v13839_v31 = vand.u32 4294901760, %v10940_v17  ;;  %v13840_v39 = vld [vmem:[#allocation55_spill] sm:$0xff]  ;;  %vm392_vm9 = vcmp.eq.s32.totalorder %v13648_v14, %v9788_v5 }
 0x27f   : > { %4442 = vmatprep.subr.mxu0 %v13157_v49  ;;  %4838 = vmatpush2.msra.mxu1 %v13836_v62  ;;  %v11032_v2 = vpop.f32.mrf.mxu1  ;;  %v2831_v43 = vpop.f32.mrf.mxu0  ;;  %v3784_v62 = vand.u32 4294901760, %v3783_v22  ;;  %v6152_v22 = vsel %vm13082_vm2, 1.0, %v13157_v49  ;;  %v11056_v35 = vsub.f32 %v6147_v0, %v6147_v0  ;;  %v13852_v1 = vand.u32 4294901760, %v11035_v41 }
 0x280   : > { %4445 = vmatpush2.msra.mxu0 %v13838_v33  ;;  %v3798_v45 = vsub.f32 %v10940_v17, %v13839_v31  ;;  %4839 = vmatprep.subr.mxu1 %v13157_v49  ;;  %v2832_v30 = vadd.f32 %v2831_v43, %v13840_v39  ;;  %v3790_v25 = vand.u32 4294901760, %v3789_v40  ;;  %v13843_v33 = vld [vmem:[#allocation108_spill] sm:$0xff]  ;;  %v11075_v17 = vsub.f32 %v6152_v22, %v6152_v22 }
 0x281   : > { %6408 = vmatmul.mubr.msk.f32.gmra.mxu1 %vm13068_vm6, %v13465_v10  ;;  %3776 = vmatmul.mubr.f32.gmra.mxu0 %v3775_v50  ;;  %v3168_v36 = vpop.f32.mrf.mxu1  ;;  %v2833_v31 = vpop.f32.mrf.mxu0  ;;  %13841 = vst [vmem:[#allocation52_spill] sm:$0xff] %v11056_v35  ;;  %v13842_v50 = vand.u32 4294901760, %v10972_v20  ;;  %vm397_vm6 = vcmp.eq.s32.totalorder %v13656_v15, %v9805_v11  ;;  %v6151_v40 = vsel %vm392_vm9, 1.0, %v13157_v49  ;;  %v13853_v23 = vand.u32 4294901760, %v11056_v35 }
 0x282   : > { %6409 = vmatprep.mubr.msk.f32.mxu1 %vm13074_vm4, %v13465_v10  ;;  %3785 = vmatprep.mubr.f32.mxu0 %v3784_v62  ;;  %v13844_v36 = vand.u32 4294901760, %v10981_v18  ;;  %v11070_v0 = vadd.f32 %v10949_v57, %v2832_v30  ;;  %v3799_v39 = vand.u32 4294901760, %v3798_v45  ;;  %13846 = vst [vmem:[#allocation55_spill] sm:$0xff] %v11075_v17  ;;  %v13847_v57 = vld [vmem:[#allocation58_spill] sm:$0xff]  ;;  %v6156_v45 = vsel %vm397_vm6, 1.0, %v13157_v49 }
 0x283   : > { %v3804_v43 = vsub.f32 %v10972_v20, %v13842_v50  ;;  %4446 = vmatprep.subr.mxu0 %v13157_v49  ;;  %4841 = vmatpush2.msra.mxu1 %v13843_v33  ;;  %v11072_v31 = vpop.f32.mrf.mxu1  ;;  %v2838_v50 = vpop.f32.mrf.mxu0  ;;  %v13845_v20 = vld [vmem:[#allocation44_spill] sm:$0xff]  ;;  %vm396_vm4 = vcmp.eq.s32.totalorder %v13656_v15, %v9788_v5 }
 0x284   : > { %v3813_v62 = vsub.f32 %v10981_v18, %v13844_v36  ;;  %4449 = vmatpush2.msra.mxu0 %v13845_v20  ;;  %4842 = vmatprep.subr.mxu1 %v13157_v49  ;;  %v2839_v30 = vadd.f32 %v2838_v50, %v13847_v57  ;;  %v13848_v57 = vand.u32 4294901760, %v11014_v52  ;;  %v13849_v20 = vld [vmem:[#allocation41_spill] sm:$0xff]  ;;  %v11106_v18 = vsub.f32 %v6151_v40, %v6151_v40 }
 0x285   : > { %6410 = vmatmul.mubr.msk.f32.gmra.mxu1 %vm13080_vm12, %v13465_v10  ;;  %3791 = vmatmul.mubr.f32.gmra.mxu0 %v3790_v25  ;;  %v3175_v22 = vpop.f32.mrf.mxu1  ;;  %v2840_v50 = vpop.f32.mrf.mxu0  ;;  %v3805_v25 = vand.u32 4294901760, %v3804_v43  ;;  %v6155_v40 = vsel %vm396_vm4, 1.0, %v13157_v49  ;;  %vm404_vm12 = vcmp.eq.s32.totalorder %v13663_v38, %v9788_v5 }
 0x286   : > { %6411 = vmatprep.mubr.msk.f32.mxu1 %vm13079_vm14, %v13465_v10  ;;  %3800 = vmatprep.mubr.f32.mxu0 %v3799_v39  ;;  %v3819_v36 = vsub.f32 %v11014_v52, %v13848_v57  ;;  %v3814_v33 = vand.u32 4294901760, %v3813_v62  ;;  %vm401_vm14 = vcmp.eq.s32.totalorder %v13659_v54, %v9805_v11  ;;  %v11111_v39 = vadd.f32 %v10991_v28, %v2839_v30  ;;  %v13850_v50 = vld [vmem:[#allocation43_spill] sm:$0xff] }
 0x287   : > { %4450 = vmatprep.subr.mxu0 %v13157_v49  ;;  %4844 = vmatpush2.msra.mxu1 %v13849_v20  ;;  %v11113_v43 = vpop.f32.mrf.mxu1  ;;  %v2845_v22 = vpop.f32.mrf.mxu0  ;;  %v11116_v57 = vsub.f32 %v6156_v45, %v6156_v45  ;;  %v3828_v62 = vsub.f32 %v11035_v41, %v13852_v1  ;;  %v6159_v1 = vsel %vm400_vm7, 1.0, %v13157_v49 }
 0x288   : > { %4453 = vmatpush2.msra.mxu0 %v13850_v50  ;;  %4845 = vmatprep.subr.mxu1 %v13157_v49  ;;  %v2846_v30 = vadd.f32 %v2845_v22, %v9812_v12  ;;  %v3820_v20 = vand.u32 4294901760, %v3819_v36  ;;  %v3834_v50 = vsub.f32 %v11056_v35, %v13853_v23  ;;  %v6160_v12 = vsel %vm401_vm14, 1.0, %v13157_v49 }
 0x289   : > { %13851 = vst [vmem:[#allocation58_spill] sm:$0xff] %v11116_v57  ;;  %6412 = vmatmul.mubr.msk.f32.gmra.mxu1 %vm388_vm11, %v13465_v10  ;;  %3806 = vmatmul.mubr.f32.gmra.mxu0 %v3805_v25  ;;  %v3182_v45 = vpop.f32.mrf.mxu1  ;;  %v2847_v28 = vpop.f32.mrf.mxu0  ;;  %v11151_v25 = vsub.f32 %v6155_v40, %v6155_v40  ;;  %v13855_v35 = vand.u32 4294901760, %v11075_v17 }
 0x28a   : > { %6413 = vmatprep.mubr.msk.f32.mxu1 %vm13082_vm2, %v13465_v10  ;;  %3815 = vmatprep.mubr.f32.mxu0 %v3814_v33  ;;  %vm405_vm2 = vcmp.eq.s32.totalorder %v13663_v38, %v9805_v11  ;;  %v11157_v33 = vadd.f32 %v11032_v2, %v2846_v30  ;;  %v13854_v28 = vld [vmem:[#allocation45_spill] sm:$0xff]  ;;  %v3829_v45 = vand.u32 4294901760, %v3828_v62  ;;  %v11172_v30 = vsub.f32 %v6160_v12, %v6160_v12  ;;  %v13856_v12 = vld [vmem:[#allocation48_spill] sm:$0xff] }
 0x28b   : > { %4454 = vmatprep.subr.mxu0 %v13157_v49  ;;  %4847 = vmatpush2.msra.mxu1 %v9629_v13  ;;  %v11159_v23 = vpop.f32.mrf.mxu1  ;;  %v2852_v36 = vpop.f32.mrf.mxu0  ;;  %v3843_v13 = vsub.f32 %v11075_v17, %v13855_v35  ;;  %v6163_v62 = vsel %vm404_vm12, 1.0, %v13157_v49  ;;  %v11178_v35 = vsub.f32 %v6159_v1, %v6159_v1  ;;  %v13857_v1 = vand.u32 4294901760, %v11106_v18 }
 0x28c   : > { %4457 = vmatpush2.msra.mxu0 %v13854_v28  ;;  %4848 = vmatprep.subr.mxu1 %v13157_v49  ;;  %v2853_v2 = vadd.f32 %v2852_v36, %v9845_v9  ;;  %v6164_v9 = vsel %vm405_vm2, 1.0, %v13157_v49  ;;  %v13858_v28 = vld [vmem:[#allocation50_spill] sm:$0xff]  ;;  %v11210_v14 = vsub.f32 %v6163_v62, %v6163_v62  ;;  %v13865_v62 = vld [vmem:[#allocation53_spill] sm:$0xff] }
 0x28d   : > { %6414 = vmatmul.mubr.msk.f32.gmra.mxu1 %vm392_vm9, %v13465_v10  ;;  %3821 = vmatmul.mubr.f32.gmra.mxu0 %v3820_v20  ;;  %v3189_v40 = vpop.f32.mrf.mxu1  ;;  %v2854_v22 = vpop.f32.mrf.mxu0  ;;  %v3835_v20 = vand.u32 4294901760, %v3834_v50  ;;  %v3849_v36 = vsub.f32 %v11106_v18, %v13857_v1  ;;  %v3844_v17 = vand.u32 4294901760, %v3843_v13  ;;  %v13859_v50 = vand.u32 4294901760, %v11116_v57 }
 0x28e   : > { %6415 = vmatprep.mubr.msk.f32.mxu1 %vm397_vm6, %v13465_v10  ;;  %3830 = vmatprep.mubr.f32.mxu0 %v3829_v45  ;;  %v11195_v40 = vadd.f32 %v11072_v31, %v2853_v2  ;;  %v11207_v31 = vsub.f32 %v6164_v9, %v6164_v9  ;;  %v13870_v5 = vand.u32 4294901760, %v11210_v14 }
 0x28f   : > { %4458 = vmatprep.subr.mxu0 %v13157_v49  ;;  %4850 = vmatpush2.msra.mxu1 %v13856_v12  ;;  %v3194_v22 = vpop.f32.mrf.mxu1  ;;  %v2859_v45 = vpop.f32.mrf.mxu0  ;;  %v3858_v12 = vsub.f32 %v11116_v57, %v13859_v50  ;;  %v3850_v15 = vand.u32 4294901760, %v3849_v36  ;;  %v13862_v57 = vld [vmem:[#allocation51_spill] sm:$0xff] }
 0x290   : > { %4461 = vmatpush2.msra.mxu0 %v13858_v28  ;;  %4851 = vmatprep.subr.mxu1 %v13157_v49  ;;  %v2860_v1 = vadd.f32 %v2859_v45, %v9885_v58  ;;  %v13860_v28 = vld [vmem:[#allocation49_spill] sm:$0xff]  ;;  %v13861_v58 = vand.u32 4294901760, %v11151_v25  ;;  %v13863_v36 = vld [vmem:[#allocation123_spill] sm:$0xff] }
 0x291   : > { %6416 = vmatmul.mubr.msk.f32.gmra.mxu1 %vm396_vm4, %v13465_v10  ;;  %3836 = vmatmul.mubr.f32.gmra.mxu0 %v3835_v20  ;;  %v3196_v13 = vpop.f32.mrf.mxu1  ;;  %v2861_v50 = vpop.f32.mrf.mxu0 }
 0x292   : > { %6417 = vmatprep.mubr.msk.f32.mxu1 %vm401_vm14, %v13465_v10  ;;  %3845 = vmatprep.mubr.f32.mxu0 %v3844_v17  ;;  %v3864_v9 = vsub.f32 %v11151_v25, %v13861_v58  ;;  %v11223_v20 = vadd.f32 %v11113_v43, %v2860_v1  ;;  %v3859_v17 = vand.u32 4294901760, %v3858_v12  ;;  %v13864_v50 = vand.u32 4294901760, %v11172_v30 }
 0x293   : > { %4462 = vmatprep.subr.mxu0 %v13157_v49  ;;  %4853 = vmatpush2.msra.mxu1 %v13860_v28  ;;  %v3201_v45 = vpop.f32.mrf.mxu1  ;;  %v2866_v2 = vpop.f32.mrf.mxu0 }
 0x294   : > { %4465 = vmatpush2.msra.mxu0 %v13862_v57  ;;  %4854 = vmatprep.subr.mxu1 %v13157_v49  ;;  %v2867_v13 = vadd.f32 %v2866_v2, %v13863_v36  ;;  %v3873_v43 = vsub.f32 %v11172_v30, %v13864_v50  ;;  %v3865_v2 = vand.u32 4294901760, %v3864_v9 }
 0x295   : > { %6418 = vmatmul.mubr.msk.f32.gmra.mxu1 %vm400_vm7, %v13465_v10  ;;  %3851 = vmatmul.mubr.f32.gmra.mxu0 %v3850_v15  ;;  %v3203_v12 = vpop.f32.mrf.mxu1  ;;  %v2868_v58 = vpop.f32.mrf.mxu0  ;;  %v13866_v15 = vand.u32 4294901760, %v11178_v35 }
 0x296   : > { %6419 = vmatprep.mubr.msk.f32.mxu1 %vm405_vm2, %v13465_v10  ;;  %3860 = vmatprep.mubr.f32.mxu0 %v3859_v17  ;;  %v11247_v1 = vadd.f32 %v11159_v23, %v2867_v13  ;;  %v13867_v17 = vld [vmem:[#allocation62_spill] sm:$0xff]  ;;  %v3874_v58 = vand.u32 4294901760, %v3873_v43  ;;  %v13869_v13 = vand.u32 4294901760, %v9897_v56 }
 0x297   : > { %4856 = vmatpush2.msra.mxu1 %v13865_v62  ;;  %4466 = vmatprep.subr.mxu0 %v13157_v49  ;;  %v3879_v36 = vsub.f32 %v11178_v35, %v13866_v15  ;;  %v3208_v54 = vpop.f32.mrf.mxu1  ;;  %v2873_v12 = vpop.f32.mrf.mxu0  ;;  %v13868_v15 = vand.u32 4294901760, %v11207_v31 }
 0x298   : > { %4857 = vmatprep.subr.mxu1 %v13157_v49  ;;  %4469 = vmatpush2.msra.mxu0 %v13867_v17  ;;  %v2874_v9 = vadd.f32 %v2873_v12, %v9971_v6  ;;  %v3894_v6 = vsub.f32 %v11210_v14, %v13870_v5 }
 0x299   : > { %6420 = vmatmul.mubr.msk.f32.gmra.mxu1 %vm404_vm12, %v13465_v10  ;;  %3866 = vmatmul.mubr.f32.gmra.mxu0 %v3865_v2  ;;  %v3888_v23 = vsub.f32 %v11207_v31, %v13868_v15  ;;  %v3210_v50 = vpop.f32.mrf.mxu1  ;;  %v2875_v11 = vpop.f32.mrf.mxu0  ;;  %v3880_v38 = vand.u32 4294901760, %v3879_v36  ;;  %v13871_v15 = vld [vmem:[#allocation122_spill] sm:$0xff]  ;;  %v13873_v36 = vld [vmem:[#allocation119_spill] sm:$0xff] }
 0x29a   : > { %4859 = vmatpush2.msra.mxu1 %v9760_v48  ;;  %4866 = vmatprep.mubr.f32.mxu1 %v13869_v13  ;;  %v11266_v43 = vadd.f32 %v3194_v22, %v2874_v9  ;;  %v13872_v13 = vand.u32 4294901760, %v13871_v15  ;;  %v3895_v9 = vand.u32 4294901760, %v3894_v6  ;;  %v13879_v6 = vld [vmem:[#allocation54_spill] sm:$0xff] }
 0x29b   : > { %3875 = vmatprep.mubr.f32.mxu0 %v3874_v58  ;;  %4860 = vmatprep.subr.mxu1 %v13157_v49  ;;  %v3215_v2 = vpop.f32.mrf.mxu1  ;;  %v2880_v12 = vpop.f32.mrf.mxu0  ;;  %v3889_v50 = vand.u32 4294901760, %v3888_v23  ;;  %v13874_v58 = vand.u32 4294901760, %v9944_v21  ;;  %v13877_v23 = vld [vmem:[#allocation124_spill] sm:$0xff] }
 0x29c   : > { %4862 = vmatpush2.msra.mxu1 %v9785_v19  ;;  %4470 = vmatprep.subr.mxu0 %v13157_v49  ;;  %v2881_v11 = vadd.f32 %v2880_v12, %v10022_v44  ;;  %v13878_v12 = vand.u32 4294901760, %v13877_v23 }
 0x29d   : > { %4870 = vmatmul.mubr.f32.vlgmr.msra.gmra.mxu1 %v13872_v13  ;;  %3881 = vmatmul.mubr.f32.gmra.mxu0 %v3880_v38  ;;  %v3217_v5 = vpop.f32.mrf.mxu1  ;;  %v2882_v22 = vpop.f32.mrf.mxu0  ;;  %v13875_v13 = vld [vmem:[#allocation121_spill] sm:$0xff]  ;;  %v13876_v38 = vand.u32 4294901760, %v9960_v4 }
 0x29e   : > { %4473 = vmatpush2.msra.mxu0 %v13873_v36  ;;  %4877 = vmatprep.mubr.f32.mxu1 %v13874_v58  ;;  %v11277_v19 = vadd.f32 %v3201_v45, %v2881_v11  ;;  %v13880_v22 = vld [vmem:[#allocation125_spill] sm:$0xff] }
 0x29f   : > { %3890 = vmatprep.mubr.f32.mxu0 %v3889_v50  ;;  %4474 = vmatprep.subr.mxu0 %v13157_v49  ;;  %v3222_v10 = vpop.f32.mrf.mxu1  ;;  %v2887_v48 = vpop.f32.mrf.mxu0 }
 0x2a0   : > { %4477 = vmatpush2.msra.mxu0 %v13875_v13  ;;  %5601 = vmatprep.subr.mxu1 %v13157_v49  ;;  %v2888_v44 = vadd.f32 %v2887_v48, %v10069_v34  ;;  %v13881_v48 = vand.u32 4294901760, %v13880_v22 }
 0x2a1   : > { %4881 = vmatmul.mubr.f32.gmra.mxu1 %v13876_v38  ;;  %3896 = vmatmul.mubr.f32.gmra.mxu0 %v3895_v9  ;;  %v3224_v50 = vpop.f32.mrf.mxu1  ;;  %v2889_v45 = vpop.f32.mrf.mxu0  ;;  %v13883_v9 = vld [vmem:[#allocation56_spill] sm:$0xff] }
 0x2a2   : > { %4888 = vmatprep.mubr.f32.mxu1 %v13878_v12  ;;  %4480 = vmatprep.mubr.f32.mxu0 %v9897_v56  ;;  %v11289_v11 = vadd.f32 %v3208_v54, %v2888_v44  ;;  %v13882_v56 = vand.u32 4294901760, %v10016_v16  ;;  %v13884_v38 = vand.u32 4294901760, %v13883_v9  ;;  %v13889_v9 = vand.u32 4294901760, %v8877_v37 }
 0x2a3   : > { %5216 = vmatprep.subr.mxu0 %v13157_v49  ;;  %5603 = vmatpush1.msra.mxu1 %v13879_v6  ;;  %v3229_v58 = vpop.f32.mrf.mxu1  ;;  %v2894_v5 = vpop.f32.mrf.mxu0  ;;  %v13887_v6 = vand.u32 4294901760, %v10045_v26 }
 0x2a4   : > { %5604 = vmatprep.subr.mxu1 %v13157_v49  ;;  %v2895_v34 = vadd.f32 %v2894_v5, %v10109_v24  ;;  %v13885_v24 = vand.u32 4294901760, %v8851_v47 }
 0x2a5   : > { %4892 = vmatmul.mubr.f32.gmra.mxu1 %v13881_v48  ;;  %4483 = vmatmul.mubr.f32.vlgmr.msra.gmra.mxu0 %v13871_v15  ;;  %v3231_v12 = vpop.f32.mrf.mxu1  ;;  %v2896_v54 = vpop.f32.mrf.mxu0  ;;  %v13886_v15 = vld [vmem:[#allocation60_spill] sm:$0xff] }
 0x2a6   : > { %4899 = vmatprep.mubr.f32.mxu1 %v13882_v56  ;;  %5220 = vmatpush1.msra.mxu0 %v13884_v38  ;;  %v11302_v44 = vadd.f32 %v3215_v2, %v2895_v34  ;;  %v13892_v38 = vld [vmem:[#allocation132_spill] sm:$0xff] }
 0x2a7   : > { %4489 = vmatprep.mubr.f32.mxu0 %v9944_v21  ;;  %5221 = vmatprep.subr.mxu0 %v13157_v49  ;;  %v3236_v50 = vpop.f32.mrf.mxu1  ;;  %v2901_v45 = vpop.f32.mrf.mxu0  ;;  %v13888_v21 = vand.u32 4294901760, %v10062_v59 }
 0x2a8   : > { %5225 = vmatpush1.msra.mxu0 %v13885_v24  ;;  %5606 = vmatpush1.msra.mxu1 %v13886_v15  ;;  %v2902_v5 = vadd.f32 %v2901_v45, %v10150_v63  ;;  %v13895_v15 = vld [vmem:[#allocation68_spill] sm:$0xff] }
 0x2a9   : > { %4903 = vmatmul.mubr.f32.gmra.mxu1 %v13887_v6  ;;  %4492 = vmatmul.mubr.f32.gmra.mxu0 %v9960_v4  ;;  %v3238_v48 = vpop.f32.mrf.mxu1  ;;  %v2903_v2 = vpop.f32.mrf.mxu0  ;;  %v13890_v4 = vld [vmem:[#allocation126_spill] sm:$0xff]  ;;  %v13896_v6 = vand.u32 4294901760, %v13895_v15  ;;  %v13908_v15 = vld [vmem:[#allocation135_spill] sm:$0xff] }
 0x2aa   : > { %4910 = vmatprep.mubr.f32.mxu1 %v13888_v21  ;;  %4498 = vmatprep.mubr.f32.mxu0 %v13877_v23  ;;  %v11316_v47 = vadd.f32 %v3222_v10, %v2902_v5  ;;  %v13891_v63 = vand.u32 4294901760, %v13890_v4  ;;  %v13893_v23 = vld [vmem:[#allocation127_spill] sm:$0xff]  ;;  %v13897_v5 = vld [vmem:[#allocation65_spill] sm:$0xff]  ;;  %v13900_v48 = vld [vmem:[#allocation134_spill] sm:$0xff] }
 0x2ab   : > { %5226 = vmatprep.subr.mxu0 %v13157_v49  ;;  %5607 = vmatprep.subr.mxu1 %v13157_v49  ;;  %v3243_v34 = vpop.f32.mrf.mxu1  ;;  %v2908_v56 = vpop.f32.mrf.mxu0  ;;  %v13894_v54 = vand.u32 4294901760, %v13893_v23 }
 0x2ac   : > { %5230 = vmatpush1.msra.mxu0 %v13889_v9  ;;  %5609 = vmatpush1.msra.mxu1 %v8853_v7  ;;  %v2909_v12 = vadd.f32 %v2908_v56, %v13892_v38 }
 0x2ad   : > { %4914 = vmatmul.mubr.f32.gmra.mxu1 %v13891_v63  ;;  %4501 = vmatmul.mubr.f32.gmra.mxu0 %v13880_v22  ;;  %v3245_v45 = vpop.f32.mrf.mxu1  ;;  %v2910_v10 = vpop.f32.mrf.mxu0  ;;  %v13898_v22 = vld [vmem:[#allocation128_spill] sm:$0xff] }
 0x2ae   : > { %4921 = vmatprep.mubr.f32.mxu1 %v13894_v54  ;;  %4507 = vmatprep.mubr.f32.mxu0 %v10016_v16  ;;  %v11330_v37 = vadd.f32 %v3229_v58, %v2909_v12  ;;  %v13899_v21 = vand.u32 4294901760, %v13898_v22  ;;  %v13901_v16 = vld [vmem:[#allocation129_spill] sm:$0xff]  ;;  %v13903_v54 = vld [vmem:[#allocation6_spill] sm:$0xff] }
 0x2af   : > { %5231 = vmatprep.subr.mxu0 %v13157_v49  ;;  %5610 = vmatprep.subr.mxu1 %v13157_v49  ;;  %v3250_v7 = vpop.f32.mrf.mxu1  ;;  %v2915_v24 = vpop.f32.mrf.mxu0  ;;  %v13902_v56 = vand.u32 4294901760, %v13901_v16  ;;  %v13904_v45 = vand.u32 4294901760, %v13903_v54  ;;  %v13905_v10 = vld [vmem:[#allocation5_spill] sm:$0xff] }
 0x2b0   : > { %5235 = vmatpush1.msra.mxu0 %v13896_v6  ;;  %5612 = vmatpush1.msra.mxu1 %v13897_v5  ;;  %v2916_v2 = vadd.f32 %v2915_v24, %v13900_v48 }
 0x2b1   : > { %4925 = vmatmul.mubr.f32.gmra.mxu1 %v13899_v21  ;;  %4510 = vmatmul.mubr.f32.gmra.mxu0 %v10045_v26  ;;  %v3252_v9 = vpop.f32.mrf.mxu1  ;;  %v2917_v58 = vpop.f32.mrf.mxu0  ;;  %v13906_v26 = vld [vmem:[#allocation130_spill] sm:$0xff] }
 0x2b2   : > { %4932 = vmatprep.mubr.f32.mxu1 %v13902_v56  ;;  %4516 = vmatprep.mubr.f32.mxu0 %v10062_v59  ;;  %v11344_v63 = vadd.f32 %v3236_v50, %v2916_v2  ;;  %v13907_v24 = vand.u32 4294901760, %v13906_v26  ;;  %v13909_v59 = vld [vmem:[#allocation131_spill] sm:$0xff] }
 0x2b3   : > { %5236 = vmatprep.subr.mxu0 %v13157_v49  ;;  %5613 = vmatprep.subr.mxu1 %v13157_v49  ;;  %v3257_v38 = vpop.f32.mrf.mxu1  ;;  %v2922_v12 = vpop.f32.mrf.mxu0  ;;  %v13910_v5 = vand.u32 4294901760, %v13909_v59  ;;  %v13911_v9 = vld [vmem:[#allocation71_spill] sm:$0xff] }
 0x2b4   : > { %5240 = vmatpush1.msra.mxu0 %v13904_v45  ;;  %5615 = vmatpush1.msra.mxu1 %v13905_v10  ;;  %v2923_v6 = vadd.f32 %v2922_v12, %v13908_v15  ;;  %v13912_v58 = vand.u32 4294901760, %v13911_v9  ;;  %v13913_v12 = vld [vmem:[#allocation69_spill] sm:$0xff] }
 0x2b5   : > { %4936 = vmatmul.mubr.f32.gmra.mxu1 %v13907_v24  ;;  %4519 = vmatmul.mubr.f32.gmra.mxu0 %v13890_v4  ;;  %v3259_v21 = vpop.f32.mrf.mxu1  ;;  %v2924_v50 = vpop.f32.mrf.mxu0  ;;  %v13914_v4 = vld [vmem:[#allocation12_spill] sm:$0xff]  ;;  %v13916_v45 = vld [vmem:[#allocation137_spill] sm:$0xff] }
 0x2b6   : > { %4943 = vmatprep.mubr.f32.mxu1 %v13910_v5  ;;  %4525 = vmatprep.mubr.f32.mxu0 %v13893_v23  ;;  %v11358_v48 = vadd.f32 %v3243_v34, %v2923_v6  ;;  %v13915_v54 = vand.u32 4294901760, %v13914_v4  ;;  %v13917_v23 = vld [vmem:[#allocation133_spill] sm:$0xff]  ;;  %v13919_v50 = vld [vmem:[#allocation11_spill] sm:$0xff] }
 0x2b7   : > { %5241 = vmatprep.subr.mxu0 %v13157_v49  ;;  %5616 = vmatprep.subr.mxu1 %v13157_v49  ;;  %v3264_v2 = vpop.f32.mrf.mxu1  ;;  %v2929_v56 = vpop.f32.mrf.mxu0  ;;  %v13918_v24 = vand.u32 4294901760, %v13917_v23  ;;  %v13920_v9 = vand.u32 4294901760, %v13919_v50 }
 0x2b8   : > { %5245 = vmatpush1.msra.mxu0 %v13912_v58  ;;  %5618 = vmatpush1.msra.mxu1 %v13913_v12  ;;  %v2930_v10 = vadd.f32 %v2929_v56, %v13916_v45  ;;  %v13921_v56 = vld [vmem:[#allocation10_spill] sm:$0xff] }
 0x2b9   : > { %4947 = vmatmul.mubr.f32.gmra.mxu1 %v13915_v54  ;;  %4528 = vmatmul.mubr.f32.gmra.mxu0 %v13898_v22  ;;  %v3266_v15 = vpop.f32.mrf.mxu1  ;;  %v2931_v34 = vpop.f32.mrf.mxu0  ;;  %v13922_v22 = vld [vmem:[#allocation8_spill] sm:$0xff] }
 0x2ba   : > { %4954 = vmatprep.mubr.f32.mxu1 %v13918_v24  ;;  %4534 = vmatprep.mubr.f32.mxu0 %v13901_v16  ;;  %v11372_v6 = vadd.f32 %v3250_v7, %v2930_v10  ;;  %v13923_v58 = vand.u32 4294901760, %v13922_v22  ;;  %v13924_v16 = vld [vmem:[#allocation136_spill] sm:$0xff]  ;;  %v13926_v34 = vld [vmem:[#allocation74_spill] sm:$0xff] }
 0x2bb   : > { %5246 = vmatprep.subr.mxu0 %v13157_v49  ;;  %5619 = vmatprep.subr.mxu1 %v13157_v49  ;;  %v3271_v5 = vpop.f32.mrf.mxu1  ;;  %v2936_v21 = vpop.f32.mrf.mxu0  ;;  %v13925_v54 = vand.u32 4294901760, %v13924_v16  ;;  %v13927_v50 = vand.u32 4294901760, %v13926_v34  ;;  %v13934_v34 = vld [vmem:[#allocation76_spill] sm:$0xff] }
 0x2bc   : > { %5250 = vmatpush1.msra.mxu0 %v13920_v9  ;;  %5621 = vmatpush1.msra.mxu1 %v13921_v56  ;;  %v2937_v12 = vadd.f32 %v2936_v21, %v10359_v46  ;;  %v13928_v46 = vld [vmem:[#allocation73_spill] sm:$0xff] }
 0x2bd   : > { %4958 = vmatmul.mubr.f32.gmra.mxu1 %v13923_v58  ;;  %4537 = vmatmul.mubr.f32.gmra.mxu0 %v13906_v26  ;;  %v3273_v45 = vpop.f32.mrf.mxu1  ;;  %v2938_v7 = vpop.f32.mrf.mxu0  ;;  %v13929_v26 = vld [vmem:[#allocation14_spill] sm:$0xff]  ;;  %v13931_v9 = vld [vmem:[#allocation141_spill] sm:$0xff] }
 0x2be   : > { %4965 = vmatprep.mubr.f32.mxu1 %v13925_v54  ;;  %4543 = vmatprep.mubr.f32.mxu0 %v13909_v59  ;;  %v11386_v10 = vadd.f32 %v3257_v38, %v2937_v12  ;;  %v13930_v21 = vand.u32 4294901760, %v13929_v26  ;;  %v13932_v59 = vld [vmem:[#allocation138_spill] sm:$0xff] }
 0x2bf   : > { %5251 = vmatprep.subr.mxu0 %v13157_v49  ;;  %5622 = vmatprep.subr.mxu1 %v13157_v49  ;;  %v3278_v24 = vpop.f32.mrf.mxu1  ;;  %v2943_v15 = vpop.f32.mrf.mxu0  ;;  %v13933_v58 = vand.u32 4294901760, %v13932_v59 }
 0x2c0   : > { %5255 = vmatpush1.msra.mxu0 %v13927_v50  ;;  %5624 = vmatpush1.msra.mxu1 %v13928_v46  ;;  %v2944_v56 = vadd.f32 %v2943_v15, %v13931_v9  ;;  %v13935_v50 = vand.u32 4294901760, %v13934_v34  ;;  %v13936_v15 = vld [vmem:[#allocation7_spill] sm:$0xff] }
 0x2c1   : > { %4969 = vmatmul.mubr.f32.gmra.mxu1 %v13930_v21  ;;  %4546 = vmatmul.mubr.f32.gmra.mxu0 %v13914_v4  ;;  %v3280_v54 = vpop.f32.mrf.mxu1  ;;  %v2945_v38 = vpop.f32.mrf.mxu0  ;;  %v13937_v4 = vld [vmem:[#allocation18_spill] sm:$0xff] }
 0x2c2   : > { %4976 = vmatprep.mubr.f32.mxu1 %v13933_v58  ;;  %4552 = vmatprep.mubr.f32.mxu0 %v13917_v23  ;;  %v11400_v12 = vadd.f32 %v3264_v2, %v2944_v56  ;;  %v13938_v46 = vand.u32 4294901760, %v13937_v4  ;;  %v13939_v21 = vld [vmem:[#allocation142_spill] sm:$0xff]  ;;  %v13940_v23 = vld [vmem:[#allocation139_spill] sm:$0xff] }
 0x2c3   : > { %5256 = vmatprep.subr.mxu0 %v13157_v49  ;;  %5625 = vmatprep.subr.mxu1 %v13157_v49  ;;  %v3285_v45 = vpop.f32.mrf.mxu1  ;;  %v2950_v7 = vpop.f32.mrf.mxu0  ;;  %v13941_v58 = vand.u32 4294901760, %v13940_v23 }
 0x2c4   : > { %5260 = vmatpush1.msra.mxu0 %v13935_v50  ;;  %5627 = vmatpush1.msra.mxu1 %v13936_v15  ;;  %v2951_v9 = vadd.f32 %v2950_v7, %v13939_v21  ;;  %v13943_v50 = vld [vmem:[#allocation9_spill] sm:$0xff]  ;;  %v13948_v21 = vld [vmem:[#allocation144_spill] sm:$0xff] }
 0x2c5   : > { %4980 = vmatmul.mubr.f32.gmra.mxu1 %v13938_v46  ;;  %4555 = vmatmul.mubr.f32.gmra.mxu0 %v13922_v22  ;;  %v3287_v54 = vpop.f32.mrf.mxu1  ;;  %v2952_v2 = vpop.f32.mrf.mxu0  ;;  %v13944_v15 = vand.u32 4294901760, %v13943_v50  ;;  %v13945_v7 = vld [vmem:[#allocation77_spill] sm:$0xff]  ;;  %v13946_v22 = vld [vmem:[#allocation83_spill] sm:$0xff] }
 0x2c6   : > { %4987 = vmatprep.mubr.f32.mxu1 %v13941_v58  ;;  %4561 = vmatprep.mubr.f32.mxu0 %v13924_v16  ;;  %v11414_v56 = vadd.f32 %v3271_v5, %v2951_v9  ;;  %v13947_v46 = vand.u32 4294901760, %v13946_v22  ;;  %v13949_v16 = vld [vmem:[#allocation140_spill] sm:$0xff] }
 0x2c7   : > { %5261 = vmatprep.subr.mxu0 %v13157_v49  ;;  %5628 = vmatprep.subr.mxu1 %v13157_v49  ;;  %v3292_v38 = vpop.f32.mrf.mxu1  ;;  %v2957_v34 = vpop.f32.mrf.mxu0  ;;  %v13950_v54 = vand.u32 4294901760, %v13949_v16 }
 0x2c8   : > { %13942 = vst [vmem:[#allocation49_spill] sm:$0xff] %v11414_v56  ;;  %5265 = vmatpush1.msra.mxu0 %v13944_v15  ;;  %5630 = vmatpush1.msra.mxu1 %v13945_v7  ;;  %v2958_v58 = vadd.f32 %v2957_v34, %v13948_v21  ;;  %v13951_v7 = vld [vmem:[#allocation16_spill] sm:$0xff]  ;;  %v13953_v34 = vld [vmem:[#allocation13_spill] sm:$0xff] }
 0x2c9   : > { %4991 = vmatmul.mubr.f32.gmra.mxu1 %v13947_v46  ;;  %4564 = vmatmul.mubr.f32.gmra.mxu0 %v13929_v26  ;;  %v3294_v2 = vpop.f32.mrf.mxu1  ;;  %v2959_v5 = vpop.f32.mrf.mxu0  ;;  %v13952_v46 = vand.u32 4294901760, %v13951_v7  ;;  %v13954_v26 = vld [vmem:[#allocation21_spill] sm:$0xff] }
 0x2ca   : > { %4998 = vmatprep.mubr.f32.mxu1 %v13950_v54  ;;  %4570 = vmatprep.mubr.f32.mxu0 %v13932_v59  ;;  %v11428_v9 = vadd.f32 %v3278_v24, %v2958_v58  ;;  %v13955_v21 = vand.u32 4294901760, %v13954_v26  ;;  %v13956_v54 = vld [vmem:[#allocation91_spill] sm:$0xff] }
 0x2cb   : > { %5266 = vmatprep.subr.mxu0 %v13157_v49  ;;  %5631 = vmatprep.subr.mxu1 %v13157_v49  ;;  %v3299_v50 = vpop.f32.mrf.mxu1  ;;  %v2964_v15 = vpop.f32.mrf.mxu0  ;;  %v13957_v59 = vld [vmem:[#allocation143_spill] sm:$0xff] }
 0x2cc   : > { %5270 = vmatpush1.msra.mxu0 %v13952_v46  ;;  %5633 = vmatpush1.msra.mxu1 %v13953_v34  ;;  %v2965_v2 = vadd.f32 %v2964_v15, %v13956_v54  ;;  %v13958_v5 = vand.u32 4294901760, %v13957_v59  ;;  %v13959_v34 = vld [vmem:[#allocation17_spill] sm:$0xff]  ;;  %v13961_v15 = vld [vmem:[#allocation15_spill] sm:$0xff] }
 0x2cd   : > { %5002 = vmatmul.mubr.f32.gmra.mxu1 %v13955_v21  ;;  %4573 = vmatmul.mubr.f32.gmra.mxu0 %v13937_v4  ;;  %v3301_v56 = vpop.f32.mrf.mxu1  ;;  %v2966_v24 = vpop.f32.mrf.mxu0  ;;  %v13960_v21 = vand.u32 4294901760, %v13959_v34  ;;  %v13962_v4 = vld [vmem:[#allocation23_spill] sm:$0xff] }
 0x2ce   : > { %5009 = vmatprep.mubr.f32.mxu1 %v13958_v5  ;;  %4579 = vmatprep.mubr.f32.mxu0 %v13940_v23  ;;  %v11442_v58 = vadd.f32 %v3285_v45, %v2965_v2  ;;  %v13963_v54 = vand.u32 4294901760, %v13962_v4  ;;  %v13964_v23 = vand.u32 4294901760, %v10489_v42 }
 0x2cf   : > { %5271 = vmatprep.subr.mxu0 %v13157_v49  ;;  %5634 = vmatprep.subr.mxu1 %v13157_v49  ;;  %v3306_v7 = vpop.f32.mrf.mxu1  ;;  %v2971_v46 = vpop.f32.mrf.mxu0 }
 0x2d0   : > { %5275 = vmatpush1.msra.mxu0 %v13960_v21  ;;  %5636 = vmatpush1.msra.mxu1 %v13961_v15  ;;  %v2972_v56 = vadd.f32 %v2971_v46, %v10573_v61  ;;  %v13965_v21 = vld [vmem:[#allocation85_spill] sm:$0xff]  ;;  %v13967_v61 = vld [vmem:[#allocation20_spill] sm:$0xff] }
 0x2d1   : > { %5013 = vmatmul.mubr.f32.gmra.mxu1 %v13963_v54  ;;  %4582 = vmatmul.mubr.f32.gmra.mxu0 %v13946_v22  ;;  %v3308_v5 = vpop.f32.mrf.mxu1  ;;  %v2973_v45 = vpop.f32.mrf.mxu0  ;;  %v13966_v15 = vand.u32 4294901760, %v13965_v21  ;;  %v13968_v22 = vand.u32 4294901760, %v10522_v60  ;;  %v13969_v46 = vld [vmem:[#allocation148_spill] sm:$0xff]  ;;  %v13972_v21 = vld [vmem:[#allocation22_spill] sm:$0xff] }
 0x2d2   : > { %5020 = vmatprep.mubr.f32.mxu1 %v13964_v23  ;;  %4588 = vmatprep.mubr.f32.mxu0 %v13949_v16  ;;  %v11456_v2 = vadd.f32 %v3292_v38, %v2972_v56  ;;  %v13970_v16 = vld [vmem:[#allocation145_spill] sm:$0xff] }
 0x2d3   : > { %5276 = vmatprep.subr.mxu0 %v13157_v49  ;;  %5637 = vmatprep.subr.mxu1 %v13157_v49  ;;  %v3313_v24 = vpop.f32.mrf.mxu1  ;;  %v2978_v34 = vpop.f32.mrf.mxu0  ;;  %v13971_v23 = vand.u32 4294901760, %v13970_v16 }
 0x2d4   : > { %5280 = vmatpush1.msra.mxu0 %v13966_v15  ;;  %5639 = vmatpush1.msra.mxu1 %v13967_v61  ;;  %v2979_v54 = vadd.f32 %v2978_v34, %v13969_v46  ;;  %v13973_v15 = vand.u32 4294901760, %v13972_v21  ;;  %v13974_v34 = vld [vmem:[#allocation19_spill] sm:$0xff] }
 0x2d5   : > { %5024 = vmatmul.mubr.f32.gmra.mxu1 %v13968_v22  ;;  %4591 = vmatmul.mubr.f32.gmra.mxu0 %v13954_v26  ;;  %v3315_v5 = vpop.f32.mrf.mxu1  ;;  %v2980_v38 = vpop.f32.mrf.mxu0  ;;  %v13975_v26 = vld [vmem:[#allocation28_spill] sm:$0xff] }
 0x2d6   : > { %5031 = vmatprep.mubr.f32.mxu1 %v13971_v23  ;;  %4597 = vmatprep.mubr.f32.mxu0 %v13957_v59  ;;  %v11470_v56 = vadd.f32 %v3299_v50, %v2979_v54  ;;  %v13976_v61 = vand.u32 4294901760, %v13975_v26  ;;  %v13977_v59 = vld [vmem:[#allocation149_spill] sm:$0xff]  ;;  %v13978_v23 = vld [vmem:[#allocation146_spill] sm:$0xff] }
 0x2d7   : > { %5281 = vmatprep.subr.mxu0 %v13157_v49  ;;  %5640 = vmatprep.subr.mxu1 %v13157_v49  ;;  %v3320_v45 = vpop.f32.mrf.mxu1  ;;  %v13979_v5 = vand.u32 4294901760, %v13978_v23  ;;  %v13980_v54 = vld [vmem:[#allocation89_spill] sm:$0xff] }
 0x2d8   : > { %5285 = vmatpush1.msra.mxu0 %v13973_v15  ;;  %5642 = vmatpush1.msra.mxu1 %v13974_v34  ;;  %v2985_v22 = vpop.f32.mrf.mxu0  ;;  %v13981_v21 = vand.u32 4294901760, %v13980_v54  ;;  %v13982_v15 = vld [vmem:[#allocation24_spill] sm:$0xff] }
 0x2d9   : > { %5035 = vmatmul.mubr.f32.gmra.mxu1 %v13976_v61  ;;  %4600 = vmatmul.mubr.f32.gmra.mxu0 %v13962_v4  ;;  %v2986_v46 = vadd.f32 %v2985_v22, %v13977_v59  ;;  %v3322_v38 = vpop.f32.mrf.mxu1  ;;  %v13983_v61 = vld [vmem:[#allocation29_spill] sm:$0xff] }
 0x2da   : > { %5042 = vmatprep.mubr.f32.mxu1 %v13979_v5  ;;  %4606 = vmatprep.mubr.f32.mxu0 %v10489_v42  ;;  %v2987_v50 = vpop.f32.mrf.mxu0  ;;  %v13984_v22 = vand.u32 4294901760, %v13983_v61  ;;  %v13985_v5 = vld [vmem:[#allocation147_spill] sm:$0xff] }
 0x2db   : > { %5286 = vmatprep.subr.mxu0 %v13157_v49  ;;  %5643 = vmatprep.subr.mxu1 %v13157_v49  ;;  %v11487_v34 = vadd.f32 %v3306_v7, %v2986_v46  ;;  %v13986_v38 = vand.u32 4294901760, %v13985_v5  ;;  %v13987_v7 = vld [vmem:[#allocation25_spill] sm:$0xff] }
 0x2dc   : > { %5290 = vmatpush1.msra.mxu0 %v13981_v21  ;;  %5645 = vmatpush1.msra.mxu1 %v13982_v15  ;;  %v4129_v4 = vpop.f32.mrf.mxu1  ;;  %v2992_v59 = vpop.f32.mrf.mxu0  ;;  %v13988_v46 = vand.u32 4294901760, %v13987_v7  ;;  %v13989_v21 = vld [vmem:[#allocation26_spill] sm:$0xff] }
 0x2dd   : > { %5046 = vmatmul.mubr.f32.gmra.mxu1 %v13984_v22  ;;  %4609 = vmatmul.mubr.f32.gmra.mxu0 %v10522_v60  ;;  %v2993_v42 = vadd.f32 %v2992_v59, %v10697_v27  ;;  %v13990_v27 = vand.u32 4294901760, %v10632_v32 }
 0x2de   : > { %5053 = vmatprep.mubr.f32.mxu1 %v13986_v38  ;;  %4615 = vmatprep.mubr.f32.mxu0 %v13970_v16  ;;  %v4131_v50 = vpop.f32.mrf.mxu1  ;;  %v2994_v54 = vpop.f32.mrf.mxu0  ;;  %v13991_v16 = vld [vmem:[#allocation152_spill] sm:$0xff]  ;;  %v13992_v38 = vld [vmem:[#allocation34_spill] sm:$0xff] }
 0x2df   : > { %5291 = vmatprep.subr.mxu0 %v13157_v49  ;;  %5646 = vmatprep.subr.mxu1 %v13157_v49  ;;  %v11501_v15 = vadd.f32 %v3313_v24, %v2993_v42  ;;  %v13993_v50 = vand.u32 4294901760, %v13992_v38  ;;  %v13994_v24 = vld [vmem:[#allocation30_spill] sm:$0xff] }
 0x2e0   : > { %5295 = vmatpush1.msra.mxu0 %v13988_v46  ;;  %5648 = vmatpush1.msra.mxu1 %v13989_v21  ;;  %v4136_v60 = vpop.f32.mrf.mxu1  ;;  %v2999_v22 = vpop.f32.mrf.mxu0  ;;  %v13995_v42 = vand.u32 4294901760, %v13994_v24  ;;  %v13996_v46 = vld [vmem:[#allocation27_spill] sm:$0xff] }
 0x2e1   : > { %5057 = vmatmul.mubr.f32.gmra.mxu1 %v13990_v27  ;;  %4618 = vmatmul.mubr.f32.gmra.mxu0 %v13975_v26  ;;  %v3000_v59 = vadd.f32 %v2999_v22, %v13991_v16  ;;  %v13998_v27 = vld [vmem:[#allocation36_spill] sm:$0xff] }
 0x2e2   : > { %5064 = vmatprep.mubr.f32.mxu1 %v13993_v50  ;;  %4624 = vmatprep.mubr.f32.mxu0 %v13978_v23  ;;  %v4138_v54 = vpop.f32.mrf.mxu1  ;;  %v3001_v7 = vpop.f32.mrf.mxu0  ;;  %v13999_v22 = vand.u32 4294901760, %v13998_v27  ;;  %v14000_v23 = vld [vmem:[#allocation154_spill] sm:$0xff] }
 0x2e3   : > { %5296 = vmatprep.subr.mxu0 %v13157_v49  ;;  %5649 = vmatprep.subr.mxu1 %v13157_v49  ;;  %v11515_v21 = vadd.f32 %v3320_v45, %v3000_v59  ;;  %v14001_v54 = vld [vmem:[#allocation150_spill] sm:$0xff]  ;;  %v14003_v45 = vld [vmem:[#allocation32_spill] sm:$0xff] }
 0x2e4   : > { %5300 = vmatpush2.msra.mxu0 %v13995_v42  ;;  %5651 = vmatpush2.msra.mxu1 %v13996_v46  ;;  %v4143_v26 = vpop.f32.mrf.mxu1  ;;  %v3432_v16 = vpop.f32.mrf.mxu0  ;;  %v14002_v7 = vand.u32 4294901760, %v14001_v54  ;;  %v14004_v59 = vand.u32 4294901760, %v14003_v45  ;;  %v14005_v46 = vld [vmem:[#allocation95_spill] sm:$0xff] }
 0x2e5   : > { %13997 = vst [vmem:[#allocation51_spill] sm:$0xff] %v11515_v21  ;;  %5068 = vmatmul.mubr.f32.gmra.mxu1 %v13999_v22  ;;  %4627 = vmatmul.mubr.f32.gmra.mxu0 %v13983_v61  ;;  %v3433_v50 = vadd.f32 %v3432_v16, %v14000_v23  ;;  %v14007_v16 = vld [vmem:[#allocation35_spill] sm:$0xff] }
 0x2e6   : > { %5075 = vmatprep.mubr.f32.mxu1 %v14002_v7  ;;  %4633 = vmatprep.mubr.f32.mxu0 %v13985_v5  ;;  %v4145_v24 = vpop.f32.mrf.mxu1  ;;  %v3434_v42 = vpop.f32.mrf.mxu0  ;;  %v14008_v23 = vand.u32 4294901760, %v14007_v16  ;;  %v14009_v5 = vld [vmem:[#allocation155_spill] sm:$0xff] }
 0x2e7   : > { %5301 = vmatprep.subr.mxu0 %v13157_v49  ;;  %5652 = vmatprep.subr.mxu1 %v13157_v49  ;;  %v11529_v22 = vadd.f32 %v4129_v4, %v3433_v50  ;;  %v14010_v42 = vld [vmem:[#allocation151_spill] sm:$0xff]  ;;  %v14012_v4 = vld [vmem:[#allocation98_spill] sm:$0xff] }
 0x2e8   : > { %5305 = vmatpush2.msra.mxu0 %v14004_v59  ;;  %5654 = vmatpush2.msra.mxu1 %v14005_v46  ;;  %v4150_v61 = vpop.f32.mrf.mxu1  ;;  %v3447_v7 = vpop.f32.mrf.mxu0  ;;  %v14011_v21 = vand.u32 4294901760, %v14010_v42  ;;  %v14013_v50 = vand.u32 4294901760, %v14012_v4  ;;  %v14014_v46 = vld [vmem:[#allocation31_spill] sm:$0xff] }
 0x2e9   : > { %14006 = vst [vmem:[#allocation123_spill] sm:$0xff] %v11529_v22  ;;  %5079 = vmatmul.mubr.f32.gmra.mxu1 %v14008_v23  ;;  %4636 = vmatmul.mubr.f32.gmra.mxu0 %v10632_v32  ;;  %v3448_v24 = vadd.f32 %v3447_v7, %v14009_v5  ;;  %v14015_v7 = vld [vmem:[#allocation40_spill] sm:$0xff] }
 0x2ea   : > { %5086 = vmatprep.mubr.f32.mxu1 %v14011_v21  ;;  %4642 = vmatprep.mubr.f32.mxu0 %v13992_v38  ;;  %v4152_v45 = vpop.f32.mrf.mxu1  ;;  %v3449_v59 = vpop.f32.mrf.mxu0  ;;  %v14016_v5 = vand.u32 4294901760, %v14015_v7  ;;  %v14017_v38 = vld [vmem:[#allocation110_spill] sm:$0xff] }
 0x2eb   : > { %5306 = vmatprep.subr.mxu0 %v13157_v49  ;;  %5655 = vmatprep.subr.mxu1 %v13157_v49  ;;  %v11543_v23 = vadd.f32 %v4136_v60, %v3448_v24  ;;  %v14018_v59 = vld [vmem:[#allocation153_spill] sm:$0xff] }
 0x2ec   : > { %5310 = vmatpush2.msra.mxu0 %v14013_v50  ;;  %5657 = vmatpush2.msra.mxu1 %v14014_v46  ;;  %v4157_v32 = vpop.f32.mrf.mxu1  ;;  %v3462_v21 = vpop.f32.mrf.mxu0  ;;  %v14019_v22 = vand.u32 4294901760, %v14018_v59  ;;  %v14020_v60 = vld [vmem:[#allocation101_spill] sm:$0xff] }
 0x2ed   : > { %5090 = vmatmul.mubr.f32.gmra.mxu1 %v14016_v5  ;;  %4645 = vmatmul.mubr.f32.gmra.mxu0 %v13998_v27  ;;  %v3463_v45 = vadd.f32 %v3462_v21, %v14017_v38  ;;  %v14021_v24 = vand.u32 4294901760, %v14020_v60  ;;  %v14022_v46 = vld [vmem:[#allocation33_spill] sm:$0xff]  ;;  %v14023_v21 = vand.u32 4294901760, %v10807_v3  ;;  %v14024_v38 = vld [vmem:[#allocation39_spill] sm:$0xff] }
 0x2ee   : > { %5097 = vmatprep.mubr.f32.mxu1 %v14019_v22  ;;  %4651 = vmatprep.mubr.f32.mxu0 %v14001_v54  ;;  %v4159_v4 = vpop.f32.mrf.mxu1  ;;  %v3464_v50 = vpop.f32.mrf.mxu0 }
 0x2ef   : > { %5311 = vmatprep.subr.mxu0 %v13157_v49  ;;  %5658 = vmatprep.subr.mxu1 %v13157_v49  ;;  %v11557_v5 = vadd.f32 %v4143_v26, %v3463_v45  ;;  %v14025_v4 = vand.u32 4294901760, %v14024_v38  ;;  %v14026_v26 = vld [vmem:[#allocation38_spill] sm:$0xff] }
 0x2f0   : > { %5315 = vmatpush2.msra.mxu0 %v14021_v24  ;;  %5660 = vmatpush2.msra.mxu1 %v14022_v46  ;;  %v4164_v27 = vpop.f32.mrf.mxu1  ;;  %v3477_v22 = vpop.f32.mrf.mxu0  ;;  %v14027_v45 = vand.u32 4294901760, %v14026_v26  ;;  %v14028_v24 = vld [vmem:[#allocation100_spill] sm:$0xff] }
 0x2f1   : > { %5101 = vmatmul.mubr.f32.gmra.mxu1 %v14023_v21  ;;  %4654 = vmatmul.mubr.f32.gmra.mxu0 %v14007_v16  ;;  %v3478_v54 = vadd.f32 %v3477_v22, %v10906_v8  ;;  %v14029_v8 = vand.u32 4294901760, %v10846_v53 }
 0x2f2   : > { %5108 = vmatprep.mubr.f32.mxu1 %v14025_v4  ;;  %4660 = vmatprep.mubr.f32.mxu0 %v14010_v42  ;;  %v4166_v50 = vpop.f32.mrf.mxu1  ;;  %v3479_v60 = vpop.f32.mrf.mxu0  ;;  %v14030_v42 = vld [vmem:[#allocation158_spill] sm:$0xff]  ;;  %v14031_v4 = vld [vmem:[#allocation156_spill] sm:$0xff] }
 0x2f3   : > { %5316 = vmatprep.subr.mxu0 %v13157_v49  ;;  %5661 = vmatprep.subr.mxu1 %v13157_v49  ;;  %v11571_v46 = vadd.f32 %v4150_v61, %v3478_v54  ;;  %v14032_v50 = vand.u32 4294901760, %v14031_v4  ;;  %v14033_v61 = vld [vmem:[#allocation104_spill] sm:$0xff] }
 0x2f4   : > { %5320 = vmatpush2.msra.mxu0 %v14027_v45  ;;  %5663 = vmatpush2.msra.mxu1 %v14028_v24  ;;  %v4171_v16 = vpop.f32.mrf.mxu1  ;;  %v3492_v21 = vpop.f32.mrf.mxu0  ;;  %v14034_v54 = vand.u32 4294901760, %v14033_v61  ;;  %v14035_v45 = vld [vmem:[#allocation103_spill] sm:$0xff]  ;;  %v14041_v61 = vld [vmem:[#allocation37_spill] sm:$0xff] }
 0x2f5   : > { %5112 = vmatmul.mubr.f32.gmra.mxu1 %v14029_v8  ;;  %4663 = vmatmul.mubr.f32.gmra.mxu0 %v14015_v7  ;;  %v3493_v22 = vadd.f32 %v3492_v21, %v14030_v42  ;;  %v14036_v8 = vand.u32 4294901760, %v10890_v29  ;;  %v14037_v42 = vld [vmem:[#allocation112_spill] sm:$0xff] }
 0x2f6   : > { %5119 = vmatprep.mubr.f32.mxu1 %v14032_v50  ;;  %4669 = vmatprep.mubr.f32.mxu0 %v14018_v59  ;;  %v4173_v60 = vpop.f32.mrf.mxu1  ;;  %v3494_v26 = vpop.f32.mrf.mxu0  ;;  %v14038_v50 = vand.u32 4294901760, %v14037_v42 }
 0x2f7   : > { %5321 = vmatprep.subr.mxu0 %v13157_v49  ;;  %5664 = vmatprep.subr.mxu1 %v13157_v49  ;;  %v11585_v24 = vadd.f32 %v4157_v32, %v3493_v22  ;;  %v14039_v32 = vld [vmem:[#allocation106_spill] sm:$0xff] }
 0x2f8   : > { %5325 = vmatpush2.msra.mxu0 %v14034_v54  ;;  %5666 = vmatpush2.msra.mxu1 %v14035_v45  ;;  %v4178_v7 = vpop.f32.mrf.mxu1  ;;  %v3507_v21 = vpop.f32.mrf.mxu0  ;;  %v14040_v22 = vand.u32 4294901760, %v14039_v32  ;;  %v14048_v32 = vld [vmem:[#allocation107_spill] sm:$0xff] }
 0x2f9   : > { %5123 = vmatmul.mubr.f32.gmra.mxu1 %v14036_v8  ;;  %4672 = vmatmul.mubr.f32.gmra.mxu0 %v10807_v3  ;;  %v3508_v59 = vadd.f32 %v3507_v21, %v10989_v55  ;;  %v14042_v55 = vld [vmem:[#allocation114_spill] sm:$0xff]  ;;  %v14044_v21 = vld [vmem:[#allocation157_spill] sm:$0xff] }
 0x2fa   : > { %5130 = vmatprep.mubr.f32.mxu1 %v14038_v50  ;;  %4678 = vmatprep.mubr.f32.mxu0 %v14024_v38  ;;  %v4180_v60 = vpop.f32.mrf.mxu1  ;;  %v3509_v26 = vpop.f32.mrf.mxu0  ;;  %v14043_v45 = vand.u32 4294901760, %v14042_v55  ;;  %v14045_v50 = vand.u32 4294901760, %v14044_v21 }
 0x2fb   : > { %5326 = vmatprep.subr.mxu0 %v13157_v49  ;;  %5667 = vmatprep.subr.mxu1 %v13157_v49  ;;  %v11599_v54 = vadd.f32 %v4164_v27, %v3508_v59  ;;  %v14046_v27 = vld [vmem:[#allocation42_spill] sm:$0xff] }
 0x2fc   : > { %5330 = vmatpush2.msra.mxu0 %v14040_v22  ;;  %5669 = vmatpush2.msra.mxu1 %v14041_v61  ;;  %v4185_v3 = vpop.f32.mrf.mxu1  ;;  %v3522_v8 = vpop.f32.mrf.mxu0  ;;  %v14047_v59 = vand.u32 4294901760, %v14046_v27  ;;  %v14055_v27 = vld [vmem:[#allocation108_spill] sm:$0xff] }
 0x2fd   : > { %5134 = vmatmul.mubr.f32.gmra.mxu1 %v14043_v45  ;;  %4681 = vmatmul.mubr.f32.gmra.mxu0 %v10846_v53  ;;  %v3523_v38 = vadd.f32 %v3522_v8, %v11030_v51  ;;  %v14049_v51 = vld [vmem:[#allocation47_spill] sm:$0xff] }
 0x2fe   : > { %5141 = vmatprep.mubr.f32.mxu1 %v14045_v50  ;;  %4687 = vmatprep.mubr.f32.mxu0 %v14031_v4  ;;  %v4187_v60 = vpop.f32.mrf.mxu1  ;;  %v3524_v26 = vpop.f32.mrf.mxu0  ;;  %v14050_v61 = vand.u32 4294901760, %v14049_v51  ;;  %v14051_v8 = vld [vmem:[#allocation159_spill] sm:$0xff] }
 0x2ff   : > { %5331 = vmatprep.subr.mxu0 %v13157_v49  ;;  %5670 = vmatprep.subr.mxu1 %v13157_v49  ;;  %v11613_v22 = vadd.f32 %v4171_v16, %v3523_v38  ;;  %v14052_v50 = vand.u32 4294901760, %v14051_v8  ;;  %v14053_v16 = vld [vmem:[#allocation44_spill] sm:$0xff] }
 0x300   : > { %5335 = vmatpush2.msra.mxu0 %v14047_v59  ;;  %5672 = vmatpush2.msra.mxu1 %v14048_v32  ;;  %v4192_v53 = vpop.f32.mrf.mxu1  ;;  %v3537_v45 = vpop.f32.mrf.mxu0  ;;  %v14054_v38 = vand.u32 4294901760, %v14053_v16 }
 0x301   : > { %5145 = vmatmul.mubr.f32.gmra.mxu1 %v14050_v61  ;;  %4690 = vmatmul.mubr.f32.gmra.mxu0 %v10890_v29  ;;  %v3538_v4 = vadd.f32 %v3537_v45, %v11070_v0  ;;  %v14056_v0 = vand.u32 4294901760, %v11014_v52  ;;  %v14057_v61 = vand.u32 4294901760, %v11035_v41 }
 0x302   : > { %5152 = vmatprep.mubr.f32.mxu1 %v14052_v50  ;;  %4696 = vmatprep.mubr.f32.mxu0 %v14037_v42  ;;  %v4194_v60 = vpop.f32.mrf.mxu1  ;;  %v3539_v26 = vpop.f32.mrf.mxu0 }
 0x303   : > { %5336 = vmatprep.subr.mxu0 %v13157_v49  ;;  %5673 = vmatprep.subr.mxu1 %v13157_v49  ;;  %v11627_v59 = vadd.f32 %v4178_v7, %v3538_v4  ;;  %v14058_v7 = vld [vmem:[#allocation43_spill] sm:$0xff]  ;;  %v14060_v60 = vld [vmem:[#allocation41_spill] sm:$0xff] }
 0x304   : > { %5340 = vmatpush2.msra.mxu0 %v14054_v38  ;;  %5675 = vmatpush2.msra.mxu1 %v14055_v27  ;;  %v4199_v29 = vpop.f32.mrf.mxu1  ;;  %v3552_v32 = vpop.f32.mrf.mxu0  ;;  %v14059_v4 = vand.u32 4294901760, %v14058_v7  ;;  %v14063_v27 = vld [vmem:[#allocation55_spill] sm:$0xff] }
 0x305   : > { %5156 = vmatmul.mubr.f32.gmra.mxu1 %v14056_v0  ;;  %4699 = vmatmul.mubr.f32.gmra.mxu0 %v14042_v55  ;;  %v3553_v42 = vadd.f32 %v3552_v32, %v11111_v39  ;;  %v14061_v39 = vld [vmem:[#allocation52_spill] sm:$0xff]  ;;  %v14064_v0 = vand.u32 4294901760, %v14063_v27 }
 0x306   : > { %5163 = vmatprep.mubr.f32.mxu1 %v14057_v61  ;;  %4705 = vmatprep.mubr.f32.mxu0 %v14044_v21  ;;  %v4201_v45 = vpop.f32.mrf.mxu1  ;;  %v3554_v50 = vpop.f32.mrf.mxu0  ;;  %v14062_v16 = vand.u32 4294901760, %v14061_v39 }
 0x307   : > { %5341 = vmatprep.subr.mxu0 %v13157_v49  ;;  %5676 = vmatprep.subr.mxu1 %v13157_v49  ;;  %v11641_v26 = vadd.f32 %v4185_v3, %v3553_v42  ;;  %v14065_v3 = vld [vmem:[#allocation45_spill] sm:$0xff]  ;;  %v14067_v45 = vld [vmem:[#allocation46_spill] sm:$0xff] }
 0x308   : > { %5345 = vmatpush2.msra.mxu0 %v14059_v4  ;;  %5678 = vmatpush2.msra.mxu1 %v14060_v60  ;;  %v4206_v55 = vpop.f32.mrf.mxu1  ;;  %v3567_v38 = vpop.f32.mrf.mxu0  ;;  %v14066_v42 = vand.u32 4294901760, %v14065_v3  ;;  %v14069_v4 = vld [vmem:[#allocation58_spill] sm:$0xff]  ;;  %v14075_v3 = vand.u32 4294901760, %v11172_v30 }
 0x309   : > { %5167 = vmatmul.mubr.f32.gmra.mxu1 %v14062_v16  ;;  %4708 = vmatmul.mubr.f32.gmra.mxu0 %v14049_v51  ;;  %v3568_v21 = vadd.f32 %v3567_v38, %v11157_v33  ;;  %v14068_v33 = vand.u32 4294901760, %v11106_v18  ;;  %v14070_v60 = vand.u32 4294901760, %v14069_v4 }
 0x30a   : > { %5174 = vmatprep.mubr.f32.mxu1 %v14064_v0  ;;  %4714 = vmatprep.mubr.f32.mxu0 %v14051_v8  ;;  %v4208_v32 = vpop.f32.mrf.mxu1  ;;  %v3569_v61 = vpop.f32.mrf.mxu0  ;;  %v14073_v0 = vld [vmem:[#allocation48_spill] sm:$0xff] }
 0x30b   : > { %5346 = vmatprep.subr.mxu0 %v13157_v49  ;;  %5679 = vmatprep.subr.mxu1 %v13157_v49  ;;  %v11655_v50 = vadd.f32 %v4192_v53, %v3568_v21  ;;  %v14071_v53 = vld [vmem:[#allocation50_spill] sm:$0xff] }
 0x30c   : > { %5350 = vmatpush2.msra.mxu0 %v14066_v42  ;;  %5681 = vmatpush2.msra.mxu1 %v14067_v45  ;;  %v4213_v51 = vpop.f32.mrf.mxu1  ;;  %v3582_v7 = vpop.f32.mrf.mxu0  ;;  %v14072_v21 = vand.u32 4294901760, %v14071_v53  ;;  %v14082_v53 = vmov 1.0  }
 0x30d   : > { %5178 = vmatmul.mubr.f32.gmra.mxu1 %v14068_v33  ;;  %4717 = vmatmul.mubr.f32.gmra.mxu0 %v11014_v52  ;;  %v3583_v8 = vadd.f32 %v3582_v7, %v11195_v40  ;;  %v14074_v40 = vand.u32 4294901760, %v11151_v25 }
 0x30e   : > { %5185 = vmatprep.mubr.f32.mxu1 %v14070_v60  ;;  %4723 = vmatprep.mubr.f32.mxu0 %v11035_v41  ;;  %v4215_v16 = vpop.f32.mrf.mxu1  ;;  %v3584_v38 = vpop.f32.mrf.mxu0 }
 0x30f   : > { %5351 = vmatprep.subr.mxu0 %v13157_v49  ;;  %5682 = vmatprep.subr.mxu1 %v13157_v49  ;;  %v11669_v32 = vadd.f32 %v4199_v29, %v3583_v8  ;;  %v14076_v29 = vand.u32 4294901760, %v13862_v57  ;;  %v14078_v8 = vand.u32 4294901760, %v11207_v31  ;;  %v14081_v38 = vld [vmem:[#allocation57_spill] sm:$0xff] }
 0x310   : > { %5355 = vmatpush2.msra.mxu0 %v14072_v21  ;;  %5684 = vmatpush2.msra.mxu1 %v14073_v0  ;;  %v4220_v52 = vpop.f32.mrf.mxu1  ;;  %v3597_v61 = vpop.f32.mrf.mxu0  ;;  %v14084_v21 = vld [vmem:[#allocation120_spill] sm:$0xff] }
 0x311   : > { %5189 = vmatmul.mubr.f32.gmra.mxu1 %v14074_v40  ;;  %4726 = vmatmul.mubr.f32.gmra.mxu0 %v14061_v39  ;;  %v3598_v41 = vadd.f32 %v3597_v61, %v11223_v20  ;;  %v14077_v20 = vand.u32 4294901760, %v11178_v35  ;;  %v14086_v61 = vand.u32 4294901760, %v13873_v36 }
 0x312   : > { %5196 = vmatprep.mubr.f32.mxu1 %v14075_v3  ;;  %4732 = vmatprep.mubr.f32.mxu0 %v14063_v27  ;;  %v4222_v42 = vpop.f32.mrf.mxu1  ;;  %v3599_v45 = vpop.f32.mrf.mxu0 }
 0x313   : > { %5356 = vmatprep.subr.mxu0 %v13157_v49  ;;  %5685 = vmatprep.subr.mxu1 %v13157_v49  ;;  %v11683_v33 = vadd.f32 %v4206_v55, %v3598_v41  ;;  %v14079_v55 = vand.u32 4294901760, %v13867_v17  ;;  %v14087_v41 = vld [vmem:[#allocation59_spill] sm:$0xff] }
 0x314   : > { %5360 = vmatpush2.msra.mxu0 %v14076_v29  ;;  %5687 = vmatpush2.msra.mxu1 %v13860_v28  ;;  %v4227_v39 = vpop.f32.mrf.mxu1  ;;  %v3612_v7 = vpop.f32.mrf.mxu0 }
 0x315   : > { %5200 = vmatmul.mubr.f32.gmra.mxu1 %v14077_v20  ;;  %4735 = vmatmul.mubr.f32.gmra.mxu0 %v11106_v18  ;;  %v3613_v27 = vadd.f32 %v3612_v7, %v11247_v1  ;;  %v14080_v1 = vand.u32 4294901760, %v11210_v14  ;;  %v14089_v20 = vand.u32 4294901760, %v13875_v13 }
 0x316   : > { %5207 = vmatprep.mubr.f32.mxu1 %v14078_v8  ;;  %4741 = vmatprep.mubr.f32.mxu0 %v14069_v4  ;;  %v4229_v57 = vpop.f32.mrf.mxu1  ;;  %v3614_v28 = vpop.f32.mrf.mxu0 }
 0x317   : > { %5688 = vmatprep.subr.mxu1 %v13157_v49  ;;  %5361 = vmatprep.subr.mxu0 %v13157_v49  ;;  %v11697_v60 = vadd.f32 %v4213_v51, %v3613_v27 }
 0x318   : > { %5690 = vmatpush2.msra.mxu1 %v13865_v62  ;;  %5365 = vmatpush2.msra.mxu0 %v14079_v55  ;;  %v4234_v18 = vpop.f32.mrf.mxu1  ;;  %v3627_v4 = vpop.f32.mrf.mxu0 }
 0x319   : > { %5211 = vmatmul.mubr.f32.gmra.mxu1 %v14080_v1  ;;  %5691 = vmatprep.subr.mxu1 %v13157_v49  ;;  %v3628_v16 = vadd.f32 %v3627_v4, %v11266_v43  ;;  %v14085_v43 = vld [vmem:[#allocation61_spill] sm:$0xff] }
 0x31a   : > { %4744 = vmatmul.mubr.f32.gmra.mxu0 %v11151_v25  ;;  %5693 = vmatpush2.msra.mxu1 %v14081_v38  ;;  %v4236_v17 = vpop.f32.mrf.mxu1  ;;  %v3629_v51 = vpop.f32.mrf.mxu0 }
 0x31b   : > { %6485 = vmatprep.mubr.msk.f32.mxu1 %vm281_vm5, %v14082_v53  ;;  %4750 = vmatprep.mubr.f32.mxu0 %v11172_v30  ;;  %v11712_v0 = vadd.f32 %v4220_v52, %v3628_v16  ;;  %v14095_v17 = vld [vmem:[#allocation72_spill] sm:$0xff] }
 0x31c   : > { %5694 = vmatprep.subr.mxu1 %v13157_v49  ;;  %5366 = vmatprep.subr.mxu0 %v13157_v49  ;;  %v4241_v25 = vpop.f32.mrf.mxu1  ;;  %v3642_v40 = vpop.f32.mrf.mxu0 }
 0x31d   : > { %5696 = vmatpush2.msra.mxu1 %v14085_v43  ;;  %5370 = vmatpush2.msra.mxu0 %v14086_v61  ;;  %v3643_v30 = vadd.f32 %v3642_v40, %v11277_v19 }
 0x31e   : > { %6486 = vmatmul.mubr.msk.f32.vlgmr.msra.gmra.mxu1 %vm280_vm3, %v14082_v53  ;;  %4753 = vmatmul.mubr.f32.gmra.mxu0 %v11178_v35  ;;  %v4243_v52 = vpop.f32.mrf.mxu1  ;;  %v3644_v42 = vpop.f32.mrf.mxu0 }
 0x31f   : > { %6487 = vmatprep.mubr.msk.f32.mxu1 %vm285_vm10, %v14082_v53  ;;  %4759 = vmatprep.mubr.f32.mxu0 %v11207_v31  ;;  %v11729_v36 = vadd.f32 %v4227_v39, %v3643_v30  ;;  %v14098_v30 = vld [vmem:[#allocation75_spill] sm:$0xff] }
 0x320   : > { %5371 = vmatprep.subr.mxu0 %v13157_v49  ;;  %v4248_v45 = vpop.f32.mrf.mxu1 }
 0x321   : > { %v3657_v29 = vpop.f32.mrf.mxu0  ;;  %5375 = vmatpush2.msra.mxu0 %v14089_v20  ;;  %v14103_v20 = vld [vmem:[#allocation78_spill] sm:$0xff] }
 0x322   : > { %6488 = vmatmul.mubr.msk.f32.gmra.mxu1 %vm284_vm8, %v14082_v53  ;;  %v3658_v19 = vadd.f32 %v3657_v29, %v11289_v11  ;;  %4762 = vmatmul.mubr.f32.gmra.mxu0 %v11210_v14  ;;  %v4250_v49 = vpop.f32.mrf.mxu1 }
 0x323   : > { %6489 = vmatprep.mubr.msk.f32.mxu1 %vm289_vm0, %v14082_v53  ;;  %6421 = vmatprep.mubr.msk.f32.mxu0 %vm281_vm5, %v14082_v53  ;;  %v3659_v31 = vpop.f32.mrf.mxu0 }
 0x324   : > { %v11747_v13 = vadd.f32 %v4234_v18, %v3658_v19  ;;  %v4255_v39 = vpop.f32.mrf.mxu1  ;;  %v14092_v18 = vld [vmem:[#allocation70_spill] sm:$0xff] }
 0x325   : > { %v3672_v7 = vpop.f32.mrf.mxu0  ;;  %vm14094_vm5 = vcmp.eq.s32.totalorder %v14092_v18, %v14087_v41 }
 0x326   : > { %6490 = vmatmul.mubr.msk.f32.gmra.mxu1 %vm288_vm13, %v14082_v53  ;;  %v3673_v14 = vadd.f32 %v3672_v7, %v11302_v44  ;;  %6422 = vmatmul.mubr.msk.f32.vlgmr.msra.gmra.mxu0 %vm280_vm3, %v14082_v53  ;;  %v4257_v27 = vpop.f32.mrf.mxu1  ;;  %vm14093_vm3 = vcmp.eq.s32.totalorder %v14092_v18, %v14084_v21  ;;  %v14107_v7 = vld [vmem:[#allocation79_spill] sm:$0xff] }
 0x327   : > { %6491 = vmatprep.mubr.msk.f32.mxu1 %vm293_vm1, %v14082_v53  ;;  %6423 = vmatprep.mubr.msk.f32.mxu0 %vm285_vm10, %v14082_v53  ;;  %v3674_v8 = vpop.f32.mrf.mxu0  ;;  %vm14096_vm10 = vcmp.eq.s32.totalorder %v14095_v17, %v14084_v21 }
 0x328   : > { %v11766_v57 = vadd.f32 %v4241_v25, %v3673_v14  ;;  %v4262_v44 = vpop.f32.mrf.mxu1 }
 0x329   : > { %v3687_v28 = vpop.f32.mrf.mxu0 }
 0x32a   : > { %6492 = vmatmul.mubr.msk.f32.gmra.mxu1 %vm292_vm15, %v14082_v53  ;;  %v3688_v55 = vadd.f32 %v3687_v28, %v11316_v47  ;;  %6424 = vmatmul.mubr.msk.f32.gmra.mxu0 %vm284_vm8, %v14082_v53  ;;  %v4264_v1 = vpop.f32.mrf.mxu1  ;;  %vm14097_vm8 = vcmp.eq.s32.totalorder %v14095_v17, %v14087_v41  ;;  %v14112_v28 = vld [vmem:[#allocation80_spill] sm:$0xff] }
 0x32b   : > { %6493 = vmatprep.mubr.msk.f32.mxu1 %vm14093_vm3, %v14082_v53  ;;  %6425 = vmatprep.mubr.msk.f32.mxu0 %vm289_vm0, %v14082_v53  ;;  %v3689_v4 = vpop.f32.mrf.mxu0  ;;  %vm14099_vm0 = vcmp.eq.s32.totalorder %v14098_v30, %v14084_v21 }
 0x32c   : > { %v11785_v16 = vadd.f32 %v4248_v45, %v3688_v55  ;;  %v4269_v47 = vpop.f32.mrf.mxu1 }
 0x32d   : > { %v3702_v38 = vpop.f32.mrf.mxu0 }
 0x32e   : > { %6494 = vmatmul.mubr.msk.f32.gmra.mxu1 %vm14094_vm5, %v14082_v53  ;;  %v3703_v62 = vadd.f32 %v3702_v38, %v11330_v37  ;;  %6426 = vmatmul.mubr.msk.f32.gmra.mxu0 %vm288_vm13, %v14082_v53  ;;  %v4271_v51 = vpop.f32.mrf.mxu1  ;;  %vm14100_vm13 = vmmov %vm14093_vm3  ;;  %vm14104_vm3 = vcmp.eq.s32.totalorder %v14103_v20, %v14084_v21  ;;  %v14117_v38 = vld [vmem:[#allocation81_spill] sm:$0xff] }
 0x32f   : > { %6495 = vmatprep.mubr.msk.f32.mxu1 %vm14096_vm10, %v14082_v53  ;;  %6427 = vmatprep.mubr.msk.f32.mxu0 %vm293_vm1, %v14082_v53  ;;  %v3704_v43 = vpop.f32.mrf.mxu0  ;;  %vm14101_vm1 = vcmp.eq.s32.totalorder %v14098_v30, %v14087_v41 }
 0x330   : > { %v11804_v25 = vadd.f32 %v4255_v39, %v3703_v62 }
 0x331   : > { %v4276_v37 = vpop.f32.mrf.mxu1  ;;  %v3717_v40 = vpop.f32.mrf.mxu0 }
 0x332   : > { %6496 = vmatmul.mubr.msk.f32.gmra.mxu1 %vm14097_vm8, %v14082_v53  ;;  %v3718_v61 = vadd.f32 %v3717_v40, %v11344_v63  ;;  %6428 = vmatmul.mubr.msk.f32.gmra.mxu0 %vm292_vm15, %v14082_v53  ;;  %vm14102_vm15 = vmmov %vm14094_vm5 }
 0x333   : > { %6497 = vmatprep.mubr.msk.f32.mxu1 %vm14099_vm0, %v14082_v53  ;;  %v4278_v3 = vpop.f32.mrf.mxu1  ;;  %6429 = vmatprep.mubr.msk.f32.mxu0 %vm14100_vm13, %v14082_v53  ;;  %v3719_v52 = vpop.f32.mrf.mxu0  ;;  %vm14105_vm5 = vmmov %vm14096_vm10  ;;  %vm14106_vm10 = vcmp.eq.s32.totalorder %v14103_v20, %v14087_v41  ;;  %vm14108_vm0 = vcmp.eq.s32.totalorder %v14107_v7, %v14084_v21  ;;  %vm14109_vm13 = vcmp.eq.s32.totalorder %v14098_v30, %v14084_v21 }
 0x334   : > { %v11823_v42 = vadd.f32 %v4262_v44, %v3718_v61  ;;  %v14123_v61 = vld [vmem:[#allocation82_spill] sm:$0xff] }
 0x335   : > { %v4283_v63 = vpop.f32.mrf.mxu1  ;;  %v3732_v45 = vpop.f32.mrf.mxu0 }
 0x336   : > { %6498 = vmatmul.mubr.msk.f32.gmra.mxu1 %vm14101_vm1, %v14082_v53  ;;  %v3733_v29 = vadd.f32 %v3732_v45, %v11358_v48  ;;  %6430 = vmatmul.mubr.msk.f32.gmra.mxu0 %vm14102_vm15, %v14082_v53  ;;  %vm14110_vm1 = vcmp.eq.s32.totalorder %v14107_v7, %v14087_v41  ;;  %vm14111_vm15 = vcmp.eq.s32.totalorder %v14098_v30, %v14087_v41 }
 0x337   : > { %6499 = vmatprep.mubr.msk.f32.mxu1 %vm14104_vm3, %v14082_v53  ;;  %v4285_v19 = vpop.f32.mrf.mxu1  ;;  %6431 = vmatprep.mubr.msk.f32.mxu0 %vm14105_vm5, %v14082_v53  ;;  %v3734_v35 = vpop.f32.mrf.mxu0  ;;  %vm14113_vm3 = vcmp.eq.s32.totalorder %v14112_v28, %v14084_v21  ;;  %vm14114_vm5 = vcmp.eq.s32.totalorder %v14103_v20, %v14084_v21 }
 0x338   : > { %v11842_v49 = vadd.f32 %v4269_v47, %v3733_v29 }
 0x339   : > { %v4290_v48 = vpop.f32.mrf.mxu1  ;;  %v3747_v31 = vpop.f32.mrf.mxu0 }
 0x33a   : > { %6500 = vmatmul.mubr.msk.f32.gmra.mxu1 %vm14106_vm10, %v14082_v53  ;;  %v3748_v39 = vadd.f32 %v3747_v31, %v11372_v6  ;;  %6432 = vmatmul.mubr.msk.f32.gmra.mxu0 %vm14097_vm8, %v14082_v53  ;;  %vm14115_vm10 = vcmp.eq.s32.totalorder %v14112_v28, %v14087_v41  ;;  %vm14116_vm8 = vcmp.eq.s32.totalorder %v14103_v20, %v14087_v41  ;;  %v14128_v20 = vld [vmem:[#allocation84_spill] sm:$0xff] }
 0x33b   : > { %6501 = vmatprep.mubr.msk.f32.mxu1 %vm14108_vm0, %v14082_v53  ;;  %v4292_v14 = vpop.f32.mrf.mxu1  ;;  %6433 = vmatprep.mubr.msk.f32.mxu0 %vm14109_vm13, %v14082_v53  ;;  %v3749_v11 = vpop.f32.mrf.mxu0  ;;  %vm14118_vm0 = vcmp.eq.s32.totalorder %v14117_v38, %v14084_v21  ;;  %vm14119_vm13 = vcmp.eq.s32.totalorder %v14107_v7, %v14084_v21 }
 0x33c   : > { %v11861_v27 = vadd.f32 %v4276_v37, %v3748_v39  ;;  %v14121_v37 = vld [vmem:[#allocation49_spill] sm:$0xff] }
 0x33d   : > { %v4297_v6 = vpop.f32.mrf.mxu1  ;;  %v3762_v8 = vpop.f32.mrf.mxu0 }
 0x33e   : > { %6502 = vmatmul.mubr.msk.f32.gmra.mxu1 %vm14110_vm1, %v14082_v53  ;;  %v3763_v44 = vadd.f32 %v3762_v8, %v11386_v10  ;;  %6434 = vmatmul.mubr.msk.f32.gmra.mxu0 %vm14111_vm15, %v14082_v53  ;;  %vm14120_vm1 = vcmp.eq.s32.totalorder %v14117_v38, %v14087_v41  ;;  %vm14122_vm15 = vcmp.eq.s32.totalorder %v14107_v7, %v14087_v41  ;;  %v14133_v7 = vld [vmem:[#allocation86_spill] sm:$0xff] }
 0x33f   : > { %6503 = vmatprep.mubr.msk.f32.mxu1 %vm14113_vm3, %v14082_v53  ;;  %v4299_v55 = vpop.f32.mrf.mxu1  ;;  %6435 = vmatprep.mubr.msk.f32.mxu0 %vm14114_vm5, %v14082_v53  ;;  %v3764_v18 = vpop.f32.mrf.mxu0  ;;  %vm14124_vm3 = vcmp.eq.s32.totalorder %v14123_v61, %v14084_v21  ;;  %vm14125_vm5 = vcmp.eq.s32.totalorder %v14112_v28, %v14084_v21 }
 0x340   : > { %v11880_v1 = vadd.f32 %v4283_v63, %v3763_v44 }
 0x341   : > { %v4304_v10 = vpop.f32.mrf.mxu1  ;;  %v3777_v4 = vpop.f32.mrf.mxu0 }
 0x342   : > { %6504 = vmatmul.mubr.msk.f32.gmra.mxu1 %vm14115_vm10, %v14082_v53  ;;  %v3778_v47 = vadd.f32 %v3777_v4, %v11400_v12  ;;  %6436 = vmatmul.mubr.msk.f32.gmra.mxu0 %vm14116_vm8, %v14082_v53  ;;  %vm14126_vm10 = vcmp.eq.s32.totalorder %v14123_v61, %v14087_v41  ;;  %vm14127_vm8 = vcmp.eq.s32.totalorder %v14112_v28, %v14087_v41  ;;  %v14138_v28 = vld [vmem:[#allocation87_spill] sm:$0xff] }
 0x343   : > { %6505 = vmatprep.mubr.msk.f32.mxu1 %vm14118_vm0, %v14082_v53  ;;  %v4306_v62 = vpop.f32.mrf.mxu1  ;;  %6437 = vmatprep.mubr.msk.f32.mxu0 %vm14119_vm13, %v14082_v53  ;;  %v3779_v17 = vpop.f32.mrf.mxu0  ;;  %vm14129_vm0 = vcmp.eq.s32.totalorder %v14128_v20, %v14084_v21  ;;  %vm14130_vm13 = vcmp.eq.s32.totalorder %v14117_v38, %v14084_v21 }
 0x344   : > { %v11899_v51 = vadd.f32 %v4290_v48, %v3778_v47 }
 0x345   : > { %v4311_v12 = vpop.f32.mrf.mxu1  ;;  %v3792_v43 = vpop.f32.mrf.mxu0 }
 0x346   : > { %6506 = vmatmul.mubr.msk.f32.gmra.mxu1 %vm14120_vm1, %v14082_v53  ;;  %v3793_v40 = vadd.f32 %v3792_v43, %v14121_v37  ;;  %6438 = vmatmul.mubr.msk.f32.gmra.mxu0 %vm14122_vm15, %v14082_v53  ;;  %vm14131_vm1 = vcmp.eq.s32.totalorder %v14128_v20, %v14087_v41  ;;  %vm14132_vm15 = vcmp.eq.s32.totalorder %v14117_v38, %v14087_v41  ;;  %v14143_v38 = vld [vmem:[#allocation88_spill] sm:$0xff] }
 0x347   : > { %6507 = vmatprep.mubr.msk.f32.mxu1 %vm14124_vm3, %v14082_v53  ;;  %v4313_v30 = vpop.f32.mrf.mxu1  ;;  %6439 = vmatprep.mubr.msk.f32.mxu0 %vm14125_vm5, %v14082_v53  ;;  %v3794_v3 = vpop.f32.mrf.mxu0  ;;  %vm14134_vm3 = vcmp.eq.s32.totalorder %v14133_v7, %v14084_v21  ;;  %vm14135_vm5 = vcmp.eq.s32.totalorder %v14123_v61, %v14084_v21 }
 0x348   : > { %v11918_v52 = vadd.f32 %v4297_v6, %v3793_v40  ;;  %v14148_v40 = vld [vmem:[#allocation90_spill] sm:$0xff] }
 0x349   : > { %v4318_v63 = vpop.f32.mrf.mxu1  ;;  %v3807_v45 = vpop.f32.mrf.mxu0 }
 0x34a   : > { %6508 = vmatmul.mubr.msk.f32.gmra.mxu1 %vm14126_vm10, %v14082_v53  ;;  %v3808_v29 = vadd.f32 %v3807_v45, %v11428_v9  ;;  %6440 = vmatmul.mubr.msk.f32.gmra.mxu0 %vm14127_vm8, %v14082_v53  ;;  %vm14136_vm10 = vcmp.eq.s32.totalorder %v14133_v7, %v14087_v41  ;;  %vm14137_vm8 = vcmp.eq.s32.totalorder %v14123_v61, %v14087_v41 }
 0x34b   : > { %6509 = vmatprep.mubr.msk.f32.mxu1 %vm14129_vm0, %v14082_v53  ;;  %v4320_v19 = vpop.f32.mrf.mxu1  ;;  %6441 = vmatprep.mubr.msk.f32.mxu0 %vm14130_vm13, %v14082_v53  ;;  %v3809_v35 = vpop.f32.mrf.mxu0  ;;  %vm14139_vm0 = vcmp.eq.s32.totalorder %v14138_v28, %v14084_v21  ;;  %vm14140_vm13 = vcmp.eq.s32.totalorder %v14128_v20, %v14084_v21 }
 0x34c   : > { %v11937_v48 = vadd.f32 %v4304_v10, %v3808_v29  ;;  %v14153_v29 = vld [vmem:[#allocation92_spill] sm:$0xff] }
 0x34d   : > { %v4325_v9 = vpop.f32.mrf.mxu1  ;;  %v3822_v31 = vpop.f32.mrf.mxu0 }
 0x34e   : > { %6510 = vmatmul.mubr.msk.f32.gmra.mxu1 %vm14131_vm1, %v14082_v53  ;;  %v3823_v39 = vadd.f32 %v3822_v31, %v11442_v58  ;;  %6442 = vmatmul.mubr.msk.f32.gmra.mxu0 %vm14132_vm15, %v14082_v53  ;;  %vm14141_vm1 = vcmp.eq.s32.totalorder %v14138_v28, %v14087_v41  ;;  %vm14142_vm15 = vcmp.eq.s32.totalorder %v14128_v20, %v14087_v41  ;;  %v14157_v31 = vld [vmem:[#allocation51_spill] sm:$0xff] }
 0x34f   : > { %6511 = vmatprep.mubr.msk.f32.mxu1 %vm14134_vm3, %v14082_v53  ;;  %v4327_v14 = vpop.f32.mrf.mxu1  ;;  %6443 = vmatprep.mubr.msk.f32.mxu0 %vm14135_vm5, %v14082_v53  ;;  %v3824_v11 = vpop.f32.mrf.mxu0  ;;  %vm14144_vm3 = vcmp.eq.s32.totalorder %v14143_v38, %v14084_v21  ;;  %vm14145_vm5 = vcmp.eq.s32.totalorder %v14133_v7, %v14084_v21 }
 0x350   : > { %v11956_v6 = vadd.f32 %v4311_v12, %v3823_v39 }
 0x351   : > { %v4332_v58 = vpop.f32.mrf.mxu1  ;;  %v3837_v8 = vpop.f32.mrf.mxu0 }
 0x352   : > { %6512 = vmatmul.mubr.msk.f32.gmra.mxu1 %vm14136_vm10, %v14082_v53  ;;  %v3838_v44 = vadd.f32 %v3837_v8, %v11456_v2  ;;  %6444 = vmatmul.mubr.msk.f32.gmra.mxu0 %vm14137_vm8, %v14082_v53  ;;  %vm14146_vm10 = vcmp.eq.s32.totalorder %v14143_v38, %v14087_v41  ;;  %vm14147_vm8 = vcmp.eq.s32.totalorder %v14133_v7, %v14087_v41  ;;  %v14159_v7 = vld [vmem:[#allocation93_spill] sm:$0xff] }
 0x353   : > { %6513 = vmatprep.mubr.msk.f32.mxu1 %vm14139_vm0, %v14082_v53  ;;  %v4334_v55 = vpop.f32.mrf.mxu1  ;;  %6445 = vmatprep.mubr.msk.f32.mxu0 %vm14140_vm13, %v14082_v53  ;;  %v3839_v18 = vpop.f32.mrf.mxu0  ;;  %vm14149_vm0 = vcmp.eq.s32.totalorder %v14148_v40, %v14084_v21  ;;  %vm14150_vm13 = vcmp.eq.s32.totalorder %v14138_v28, %v14084_v21 }
 0x354   : > { %v11975_v10 = vadd.f32 %v4318_v63, %v3838_v44  ;;  %v14165_v18 = vld [vmem:[#allocation94_spill] sm:$0xff] }
 0x355   : > { %v4339_v2 = vpop.f32.mrf.mxu1  ;;  %v3852_v4 = vpop.f32.mrf.mxu0 }
 0x356   : > { %6514 = vmatmul.mubr.msk.f32.gmra.mxu1 %vm14141_vm1, %v14082_v53  ;;  %v3853_v47 = vadd.f32 %v3852_v4, %v11470_v56  ;;  %6446 = vmatmul.mubr.msk.f32.gmra.mxu0 %vm14142_vm15, %v14082_v53  ;;  %vm14151_vm1 = vcmp.eq.s32.totalorder %v14148_v40, %v14087_v41  ;;  %vm14152_vm15 = vcmp.eq.s32.totalorder %v14138_v28, %v14087_v41  ;;  %v14163_v28 = vld [vmem:[#allocation123_spill] sm:$0xff] }
 0x357   : > { %6515 = vmatprep.mubr.msk.f32.mxu1 %vm14144_vm3, %v14082_v53  ;;  %v4341_v62 = vpop.f32.mrf.mxu1  ;;  %6447 = vmatprep.mubr.msk.f32.mxu0 %vm14145_vm5, %v14082_v53  ;;  %v3854_v17 = vpop.f32.mrf.mxu0  ;;  %vm14154_vm3 = vcmp.eq.s32.totalorder %v14153_v29, %v14084_v21  ;;  %vm14155_vm5 = vcmp.eq.s32.totalorder %v14143_v38, %v14084_v21 }
 0x358   : > { %v11994_v12 = vadd.f32 %v4325_v9, %v3853_v47 }
 0x359   : > { %v4346_v56 = vpop.f32.mrf.mxu1  ;;  %v3867_v43 = vpop.f32.mrf.mxu0 }
 0x35a   : > { %6516 = vmatmul.mubr.msk.f32.gmra.mxu1 %vm14146_vm10, %v14082_v53  ;;  %v3868_v37 = vadd.f32 %v3867_v43, %v11487_v34  ;;  %6448 = vmatmul.mubr.msk.f32.gmra.mxu0 %vm14147_vm8, %v14082_v53  ;;  %vm14156_vm10 = vcmp.eq.s32.totalorder %v14153_v29, %v14087_v41  ;;  %vm14158_vm8 = vcmp.eq.s32.totalorder %v14143_v38, %v14087_v41 }
 0x35b   : > { %6517 = vmatprep.mubr.msk.f32.mxu1 %vm14149_vm0, %v14082_v53  ;;  %v4348_v61 = vpop.f32.mrf.mxu1  ;;  %6449 = vmatprep.mubr.msk.f32.mxu0 %vm14150_vm13, %v14082_v53  ;;  %v3869_v30 = vpop.f32.mrf.mxu0  ;;  %vm14160_vm0 = vcmp.eq.s32.totalorder %v14159_v7, %v14084_v21  ;;  %vm14161_vm13 = vcmp.eq.s32.totalorder %v14148_v40, %v14084_v21 }
 0x35c   : > { %v12013_v3 = vadd.f32 %v4332_v58, %v3868_v37 }
 0x35d   : > { %v4871_v34 = vpop.f32.mrf.mxu1  ;;  %v3882_v63 = vpop.f32.mrf.mxu0 }
 0x35e   : > { %6518 = vmatmul.mubr.msk.f32.gmra.mxu1 %vm14151_vm1, %v14082_v53  ;;  %v3883_v45 = vadd.f32 %v3882_v63, %v11501_v15  ;;  %6450 = vmatmul.mubr.msk.f32.gmra.mxu0 %vm14152_vm15, %v14082_v53  ;;  %vm14162_vm1 = vcmp.eq.s32.totalorder %v14159_v7, %v14087_v41  ;;  %vm14164_vm15 = vcmp.eq.s32.totalorder %v14148_v40, %v14087_v41 }
 0x35f   : > { %6519 = vmatprep.mubr.msk.f32.mxu1 %vm14154_vm3, %v14082_v53  ;;  %v4873_v20 = vpop.f32.mrf.mxu1  ;;  %6451 = vmatprep.mubr.msk.f32.mxu0 %vm14155_vm5, %v14082_v53  ;;  %v3884_v19 = vpop.f32.mrf.mxu0  ;;  %vm14166_vm3 = vcmp.eq.s32.totalorder %v14165_v18, %v14084_v21  ;;  %vm14167_vm5 = vcmp.eq.s32.totalorder %v14153_v29, %v14084_v21 }
 0x360   : > { %v12032_v35 = vadd.f32 %v4339_v2, %v3883_v45 }
 0x361   : > { %v4882_v15 = vpop.f32.mrf.mxu1  ;;  %v3897_v9 = vpop.f32.mrf.mxu0 }
 0x362   : > { %6520 = vmatmul.mubr.msk.f32.gmra.mxu1 %vm14156_vm10, %v14082_v53  ;;  %v3898_v39 = vadd.f32 %v3897_v9, %v14157_v31  ;;  %6452 = vmatmul.mubr.msk.f32.gmra.mxu0 %vm14158_vm8, %v14082_v53  ;;  %vm14168_vm10 = vcmp.eq.s32.totalorder %v14165_v18, %v14087_v41  ;;  %vm14169_vm8 = vcmp.eq.s32.totalorder %v14153_v29, %v14087_v41 }
 0x363   : > { %6521 = vmatprep.mubr.msk.f32.mxu1 %vm14160_vm0, %v14082_v53  ;;  %v4884_v14 = vpop.f32.mrf.mxu1  ;;  %6453 = vmatprep.mubr.msk.f32.mxu0 %vm14161_vm13, %v14082_v53  ;;  %v3899_v11 = vpop.f32.mrf.mxu0  ;;  %vm14172_vm13 = vcmp.eq.s32.totalorder %v14159_v7, %v14084_v21 }
 0x364   : > { %v12051_v58 = vadd.f32 %v4346_v56, %v3898_v39  ;;  %v14170_v56 = vld [vmem:[#allocation96_spill] sm:$0xff]  ;;  %v14185_v11 = vld [vmem:[#allocation102_spill] sm:$0xff] }
 0x365   : > { %v4893_v8 = vpop.f32.mrf.mxu1  ;;  %v4484_v44 = vpop.f32.mrf.mxu0  ;;  %vm14171_vm0 = vcmp.eq.s32.totalorder %v14170_v56, %v14084_v21 }
 0x366   : > { %6522 = vmatmul.mubr.msk.f32.gmra.mxu1 %vm14162_vm1, %v14082_v53  ;;  %v4485_v55 = vadd.f32 %v4484_v44, %v14163_v28  ;;  %6454 = vmatmul.mubr.msk.f32.gmra.mxu0 %vm14164_vm15, %v14082_v53  ;;  %vm14173_vm1 = vcmp.eq.s32.totalorder %v14170_v56, %v14087_v41  ;;  %vm14174_vm15 = vcmp.eq.s32.totalorder %v14159_v7, %v14087_v41 }
 0x367   : > { %6523 = vmatprep.mubr.msk.f32.mxu1 %vm14166_vm3, %v14082_v53  ;;  %v4895_v2 = vpop.f32.mrf.mxu1  ;;  %6455 = vmatprep.mubr.msk.f32.mxu0 %vm14167_vm5, %v14082_v53  ;;  %v4486_v4 = vpop.f32.mrf.mxu0  ;;  %vm14177_vm5 = vcmp.eq.s32.totalorder %v14165_v18, %v14084_v21 }
 0x368   : > { %v12070_v47 = vadd.f32 %v4871_v34, %v4485_v55  ;;  %v14175_v34 = vld [vmem:[#allocation97_spill] sm:$0xff] }
 0x369   : > { %v4904_v38 = vpop.f32.mrf.mxu1  ;;  %v4493_v62 = vpop.f32.mrf.mxu0  ;;  %vm14176_vm3 = vcmp.eq.s32.totalorder %v14175_v34, %v14084_v21  ;;  %v14190_v2 = vld [vmem:[#allocation105_spill] sm:$0xff] }
 0x36a   : > { %6524 = vmatmul.mubr.msk.f32.gmra.mxu1 %vm14168_vm10, %v14082_v53  ;;  %v4494_v17 = vadd.f32 %v4493_v62, %v11543_v23  ;;  %6456 = vmatmul.mubr.msk.f32.gmra.mxu0 %vm14169_vm8, %v14082_v53  ;;  %vm14178_vm10 = vcmp.eq.s32.totalorder %v14175_v34, %v14087_v41  ;;  %vm14179_vm8 = vcmp.eq.s32.totalorder %v14165_v18, %v14087_v41 }
 0x36b   : > { %6525 = vmatprep.mubr.msk.f32.mxu1 %vm14171_vm0, %v14082_v53  ;;  %v4906_v43 = vpop.f32.mrf.mxu1  ;;  %6457 = vmatprep.mubr.msk.f32.mxu0 %vm14172_vm13, %v14082_v53  ;;  %v4495_v37 = vpop.f32.mrf.mxu0  ;;  %vm14182_vm13 = vcmp.eq.s32.totalorder %v14170_v56, %v14084_v21 }
 0x36c   : > { %v12089_v40 = vadd.f32 %v4882_v15, %v4494_v17  ;;  %v14180_v15 = vld [vmem:[#allocation99_spill] sm:$0xff]  ;;  %v14195_v43 = vld [vmem:[#allocation109_spill] sm:$0xff] }
 0x36d   : > { %v4915_v23 = vpop.f32.mrf.mxu1  ;;  %v4502_v61 = vpop.f32.mrf.mxu0  ;;  %vm14181_vm0 = vcmp.eq.s32.totalorder %v14180_v15, %v14084_v21 }
 0x36e   : > { %6526 = vmatmul.mubr.msk.f32.gmra.mxu1 %vm14173_vm1, %v14082_v53  ;;  %v4503_v30 = vadd.f32 %v4502_v61, %v11557_v5  ;;  %6458 = vmatmul.mubr.msk.f32.gmra.mxu0 %vm14174_vm15, %v14082_v53  ;;  %vm14183_vm1 = vcmp.eq.s32.totalorder %v14180_v15, %v14087_v41  ;;  %vm14184_vm15 = vcmp.eq.s32.totalorder %v14170_v56, %v14087_v41 }
 0x36f   : > { %6527 = vmatprep.mubr.msk.f32.mxu1 %vm14176_vm3, %v14082_v53  ;;  %v4917_v63 = vpop.f32.mrf.mxu1  ;;  %6459 = vmatprep.mubr.msk.f32.mxu0 %vm14177_vm5, %v14082_v53  ;;  %v4504_v45 = vpop.f32.mrf.mxu0  ;;  %vm14186_vm3 = vcmp.eq.s32.totalorder %v14185_v11, %v14084_v21  ;;  %vm14187_vm5 = vcmp.eq.s32.totalorder %v14175_v34, %v14084_v21 }
 0x370   : > { %v12108_v29 = vadd.f32 %v4893_v8, %v4503_v30  ;;  %v14200_v63 = vld [vmem:[#allocation111_spill] sm:$0xff] }
 0x371   : > { %v4926_v5 = vpop.f32.mrf.mxu1  ;;  %v4511_v20 = vpop.f32.mrf.mxu0 }
 0x372   : > { %6528 = vmatmul.mubr.msk.f32.gmra.mxu1 %vm14178_vm10, %v14082_v53  ;;  %v4512_v19 = vadd.f32 %v4511_v20, %v11571_v46  ;;  %6460 = vmatmul.mubr.msk.f32.gmra.mxu0 %vm14179_vm8, %v14082_v53  ;;  %vm14188_vm10 = vcmp.eq.s32.totalorder %v14185_v11, %v14087_v41  ;;  %vm14189_vm8 = vcmp.eq.s32.totalorder %v14175_v34, %v14087_v41 }
 0x373   : > { %6529 = vmatprep.mubr.msk.f32.mxu1 %vm14181_vm0, %v14082_v53  ;;  %v4928_v9 = vpop.f32.mrf.mxu1  ;;  %6461 = vmatprep.mubr.msk.f32.mxu0 %vm14182_vm13, %v14082_v53  ;;  %v4513_v31 = vpop.f32.mrf.mxu0  ;;  %vm14191_vm0 = vcmp.eq.s32.totalorder %v14190_v2, %v14084_v21  ;;  %vm14192_vm13 = vcmp.eq.s32.totalorder %v14180_v15, %v14084_v21 }
 0x374   : > { %v12127_v39 = vadd.f32 %v4904_v38, %v4512_v19  ;;  %v14205_v9 = vld [vmem:[#allocation113_spill] sm:$0xff] }
 0x375   : > { %v4937_v46 = vpop.f32.mrf.mxu1  ;;  %v4520_v7 = vpop.f32.mrf.mxu0 }
 0x376   : > { %6530 = vmatmul.mubr.msk.f32.gmra.mxu1 %vm14183_vm1, %v14082_v53  ;;  %v4521_v14 = vadd.f32 %v4520_v7, %v11585_v24  ;;  %6462 = vmatmul.mubr.msk.f32.gmra.mxu0 %vm14184_vm15, %v14082_v53  ;;  %vm14193_vm1 = vcmp.eq.s32.totalorder %v14190_v2, %v14087_v41  ;;  %vm14194_vm15 = vcmp.eq.s32.totalorder %v14180_v15, %v14087_v41 }
 0x377   : > { %6531 = vmatprep.mubr.msk.f32.mxu1 %vm14186_vm3, %v14082_v53  ;;  %v4939_v8 = vpop.f32.mrf.mxu1  ;;  %6463 = vmatprep.mubr.msk.f32.mxu0 %vm14187_vm5, %v14082_v53  ;;  %v4522_v44 = vpop.f32.mrf.mxu0  ;;  %vm14196_vm3 = vcmp.eq.s32.totalorder %v14195_v43, %v14084_v21  ;;  %vm14197_vm5 = vcmp.eq.s32.totalorder %v14185_v11, %v14084_v21 }
 0x378   : > { %v12146_v28 = vadd.f32 %v4915_v23, %v4521_v14  ;;  %v14208_v8 = vld [vmem:[#allocation115_spill] sm:$0xff] }
 0x379   : > { %v4948_v24 = vpop.f32.mrf.mxu1  ;;  %v4529_v55 = vpop.f32.mrf.mxu0 }
 0x37a   : > { %6532 = vmatmul.mubr.msk.f32.gmra.mxu1 %vm14188_vm10, %v14082_v53  ;;  %v4530_v18 = vadd.f32 %v4529_v55, %v11599_v54  ;;  %6464 = vmatmul.mubr.msk.f32.gmra.mxu0 %vm14189_vm8, %v14082_v53  ;;  %vm14198_vm10 = vcmp.eq.s32.totalorder %v14195_v43, %v14087_v41  ;;  %vm14199_vm8 = vcmp.eq.s32.totalorder %v14185_v11, %v14087_v41 }
 0x37b   : > { %6533 = vmatprep.mubr.msk.f32.mxu1 %vm14191_vm0, %v14082_v53  ;;  %v4950_v4 = vpop.f32.mrf.mxu1  ;;  %6465 = vmatprep.mubr.msk.f32.mxu0 %vm14192_vm13, %v14082_v53  ;;  %v4531_v38 = vpop.f32.mrf.mxu0  ;;  %vm14201_vm0 = vcmp.eq.s32.totalorder %v14200_v63, %v14084_v21  ;;  %vm14202_vm13 = vcmp.eq.s32.totalorder %v14190_v2, %v14084_v21 }
 0x37c   : > { %v12165_v62 = vadd.f32 %v4926_v5, %v4530_v18 }
 0x37d   : > { %v4959_v54 = vpop.f32.mrf.mxu1  ;;  %v4538_v17 = vpop.f32.mrf.mxu0 }
 0x37e   : > { %6534 = vmatmul.mubr.msk.f32.gmra.mxu1 %vm14193_vm1, %v14082_v53  ;;  %v4539_v56 = vadd.f32 %v4538_v17, %v11613_v22  ;;  %6466 = vmatmul.mubr.msk.f32.gmra.mxu0 %vm14194_vm15, %v14082_v53  ;;  %vm14203_vm1 = vcmp.eq.s32.totalorder %v14200_v63, %v14087_v41  ;;  %vm14204_vm15 = vcmp.eq.s32.totalorder %v14190_v2, %v14087_v41 }
 0x37f   : > { %6535 = vmatprep.mubr.msk.f32.mxu1 %vm14196_vm3, %v14082_v53  ;;  %v4961_v37 = vpop.f32.mrf.mxu1  ;;  %6467 = vmatprep.mubr.msk.f32.mxu0 %vm14197_vm5, %v14082_v53  ;;  %v4540_v23 = vpop.f32.mrf.mxu0  ;;  %vm14206_vm3 = vcmp.eq.s32.totalorder %v14205_v9, %v14084_v21  ;;  %vm14207_vm5 = vcmp.eq.s32.totalorder %v14195_v43, %v14084_v21 }
 0x380   : > { %v12184_v61 = vadd.f32 %v4937_v46, %v4539_v56 }
 0x381   : > { %v4970_v22 = vpop.f32.mrf.mxu1  ;;  %v4547_v30 = vpop.f32.mrf.mxu0 }
 0x382   : > { %6536 = vmatmul.mubr.msk.f32.gmra.mxu1 %vm14198_vm10, %v14082_v53  ;;  %v4548_v34 = vadd.f32 %v4547_v30, %v11627_v59  ;;  %6468 = vmatmul.mubr.msk.f32.gmra.mxu0 %vm14199_vm8, %v14082_v53  ;;  %vm14209_vm8 = vcmp.eq.s32.totalorder %v14208_v8, %v14084_v21 }
 0x383   : > { %6537 = vmatprep.mubr.msk.f32.mxu1 %vm14201_vm0, %v14082_v53  ;;  %v4972_v45 = vpop.f32.mrf.mxu1  ;;  %6469 = vmatprep.mubr.msk.f32.mxu0 %vm14202_vm13, %v14082_v53  ;;  %v4549_v5 = vpop.f32.mrf.mxu0  ;;  %vm14210_vm13 = vmmov %vm14203_vm1 }
 0x384   : > { %v12203_v20 = vadd.f32 %v4948_v24, %v4548_v34 }
 0x385   : > { %v4981_v59 = vpop.f32.mrf.mxu1  ;;  %v4556_v19 = vpop.f32.mrf.mxu0 }
 0x386   : > { %6538 = vmatmul.mubr.msk.f32.gmra.mxu1 %vm14203_vm1, %v14082_v53  ;;  %v4557_v15 = vadd.f32 %v4556_v19, %v11641_v26  ;;  %6470 = vmatmul.mubr.msk.f32.gmra.mxu0 %vm14204_vm15, %v14082_v53  ;;  %vm14212_vm1 = vmmov %vm14206_vm3 }
 0x387   : > { %6539 = vmatprep.mubr.msk.f32.mxu1 %vm14206_vm3, %v14082_v53  ;;  %v4983_v31 = vpop.f32.mrf.mxu1  ;;  %6471 = vmatprep.mubr.msk.f32.mxu0 %vm14207_vm5, %v14082_v53  ;;  %v4558_v46 = vpop.f32.mrf.mxu0  ;;  %vm14214_vm15 = vmmov %vm14209_vm8 }
 0x388   : > { %v12222_v7 = vadd.f32 %v4959_v54, %v4557_v15 }
 0x389   : > { %v4992_v26 = vpop.f32.mrf.mxu1  ;;  %v4565_v14 = vpop.f32.mrf.mxu0 }
 0x38a   : > { %6540 = vmatmul.mubr.msk.f32.gmra.mxu1 %vm388_vm11, %v14082_v53  ;;  %v4566_v11 = vadd.f32 %v4565_v14, %v11655_v50  ;;  %6472 = vmatmul.mubr.msk.f32.gmra.mxu0 %vm14198_vm10, %v14082_v53 }
 0x38b   : > { %6541 = vmatprep.mubr.msk.f32.mxu1 %vm14209_vm8, %v14082_v53  ;;  %v4994_v44 = vpop.f32.mrf.mxu1  ;;  %6473 = vmatprep.mubr.msk.f32.mxu0 %vm14201_vm0, %v14082_v53  ;;  %v4567_v24 = vpop.f32.mrf.mxu0 }
 0x38c   : > { %v12241_v55 = vadd.f32 %v4970_v22, %v4566_v11 }
 0x38d   : > { %v5003_v50 = vpop.f32.mrf.mxu1  ;;  %v4574_v18 = vpop.f32.mrf.mxu0 }
 0x38e   : > { %6542 = vmatmul.mubr.msk.f32.gmra.mxu1 %vm392_vm9, %v14082_v53  ;;  %v4575_v2 = vadd.f32 %v4574_v18, %v11669_v32  ;;  %6474 = vmatmul.mubr.msk.f32.gmra.mxu0 %vm14210_vm13, %v14082_v53 }
 0x38f   : > { %6543 = vmatprep.mubr.msk.f32.mxu1 %vm397_vm6, %v14082_v53  ;;  %v5005_v38 = vpop.f32.mrf.mxu1  ;;  %6475 = vmatprep.mubr.msk.f32.mxu0 %vm14212_vm1, %v14082_v53  ;;  %v4576_v54 = vpop.f32.mrf.mxu0 }
 0x390   : > { %v12260_v17 = vadd.f32 %v4981_v59, %v4575_v2 }
 0x391   : > { %v5014_v32 = vpop.f32.mrf.mxu1  ;;  %v4583_v56 = vpop.f32.mrf.mxu0 }
 0x392   : > { %6544 = vmatmul.mubr.msk.f32.gmra.mxu1 %vm396_vm4, %v14082_v53  ;;  %v4584_v43 = vadd.f32 %v4583_v56, %v11683_v33  ;;  %6476 = vmatmul.mubr.msk.f32.gmra.mxu0 %vm388_vm11, %v14082_v53 }
 0x393   : > { %6545 = vmatprep.mubr.msk.f32.mxu1 %vm401_vm14, %v14082_v53  ;;  %v5016_v23 = vpop.f32.mrf.mxu1  ;;  %6477 = vmatprep.mubr.msk.f32.mxu0 %vm14214_vm15, %v14082_v53  ;;  %v4585_v22 = vpop.f32.mrf.mxu0 }
 0x394   : > { %v12279_v30 = vadd.f32 %v4992_v26, %v4584_v43 }
 0x395   : > { %v5025_v33 = vpop.f32.mrf.mxu1  ;;  %v4592_v34 = vpop.f32.mrf.mxu0 }
 0x396   : > { %6546 = vmatmul.mubr.msk.f32.gmra.mxu1 %vm400_vm7, %v14082_v53  ;;  %v4593_v63 = vadd.f32 %v4592_v34, %v11697_v60  ;;  %6478 = vmatmul.mubr.msk.f32.gmra.mxu0 %vm392_vm9, %v14082_v53 }
 0x397   : > { %6547 = vmatprep.mubr.msk.f32.mxu1 %vm405_vm2, %v14082_v53  ;;  %v5027_v5 = vpop.f32.mrf.mxu1  ;;  %6479 = vmatprep.mubr.msk.f32.mxu0 %vm397_vm6, %v14082_v53  ;;  %v4594_v59 = vpop.f32.mrf.mxu0 }
 0x398   : > { %v12298_v19 = vadd.f32 %v5003_v50, %v4593_v63 }
 0x399   : > { %v5036_v60 = vpop.f32.mrf.mxu1  ;;  %v4601_v15 = vpop.f32.mrf.mxu0 }
 0x39a   : > { %6548 = vmatmul.mubr.msk.f32.gmra.mxu1 %vm404_vm12, %v14082_v53  ;;  %v4602_v9 = vadd.f32 %v4601_v15, %v11712_v0  ;;  %6480 = vmatmul.mubr.msk.f32.gmra.mxu0 %vm396_vm4, %v14082_v53 }
 0x39b   : > { %v5038_v31 = vpop.f32.mrf.mxu1  ;;  %6481 = vmatprep.mubr.msk.f32.mxu0 %vm401_vm14, %v14082_v53  ;;  %v4603_v46 = vpop.f32.mrf.mxu0 }
 0x39c   : > { %v12313_v26 = vadd.f32 %v5014_v32, %v4602_v9 }
 0x39d   : > { %v5047_v14 = vpop.f32.mrf.mxu1  ;;  %v4610_v11 = vpop.f32.mrf.mxu0 }
 0x39e   : > { %v4611_v8 = vadd.f32 %v4610_v11, %v11729_v36  ;;  %6482 = vmatmul.mubr.msk.f32.gmra.mxu0 %vm400_vm7, %v14082_v53 }
 0x39f   : > { %v5049_v0 = vpop.f32.mrf.mxu1  ;;  %6483 = vmatprep.mubr.msk.f32.mxu0 %vm405_vm2, %v14082_v53  ;;  %v4612_v44 = vpop.f32.mrf.mxu0 }
 0x3a0   : > { %v12324_v24 = vadd.f32 %v5025_v33, %v4611_v8 }
 0x3a1   : > { %v5058_v50 = vpop.f32.mrf.mxu1  ;;  %v4619_v18 = vpop.f32.mrf.mxu0 }
 0x3a2   : > { %v4620_v2 = vadd.f32 %v4619_v18, %v11747_v13  ;;  %6484 = vmatmul.mubr.msk.f32.gmra.mxu0 %vm404_vm12, %v14082_v53 }
 0x3a3   : > { %v5060_v36 = vpop.f32.mrf.mxu1  ;;  %v4621_v4 = vpop.f32.mrf.mxu0 }
 0x3a4   : > { %v12331_v38 = vadd.f32 %v5036_v60, %v4620_v2 }
 0x3a5   : > { %v5069_v54 = vpop.f32.mrf.mxu1  ;;  %v4628_v32 = vpop.f32.mrf.mxu0 }
 0x3a6   : > { %v4629_v21 = vadd.f32 %v4628_v32, %v11766_v57 }
 0x3a7   : > { %v5071_v56 = vpop.f32.mrf.mxu1  ;;  %v4630_v43 = vpop.f32.mrf.mxu0 }
 0x3a8   : > { %v12334_v37 = vadd.f32 %v5047_v14, %v4629_v21 }
 0x3a9   : > { %v5080_v23 = vpop.f32.mrf.mxu1  ;;  %v4637_v22 = vpop.f32.mrf.mxu0 }
 0x3aa   : > { %v4638_v13 = vadd.f32 %v4637_v22, %v11785_v16 }
 0x3ab   : > { %v5082_v33 = vpop.f32.mrf.mxu1  ;;  %v4639_v34 = vpop.f32.mrf.mxu0 }
 0x3ac   : > { %v12337_v41 = vadd.f32 %v5058_v50, %v4638_v13 }
 0x3ad   : > { %v5091_v53 = vpop.f32.mrf.mxu1  ;;  %v4646_v63 = vpop.f32.mrf.mxu0 }
 0x3ae   : > { %v4647_v45 = vadd.f32 %v4646_v63, %v11804_v25 }
 0x3af   : > { %v5093_v5 = vpop.f32.mrf.mxu1  ;;  %v4648_v59 = vpop.f32.mrf.mxu0 }
 0x3b0   : > { %v12340_v60 = vadd.f32 %v5069_v54, %v4647_v45 }
 0x3b1   : > { %v5102_v57 = vpop.f32.mrf.mxu1  ;;  %v4655_v15 = vpop.f32.mrf.mxu0 }
 0x3b2   : > { %v4656_v9 = vadd.f32 %v4655_v15, %v11823_v42 }
 0x3b3   : > { %v5104_v31 = vpop.f32.mrf.mxu1  ;;  %v4657_v46 = vpop.f32.mrf.mxu0 }
 0x3b4   : > { %v12343_v14 = vadd.f32 %v5080_v23, %v4656_v9 }
 0x3b5   : > { %v5113_v16 = vpop.f32.mrf.mxu1  ;;  %v4664_v11 = vpop.f32.mrf.mxu0 }
 0x3b6   : > { %v4665_v8 = vadd.f32 %v4664_v11, %v11842_v49 }
 0x3b7   : > { %v5115_v0 = vpop.f32.mrf.mxu1  ;;  %v4666_v44 = vpop.f32.mrf.mxu0 }
 0x3b8   : > { %v12346_v50 = vadd.f32 %v5091_v53, %v4665_v8 }
 0x3b9   : > { %v5124_v25 = vpop.f32.mrf.mxu1  ;;  %v4673_v18 = vpop.f32.mrf.mxu0 }
 0x3ba   : > { %v4674_v2 = vadd.f32 %v4673_v18, %v11861_v27 }
 0x3bb   : > { %v5126_v36 = vpop.f32.mrf.mxu1  ;;  %v4675_v4 = vpop.f32.mrf.mxu0 }
 0x3bc   : > { %v12349_v54 = vadd.f32 %v5102_v57, %v4674_v2 }
 0x3bd   : > { %v5135_v42 = vpop.f32.mrf.mxu1  ;;  %v4682_v32 = vpop.f32.mrf.mxu0 }
 0x3be   : > { %v4683_v21 = vadd.f32 %v4682_v32, %v11880_v1 }
 0x3bf   : > { %v5137_v56 = vpop.f32.mrf.mxu1  ;;  %v4684_v43 = vpop.f32.mrf.mxu0 }
 0x3c0   : > { %v12352_v23 = vadd.f32 %v5113_v16, %v4683_v21 }
 0x3c1   : > { %v5146_v49 = vpop.f32.mrf.mxu1  ;;  %v4691_v22 = vpop.f32.mrf.mxu0 }
 0x3c2   : > { %v4692_v13 = vadd.f32 %v4691_v22, %v11899_v51 }
 0x3c3   : > { %v5148_v33 = vpop.f32.mrf.mxu1  ;;  %v4693_v34 = vpop.f32.mrf.mxu0 }
 0x3c4   : > { %v12355_v53 = vadd.f32 %v5124_v25, %v4692_v13 }
 0x3c5   : > { %v5157_v27 = vpop.f32.mrf.mxu1  ;;  %v4700_v63 = vpop.f32.mrf.mxu0 }
 0x3c6   : > { %v4701_v45 = vadd.f32 %v4700_v63, %v11918_v52 }
 0x3c7   : > { %v5159_v5 = vpop.f32.mrf.mxu1  ;;  %v4702_v59 = vpop.f32.mrf.mxu0 }
 0x3c8   : > { %v12358_v57 = vadd.f32 %v5135_v42, %v4701_v45 }
 0x3c9   : > { %v5168_v1 = vpop.f32.mrf.mxu1  ;;  %v4709_v15 = vpop.f32.mrf.mxu0 }
 0x3ca   : > { %v4710_v9 = vadd.f32 %v4709_v15, %v11937_v48 }
 0x3cb   : > { %v5170_v31 = vpop.f32.mrf.mxu1  ;;  %v4711_v46 = vpop.f32.mrf.mxu0 }
 0x3cc   : > { %v12361_v16 = vadd.f32 %v5146_v49, %v4710_v9 }
 0x3cd   : > { %v5179_v51 = vpop.f32.mrf.mxu1  ;;  %v4718_v11 = vpop.f32.mrf.mxu0 }
 0x3ce   : > { %v4719_v8 = vadd.f32 %v4718_v11, %v11956_v6 }
 0x3cf   : > { %v5181_v0 = vpop.f32.mrf.mxu1  ;;  %v4720_v44 = vpop.f32.mrf.mxu0 }
 0x3d0   : > { %v12364_v25 = vadd.f32 %v5157_v27, %v4719_v8 }
 0x3d1   : > { %v5190_v52 = vpop.f32.mrf.mxu1  ;;  %v4727_v18 = vpop.f32.mrf.mxu0 }
 0x3d2   : > { %v4728_v2 = vadd.f32 %v4727_v18, %v11975_v10 }
 0x3d3   : > { %v5192_v36 = vpop.f32.mrf.mxu1  ;;  %v4729_v4 = vpop.f32.mrf.mxu0 }
 0x3d4   : > { %v12367_v42 = vadd.f32 %v5168_v1, %v4728_v2 }
 0x3d5   : > { %v5201_v48 = vpop.f32.mrf.mxu1  ;;  %v4736_v32 = vpop.f32.mrf.mxu0 }
 0x3d6   : > { %v4737_v21 = vadd.f32 %v4736_v32, %v11994_v12 }
 0x3d7   : > { %v5203_v56 = vpop.f32.mrf.mxu1  ;;  %v4738_v43 = vpop.f32.mrf.mxu0 }
 0x3d8   : > { %v12370_v6 = vadd.f32 %v5179_v51, %v4737_v21 }
 0x3d9   : > { %v5212_v49 = vpop.f32.mrf.mxu1 }
 0x3da   : > { %v4745_v22 = vpop.f32.mrf.mxu0 }
 0x3db   : > { %v4746_v13 = vadd.f32 %v4745_v22, %v12013_v3  ;;  %v5214_v33 = vpop.f32.mrf.mxu1 }
 0x3dc   : > { %v4747_v10 = vpop.f32.mrf.mxu0 }
 0x3dd   : > { %v12373_v34 = vadd.f32 %v5190_v52, %v4746_v13 }
 0x3de   : > { %v5701_v27 = vpop.f32.mrf.mxu1  ;;  %v4754_v63 = vpop.f32.mrf.mxu0 }
 0x3df   : > { %v4755_v45 = vadd.f32 %v4754_v63, %v12032_v35 }
 0x3e0   : > { %v5703_v5 = vpop.f32.mrf.mxu1  ;;  %v4756_v12 = vpop.f32.mrf.mxu0 }
 0x3e1   : > { %v12376_v59 = vadd.f32 %v5201_v48, %v4755_v45 }
 0x3e2   : > { %v5708_v1 = vpop.f32.mrf.mxu1  ;;  %v4763_v15 = vpop.f32.mrf.mxu0 }
 0x3e3   : > { %v4764_v9 = vadd.f32 %v4763_v15, %v12051_v58 }
 0x3e4   : > { %v5710_v31 = vpop.f32.mrf.mxu1  ;;  %v4765_v3 = vpop.f32.mrf.mxu0 }
 0x3e5   : > { %v12382_v46 = vadd.f32 %v5212_v49, %v4764_v9 }
 0x3e6   : > { %v5715_v51 = vpop.f32.mrf.mxu1  ;;  %v5380_v11 = vpop.f32.mrf.mxu0 }
 0x3e7   : > { %v5381_v8 = vadd.f32 %v5380_v11, %v12070_v47 }
 0x3e8   : > { %v5717_v35 = vpop.f32.mrf.mxu1  ;;  %v5382_v0 = vpop.f32.mrf.mxu0 }
 0x3e9   : > { %v5702_v44 = vadd.f32 %v5701_v27, %v5381_v8 }
 0x3ea   : > { %v5722_v52 = vpop.f32.mrf.mxu1  ;;  %v5387_v18 = vpop.f32.mrf.mxu0 }
 0x3eb   : > { %5922 = vst [vmem:[%s12385_s25] sm:$0xff] %v5702_v44  ;;  %v5388_v58 = vadd.f32 %v5387_v18, %v12089_v40 }
 0x3ec   : > { %v5724_v2 = vpop.f32.mrf.mxu1  ;;  %v5389_v36 = vpop.f32.mrf.mxu0 }
 0x3ed   : > { %v5709_v4 = vadd.f32 %v5708_v1, %v5388_v58 }
 0x3ee   : > { %v5729_v48 = vpop.f32.mrf.mxu1  ;;  %v5394_v32 = vpop.f32.mrf.mxu0 }
 0x3ef   : > { %5923 = vst [vmem:[%s12385_s25 + $0x8] sm:$0xff] %v5709_v4  ;;  %v5395_v47 = vadd.f32 %v5394_v32, %v12108_v29 }
 0x3f0   : > { %v5731_v21 = vpop.f32.mrf.mxu1  ;;  %v5396_v56 = vpop.f32.mrf.mxu0 }
 0x3f1   : > { %v5716_v43 = vadd.f32 %v5715_v51, %v5395_v47 }
 0x3f2   : > { %v5736_v49 = vpop.f32.mrf.mxu1  ;;  %v5401_v22 = vpop.f32.mrf.mxu0 }
 0x3f3   : > { %5924 = vst [vmem:[%s12385_s25 + $0x10] sm:$0xff] %v5716_v43  ;;  %v5402_v13 = vadd.f32 %v5401_v22, %v12127_v39 }
 0x3f4   : > { %v5738_v33 = vpop.f32.mrf.mxu1  ;;  %v5403_v40 = vpop.f32.mrf.mxu0 }
 0x3f5   : > { %v5723_v10 = vadd.f32 %v5722_v52, %v5402_v13 }
 0x3f6   : > { %v5743_v27 = vpop.f32.mrf.mxu1  ;;  %v5408_v63 = vpop.f32.mrf.mxu0 }
 0x3f7   : > { %5925 = vst [vmem:[%s12385_s25 + $0x18] sm:$0xff] %v5723_v10  ;;  %v5409_v45 = vadd.f32 %v5408_v63, %v12146_v28 }
 0x3f8   : > { %v5745_v5 = vpop.f32.mrf.mxu1  ;;  %v5410_v29 = vpop.f32.mrf.mxu0 }
 0x3f9   : > { %v5730_v12 = vadd.f32 %v5729_v48, %v5409_v45 }
 0x3fa   : > { %v5750_v1 = vpop.f32.mrf.mxu1  ;;  %v5415_v15 = vpop.f32.mrf.mxu0 }
 0x3fb   : > { %5926 = vst [vmem:[%s12385_s25 + $0x20] sm:$0xff] %v5730_v12  ;;  %v5416_v9 = vadd.f32 %v5415_v15, %v12165_v62 }
 0x3fc   : > { %v5752_v31 = vpop.f32.mrf.mxu1  ;;  %v5417_v39 = vpop.f32.mrf.mxu0 }
 0x3fd   : > { %v5737_v3 = vadd.f32 %v5736_v49, %v5416_v9 }
 0x3fe   : > { %v5757_v51 = vpop.f32.mrf.mxu1  ;;  %v5422_v11 = vpop.f32.mrf.mxu0 }
 0x3ff   : > { %5927 = vst [vmem:[%s12385_s25 + $0x28] sm:$0xff] %v5737_v3  ;;  %v5423_v8 = vadd.f32 %v5422_v11, %v12184_v61 }
 0x400   : > { %v5759_v35 = vpop.f32.mrf.mxu1  ;;  %v5424_v28 = vpop.f32.mrf.mxu0 }
 0x401   : > { %v5744_v0 = vadd.f32 %v5743_v27, %v5423_v8 }
 0x402   : > { %v5764_v44 = vpop.f32.mrf.mxu1  ;;  %v5429_v52 = vpop.f32.mrf.mxu0 }
 0x403   : > { %5928 = vst [vmem:[%s12385_s25 + $0x30] sm:$0xff] %v5744_v0  ;;  %v5430_v18 = vadd.f32 %v5429_v52, %v12203_v20 }
 0x404   : > { %v5766_v58 = vpop.f32.mrf.mxu1  ;;  %v5431_v62 = vpop.f32.mrf.mxu0 }
 0x405   : > { %v5751_v2 = vadd.f32 %v5750_v1, %v5430_v18 }
 0x406   : > { %v5771_v36 = vpop.f32.mrf.mxu1  ;;  %v5436_v4 = vpop.f32.mrf.mxu0 }
 0x407   : > { %5929 = vst [vmem:[%s12385_s25 + $0x38] sm:$0xff] %v5751_v2  ;;  %v5437_v48 = vadd.f32 %v5436_v4, %v12222_v7 }
 0x408   : > { %v5773_v32 = vpop.f32.mrf.mxu1  ;;  %v5438_v61 = vpop.f32.mrf.mxu0 }
 0x409   : > { %v5758_v47 = vadd.f32 %v5757_v51, %v5437_v48 }
 0x40a   : > { %v5778_v21 = vpop.f32.mrf.mxu1  ;;  %v5443_v56 = vpop.f32.mrf.mxu0 }
 0x40b   : > { %5930 = vst [vmem:[%s12385_s25 + $0x40] sm:$0xff] %v5758_v47  ;;  %v5444_v43 = vadd.f32 %v5443_v56, %v12241_v55 }
 0x40c   : > { %v5780_v49 = vpop.f32.mrf.mxu1  ;;  %v5445_v20 = vpop.f32.mrf.mxu0 }
 0x40d   : > { %v5765_v22 = vadd.f32 %v5764_v44, %v5444_v43 }
 0x40e   : > { %v5785_v13 = vpop.f32.mrf.mxu1  ;;  %v5450_v33 = vpop.f32.mrf.mxu0 }
 0x40f   : > { %5931 = vst [vmem:[%s12385_s25 + $0x48] sm:$0xff] %v5765_v22  ;;  %v5451_v40 = vadd.f32 %v5450_v33, %v12260_v17 }
 0x410   : > { %v5787_v10 = vpop.f32.mrf.mxu1  ;;  %v5452_v7 = vpop.f32.mrf.mxu0 }
 0x411   : > { %v5772_v27 = vadd.f32 %v5771_v36, %v5451_v40 }
 0x412   : > { %v5792_v63 = vpop.f32.mrf.mxu1  ;;  %v5457_v45 = vpop.f32.mrf.mxu0 }
 0x413   : > { %5932 = vst [vmem:[%s12385_s25 + $0x50] sm:$0xff] %v5772_v27  ;;  %v5458_v5 = vadd.f32 %v5457_v45, %v12279_v30 }
 0x414   : > { %v5794_v29 = vpop.f32.mrf.mxu1  ;;  %v5459_v55 = vpop.f32.mrf.mxu0 }
 0x415   : > { %v5779_v12 = vadd.f32 %v5778_v21, %v5458_v5 }
 0x416   : > { %v5799_v1 = vpop.f32.mrf.mxu1  ;;  %v5464_v15 = vpop.f32.mrf.mxu0 }
 0x417   : > { %5933 = vst [vmem:[%s12385_s25 + $0x58] sm:$0xff] %v5779_v12  ;;  %v5465_v9 = vadd.f32 %v5464_v15, %v12298_v19 }
 0x418   : > { %v5801_v31 = vpop.f32.mrf.mxu1  ;;  %v5466_v17 = vpop.f32.mrf.mxu0 }
 0x419   : > { %v5786_v39 = vadd.f32 %v5785_v13, %v5465_v9 }
 0x41a   : > { %v5806_v3 = vpop.f32.mrf.mxu1  ;;  %v5471_v51 = vpop.f32.mrf.mxu0 }
 0x41b   : > { %5934 = vst [vmem:[%s12385_s25 + $0x60] sm:$0xff] %v5786_v39  ;;  %v5472_v11 = vadd.f32 %v5471_v51, %v12313_v26 }
 0x41c   : > { %v5808_v8 = vpop.f32.mrf.mxu1  ;;  %v5473_v30 = vpop.f32.mrf.mxu0 }
 0x41d   : > { %v5793_v35 = vadd.f32 %v5792_v63, %v5472_v11 }
 0x41e   : > { %v5813_v28 = vpop.f32.mrf.mxu1  ;;  %v5478_v0 = vpop.f32.mrf.mxu0 }
 0x41f   : > { %5935 = vst [vmem:[%s12385_s25 + $0x68] sm:$0xff] %v5793_v35  ;;  %v5479_v44 = vadd.f32 %v5478_v0, %v12324_v24 }
 0x420   : > { %v5815_v52 = vpop.f32.mrf.mxu1  ;;  %v5480_v19 = vpop.f32.mrf.mxu0 }
 0x421   : > { %v5800_v18 = vadd.f32 %v5799_v1, %v5479_v44 }
 0x422   : > { %v5820_v58 = vpop.f32.mrf.mxu1  ;;  %v5485_v62 = vpop.f32.mrf.mxu0 }
 0x423   : > { %5936 = vst [vmem:[%s12385_s25 + $0x70] sm:$0xff] %v5800_v18  ;;  %v5486_v2 = vadd.f32 %v5485_v62, %v12331_v38 }
 0x424   : > { %v5822_v36 = vpop.f32.mrf.mxu1  ;;  %v5487_v26 = vpop.f32.mrf.mxu0 }
 0x425   : > { %v5807_v4 = vadd.f32 %v5806_v3, %v5486_v2 }
 0x426   : > { %v5827_v48 = vpop.f32.mrf.mxu1  ;;  %v5492_v32 = vpop.f32.mrf.mxu0 }
 0x427   : > { %5937 = vst [vmem:[%s12385_s25 + $0x78] sm:$0xff] %v5807_v4  ;;  %v5493_v61 = vadd.f32 %v5492_v32, %v12334_v37 }
 0x428   : > { %v5829_v47 = vpop.f32.mrf.mxu1  ;;  %v5494_v24 = vpop.f32.mrf.mxu0 }
 0x429   : > { %v5814_v21 = vadd.f32 %v5813_v28, %v5493_v61 }
 0x42a   : > { %v5834_v56 = vpop.f32.mrf.mxu1  ;;  %v5499_v43 = vpop.f32.mrf.mxu0 }
 0x42b   : > { %5938 = vst [vmem:[%s12385_s25 + $0x80] sm:$0xff] %v5814_v21  ;;  %v5500_v49 = vadd.f32 %v5499_v43, %v12337_v41 }
 0x42c   : > { %v5836_v20 = vpop.f32.mrf.mxu1  ;;  %v5501_v38 = vpop.f32.mrf.mxu0 }
 0x42d   : > { %v5821_v22 = vadd.f32 %v5820_v58, %v5500_v49 }
 0x42e   : > { %v5841_v13 = vpop.f32.mrf.mxu1  ;;  %v5506_v33 = vpop.f32.mrf.mxu0 }
 0x42f   : > { %5939 = vst [vmem:[%s12385_s25 + $0x88] sm:$0xff] %v5821_v22  ;;  %v5507_v40 = vadd.f32 %v5506_v33, %v12340_v60 }
 0x430   : > { %v5843_v10 = vpop.f32.mrf.mxu1  ;;  %v5508_v37 = vpop.f32.mrf.mxu0 }
 0x431   : > { %v5828_v7 = vadd.f32 %v5827_v48, %v5507_v40 }
 0x432   : > { %v5848_v27 = vpop.f32.mrf.mxu1  ;;  %v5513_v63 = vpop.f32.mrf.mxu0 }
 0x433   : > { %5940 = vst [vmem:[%s12385_s25 + $0x90] sm:$0xff] %v5828_v7  ;;  %v5514_v45 = vadd.f32 %v5513_v63, %v12343_v14 }
 0x434   : > { %v5850_v5 = vpop.f32.mrf.mxu1  ;;  %v5515_v41 = vpop.f32.mrf.mxu0 }
 0x435   : > { %v5835_v29 = vadd.f32 %v5834_v56, %v5514_v45 }
 0x436   : > { %v5855_v55 = vpop.f32.mrf.mxu1  ;;  %v5520_v12 = vpop.f32.mrf.mxu0 }
 0x437   : > { %5941 = vst [vmem:[%s12385_s25 + $0x98] sm:$0xff] %v5835_v29  ;;  %v5521_v1 = vadd.f32 %v5520_v12, %v12346_v50 }
 0x438   : > { %v5857_v15 = vpop.f32.mrf.mxu1  ;;  %v5522_v60 = vpop.f32.mrf.mxu0 }
 0x439   : > { %v5842_v9 = vadd.f32 %v5841_v13, %v5521_v1 }
 0x43a   : > { %v5862_v31 = vpop.f32.mrf.mxu1  ;;  %v5527_v17 = vpop.f32.mrf.mxu0 }
 0x43b   : > { %5942 = vst [vmem:[%s12385_s25 + $0xa0] sm:$0xff] %v5842_v9  ;;  %v5528_v39 = vadd.f32 %v5527_v17, %v12349_v54 }
 0x43c   : > { %v5864_v3 = vpop.f32.mrf.mxu1  ;;  %v5529_v14 = vpop.f32.mrf.mxu0 }
 0x43d   : > { %v5849_v51 = vadd.f32 %v5848_v27, %v5528_v39 }
 0x43e   : > { %v5869_v11 = vpop.f32.mrf.mxu1  ;;  %v5534_v8 = vpop.f32.mrf.mxu0 }
 0x43f   : > { %5943 = vst [vmem:[%s12385_s25 + $0xa8] sm:$0xff] %v5849_v51  ;;  %v5535_v30 = vadd.f32 %v5534_v8, %v12352_v23 }
 0x440   : > { %v5871_v35 = vpop.f32.mrf.mxu1  ;;  %v5536_v50 = vpop.f32.mrf.mxu0 }
 0x441   : > { %v5856_v28 = vadd.f32 %v5855_v55, %v5535_v30 }
 0x442   : > { %v5876_v0 = vpop.f32.mrf.mxu1  ;;  %v5541_v44 = vpop.f32.mrf.mxu0 }
 0x443   : > { %5944 = vst [vmem:[%s12385_s25 + $0xb0] sm:$0xff] %v5856_v28  ;;  %v5542_v52 = vadd.f32 %v5541_v44, %v12355_v53 }
 0x444   : > { %v5878_v19 = vpop.f32.mrf.mxu1  ;;  %v5543_v54 = vpop.f32.mrf.mxu0 }
 0x445   : > { %v5863_v18 = vadd.f32 %v5862_v31, %v5542_v52 }
 0x446   : > { %v5883_v58 = vpop.f32.mrf.mxu1  ;;  %v5548_v62 = vpop.f32.mrf.mxu0 }
 0x447   : > { %5945 = vst [vmem:[%s12385_s25 + $0xb8] sm:$0xff] %v5863_v18  ;;  %v5549_v2 = vadd.f32 %v5548_v62, %v12358_v57 }
 0x448   : > { %v5885_v36 = vpop.f32.mrf.mxu1  ;;  %v5550_v23 = vpop.f32.mrf.mxu0 }
 0x449   : > { %v5870_v26 = vadd.f32 %v5869_v11, %v5549_v2 }
 0x44a   : > { %v5890_v4 = vpop.f32.mrf.mxu1  ;;  %v5555_v48 = vpop.f32.mrf.mxu0 }
 0x44b   : > { %5946 = vst [vmem:[%s12385_s25 + $0xc0] sm:$0xff] %v5870_v26  ;;  %v5556_v32 = vadd.f32 %v5555_v48, %v12361_v16 }
 0x44c   : > { %v5892_v61 = vpop.f32.mrf.mxu1  ;;  %v5557_v53 = vpop.f32.mrf.mxu0 }
 0x44d   : > { %v5877_v47 = vadd.f32 %v5876_v0, %v5556_v32 }
 0x44e   : > { %v5897_v24 = vpop.f32.mrf.mxu1  ;;  %v5562_v21 = vpop.f32.mrf.mxu0 }
 0x44f   : > { %5947 = vst [vmem:[%s12385_s25 + $0xc8] sm:$0xff] %v5877_v47  ;;  %v5563_v56 = vadd.f32 %v5562_v21, %v12364_v25 }
 0x450   : > { %v5899_v43 = vpop.f32.mrf.mxu1  ;;  %v5564_v57 = vpop.f32.mrf.mxu0 }
 0x451   : > { %v5884_v49 = vadd.f32 %v5883_v58, %v5563_v56 }
 0x452   : > { %v5904_v20 = vpop.f32.mrf.mxu1  ;;  %v5569_v38 = vpop.f32.mrf.mxu0 }
 0x453   : > { %5948 = vst [vmem:[%s12385_s25 + $0xd0] sm:$0xff] %v5884_v49  ;;  %v5570_v22 = vadd.f32 %v5569_v38, %v12367_v42 }
 0x454   : > { %v5906_v13 = vpop.f32.mrf.mxu1  ;;  %v5571_v16 = vpop.f32.mrf.mxu0 }
 0x455   : > { %v5891_v33 = vadd.f32 %v5890_v4, %v5570_v22 }
 0x456   : > { %v5911_v40 = vpop.f32.mrf.mxu1  ;;  %v5576_v10 = vpop.f32.mrf.mxu0 }
 0x457   : > { %5949 = vst [vmem:[%s12385_s25 + $0xd8] sm:$0xff] %v5891_v33  ;;  %v5577_v37 = vadd.f32 %v5576_v10, %v12370_v6 }
 0x458   : > { %v5913_v25 = vpop.f32.mrf.mxu1  ;;  %v5578_v7 = vpop.f32.mrf.mxu0 }
 0x459   : > { %v5898_v27 = vadd.f32 %v5897_v24, %v5577_v37 }
 0x45a   : > { %v5918_v63 = vpop.f32.mrf.mxu1  ;;  %v5583_v45 = vpop.f32.mrf.mxu0 }
 0x45b   : > { %5950 = vst [vmem:[%s12385_s25 + $0xe0] sm:$0xff] %v5898_v27  ;;  %v5584_v42 = vadd.f32 %v5583_v45, %v12373_v34 }
 0x45c   : > { %v5920_v5 = vpop.f32.mrf.mxu1  ;;  %v5585_v41 = vpop.f32.mrf.mxu0 }
 0x45d   : > { %v5905_v29 = vadd.f32 %v5904_v20, %v5584_v42 }
 0x45e   : > { %v5590_v55 = vpop.f32.mrf.mxu0 }
 0x45f   : > { %5951 = vst [vmem:[%s12385_s25 + $0xe8] sm:$0xff] %v5905_v29  ;;  %v5591_v6 = vadd.f32 %v5590_v55, %v12376_v59 }
 0x460   : > { %v5592_v12 = vpop.f32.mrf.mxu0 }
 0x461   : > { %v5912_v1 = vadd.f32 %v5911_v40, %v5591_v6 }
 0x462   : > { %v5597_v15 = vpop.f32.mrf.mxu0 }
 0x463   : > { %5952 = vst [vmem:[%s12385_s25 + $0xf0] sm:$0xff] %v5912_v1  ;;  %v5598_v60 = vadd.f32 %v5597_v15, %v12382_v46 }
 0x464   : > { %v5599_v9 = vpop.f32.mrf.mxu0 }
 0x465   : > { %v5919_v34 = vadd.f32 %v5918_v63, %v5598_v60 }
 0x467   : > { %5953 = vst [vmem:[%s12385_s25 + $0xf8] sm:$0xff] %v5919_v34 }
 0x468   : > { %6614 = shalt.err (!%p6611_p3)
}
 0x469   : > { %s6615_s17 = scalar_lea.hbm %s12454_s30, 4096  ;;  %s6619_s14 = scalar_lea.hbm %s12503_s2, 8192 }
 0x46a   : > { %p6616_p4 = scmp.ne.s32.totalorder %s12454_s30, %s6615_s17  ;;  %p6620_p9 = scmp.lt.s32.totalorder %s12454_s30, %s12503_s2 }
 0x46b   : > { %p6621_p10 = scmp.lt.s32.totalorder %s6619_s14, %s6615_s17 }
 0x46c   : > { %p6617_p7 = pnand %p6616_p4, %p6722_p5 }
 0x46d   : > { %p6622_p11 = por %p6621_p10, %p6620_p9 }
 0x46e   : > { %p6618_p8 = pneg %p6617_p7 }
 0x470   : > { %p6623_p12 = pnand %p6622_p11, %p6618_p8 }
 0x472   : > { %6626 = shalt.err (!%p6623_p12)
}
 0x473   : > { %s6667_s22 = smov 128   ;;  %s6668_s23 = smov 8  }
 0x474   : > { %6555 = dma.vmem_to_hbm [thread:$0]  (%p6722_p5), %s12456_s27, 4096, %s12454_s30, %s12461_s13, %s6667_s22, %s6667_s22, %s6668_s23  }
 0x475 PF: > { %p6561_p13 = scmp.ge.s32.totalorder %s6661_s12, 2  ;;  %s5983_s24 = sand.u32 1, %s6649_s9  }
 0x476   : > { %s5984_s25 = scalar_lea.sflag [#allocation3], %s5983_s24 }
 0x477   : > { %p6558_p0 = pnand %p6561_p13, %p6726_p6 }
 0x479   : > { %p6559_p1 = pneg %p6558_p0 }
 0x47b   : > { %6644 = dma.done.wait (%p6559_p1), %s5984_s25, 4096  }
 0x47c   : > { %6646 = vsyncadd (%p6559_p1), %s5984_s25, 4294963200  ;;  %p12_p2 = scmp.ge.s32.totalorder %s6709_s15, 4   ;;  %s14216_s9 = smov %s6653_s10 }
 0x47d   : > { %s14217_s10 = smov %s6657_s11  ;;  %s14218_s11 = smov %s6720_s18 }
 0x47e   : > { %s14219_s12 = smov %s6709_s15  ;;  %14 = sbr.rel (!%p12_p2) target bundleno = 3 (0x3), region = 63 }
 0x483   :  { %5989 = vsyncpa [#allocation3], 1 }
 0x484   :  { %5991 = vsyncpa [#allocation3 + $0x1], 1 }

</bundles_post_ra>
